<compile_context>
chip_gen: v7x
topology: tpu7x:2x2x1
jax: 0.10.0
libtpu: 0.0.40
codegen_flags: <defaults>
</compile_context>

<pallas_src>
import jax
import jax.numpy as jnp
from jax.experimental import pallas as pl
from jax.experimental.pallas import tpu as pltpu

_MXU_DTYPE = jnp.bfloat16          # MXU operand dtype; accumulation/BN stay f32.
_VMEM = pl.BlockSpec(memory_space=pltpu.MemorySpace.VMEM)


def _decoder_block_kernel(x2d_ref, skipq_ref, up_w_ref, up_b_ref,
                          w1_ref, g1_ref, be1_ref,
                          w2_ref, g2_ref, be2_ref,
                          out_ref, cat_pad, y1_pad):
    f32 = jnp.float32
    eps = 1e-5

    C = out_ref.shape[-1]                       # out channels
    CC = 2 * C                                  # conv1 in channels (up ++ skip)
    _, N, Hp, Wp, _ = cat_pad.shape
    H, W = Hp - 2, Wp - 2                       # quadrant spatial size
    M = N * H * W                               # pixels per quadrant

    # ---- 0. zero only the 1-wide halo borders of the padded scratch buffers.
    #         (hoisted out of the quadrant loop: 4 stores per buffer, zeros
    #          built once and reused).
    z_row_cc = jnp.zeros((4, N, 1, Wp, CC), f32)
    z_col_cc = jnp.zeros((4, N, Hp, 1, CC), f32)
    cat_pad[:, :, 0:1, :, :] = z_row_cc
    cat_pad[:, :, Hp - 1:Hp, :, :] = z_row_cc
    cat_pad[:, :, :, 0:1, :] = z_col_cc
    cat_pad[:, :, :, Wp - 1:Wp, :] = z_col_cc
    z_row_c = jnp.zeros((4, N, 1, Wp, C), f32)
    z_col_c = jnp.zeros((4, N, Hp, 1, C), f32)
    y1_pad[:, :, 0:1, :, :] = z_row_c
    y1_pad[:, :, Hp - 1:Hp, :, :] = z_row_c
    y1_pad[:, :, :, 0:1, :] = z_col_c
    y1_pad[:, :, :, Wp - 1:Wp, :] = z_col_c

    # ---- 1. ConvTranspose2d(k=2, s=2) == ONE bf16 MXU matmul; column group
    #         (a*2+b) of the result IS output-parity quadrant (a, b), so the
    #         stride-2 de-interleave is free (pure weight-column ordering).
    y_up = jnp.dot(x2d_ref[...], up_w_ref[...], preferred_element_type=f32)
    up_b = up_b_ref[...]                        # (1, C) f32

    # ---- 2. fused "torch.cat([up, skip], 1)": write the two channel halves of
    #         the padded per-quadrant conv1 inputs (up-bias folded into the
    #         write; nothing round-trips through HBM).
    for qd in range(4):
        up_q = (y_up[:, qd * C:(qd + 1) * C] + up_b).reshape(N, H, W, C)
        cat_pad[qd, :, 1:H + 1, 1:W + 1, 0:C] = up_q
        cat_pad[qd, :, 1:H + 1, 1:W + 1, C:CC] = skipq_ref[qd].astype(f32)

    def conv3x3(src_pad, cin, w_ref):
        """3x3 same-pad conv in quadrant (space-to-depth) space: nine
        (4M, cin) @ (cin, C) bf16 MXU matmuls accumulated in f32 -- no im2col
        scratch round-trip.  Conv bias is omitted: it cancels exactly under
        training-mode BatchNorm (mean subtraction)."""
        acc = jnp.zeros((4 * M, C), f32)
        for kh in range(3):
            for kw in range(3):
                tap = kh * 3 + kw
                w_tap = w_ref[tap * cin:(tap + 1) * cin, :]      # (cin, C) bf16
                cols = []
                for p in range(2):              # output row parity
                    for r in range(2):          # output col parity
                        th, tw = p + kh - 1, r + kw - 1
                        sq = (th % 2) * 2 + (tw % 2)        # source quadrant
                        sh, sw = th // 2 + 1, tw // 2 + 1   # padded slice start
                        cols.append(
                            src_pad[sq, :, sh:sh + H, sw:sw + W, :].reshape(M, cin))
                src = jnp.concatenate(cols, axis=0).astype(w_tap.dtype)
                acc = acc + jnp.dot(src, w_tap, preferred_element_type=f32)
        return acc

    def bn_scale_shift(acc, g_ref, be_ref):
        """Training-mode BatchNorm (biased variance, eps=1e-5) folded into a
        per-channel affine; stats computed single-pass in f32."""
        inv_m = 1.0 / acc.shape[0]
        s = jnp.sum(acc, axis=0, keepdims=True)
        ss = jnp.sum(acc * acc, axis=0, keepdims=True)
        mean = s * inv_m
        var = jnp.maximum(ss * inv_m - mean * mean, 0.0)   # clamp: rsqrt stays finite
        scale = jax.lax.rsqrt(var + eps) * g_ref[...]
        shift = be_ref[...] - mean * scale
        return scale, shift

    # ---- 3. conv1 -> BN1 -> ReLU, scattered straight into the padded conv2
    #         input quadrants (scatter fused with the normalization pass).
    acc1 = conv3x3(cat_pad, CC, w1_ref)
    sc1, sh1 = bn_scale_shift(acc1, g1_ref, be1_ref)
    for qd in range(4):
        y1_q = jnp.maximum(acc1[qd * M:(qd + 1) * M, :] * sc1 + sh1, 0.0)
        y1_pad[qd, :, 1:H + 1, 1:W + 1, :] = y1_q.reshape(N, H, W, C)

    # ---- 4. conv2 -> BN2 -> ReLU -> the only HBM write of the kernel.
    acc2 = conv3x3(y1_pad, C, w2_ref)
    sc2, sh2 = bn_scale_shift(acc2, g2_ref, be2_ref)
    out_ref[...] = jnp.maximum(acc2 * sc2 + sh2, 0.0).astype(out_ref.dtype)


def prepare_params(params):
    """One-time re-layout of PyTorch-style parameters for the kernel."""
    C = int(params["conv1_b"].shape[0])
    Cin = int(params["up_w"].shape[0])
    bf = _MXU_DTYPE
    return {
        # ConvTranspose2d weight (Cin, Cout, 2, 2) -> (Cin, (a, b, Cout)):
        # column group a*2+b is exactly output-parity quadrant (a, b).
        "up_w": jnp.transpose(params["up_w"], (0, 2, 3, 1)).reshape(Cin, 4 * C).astype(bf),
        "up_b": params["up_b"].reshape(1, C).astype(jnp.float32),
        # Conv2d weight (out, in, kh, kw) -> ((kh, kw, in), out); row block
        # tap*in:(tap+1)*in is the (kh, kw) tap.
        "w1": jnp.transpose(params["conv1_w"], (2, 3, 1, 0)).reshape(9 * 2 * C, C).astype(bf),
        "g1": params["bn1_g"].reshape(1, C).astype(jnp.float32),
        "be1": params["bn1_b"].reshape(1, C).astype(jnp.float32),
        "w2": jnp.transpose(params["conv2_w"], (2, 3, 1, 0)).reshape(9 * C, C).astype(bf),
        "g2": params["bn2_g"].reshape(1, C).astype(jnp.float32),
        "be2": params["bn2_b"].reshape(1, C).astype(jnp.float32),
        # conv1_b / conv2_b intentionally dropped: under training-mode
        # BatchNorm the conv bias cancels exactly in the forward pass.
    }


def _vmem_capacity_bytes():
    try:
        return int(pltpu.get_tpu_info().vmem_capacity_bytes)
    except Exception:
        return 64 << 20          # conservative fallback (v7x per-core VMEM)


@jax.jit
def decoder_block_forward(inputs_nchw, skip_nchw, prepped):
    """Matches decoder_block.forward(inputs, skip) with NCHW tensors."""
    N, Cin, H, W = inputs_nchw.shape
    C = prepped["g1"].shape[-1]
    M = N * H * W
    Hp, Wp = H + 2, W + 2

    # Boundary relayouts only (they replace the NCHW<->NHWC transposes needed
    # anyway); every intermediate stays in VMEM inside the fused kernel.
    x2d = jnp.transpose(inputs_nchw, (0, 2, 3, 1)).reshape(M, Cin).astype(_MXU_DTYPE)
    skipq = jnp.transpose(skip_nchw.reshape(N, C, H, 2, W, 2),
                          (3, 5, 0, 2, 4, 1)).reshape(4, N, H, W, C).astype(_MXU_DTYPE)

    # VMEM budget from the actual buffers, capped generation-aware.
    f4, f2 = 4, 2
    scratch_bytes = f4 * (4 * N * Hp * Wp * 2 * C + 4 * N * Hp * Wp * C)
    io_bytes = (f2 * (M * Cin + 4 * M * C + Cin * 4 * C + 9 * 2 * C * C + 9 * C * C)
                + f4 * (4 * M * C + 7 * C))
    live_bytes = f4 * 3 * 4 * M * C          # f32 conv accumulators / temps
    vmem_bytes = min(2 * (scratch_bytes + io_bytes + live_bytes) + (16 << 20),
                     int(0.85 * _vmem_capacity_bytes()))

    flops = 2 * (M * Cin * 4 * C + 4 * M * 9 * 2 * C * C + 4 * M * 9 * C * C)

    out2d = pl.pallas_call(
        _decoder_block_kernel,
        out_shape=jax.ShapeDtypeStruct((4 * M, C), jnp.float32),
        in_specs=[_VMEM] * 10,
        out_specs=_VMEM,
        scratch_shapes=[
            pltpu.VMEM((4, N, Hp, Wp, 2 * C), jnp.float32),  # padded cat quadrants
            pltpu.VMEM((4, N, Hp, Wp, C), jnp.float32),      # padded y1 quadrants
        ],
        compiler_params=pltpu.CompilerParams(vmem_limit_bytes=vmem_bytes),
        cost_estimate=pl.CostEstimate(flops=flops, transcendentals=0,
                                      bytes_accessed=io_bytes),
    )(x2d, skipq, prepped["up_w"], prepped["up_b"],
      prepped["w1"], prepped["g1"], prepped["be1"],
      prepped["w2"], prepped["g2"], prepped["be2"])

    # Quadrants -> NCHW (single boundary relayout, fused by XLA).
    out6 = out2d.reshape(2, 2, N, H, W, C)
    return jnp.transpose(out6, (2, 5, 3, 0, 4, 1)).reshape(N, C, 2 * H, 2 * W)


def _reference_forward(inputs_nchw, skip_nchw, params):
    """Pure-JAX (XLA) reference with the exact PyTorch forward semantics."""
    hi = jax.lax.Precision.HIGHEST
    N, _, H, W = inputs_nchw.shape
    C = params["conv1_b"].shape[0]

    up = jnp.einsum("nihw,ioab->nohawb", inputs_nchw, params["up_w"], precision=hi)
    up = up.reshape(N, C, 2 * H, 2 * W) + params["up_b"][None, :, None, None]
    x = jnp.concatenate([up, skip_nchw], axis=1)

    def conv_bn_relu(z, w, b, g, be):
        y = jax.lax.conv_general_dilated(
            z, w, (1, 1), ((1, 1), (1, 1)),
            dimension_numbers=("NCHW", "OIHW", "NCHW"), precision=hi)
        y = y + b[None, :, None, None]
        mean = y.mean(axis=(0, 2, 3), keepdims=True)
        var = ((y - mean) ** 2).mean(axis=(0, 2, 3), keepdims=True)
        y = (y - mean) * jax.lax.rsqrt(var + 1e-5)
        y = y * g[None, :, None, None] + be[None, :, None, None]
        return jnp.maximum(y, 0.0)

    x = conv_bn_relu(x, params["conv1_w"], params["conv1_b"],
                     params["bn1_g"], params["bn1_b"])
    x = conv_bn_relu(x, params["conv2_w"], params["conv2_b"],
                     params["bn2_g"], params["bn2_b"])
    return x


def init_params(key, in_c, out_c):
    ks = jax.random.split(key, 8)
    return {
        # ConvTranspose2d weight: (in_c, out_c, 2, 2)
        "up_w": 0.1 * jax.random.normal(ks[0], (in_c, out_c, 2, 2), jnp.float32),
        "up_b": 0.1 * jax.random.normal(ks[1], (out_c,), jnp.float32),
        # conv1: Conv2d(out_c + out_c, out_c, 3, padding=1)
        "conv1_w": 0.1 * jax.random.normal(ks[2], (out_c, 2 * out_c, 3, 3), jnp.float32),
        "conv1_b": 0.1 * jax.random.normal(ks[3], (out_c,), jnp.float32),
        "bn1_g": 1.0 + 0.05 * jax.random.normal(ks[4], (out_c,), jnp.float32),
        "bn1_b": 0.05 * jax.random.normal(ks[5], (out_c,), jnp.float32),
        # conv2: Conv2d(out_c, out_c, 3, padding=1)
        "conv2_w": 0.1 * jax.random.normal(ks[6], (out_c, out_c, 3, 3), jnp.float32),
        "conv2_b": 0.1 * jax.random.normal(ks[7], (out_c,), jnp.float32),
        "bn2_g": jnp.ones((out_c,), jnp.float32),
        "bn2_b": jnp.zeros((out_c,), jnp.float32),
    }


if __name__ == "__main__":
    key = jax.random.PRNGKey(0)
    k_in, k_skip, k_par = jax.random.split(key, 3)

    N, in_c, out_c = 2, 8, 4
    H, W = 8, 8                       # decoder input spatial; skip is 2H x 2W

    inputs = jax.random.normal(k_in, (N, in_c, H, W), jnp.float32)       # NCHW
    skip = jax.random.normal(k_skip, (N, out_c, 2 * H, 2 * W), jnp.float32)

    params = init_params(k_par, in_c, out_c)
    prepped = prepare_params(params)          # one-time weight re-layout

    out = decoder_block_forward(inputs, skip, prepped)
    out = jax.block_until_ready(out)
    assert out.shape == (N, out_c, 2 * H, 2 * W), out.shape

    ref = _reference_forward(inputs, skip, params)
    err = float(jnp.max(jnp.abs(out - ref)))
    # bf16 MXU operands / f32 accumulation: max-abs error vs the f32 reference
    # is O(1e-2) at these magnitudes; 5e-2 keeps ~2x margin.
    assert err < 5e-2, f"max abs err vs reference: {err}"

    print("KERNEL_OK")
</pallas_src>

<mosaic_0001>
module attributes {stable_mosaic.version = 11 : i64} {
  func.func @_decoder_block_kernel(%arg0: memref<128x8xbf16, #tpu.memory_space<vmem>>, %arg1: memref<4x2x8x8x4xbf16, #tpu.memory_space<vmem>>, %arg2: memref<8x16xbf16, #tpu.memory_space<vmem>>, %arg3: memref<1x4xf32, #tpu.memory_space<vmem>>, %arg4: memref<72x4xbf16, #tpu.memory_space<vmem>>, %arg5: memref<1x4xf32, #tpu.memory_space<vmem>>, %arg6: memref<1x4xf32, #tpu.memory_space<vmem>>, %arg7: memref<36x4xbf16, #tpu.memory_space<vmem>>, %arg8: memref<1x4xf32, #tpu.memory_space<vmem>>, %arg9: memref<1x4xf32, #tpu.memory_space<vmem>>, %arg10: memref<512x4xf32, #tpu.memory_space<vmem>>, %arg11: memref<4x2x10x10x8xf32, #tpu.memory_space<vmem>>, %arg12: memref<4x2x10x10x4xf32, #tpu.memory_space<vmem>>) attributes {dimension_semantics = [], scalar_prefetch = 0 : i64, scratch_operands = 2 : i64, tpu.core_type = #tpu.core_type<tc>} {
    %cst = arith.constant 0.000000e+00 : f32
    %0 = vector.broadcast %cst : f32 to vector<4x2x1x10x8xf32>
    %cst_0 = arith.constant 0.000000e+00 : f32
    %1 = vector.broadcast %cst_0 : f32 to vector<4x2x10x1x8xf32>
    %c0 = arith.constant 0 : index
    %c0_1 = arith.constant 0 : index
    %c0_2 = arith.constant 0 : index
    %c0_3 = arith.constant 0 : index
    %c0_4 = arith.constant 0 : index
    %2 = vector.load %arg11[%c0, %c0_1, %c0_2, %c0_3, %c0_4] : memref<4x2x10x10x8xf32, #tpu.memory_space<vmem>>, vector<4x2x1x10x8xf32>
    tpu.vector_store %arg11[%c0, %c0_1, %c0_2, %c0_3, %c0_4], %0 {strides = array<i32>} : memref<4x2x10x10x8xf32, #tpu.memory_space<vmem>>, vector<4x2x1x10x8xf32>,
    %c0_5 = arith.constant 0 : index
    %c0_6 = arith.constant 0 : index
    %c9 = arith.constant 9 : index
    %c0_7 = arith.constant 0 : index
    %c0_8 = arith.constant 0 : index
    %3 = vector.load %arg11[%c0_5, %c0_6, %c9, %c0_7, %c0_8] : memref<4x2x10x10x8xf32, #tpu.memory_space<vmem>>, vector<4x2x1x10x8xf32>
    tpu.vector_store %arg11[%c0_5, %c0_6, %c9, %c0_7, %c0_8], %0 {strides = array<i32>} : memref<4x2x10x10x8xf32, #tpu.memory_space<vmem>>, vector<4x2x1x10x8xf32>,
    %c0_9 = arith.constant 0 : index
    %c0_10 = arith.constant 0 : index
    %c0_11 = arith.constant 0 : index
    %c0_12 = arith.constant 0 : index
    %c0_13 = arith.constant 0 : index
    %4 = vector.load %arg11[%c0_9, %c0_10, %c0_11, %c0_12, %c0_13] : memref<4x2x10x10x8xf32, #tpu.memory_space<vmem>>, vector<4x2x10x1x8xf32>
    tpu.vector_store %arg11[%c0_9, %c0_10, %c0_11, %c0_12, %c0_13], %1 {strides = array<i32>} : memref<4x2x10x10x8xf32, #tpu.memory_space<vmem>>, vector<4x2x10x1x8xf32>,
    %c0_14 = arith.constant 0 : index
    %c0_15 = arith.constant 0 : index
    %c0_16 = arith.constant 0 : index
    %c9_17 = arith.constant 9 : index
    %c0_18 = arith.constant 0 : index
    %5 = vector.load %arg11[%c0_14, %c0_15, %c0_16, %c9_17, %c0_18] : memref<4x2x10x10x8xf32, #tpu.memory_space<vmem>>, vector<4x2x10x1x8xf32>
    tpu.vector_store %arg11[%c0_14, %c0_15, %c0_16, %c9_17, %c0_18], %1 {strides = array<i32>} : memref<4x2x10x10x8xf32, #tpu.memory_space<vmem>>, vector<4x2x10x1x8xf32>,
    %cst_19 = arith.constant 0.000000e+00 : f32
    %6 = vector.broadcast %cst_19 : f32 to vector<4x2x1x10x4xf32>
    %cst_20 = arith.constant 0.000000e+00 : f32
    %7 = vector.broadcast %cst_20 : f32 to vector<4x2x10x1x4xf32>
    %c0_21 = arith.constant 0 : index
    %c0_22 = arith.constant 0 : index
    %c0_23 = arith.constant 0 : index
    %c0_24 = arith.constant 0 : index
    %c0_25 = arith.constant 0 : index
    %8 = vector.load %arg12[%c0_21, %c0_22, %c0_23, %c0_24, %c0_25] : memref<4x2x10x10x4xf32, #tpu.memory_space<vmem>>, vector<4x2x1x10x4xf32>
    tpu.vector_store %arg12[%c0_21, %c0_22, %c0_23, %c0_24, %c0_25], %6 {strides = array<i32>} : memref<4x2x10x10x4xf32, #tpu.memory_space<vmem>>, vector<4x2x1x10x4xf32>,
    %c0_26 = arith.constant 0 : index
    %c0_27 = arith.constant 0 : index
    %c9_28 = arith.constant 9 : index
    %c0_29 = arith.constant 0 : index
    %c0_30 = arith.constant 0 : index
    %9 = vector.load %arg12[%c0_26, %c0_27, %c9_28, %c0_29, %c0_30] : memref<4x2x10x10x4xf32, #tpu.memory_space<vmem>>, vector<4x2x1x10x4xf32>
    tpu.vector_store %arg12[%c0_26, %c0_27, %c9_28, %c0_29, %c0_30], %6 {strides = array<i32>} : memref<4x2x10x10x4xf32, #tpu.memory_space<vmem>>, vector<4x2x1x10x4xf32>,
    %c0_31 = arith.constant 0 : index
    %c0_32 = arith.constant 0 : index
    %c0_33 = arith.constant 0 : index
    %c0_34 = arith.constant 0 : index
    %c0_35 = arith.constant 0 : index
    %10 = vector.load %arg12[%c0_31, %c0_32, %c0_33, %c0_34, %c0_35] : memref<4x2x10x10x4xf32, #tpu.memory_space<vmem>>, vector<4x2x10x1x4xf32>
    tpu.vector_store %arg12[%c0_31, %c0_32, %c0_33, %c0_34, %c0_35], %7 {strides = array<i32>} : memref<4x2x10x10x4xf32, #tpu.memory_space<vmem>>, vector<4x2x10x1x4xf32>,
    %c0_36 = arith.constant 0 : index
    %c0_37 = arith.constant 0 : index
    %c0_38 = arith.constant 0 : index
    %c9_39 = arith.constant 9 : index
    %c0_40 = arith.constant 0 : index
    %11 = vector.load %arg12[%c0_36, %c0_37, %c0_38, %c9_39, %c0_40] : memref<4x2x10x10x4xf32, #tpu.memory_space<vmem>>, vector<4x2x10x1x4xf32>
    tpu.vector_store %arg12[%c0_36, %c0_37, %c0_38, %c9_39, %c0_40], %7 {strides = array<i32>} : memref<4x2x10x10x4xf32, #tpu.memory_space<vmem>>, vector<4x2x10x1x4xf32>,
    %c0_41 = arith.constant 0 : index
    %c0_42 = arith.constant 0 : index
    %12 = vector.load %arg0[%c0_41, %c0_42] : memref<128x8xbf16, #tpu.memory_space<vmem>>, vector<128x8xbf16>
    %c0_43 = arith.constant 0 : index
    %c0_44 = arith.constant 0 : index
    %13 = vector.load %arg2[%c0_43, %c0_44] : memref<8x16xbf16, #tpu.memory_space<vmem>>, vector<8x16xbf16>
    %cst_45 = arith.constant dense<0.000000e+00> : vector<128x16xf32>
    %14 = tpu.matmul %12, %13, %cst_45 {dimension_numbers = #tpu.dot_dimension_numbers<[1], [0], [0], [1], [0, 0, 1, 1], [], []>} : vector<128x8xbf16>, vector<8x16xbf16>, vector<128x16xf32> -> vector<128x16xf32>
    %c0_46 = arith.constant 0 : index
    %c0_47 = arith.constant 0 : index
    %15 = vector.load %arg3[%c0_46, %c0_47] : memref<1x4xf32, #tpu.memory_space<vmem>>, vector<1x4xf32>
    %16 = vector.extract_strided_slice %14 {offsets = [0, 0], sizes = [128, 4], strides = [1, 1]} : vector<128x16xf32> to vector<128x4xf32>
    %17 = vector.broadcast %15 : vector<1x4xf32> to vector<128x4xf32>
    %18 = arith.addf %16, %17 : vector<128x4xf32>
    %19 = vector.shape_cast %18 : vector<128x4xf32> to vector<2x8x8x4xf32>
    %c0_48 = arith.constant 0 : index
    %c0_49 = arith.constant 0 : index
    %c1 = arith.constant 1 : index
    %c1_50 = arith.constant 1 : index
    %c0_51 = arith.constant 0 : index
    %20 = vector.load %arg11[%c0_48, %c0_49, %c1, %c1_50, %c0_51] : memref<4x2x10x10x8xf32, #tpu.memory_space<vmem>>, vector<1x2x8x8x4xf32>
    %21 = vector.shape_cast %20 : vector<1x2x8x8x4xf32> to vector<2x8x8x4xf32>
    %22 = vector.shape_cast %19 : vector<2x8x8x4xf32> to vector<1x2x8x8x4xf32>
    tpu.vector_store %arg11[%c0_48, %c0_49, %c1, %c1_50, %c0_51], %22 {strides = array<i32>} : memref<4x2x10x10x8xf32, #tpu.memory_space<vmem>>, vector<1x2x8x8x4xf32>,
    %c0_52 = arith.constant 0 : index
    %c0_53 = arith.constant 0 : index
    %c0_54 = arith.constant 0 : index
    %c0_55 = arith.constant 0 : index
    %c0_56 = arith.constant 0 : index
    %23 = vector.load %arg1[%c0_52, %c0_53, %c0_54, %c0_55, %c0_56] : memref<4x2x8x8x4xbf16, #tpu.memory_space<vmem>>, vector<1x2x8x8x4xbf16>
    %24 = vector.shape_cast %23 : vector<1x2x8x8x4xbf16> to vector<2x8x8x4xbf16>
    %25 = arith.extf %24 : vector<2x8x8x4xbf16> to vector<2x8x8x4xf32>
    %c0_57 = arith.constant 0 : index
    %c0_58 = arith.constant 0 : index
    %c1_59 = arith.constant 1 : index
    %c1_60 = arith.constant 1 : index
    %c4 = arith.constant 4 : index
    %26 = vector.load %arg11[%c0_57, %c0_58, %c1_59, %c1_60, %c4] : memref<4x2x10x10x8xf32, #tpu.memory_space<vmem>>, vector<1x2x8x8x4xf32>
    %27 = vector.shape_cast %26 : vector<1x2x8x8x4xf32> to vector<2x8x8x4xf32>
    %28 = vector.shape_cast %25 : vector<2x8x8x4xf32> to vector<1x2x8x8x4xf32>
    tpu.vector_store %arg11[%c0_57, %c0_58, %c1_59, %c1_60, %c4], %28 {strides = array<i32>} : memref<4x2x10x10x8xf32, #tpu.memory_space<vmem>>, vector<1x2x8x8x4xf32>,
    %29 = vector.extract_strided_slice %14 {offsets = [0, 4], sizes = [128, 4], strides = [1, 1]} : vector<128x16xf32> to vector<128x4xf32>
    %30 = vector.broadcast %15 : vector<1x4xf32> to vector<128x4xf32>
    %31 = arith.addf %29, %30 : vector<128x4xf32>
    %32 = vector.shape_cast %31 : vector<128x4xf32> to vector<2x8x8x4xf32>
    %c1_61 = arith.constant 1 : index
    %c0_62 = arith.constant 0 : index
    %c1_63 = arith.constant 1 : index
    %c1_64 = arith.constant 1 : index
    %c0_65 = arith.constant 0 : index
    %33 = vector.load %arg11[%c1_61, %c0_62, %c1_63, %c1_64, %c0_65] : memref<4x2x10x10x8xf32, #tpu.memory_space<vmem>>, vector<1x2x8x8x4xf32>
    %34 = vector.shape_cast %33 : vector<1x2x8x8x4xf32> to vector<2x8x8x4xf32>
    %35 = vector.shape_cast %32 : vector<2x8x8x4xf32> to vector<1x2x8x8x4xf32>
    tpu.vector_store %arg11[%c1_61, %c0_62, %c1_63, %c1_64, %c0_65], %35 {strides = array<i32>} : memref<4x2x10x10x8xf32, #tpu.memory_space<vmem>>, vector<1x2x8x8x4xf32>,
    %c1_66 = arith.constant 1 : index
    %c0_67 = arith.constant 0 : index
    %c0_68 = arith.constant 0 : index
    %c0_69 = arith.constant 0 : index
    %c0_70 = arith.constant 0 : index
    %36 = vector.load %arg1[%c1_66, %c0_67, %c0_68, %c0_69, %c0_70] : memref<4x2x8x8x4xbf16, #tpu.memory_space<vmem>>, vector<1x2x8x8x4xbf16>
    %37 = vector.shape_cast %36 : vector<1x2x8x8x4xbf16> to vector<2x8x8x4xbf16>
    %38 = arith.extf %37 : vector<2x8x8x4xbf16> to vector<2x8x8x4xf32>
    %c1_71 = arith.constant 1 : index
    %c0_72 = arith.constant 0 : index
    %c1_73 = arith.constant 1 : index
    %c1_74 = arith.constant 1 : index
    %c4_75 = arith.constant 4 : index
    %39 = vector.load %arg11[%c1_71, %c0_72, %c1_73, %c1_74, %c4_75] : memref<4x2x10x10x8xf32, #tpu.memory_space<vmem>>, vector<1x2x8x8x4xf32>
    %40 = vector.shape_cast %39 : vector<1x2x8x8x4xf32> to vector<2x8x8x4xf32>
    %41 = vector.shape_cast %38 : vector<2x8x8x4xf32> to vector<1x2x8x8x4xf32>
    tpu.vector_store %arg11[%c1_71, %c0_72, %c1_73, %c1_74, %c4_75], %41 {strides = array<i32>} : memref<4x2x10x10x8xf32, #tpu.memory_space<vmem>>, vector<1x2x8x8x4xf32>,
    %42 = vector.extract_strided_slice %14 {offsets = [0, 8], sizes = [128, 4], strides = [1, 1]} : vector<128x16xf32> to vector<128x4xf32>
    %43 = vector.broadcast %15 : vector<1x4xf32> to vector<128x4xf32>
    %44 = arith.addf %42, %43 : vector<128x4xf32>
    %45 = vector.shape_cast %44 : vector<128x4xf32> to vector<2x8x8x4xf32>
    %c2 = arith.constant 2 : index
    %c0_76 = arith.constant 0 : index
    %c1_77 = arith.constant 1 : index
    %c1_78 = arith.constant 1 : index
    %c0_79 = arith.constant 0 : index
    %46 = vector.load %arg11[%c2, %c0_76, %c1_77, %c1_78, %c0_79] : memref<4x2x10x10x8xf32, #tpu.memory_space<vmem>>, vector<1x2x8x8x4xf32>
    %47 = vector.shape_cast %46 : vector<1x2x8x8x4xf32> to vector<2x8x8x4xf32>
    %48 = vector.shape_cast %45 : vector<2x8x8x4xf32> to vector<1x2x8x8x4xf32>
    tpu.vector_store %arg11[%c2, %c0_76, %c1_77, %c1_78, %c0_79], %48 {strides = array<i32>} : memref<4x2x10x10x8xf32, #tpu.memory_space<vmem>>, vector<1x2x8x8x4xf32>,
    %c2_80 = arith.constant 2 : index
    %c0_81 = arith.constant 0 : index
    %c0_82 = arith.constant 0 : index
    %c0_83 = arith.constant 0 : index
    %c0_84 = arith.constant 0 : index
    %49 = vector.load %arg1[%c2_80, %c0_81, %c0_82, %c0_83, %c0_84] : memref<4x2x8x8x4xbf16, #tpu.memory_space<vmem>>, vector<1x2x8x8x4xbf16>
    %50 = vector.shape_cast %49 : vector<1x2x8x8x4xbf16> to vector<2x8x8x4xbf16>
    %51 = arith.extf %50 : vector<2x8x8x4xbf16> to vector<2x8x8x4xf32>
    %c2_85 = arith.constant 2 : index
    %c0_86 = arith.constant 0 : index
    %c1_87 = arith.constant 1 : index
    %c1_88 = arith.constant 1 : index
    %c4_89 = arith.constant 4 : index
    %52 = vector.load %arg11[%c2_85, %c0_86, %c1_87, %c1_88, %c4_89] : memref<4x2x10x10x8xf32, #tpu.memory_space<vmem>>, vector<1x2x8x8x4xf32>
    %53 = vector.shape_cast %52 : vector<1x2x8x8x4xf32> to vector<2x8x8x4xf32>
    %54 = vector.shape_cast %51 : vector<2x8x8x4xf32> to vector<1x2x8x8x4xf32>
    tpu.vector_store %arg11[%c2_85, %c0_86, %c1_87, %c1_88, %c4_89], %54 {strides = array<i32>} : memref<4x2x10x10x8xf32, #tpu.memory_space<vmem>>, vector<1x2x8x8x4xf32>,
    %55 = vector.extract_strided_slice %14 {offsets = [0, 12], sizes = [128, 4], strides = [1, 1]} : vector<128x16xf32> to vector<128x4xf32>
    %56 = vector.broadcast %15 : vector<1x4xf32> to vector<128x4xf32>
    %57 = arith.addf %55, %56 : vector<128x4xf32>
    %58 = vector.shape_cast %57 : vector<128x4xf32> to vector<2x8x8x4xf32>
    %c3 = arith.constant 3 : index
    %c0_90 = arith.constant 0 : index
    %c1_91 = arith.constant 1 : index
    %c1_92 = arith.constant 1 : index
    %c0_93 = arith.constant 0 : index
    %59 = vector.load %arg11[%c3, %c0_90, %c1_91, %c1_92, %c0_93] : memref<4x2x10x10x8xf32, #tpu.memory_space<vmem>>, vector<1x2x8x8x4xf32>
    %60 = vector.shape_cast %59 : vector<1x2x8x8x4xf32> to vector<2x8x8x4xf32>
    %61 = vector.shape_cast %58 : vector<2x8x8x4xf32> to vector<1x2x8x8x4xf32>
    tpu.vector_store %arg11[%c3, %c0_90, %c1_91, %c1_92, %c0_93], %61 {strides = array<i32>} : memref<4x2x10x10x8xf32, #tpu.memory_space<vmem>>, vector<1x2x8x8x4xf32>,
    %c3_94 = arith.constant 3 : index
    %c0_95 = arith.constant 0 : index
    %c0_96 = arith.constant 0 : index
    %c0_97 = arith.constant 0 : index
    %c0_98 = arith.constant 0 : index
    %62 = vector.load %arg1[%c3_94, %c0_95, %c0_96, %c0_97, %c0_98] : memref<4x2x8x8x4xbf16, #tpu.memory_space<vmem>>, vector<1x2x8x8x4xbf16>
    %63 = vector.shape_cast %62 : vector<1x2x8x8x4xbf16> to vector<2x8x8x4xbf16>
    %64 = arith.extf %63 : vector<2x8x8x4xbf16> to vector<2x8x8x4xf32>
    %c3_99 = arith.constant 3 : index
    %c0_100 = arith.constant 0 : index
    %c1_101 = arith.constant 1 : index
    %c1_102 = arith.constant 1 : index
    %c4_103 = arith.constant 4 : index
    %65 = vector.load %arg11[%c3_99, %c0_100, %c1_101, %c1_102, %c4_103] : memref<4x2x10x10x8xf32, #tpu.memory_space<vmem>>, vector<1x2x8x8x4xf32>
    %66 = vector.shape_cast %65 : vector<1x2x8x8x4xf32> to vector<2x8x8x4xf32>
    %67 = vector.shape_cast %64 : vector<2x8x8x4xf32> to vector<1x2x8x8x4xf32>
    tpu.vector_store %arg11[%c3_99, %c0_100, %c1_101, %c1_102, %c4_103], %67 {strides = array<i32>} : memref<4x2x10x10x8xf32, #tpu.memory_space<vmem>>, vector<1x2x8x8x4xf32>,
    %cst_104 = arith.constant 0.000000e+00 : f32
    %68 = vector.broadcast %cst_104 : f32 to vector<512x4xf32>
    %c0_105 = arith.constant 0 : index
    %c0_106 = arith.constant 0 : index
    %69 = vector.load %arg4[%c0_105, %c0_106] : memref<72x4xbf16, #tpu.memory_space<vmem>>, vector<8x4xbf16>
    %c3_107 = arith.constant 3 : index
    %c0_108 = arith.constant 0 : index
    %c0_109 = arith.constant 0 : index
    %c0_110 = arith.constant 0 : index
    %c0_111 = arith.constant 0 : index
    %70 = vector.load %arg11[%c3_107, %c0_108, %c0_109, %c0_110, %c0_111] : memref<4x2x10x10x8xf32, #tpu.memory_space<vmem>>, vector<1x2x8x8x8xf32>
    %71 = vector.shape_cast %70 : vector<1x2x8x8x8xf32> to vector<2x8x8x8xf32>
    %72 = vector.shape_cast %71 : vector<2x8x8x8xf32> to vector<128x8xf32>
    %c2_112 = arith.constant 2 : index
    %c0_113 = arith.constant 0 : index
    %c0_114 = arith.constant 0 : index
    %c1_115 = arith.constant 1 : index
    %c0_116 = arith.constant 0 : index
    %73 = vector.load %arg11[%c2_112, %c0_113, %c0_114, %c1_115, %c0_116] : memref<4x2x10x10x8xf32, #tpu.memory_space<vmem>>, vector<1x2x8x8x8xf32>
    %74 = vector.shape_cast %73 : vector<1x2x8x8x8xf32> to vector<2x8x8x8xf32>
    %75 = vector.shape_cast %74 : vector<2x8x8x8xf32> to vector<128x8xf32>
    %c1_117 = arith.constant 1 : index
    %c0_118 = arith.constant 0 : index
    %c1_119 = arith.constant 1 : index
    %c0_120 = arith.constant 0 : index
    %c0_121 = arith.constant 0 : index
    %76 = vector.load %arg11[%c1_117, %c0_118, %c1_119, %c0_120, %c0_121] : memref<4x2x10x10x8xf32, #tpu.memory_space<vmem>>, vector<1x2x8x8x8xf32>
    %77 = vector.shape_cast %76 : vector<1x2x8x8x8xf32> to vector<2x8x8x8xf32>
    %78 = vector.shape_cast %77 : vector<2x8x8x8xf32> to vector<128x8xf32>
    %c0_122 = arith.constant 0 : index
    %c0_123 = arith.constant 0 : index
    %c1_124 = arith.constant 1 : index
    %c1_125 = arith.constant 1 : index
    %c0_126 = arith.constant 0 : index
    %79 = vector.load %arg11[%c0_122, %c0_123, %c1_124, %c1_125, %c0_126] : memref<4x2x10x10x8xf32, #tpu.memory_space<vmem>>, vector<1x2x8x8x8xf32>
    %80 = vector.shape_cast %79 : vector<1x2x8x8x8xf32> to vector<2x8x8x8xf32>
    %81 = vector.shape_cast %80 : vector<2x8x8x8xf32> to vector<128x8xf32>
    %82 = tpu.concatenate %72, %75, %78, %81 in 0 : vector<128x8xf32>, vector<128x8xf32>, vector<128x8xf32>, vector<128x8xf32> -> vector<512x8xf32>
    %83 = arith.truncf %82 : vector<512x8xf32> to vector<512x8xbf16>
    %cst_127 = arith.constant dense<0.000000e+00> : vector<512x4xf32>
    %84 = tpu.matmul %83, %69, %cst_127 {dimension_numbers = #tpu.dot_dimension_numbers<[1], [0], [0], [1], [0, 0, 1, 1], [], []>} : vector<512x8xbf16>, vector<8x4xbf16>, vector<512x4xf32> -> vector<512x4xf32>
    %85 = arith.addf %68, %84 : vector<512x4xf32>
    %c8 = arith.constant 8 : index
    %c0_128 = arith.constant 0 : index
    %86 = vector.load %arg4[%c8, %c0_128] : memref<72x4xbf16, #tpu.memory_space<vmem>>, vector<8x4xbf16>
    %c2_129 = arith.constant 2 : index
    %c0_130 = arith.constant 0 : index
    %c0_131 = arith.constant 0 : index
    %c1_132 = arith.constant 1 : index
    %c0_133 = arith.constant 0 : index
    %87 = vector.load %arg11[%c2_129, %c0_130, %c0_131, %c1_132, %c0_133] : memref<4x2x10x10x8xf32, #tpu.memory_space<vmem>>, vector<1x2x8x8x8xf32>
    %88 = vector.shape_cast %87 : vector<1x2x8x8x8xf32> to vector<2x8x8x8xf32>
    %89 = vector.shape_cast %88 : vector<2x8x8x8xf32> to vector<128x8xf32>
    %c3_134 = arith.constant 3 : index
    %c0_135 = arith.constant 0 : index
    %c0_136 = arith.constant 0 : index
    %c1_137 = arith.constant 1 : index
    %c0_138 = arith.constant 0 : index
    %90 = vector.load %arg11[%c3_134, %c0_135, %c0_136, %c1_137, %c0_138] : memref<4x2x10x10x8xf32, #tpu.memory_space<vmem>>, vector<1x2x8x8x8xf32>
    %91 = vector.shape_cast %90 : vector<1x2x8x8x8xf32> to vector<2x8x8x8xf32>
    %92 = vector.shape_cast %91 : vector<2x8x8x8xf32> to vector<128x8xf32>
    %c0_139 = arith.constant 0 : index
    %c0_140 = arith.constant 0 : index
    %c1_141 = arith.constant 1 : index
    %c1_142 = arith.constant 1 : index
    %c0_143 = arith.constant 0 : index
    %93 = vector.load %arg11[%c0_139, %c0_140, %c1_141, %c1_142, %c0_143] : memref<4x2x10x10x8xf32, #tpu.memory_space<vmem>>, vector<1x2x8x8x8xf32>
    %94 = vector.shape_cast %93 : vector<1x2x8x8x8xf32> to vector<2x8x8x8xf32>
    %95 = vector.shape_cast %94 : vector<2x8x8x8xf32> to vector<128x8xf32>
    %c1_144 = arith.constant 1 : index
    %c0_145 = arith.constant 0 : index
    %c1_146 = arith.constant 1 : index
    %c1_147 = arith.constant 1 : index
    %c0_148 = arith.constant 0 : index
    %96 = vector.load %arg11[%c1_144, %c0_145, %c1_146, %c1_147, %c0_148] : memref<4x2x10x10x8xf32, #tpu.memory_space<vmem>>, vector<1x2x8x8x8xf32>
    %97 = vector.shape_cast %96 : vector<1x2x8x8x8xf32> to vector<2x8x8x8xf32>
    %98 = vector.shape_cast %97 : vector<2x8x8x8xf32> to vector<128x8xf32>
    %99 = tpu.concatenate %89, %92, %95, %98 in 0 : vector<128x8xf32>, vector<128x8xf32>, vector<128x8xf32>, vector<128x8xf32> -> vector<512x8xf32>
    %100 = arith.truncf %99 : vector<512x8xf32> to vector<512x8xbf16>
    %cst_149 = arith.constant dense<0.000000e+00> : vector<512x4xf32>
    %101 = tpu.matmul %100, %86, %cst_149 {dimension_numbers = #tpu.dot_dimension_numbers<[1], [0], [0], [1], [0, 0, 1, 1], [], []>} : vector<512x8xbf16>, vector<8x4xbf16>, vector<512x4xf32> -> vector<512x4xf32>
    %102 = arith.addf %85, %101 : vector<512x4xf32>
    %c16 = arith.constant 16 : index
    %c0_150 = arith.constant 0 : index
    %103 = vector.load %arg4[%c16, %c0_150] : memref<72x4xbf16, #tpu.memory_space<vmem>>, vector<8x4xbf16>
    %c3_151 = arith.constant 3 : index
    %c0_152 = arith.constant 0 : index
    %c0_153 = arith.constant 0 : index
    %c1_154 = arith.constant 1 : index
    %c0_155 = arith.constant 0 : index
    %104 = vector.load %arg11[%c3_151, %c0_152, %c0_153, %c1_154, %c0_155] : memref<4x2x10x10x8xf32, #tpu.memory_space<vmem>>, vector<1x2x8x8x8xf32>
    %105 = vector.shape_cast %104 : vector<1x2x8x8x8xf32> to vector<2x8x8x8xf32>
    %106 = vector.shape_cast %105 : vector<2x8x8x8xf32> to vector<128x8xf32>
    %c2_156 = arith.constant 2 : index
    %c0_157 = arith.constant 0 : index
    %c0_158 = arith.constant 0 : index
    %c2_159 = arith.constant 2 : index
    %c0_160 = arith.constant 0 : index
    %107 = vector.load %arg11[%c2_156, %c0_157, %c0_158, %c2_159, %c0_160] : memref<4x2x10x10x8xf32, #tpu.memory_space<vmem>>, vector<1x2x8x8x8xf32>
    %108 = vector.shape_cast %107 : vector<1x2x8x8x8xf32> to vector<2x8x8x8xf32>
    %109 = vector.shape_cast %108 : vector<2x8x8x8xf32> to vector<128x8xf32>
    %c1_161 = arith.constant 1 : index
    %c0_162 = arith.constant 0 : index
    %c1_163 = arith.constant 1 : index
    %c1_164 = arith.constant 1 : index
    %c0_165 = arith.constant 0 : index
    %110 = vector.load %arg11[%c1_161, %c0_162, %c1_163, %c1_164, %c0_165] : memref<4x2x10x10x8xf32, #tpu.memory_space<vmem>>, vector<1x2x8x8x8xf32>
    %111 = vector.shape_cast %110 : vector<1x2x8x8x8xf32> to vector<2x8x8x8xf32>
    %112 = vector.shape_cast %111 : vector<2x8x8x8xf32> to vector<128x8xf32>
    %c0_166 = arith.constant 0 : index
    %c0_167 = arith.constant 0 : index
    %c1_168 = arith.constant 1 : index
    %c2_169 = arith.constant 2 : index
    %c0_170 = arith.constant 0 : index
    %113 = vector.load %arg11[%c0_166, %c0_167, %c1_168, %c2_169, %c0_170] : memref<4x2x10x10x8xf32, #tpu.memory_space<vmem>>, vector<1x2x8x8x8xf32>
    %114 = vector.shape_cast %113 : vector<1x2x8x8x8xf32> to vector<2x8x8x8xf32>
    %115 = vector.shape_cast %114 : vector<2x8x8x8xf32> to vector<128x8xf32>
    %116 = tpu.concatenate %106, %109, %112, %115 in 0 : vector<128x8xf32>, vector<128x8xf32>, vector<128x8xf32>, vector<128x8xf32> -> vector<512x8xf32>
    %117 = arith.truncf %116 : vector<512x8xf32> to vector<512x8xbf16>
    %cst_171 = arith.constant dense<0.000000e+00> : vector<512x4xf32>
    %118 = tpu.matmul %117, %103, %cst_171 {dimension_numbers = #tpu.dot_dimension_numbers<[1], [0], [0], [1], [0, 0, 1, 1], [], []>} : vector<512x8xbf16>, vector<8x4xbf16>, vector<512x4xf32> -> vector<512x4xf32>
    %119 = arith.addf %102, %118 : vector<512x4xf32>
    %c24 = arith.constant 24 : index
    %c0_172 = arith.constant 0 : index
    %120 = vector.load %arg4[%c24, %c0_172] : memref<72x4xbf16, #tpu.memory_space<vmem>>, vector<8x4xbf16>
    %c1_173 = arith.constant 1 : index
    %c0_174 = arith.constant 0 : index
    %c1_175 = arith.constant 1 : index
    %c0_176 = arith.constant 0 : index
    %c0_177 = arith.constant 0 : index
    %121 = vector.load %arg11[%c1_173, %c0_174, %c1_175, %c0_176, %c0_177] : memref<4x2x10x10x8xf32, #tpu.memory_space<vmem>>, vector<1x2x8x8x8xf32>
    %122 = vector.shape_cast %121 : vector<1x2x8x8x8xf32> to vector<2x8x8x8xf32>
    %123 = vector.shape_cast %122 : vector<2x8x8x8xf32> to vector<128x8xf32>
    %c0_178 = arith.constant 0 : index
    %c0_179 = arith.constant 0 : index
    %c1_180 = arith.constant 1 : index
    %c1_181 = arith.constant 1 : index
    %c0_182 = arith.constant 0 : index
    %124 = vector.load %arg11[%c0_178, %c0_179, %c1_180, %c1_181, %c0_182] : memref<4x2x10x10x8xf32, #tpu.memory_space<vmem>>, vector<1x2x8x8x8xf32>
    %125 = vector.shape_cast %124 : vector<1x2x8x8x8xf32> to vector<2x8x8x8xf32>
    %126 = vector.shape_cast %125 : vector<2x8x8x8xf32> to vector<128x8xf32>
    %c3_183 = arith.constant 3 : index
    %c0_184 = arith.constant 0 : index
    %c1_185 = arith.constant 1 : index
    %c0_186 = arith.constant 0 : index
    %c0_187 = arith.constant 0 : index
    %127 = vector.load %arg11[%c3_183, %c0_184, %c1_185, %c0_186, %c0_187] : memref<4x2x10x10x8xf32, #tpu.memory_space<vmem>>, vector<1x2x8x8x8xf32>
    %128 = vector.shape_cast %127 : vector<1x2x8x8x8xf32> to vector<2x8x8x8xf32>
    %129 = vector.shape_cast %128 : vector<2x8x8x8xf32> to vector<128x8xf32>
    %c2_188 = arith.constant 2 : index
    %c0_189 = arith.constant 0 : index
    %c1_190 = arith.constant 1 : index
    %c1_191 = arith.constant 1 : index
    %c0_192 = arith.constant 0 : index
    %130 = vector.load %arg11[%c2_188, %c0_189, %c1_190, %c1_191, %c0_192] : memref<4x2x10x10x8xf32, #tpu.memory_space<vmem>>, vector<1x2x8x8x8xf32>
    %131 = vector.shape_cast %130 : vector<1x2x8x8x8xf32> to vector<2x8x8x8xf32>
    %132 = vector.shape_cast %131 : vector<2x8x8x8xf32> to vector<128x8xf32>
    %133 = tpu.concatenate %123, %126, %129, %132 in 0 : vector<128x8xf32>, vector<128x8xf32>, vector<128x8xf32>, vector<128x8xf32> -> vector<512x8xf32>
    %134 = arith.truncf %133 : vector<512x8xf32> to vector<512x8xbf16>
    %cst_193 = arith.constant dense<0.000000e+00> : vector<512x4xf32>
    %135 = tpu.matmul %134, %120, %cst_193 {dimension_numbers = #tpu.dot_dimension_numbers<[1], [0], [0], [1], [0, 0, 1, 1], [], []>} : vector<512x8xbf16>, vector<8x4xbf16>, vector<512x4xf32> -> vector<512x4xf32>
    %136 = arith.addf %119, %135 : vector<512x4xf32>
    %c32 = arith.constant 32 : index
    %c0_194 = arith.constant 0 : index
    %137 = vector.load %arg4[%c32, %c0_194] : memref<72x4xbf16, #tpu.memory_space<vmem>>, vector<8x4xbf16>
    %c0_195 = arith.constant 0 : index
    %c0_196 = arith.constant 0 : index
    %c1_197 = arith.constant 1 : index
    %c1_198 = arith.constant 1 : index
    %c0_199 = arith.constant 0 : index
    %138 = vector.load %arg11[%c0_195, %c0_196, %c1_197, %c1_198, %c0_199] : memref<4x2x10x10x8xf32, #tpu.memory_space<vmem>>, vector<1x2x8x8x8xf32>
    %139 = vector.shape_cast %138 : vector<1x2x8x8x8xf32> to vector<2x8x8x8xf32>
    %140 = vector.shape_cast %139 : vector<2x8x8x8xf32> to vector<128x8xf32>
    %c1_200 = arith.constant 1 : index
    %c0_201 = arith.constant 0 : index
    %c1_202 = arith.constant 1 : index
    %c1_203 = arith.constant 1 : index
    %c0_204 = arith.constant 0 : index
    %141 = vector.load %arg11[%c1_200, %c0_201, %c1_202, %c1_203, %c0_204] : memref<4x2x10x10x8xf32, #tpu.memory_space<vmem>>, vector<1x2x8x8x8xf32>
    %142 = vector.shape_cast %141 : vector<1x2x8x8x8xf32> to vector<2x8x8x8xf32>
    %143 = vector.shape_cast %142 : vector<2x8x8x8xf32> to vector<128x8xf32>
    %c2_205 = arith.constant 2 : index
    %c0_206 = arith.constant 0 : index
    %c1_207 = arith.constant 1 : index
    %c1_208 = arith.constant 1 : index
    %c0_209 = arith.constant 0 : index
    %144 = vector.load %arg11[%c2_205, %c0_206, %c1_207, %c1_208, %c0_209] : memref<4x2x10x10x8xf32, #tpu.memory_space<vmem>>, vector<1x2x8x8x8xf32>
    %145 = vector.shape_cast %144 : vector<1x2x8x8x8xf32> to vector<2x8x8x8xf32>
    %146 = vector.shape_cast %145 : vector<2x8x8x8xf32> to vector<128x8xf32>
    %c3_210 = arith.constant 3 : index
    %c0_211 = arith.constant 0 : index
    %c1_212 = arith.constant 1 : index
    %c1_213 = arith.constant 1 : index
    %c0_214 = arith.constant 0 : index
    %147 = vector.load %arg11[%c3_210, %c0_211, %c1_212, %c1_213, %c0_214] : memref<4x2x10x10x8xf32, #tpu.memory_space<vmem>>, vector<1x2x8x8x8xf32>
    %148 = vector.shape_cast %147 : vector<1x2x8x8x8xf32> to vector<2x8x8x8xf32>
    %149 = vector.shape_cast %148 : vector<2x8x8x8xf32> to vector<128x8xf32>
    %150 = tpu.concatenate %140, %143, %146, %149 in 0 : vector<128x8xf32>, vector<128x8xf32>, vector<128x8xf32>, vector<128x8xf32> -> vector<512x8xf32>
    %151 = arith.truncf %150 : vector<512x8xf32> to vector<512x8xbf16>
    %cst_215 = arith.constant dense<0.000000e+00> : vector<512x4xf32>
    %152 = tpu.matmul %151, %137, %cst_215 {dimension_numbers = #tpu.dot_dimension_numbers<[1], [0], [0], [1], [0, 0, 1, 1], [], []>} : vector<512x8xbf16>, vector<8x4xbf16>, vector<512x4xf32> -> vector<512x4xf32>
    %153 = arith.addf %136, %152 : vector<512x4xf32>
    %c40 = arith.constant 40 : index
    %c0_216 = arith.constant 0 : index
    %154 = vector.load %arg4[%c40, %c0_216] : memref<72x4xbf16, #tpu.memory_space<vmem>>, vector<8x4xbf16>
    %c1_217 = arith.constant 1 : index
    %c0_218 = arith.constant 0 : index
    %c1_219 = arith.constant 1 : index
    %c1_220 = arith.constant 1 : index
    %c0_221 = arith.constant 0 : index
    %155 = vector.load %arg11[%c1_217, %c0_218, %c1_219, %c1_220, %c0_221] : memref<4x2x10x10x8xf32, #tpu.memory_space<vmem>>, vector<1x2x8x8x8xf32>
    %156 = vector.shape_cast %155 : vector<1x2x8x8x8xf32> to vector<2x8x8x8xf32>
    %157 = vector.shape_cast %156 : vector<2x8x8x8xf32> to vector<128x8xf32>
    %c0_222 = arith.constant 0 : index
    %c0_223 = arith.constant 0 : index
    %c1_224 = arith.constant 1 : index
    %c2_225 = arith.constant 2 : index
    %c0_226 = arith.constant 0 : index
    %158 = vector.load %arg11[%c0_222, %c0_223, %c1_224, %c2_225, %c0_226] : memref<4x2x10x10x8xf32, #tpu.memory_space<vmem>>, vector<1x2x8x8x8xf32>
    %159 = vector.shape_cast %158 : vector<1x2x8x8x8xf32> to vector<2x8x8x8xf32>
    %160 = vector.shape_cast %159 : vector<2x8x8x8xf32> to vector<128x8xf32>
    %c3_227 = arith.constant 3 : index
    %c0_228 = arith.constant 0 : index
    %c1_229 = arith.constant 1 : index
    %c1_230 = arith.constant 1 : index
    %c0_231 = arith.constant 0 : index
    %161 = vector.load %arg11[%c3_227, %c0_228, %c1_229, %c1_230, %c0_231] : memref<4x2x10x10x8xf32, #tpu.memory_space<vmem>>, vector<1x2x8x8x8xf32>
    %162 = vector.shape_cast %161 : vector<1x2x8x8x8xf32> to vector<2x8x8x8xf32>
    %163 = vector.shape_cast %162 : vector<2x8x8x8xf32> to vector<128x8xf32>
    %c2_232 = arith.constant 2 : index
    %c0_233 = arith.constant 0 : index
    %c1_234 = arith.constant 1 : index
    %c2_235 = arith.constant 2 : index
    %c0_236 = arith.constant 0 : index
    %164 = vector.load %arg11[%c2_232, %c0_233, %c1_234, %c2_235, %c0_236] : memref<4x2x10x10x8xf32, #tpu.memory_space<vmem>>, vector<1x2x8x8x8xf32>
    %165 = vector.shape_cast %164 : vector<1x2x8x8x8xf32> to vector<2x8x8x8xf32>
    %166 = vector.shape_cast %165 : vector<2x8x8x8xf32> to vector<128x8xf32>
    %167 = tpu.concatenate %157, %160, %163, %166 in 0 : vector<128x8xf32>, vector<128x8xf32>, vector<128x8xf32>, vector<128x8xf32> -> vector<512x8xf32>
    %168 = arith.truncf %167 : vector<512x8xf32> to vector<512x8xbf16>
    %cst_237 = arith.constant dense<0.000000e+00> : vector<512x4xf32>
    %169 = tpu.matmul %168, %154, %cst_237 {dimension_numbers = #tpu.dot_dimension_numbers<[1], [0], [0], [1], [0, 0, 1, 1], [], []>} : vector<512x8xbf16>, vector<8x4xbf16>, vector<512x4xf32> -> vector<512x4xf32>
    %170 = arith.addf %153, %169 : vector<512x4xf32>
    %c48 = arith.constant 48 : index
    %c0_238 = arith.constant 0 : index
    %171 = vector.load %arg4[%c48, %c0_238] : memref<72x4xbf16, #tpu.memory_space<vmem>>, vector<8x4xbf16>
    %c3_239 = arith.constant 3 : index
    %c0_240 = arith.constant 0 : index
    %c1_241 = arith.constant 1 : index
    %c0_242 = arith.constant 0 : index
    %c0_243 = arith.constant 0 : index
    %172 = vector.load %arg11[%c3_239, %c0_240, %c1_241, %c0_242, %c0_243] : memref<4x2x10x10x8xf32, #tpu.memory_space<vmem>>, vector<1x2x8x8x8xf32>
    %173 = vector.shape_cast %172 : vector<1x2x8x8x8xf32> to vector<2x8x8x8xf32>
    %174 = vector.shape_cast %173 : vector<2x8x8x8xf32> to vector<128x8xf32>
    %c2_244 = arith.constant 2 : index
    %c0_245 = arith.constant 0 : index
    %c1_246 = arith.constant 1 : index
    %c1_247 = arith.constant 1 : index
    %c0_248 = arith.constant 0 : index
    %175 = vector.load %arg11[%c2_244, %c0_245, %c1_246, %c1_247, %c0_248] : memref<4x2x10x10x8xf32, #tpu.memory_space<vmem>>, vector<1x2x8x8x8xf32>
    %176 = vector.shape_cast %175 : vector<1x2x8x8x8xf32> to vector<2x8x8x8xf32>
    %177 = vector.shape_cast %176 : vector<2x8x8x8xf32> to vector<128x8xf32>
    %c1_249 = arith.constant 1 : index
    %c0_250 = arith.constant 0 : index
    %c2_251 = arith.constant 2 : index
    %c0_252 = arith.constant 0 : index
    %c0_253 = arith.constant 0 : index
    %178 = vector.load %arg11[%c1_249, %c0_250, %c2_251, %c0_252, %c0_253] : memref<4x2x10x10x8xf32, #tpu.memory_space<vmem>>, vector<1x2x8x8x8xf32>
    %179 = vector.shape_cast %178 : vector<1x2x8x8x8xf32> to vector<2x8x8x8xf32>
    %180 = vector.shape_cast %179 : vector<2x8x8x8xf32> to vector<128x8xf32>
    %c0_254 = arith.constant 0 : index
    %c0_255 = arith.constant 0 : index
    %c2_256 = arith.constant 2 : index
    %c1_257 = arith.constant 1 : index
    %c0_258 = arith.constant 0 : index
    %181 = vector.load %arg11[%c0_254, %c0_255, %c2_256, %c1_257, %c0_258] : memref<4x2x10x10x8xf32, #tpu.memory_space<vmem>>, vector<1x2x8x8x8xf32>
    %182 = vector.shape_cast %181 : vector<1x2x8x8x8xf32> to vector<2x8x8x8xf32>
    %183 = vector.shape_cast %182 : vector<2x8x8x8xf32> to vector<128x8xf32>
    %184 = tpu.concatenate %174, %177, %180, %183 in 0 : vector<128x8xf32>, vector<128x8xf32>, vector<128x8xf32>, vector<128x8xf32> -> vector<512x8xf32>
    %185 = arith.truncf %184 : vector<512x8xf32> to vector<512x8xbf16>
    %cst_259 = arith.constant dense<0.000000e+00> : vector<512x4xf32>
    %186 = tpu.matmul %185, %171, %cst_259 {dimension_numbers = #tpu.dot_dimension_numbers<[1], [0], [0], [1], [0, 0, 1, 1], [], []>} : vector<512x8xbf16>, vector<8x4xbf16>, vector<512x4xf32> -> vector<512x4xf32>
    %187 = arith.addf %170, %186 : vector<512x4xf32>
    %c56 = arith.constant 56 : index
    %c0_260 = arith.constant 0 : index
    %188 = vector.load %arg4[%c56, %c0_260] : memref<72x4xbf16, #tpu.memory_space<vmem>>, vector<8x4xbf16>
    %c2_261 = arith.constant 2 : index
    %c0_262 = arith.constant 0 : index
    %c1_263 = arith.constant 1 : index
    %c1_264 = arith.constant 1 : index
    %c0_265 = arith.constant 0 : index
    %189 = vector.load %arg11[%c2_261, %c0_262, %c1_263, %c1_264, %c0_265] : memref<4x2x10x10x8xf32, #tpu.memory_space<vmem>>, vector<1x2x8x8x8xf32>
    %190 = vector.shape_cast %189 : vector<1x2x8x8x8xf32> to vector<2x8x8x8xf32>
    %191 = vector.shape_cast %190 : vector<2x8x8x8xf32> to vector<128x8xf32>
    %c3_266 = arith.constant 3 : index
    %c0_267 = arith.constant 0 : index
    %c1_268 = arith.constant 1 : index
    %c1_269 = arith.constant 1 : index
    %c0_270 = arith.constant 0 : index
    %192 = vector.load %arg11[%c3_266, %c0_267, %c1_268, %c1_269, %c0_270] : memref<4x2x10x10x8xf32, #tpu.memory_space<vmem>>, vector<1x2x8x8x8xf32>
    %193 = vector.shape_cast %192 : vector<1x2x8x8x8xf32> to vector<2x8x8x8xf32>
    %194 = vector.shape_cast %193 : vector<2x8x8x8xf32> to vector<128x8xf32>
    %c0_271 = arith.constant 0 : index
    %c0_272 = arith.constant 0 : index
    %c2_273 = arith.constant 2 : index
    %c1_274 = arith.constant 1 : index
    %c0_275 = arith.constant 0 : index
    %195 = vector.load %arg11[%c0_271, %c0_272, %c2_273, %c1_274, %c0_275] : memref<4x2x10x10x8xf32, #tpu.memory_space<vmem>>, vector<1x2x8x8x8xf32>
    %196 = vector.shape_cast %195 : vector<1x2x8x8x8xf32> to vector<2x8x8x8xf32>
    %197 = vector.shape_cast %196 : vector<2x8x8x8xf32> to vector<128x8xf32>
    %c1_276 = arith.constant 1 : index
    %c0_277 = arith.constant 0 : index
    %c2_278 = arith.constant 2 : index
    %c1_279 = arith.constant 1 : index
    %c0_280 = arith.constant 0 : index
    %198 = vector.load %arg11[%c1_276, %c0_277, %c2_278, %c1_279, %c0_280] : memref<4x2x10x10x8xf32, #tpu.memory_space<vmem>>, vector<1x2x8x8x8xf32>
    %199 = vector.shape_cast %198 : vector<1x2x8x8x8xf32> to vector<2x8x8x8xf32>
    %200 = vector.shape_cast %199 : vector<2x8x8x8xf32> to vector<128x8xf32>
    %201 = tpu.concatenate %191, %194, %197, %200 in 0 : vector<128x8xf32>, vector<128x8xf32>, vector<128x8xf32>, vector<128x8xf32> -> vector<512x8xf32>
    %202 = arith.truncf %201 : vector<512x8xf32> to vector<512x8xbf16>
    %cst_281 = arith.constant dense<0.000000e+00> : vector<512x4xf32>
    %203 = tpu.matmul %202, %188, %cst_281 {dimension_numbers = #tpu.dot_dimension_numbers<[1], [0], [0], [1], [0, 0, 1, 1], [], []>} : vector<512x8xbf16>, vector<8x4xbf16>, vector<512x4xf32> -> vector<512x4xf32>
    %204 = arith.addf %187, %203 : vector<512x4xf32>
    %c64 = arith.constant 64 : index
    %c0_282 = arith.constant 0 : index
    %205 = vector.load %arg4[%c64, %c0_282] : memref<72x4xbf16, #tpu.memory_space<vmem>>, vector<8x4xbf16>
    %c3_283 = arith.constant 3 : index
    %c0_284 = arith.constant 0 : index
    %c1_285 = arith.constant 1 : index
    %c1_286 = arith.constant 1 : index
    %c0_287 = arith.constant 0 : index
    %206 = vector.load %arg11[%c3_283, %c0_284, %c1_285, %c1_286, %c0_287] : memref<4x2x10x10x8xf32, #tpu.memory_space<vmem>>, vector<1x2x8x8x8xf32>
    %207 = vector.shape_cast %206 : vector<1x2x8x8x8xf32> to vector<2x8x8x8xf32>
    %208 = vector.shape_cast %207 : vector<2x8x8x8xf32> to vector<128x8xf32>
    %c2_288 = arith.constant 2 : index
    %c0_289 = arith.constant 0 : index
    %c1_290 = arith.constant 1 : index
    %c2_291 = arith.constant 2 : index
    %c0_292 = arith.constant 0 : index
    %209 = vector.load %arg11[%c2_288, %c0_289, %c1_290, %c2_291, %c0_292] : memref<4x2x10x10x8xf32, #tpu.memory_space<vmem>>, vector<1x2x8x8x8xf32>
    %210 = vector.shape_cast %209 : vector<1x2x8x8x8xf32> to vector<2x8x8x8xf32>
    %211 = vector.shape_cast %210 : vector<2x8x8x8xf32> to vector<128x8xf32>
    %c1_293 = arith.constant 1 : index
    %c0_294 = arith.constant 0 : index
    %c2_295 = arith.constant 2 : index
    %c1_296 = arith.constant 1 : index
    %c0_297 = arith.constant 0 : index
    %212 = vector.load %arg11[%c1_293, %c0_294, %c2_295, %c1_296, %c0_297] : memref<4x2x10x10x8xf32, #tpu.memory_space<vmem>>, vector<1x2x8x8x8xf32>
    %213 = vector.shape_cast %212 : vector<1x2x8x8x8xf32> to vector<2x8x8x8xf32>
    %214 = vector.shape_cast %213 : vector<2x8x8x8xf32> to vector<128x8xf32>
    %c0_298 = arith.constant 0 : index
    %c0_299 = arith.constant 0 : index
    %c2_300 = arith.constant 2 : index
    %c2_301 = arith.constant 2 : index
    %c0_302 = arith.constant 0 : index
    %215 = vector.load %arg11[%c0_298, %c0_299, %c2_300, %c2_301, %c0_302] : memref<4x2x10x10x8xf32, #tpu.memory_space<vmem>>, vector<1x2x8x8x8xf32>
    %216 = vector.shape_cast %215 : vector<1x2x8x8x8xf32> to vector<2x8x8x8xf32>
    %217 = vector.shape_cast %216 : vector<2x8x8x8xf32> to vector<128x8xf32>
    %218 = tpu.concatenate %208, %211, %214, %217 in 0 : vector<128x8xf32>, vector<128x8xf32>, vector<128x8xf32>, vector<128x8xf32> -> vector<512x8xf32>
    %219 = arith.truncf %218 : vector<512x8xf32> to vector<512x8xbf16>
    %cst_303 = arith.constant dense<0.000000e+00> : vector<512x4xf32>
    %220 = tpu.matmul %219, %205, %cst_303 {dimension_numbers = #tpu.dot_dimension_numbers<[1], [0], [0], [1], [0, 0, 1, 1], [], []>} : vector<512x8xbf16>, vector<8x4xbf16>, vector<512x4xf32> -> vector<512x4xf32>
    %221 = arith.addf %204, %220 : vector<512x4xf32>
    %cst_304 = arith.constant dense<0.000000e+00> : vector<4xf32>
    %222 = vector.multi_reduction <add>, %221, %cst_304 [0] : vector<512x4xf32> to vector<4xf32>
    %223 = vector.shape_cast %222 : vector<4xf32> to vector<1x4xf32>
    %224 = arith.mulf %221, %221 : vector<512x4xf32>
    %cst_305 = arith.constant dense<0.000000e+00> : vector<4xf32>
    %225 = vector.multi_reduction <add>, %224, %cst_305 [0] : vector<512x4xf32> to vector<4xf32>
    %226 = vector.shape_cast %225 : vector<4xf32> to vector<1x4xf32>
    %cst_306 = arith.constant 0.001953125 : f32
    %227 = vector.broadcast %cst_306 : f32 to vector<1x4xf32>
    %228 = arith.mulf %223, %227 : vector<1x4xf32>
    %cst_307 = arith.constant 0.001953125 : f32
    %229 = vector.broadcast %cst_307 : f32 to vector<1x4xf32>
    %230 = arith.mulf %226, %229 : vector<1x4xf32>
    %231 = arith.mulf %228, %228 : vector<1x4xf32>
    %232 = arith.subf %230, %231 : vector<1x4xf32>
    %cst_308 = arith.constant 0.000000e+00 : f32
    %233 = vector.broadcast %cst_308 : f32 to vector<1x4xf32>
    %234 = arith.maximumf %232, %233 : vector<1x4xf32>
    %cst_309 = arith.constant 9.99999974E-6 : f32
    %235 = vector.broadcast %cst_309 : f32 to vector<1x4xf32>
    %236 = arith.addf %234, %235 : vector<1x4xf32>
    %237 = math.rsqrt %236 : vector<1x4xf32>
    %c0_310 = arith.constant 0 : index
    %c0_311 = arith.constant 0 : index
    %238 = vector.load %arg5[%c0_310, %c0_311] : memref<1x4xf32, #tpu.memory_space<vmem>>, vector<1x4xf32>
    %239 = arith.mulf %237, %238 : vector<1x4xf32>
    %c0_312 = arith.constant 0 : index
    %c0_313 = arith.constant 0 : index
    %240 = vector.load %arg6[%c0_312, %c0_313] : memref<1x4xf32, #tpu.memory_space<vmem>>, vector<1x4xf32>
    %241 = arith.mulf %228, %239 : vector<1x4xf32>
    %242 = arith.subf %240, %241 : vector<1x4xf32>
    %243 = vector.extract_strided_slice %221 {offsets = [0, 0], sizes = [128, 4], strides = [1, 1]} : vector<512x4xf32> to vector<128x4xf32>
    %244 = vector.broadcast %239 : vector<1x4xf32> to vector<128x4xf32>
    %245 = arith.mulf %243, %244 : vector<128x4xf32>
    %246 = vector.broadcast %242 : vector<1x4xf32> to vector<128x4xf32>
    %247 = arith.addf %245, %246 : vector<128x4xf32>
    %cst_314 = arith.constant 0.000000e+00 : f32
    %248 = vector.broadcast %cst_314 : f32 to vector<128x4xf32>
    %249 = arith.maximumf %247, %248 : vector<128x4xf32>
    %250 = vector.shape_cast %249 : vector<128x4xf32> to vector<2x8x8x4xf32>
    %c0_315 = arith.constant 0 : index
    %c0_316 = arith.constant 0 : index
    %c1_317 = arith.constant 1 : index
    %c1_318 = arith.constant 1 : index
    %c0_319 = arith.constant 0 : index
    %251 = vector.load %arg12[%c0_315, %c0_316, %c1_317, %c1_318, %c0_319] : memref<4x2x10x10x4xf32, #tpu.memory_space<vmem>>, vector<1x2x8x8x4xf32>
    %252 = vector.shape_cast %251 : vector<1x2x8x8x4xf32> to vector<2x8x8x4xf32>
    %253 = vector.shape_cast %250 : vector<2x8x8x4xf32> to vector<1x2x8x8x4xf32>
    tpu.vector_store %arg12[%c0_315, %c0_316, %c1_317, %c1_318, %c0_319], %253 {strides = array<i32>} : memref<4x2x10x10x4xf32, #tpu.memory_space<vmem>>, vector<1x2x8x8x4xf32>,
    %254 = vector.extract_strided_slice %221 {offsets = [128, 0], sizes = [128, 4], strides = [1, 1]} : vector<512x4xf32> to vector<128x4xf32>
    %255 = vector.broadcast %239 : vector<1x4xf32> to vector<128x4xf32>
    %256 = arith.mulf %254, %255 : vector<128x4xf32>
    %257 = vector.broadcast %242 : vector<1x4xf32> to vector<128x4xf32>
    %258 = arith.addf %256, %257 : vector<128x4xf32>
    %cst_320 = arith.constant 0.000000e+00 : f32
    %259 = vector.broadcast %cst_320 : f32 to vector<128x4xf32>
    %260 = arith.maximumf %258, %259 : vector<128x4xf32>
    %261 = vector.shape_cast %260 : vector<128x4xf32> to vector<2x8x8x4xf32>
    %c1_321 = arith.constant 1 : index
    %c0_322 = arith.constant 0 : index
    %c1_323 = arith.constant 1 : index
    %c1_324 = arith.constant 1 : index
    %c0_325 = arith.constant 0 : index
    %262 = vector.load %arg12[%c1_321, %c0_322, %c1_323, %c1_324, %c0_325] : memref<4x2x10x10x4xf32, #tpu.memory_space<vmem>>, vector<1x2x8x8x4xf32>
    %263 = vector.shape_cast %262 : vector<1x2x8x8x4xf32> to vector<2x8x8x4xf32>
    %264 = vector.shape_cast %261 : vector<2x8x8x4xf32> to vector<1x2x8x8x4xf32>
    tpu.vector_store %arg12[%c1_321, %c0_322, %c1_323, %c1_324, %c0_325], %264 {strides = array<i32>} : memref<4x2x10x10x4xf32, #tpu.memory_space<vmem>>, vector<1x2x8x8x4xf32>,
    %265 = vector.extract_strided_slice %221 {offsets = [256, 0], sizes = [128, 4], strides = [1, 1]} : vector<512x4xf32> to vector<128x4xf32>
    %266 = vector.broadcast %239 : vector<1x4xf32> to vector<128x4xf32>
    %267 = arith.mulf %265, %266 : vector<128x4xf32>
    %268 = vector.broadcast %242 : vector<1x4xf32> to vector<128x4xf32>
    %269 = arith.addf %267, %268 : vector<128x4xf32>
    %cst_326 = arith.constant 0.000000e+00 : f32
    %270 = vector.broadcast %cst_326 : f32 to vector<128x4xf32>
    %271 = arith.maximumf %269, %270 : vector<128x4xf32>
    %272 = vector.shape_cast %271 : vector<128x4xf32> to vector<2x8x8x4xf32>
    %c2_327 = arith.constant 2 : index
    %c0_328 = arith.constant 0 : index
    %c1_329 = arith.constant 1 : index
    %c1_330 = arith.constant 1 : index
    %c0_331 = arith.constant 0 : index
    %273 = vector.load %arg12[%c2_327, %c0_328, %c1_329, %c1_330, %c0_331] : memref<4x2x10x10x4xf32, #tpu.memory_space<vmem>>, vector<1x2x8x8x4xf32>
    %274 = vector.shape_cast %273 : vector<1x2x8x8x4xf32> to vector<2x8x8x4xf32>
    %275 = vector.shape_cast %272 : vector<2x8x8x4xf32> to vector<1x2x8x8x4xf32>
    tpu.vector_store %arg12[%c2_327, %c0_328, %c1_329, %c1_330, %c0_331], %275 {strides = array<i32>} : memref<4x2x10x10x4xf32, #tpu.memory_space<vmem>>, vector<1x2x8x8x4xf32>,
    %276 = vector.extract_strided_slice %221 {offsets = [384, 0], sizes = [128, 4], strides = [1, 1]} : vector<512x4xf32> to vector<128x4xf32>
    %277 = vector.broadcast %239 : vector<1x4xf32> to vector<128x4xf32>
    %278 = arith.mulf %276, %277 : vector<128x4xf32>
    %279 = vector.broadcast %242 : vector<1x4xf32> to vector<128x4xf32>
    %280 = arith.addf %278, %279 : vector<128x4xf32>
    %cst_332 = arith.constant 0.000000e+00 : f32
    %281 = vector.broadcast %cst_332 : f32 to vector<128x4xf32>
    %282 = arith.maximumf %280, %281 : vector<128x4xf32>
    %283 = vector.shape_cast %282 : vector<128x4xf32> to vector<2x8x8x4xf32>
    %c3_333 = arith.constant 3 : index
    %c0_334 = arith.constant 0 : index
    %c1_335 = arith.constant 1 : index
    %c1_336 = arith.constant 1 : index
    %c0_337 = arith.constant 0 : index
    %284 = vector.load %arg12[%c3_333, %c0_334, %c1_335, %c1_336, %c0_337] : memref<4x2x10x10x4xf32, #tpu.memory_space<vmem>>, vector<1x2x8x8x4xf32>
    %285 = vector.shape_cast %284 : vector<1x2x8x8x4xf32> to vector<2x8x8x4xf32>
    %286 = vector.shape_cast %283 : vector<2x8x8x4xf32> to vector<1x2x8x8x4xf32>
    tpu.vector_store %arg12[%c3_333, %c0_334, %c1_335, %c1_336, %c0_337], %286 {strides = array<i32>} : memref<4x2x10x10x4xf32, #tpu.memory_space<vmem>>, vector<1x2x8x8x4xf32>,
    %cst_338 = arith.constant 0.000000e+00 : f32
    %287 = vector.broadcast %cst_338 : f32 to vector<512x4xf32>
    %c0_339 = arith.constant 0 : index
    %c0_340 = arith.constant 0 : index
    %288 = vector.load %arg7[%c0_339, %c0_340] : memref<36x4xbf16, #tpu.memory_space<vmem>>, vector<4x4xbf16>
    %c3_341 = arith.constant 3 : index
    %c0_342 = arith.constant 0 : index
    %c0_343 = arith.constant 0 : index
    %c0_344 = arith.constant 0 : index
    %c0_345 = arith.constant 0 : index
    %289 = vector.load %arg12[%c3_341, %c0_342, %c0_343, %c0_344, %c0_345] : memref<4x2x10x10x4xf32, #tpu.memory_space<vmem>>, vector<1x2x8x8x4xf32>
    %290 = vector.shape_cast %289 : vector<1x2x8x8x4xf32> to vector<2x8x8x4xf32>
    %291 = vector.shape_cast %290 : vector<2x8x8x4xf32> to vector<128x4xf32>
    %c2_346 = arith.constant 2 : index
    %c0_347 = arith.constant 0 : index
    %c0_348 = arith.constant 0 : index
    %c1_349 = arith.constant 1 : index
    %c0_350 = arith.constant 0 : index
    %292 = vector.load %arg12[%c2_346, %c0_347, %c0_348, %c1_349, %c0_350] : memref<4x2x10x10x4xf32, #tpu.memory_space<vmem>>, vector<1x2x8x8x4xf32>
    %293 = vector.shape_cast %292 : vector<1x2x8x8x4xf32> to vector<2x8x8x4xf32>
    %294 = vector.shape_cast %293 : vector<2x8x8x4xf32> to vector<128x4xf32>
    %c1_351 = arith.constant 1 : index
    %c0_352 = arith.constant 0 : index
    %c1_353 = arith.constant 1 : index
    %c0_354 = arith.constant 0 : index
    %c0_355 = arith.constant 0 : index
    %295 = vector.load %arg12[%c1_351, %c0_352, %c1_353, %c0_354, %c0_355] : memref<4x2x10x10x4xf32, #tpu.memory_space<vmem>>, vector<1x2x8x8x4xf32>
    %296 = vector.shape_cast %295 : vector<1x2x8x8x4xf32> to vector<2x8x8x4xf32>
    %297 = vector.shape_cast %296 : vector<2x8x8x4xf32> to vector<128x4xf32>
    %c0_356 = arith.constant 0 : index
    %c0_357 = arith.constant 0 : index
    %c1_358 = arith.constant 1 : index
    %c1_359 = arith.constant 1 : index
    %c0_360 = arith.constant 0 : index
    %298 = vector.load %arg12[%c0_356, %c0_357, %c1_358, %c1_359, %c0_360] : memref<4x2x10x10x4xf32, #tpu.memory_space<vmem>>, vector<1x2x8x8x4xf32>
    %299 = vector.shape_cast %298 : vector<1x2x8x8x4xf32> to vector<2x8x8x4xf32>
    %300 = vector.shape_cast %299 : vector<2x8x8x4xf32> to vector<128x4xf32>
    %301 = tpu.concatenate %291, %294, %297, %300 in 0 : vector<128x4xf32>, vector<128x4xf32>, vector<128x4xf32>, vector<128x4xf32> -> vector<512x4xf32>
    %302 = arith.truncf %301 : vector<512x4xf32> to vector<512x4xbf16>
    %cst_361 = arith.constant dense<0.000000e+00> : vector<512x4xf32>
    %303 = tpu.matmul %302, %288, %cst_361 {dimension_numbers = #tpu.dot_dimension_numbers<[1], [0], [0], [1], [0, 0, 1, 1], [], []>} : vector<512x4xbf16>, vector<4x4xbf16>, vector<512x4xf32> -> vector<512x4xf32>
    %304 = arith.addf %287, %303 : vector<512x4xf32>
    %c4_362 = arith.constant 4 : index
    %c0_363 = arith.constant 0 : index
    %305 = vector.load %arg7[%c4_362, %c0_363] : memref<36x4xbf16, #tpu.memory_space<vmem>>, vector<4x4xbf16>
    %c2_364 = arith.constant 2 : index
    %c0_365 = arith.constant 0 : index
    %c0_366 = arith.constant 0 : index
    %c1_367 = arith.constant 1 : index
    %c0_368 = arith.constant 0 : index
    %306 = vector.load %arg12[%c2_364, %c0_365, %c0_366, %c1_367, %c0_368] : memref<4x2x10x10x4xf32, #tpu.memory_space<vmem>>, vector<1x2x8x8x4xf32>
    %307 = vector.shape_cast %306 : vector<1x2x8x8x4xf32> to vector<2x8x8x4xf32>
    %308 = vector.shape_cast %307 : vector<2x8x8x4xf32> to vector<128x4xf32>
    %c3_369 = arith.constant 3 : index
    %c0_370 = arith.constant 0 : index
    %c0_371 = arith.constant 0 : index
    %c1_372 = arith.constant 1 : index
    %c0_373 = arith.constant 0 : index
    %309 = vector.load %arg12[%c3_369, %c0_370, %c0_371, %c1_372, %c0_373] : memref<4x2x10x10x4xf32, #tpu.memory_space<vmem>>, vector<1x2x8x8x4xf32>
    %310 = vector.shape_cast %309 : vector<1x2x8x8x4xf32> to vector<2x8x8x4xf32>
    %311 = vector.shape_cast %310 : vector<2x8x8x4xf32> to vector<128x4xf32>
    %c0_374 = arith.constant 0 : index
    %c0_375 = arith.constant 0 : index
    %c1_376 = arith.constant 1 : index
    %c1_377 = arith.constant 1 : index
    %c0_378 = arith.constant 0 : index
    %312 = vector.load %arg12[%c0_374, %c0_375, %c1_376, %c1_377, %c0_378] : memref<4x2x10x10x4xf32, #tpu.memory_space<vmem>>, vector<1x2x8x8x4xf32>
    %313 = vector.shape_cast %312 : vector<1x2x8x8x4xf32> to vector<2x8x8x4xf32>
    %314 = vector.shape_cast %313 : vector<2x8x8x4xf32> to vector<128x4xf32>
    %c1_379 = arith.constant 1 : index
    %c0_380 = arith.constant 0 : index
    %c1_381 = arith.constant 1 : index
    %c1_382 = arith.constant 1 : index
    %c0_383 = arith.constant 0 : index
    %315 = vector.load %arg12[%c1_379, %c0_380, %c1_381, %c1_382, %c0_383] : memref<4x2x10x10x4xf32, #tpu.memory_space<vmem>>, vector<1x2x8x8x4xf32>
    %316 = vector.shape_cast %315 : vector<1x2x8x8x4xf32> to vector<2x8x8x4xf32>
    %317 = vector.shape_cast %316 : vector<2x8x8x4xf32> to vector<128x4xf32>
    %318 = tpu.concatenate %308, %311, %314, %317 in 0 : vector<128x4xf32>, vector<128x4xf32>, vector<128x4xf32>, vector<128x4xf32> -> vector<512x4xf32>
    %319 = arith.truncf %318 : vector<512x4xf32> to vector<512x4xbf16>
    %cst_384 = arith.constant dense<0.000000e+00> : vector<512x4xf32>
    %320 = tpu.matmul %319, %305, %cst_384 {dimension_numbers = #tpu.dot_dimension_numbers<[1], [0], [0], [1], [0, 0, 1, 1], [], []>} : vector<512x4xbf16>, vector<4x4xbf16>, vector<512x4xf32> -> vector<512x4xf32>
    %321 = arith.addf %304, %320 : vector<512x4xf32>
    %c8_385 = arith.constant 8 : index
    %c0_386 = arith.constant 0 : index
    %322 = vector.load %arg7[%c8_385, %c0_386] : memref<36x4xbf16, #tpu.memory_space<vmem>>, vector<4x4xbf16>
    %c3_387 = arith.constant 3 : index
    %c0_388 = arith.constant 0 : index
    %c0_389 = arith.constant 0 : index
    %c1_390 = arith.constant 1 : index
    %c0_391 = arith.constant 0 : index
    %323 = vector.load %arg12[%c3_387, %c0_388, %c0_389, %c1_390, %c0_391] : memref<4x2x10x10x4xf32, #tpu.memory_space<vmem>>, vector<1x2x8x8x4xf32>
    %324 = vector.shape_cast %323 : vector<1x2x8x8x4xf32> to vector<2x8x8x4xf32>
    %325 = vector.shape_cast %324 : vector<2x8x8x4xf32> to vector<128x4xf32>
    %c2_392 = arith.constant 2 : index
    %c0_393 = arith.constant 0 : index
    %c0_394 = arith.constant 0 : index
    %c2_395 = arith.constant 2 : index
    %c0_396 = arith.constant 0 : index
    %326 = vector.load %arg12[%c2_392, %c0_393, %c0_394, %c2_395, %c0_396] : memref<4x2x10x10x4xf32, #tpu.memory_space<vmem>>, vector<1x2x8x8x4xf32>
    %327 = vector.shape_cast %326 : vector<1x2x8x8x4xf32> to vector<2x8x8x4xf32>
    %328 = vector.shape_cast %327 : vector<2x8x8x4xf32> to vector<128x4xf32>
    %c1_397 = arith.constant 1 : index
    %c0_398 = arith.constant 0 : index
    %c1_399 = arith.constant 1 : index
    %c1_400 = arith.constant 1 : index
    %c0_401 = arith.constant 0 : index
    %329 = vector.load %arg12[%c1_397, %c0_398, %c1_399, %c1_400, %c0_401] : memref<4x2x10x10x4xf32, #tpu.memory_space<vmem>>, vector<1x2x8x8x4xf32>
    %330 = vector.shape_cast %329 : vector<1x2x8x8x4xf32> to vector<2x8x8x4xf32>
    %331 = vector.shape_cast %330 : vector<2x8x8x4xf32> to vector<128x4xf32>
    %c0_402 = arith.constant 0 : index
    %c0_403 = arith.constant 0 : index
    %c1_404 = arith.constant 1 : index
    %c2_405 = arith.constant 2 : index
    %c0_406 = arith.constant 0 : index
    %332 = vector.load %arg12[%c0_402, %c0_403, %c1_404, %c2_405, %c0_406] : memref<4x2x10x10x4xf32, #tpu.memory_space<vmem>>, vector<1x2x8x8x4xf32>
    %333 = vector.shape_cast %332 : vector<1x2x8x8x4xf32> to vector<2x8x8x4xf32>
    %334 = vector.shape_cast %333 : vector<2x8x8x4xf32> to vector<128x4xf32>
    %335 = tpu.concatenate %325, %328, %331, %334 in 0 : vector<128x4xf32>, vector<128x4xf32>, vector<128x4xf32>, vector<128x4xf32> -> vector<512x4xf32>
    %336 = arith.truncf %335 : vector<512x4xf32> to vector<512x4xbf16>
    %cst_407 = arith.constant dense<0.000000e+00> : vector<512x4xf32>
    %337 = tpu.matmul %336, %322, %cst_407 {dimension_numbers = #tpu.dot_dimension_numbers<[1], [0], [0], [1], [0, 0, 1, 1], [], []>} : vector<512x4xbf16>, vector<4x4xbf16>, vector<512x4xf32> -> vector<512x4xf32>
    %338 = arith.addf %321, %337 : vector<512x4xf32>
    %c12 = arith.constant 12 : index
    %c0_408 = arith.constant 0 : index
    %339 = vector.load %arg7[%c12, %c0_408] : memref<36x4xbf16, #tpu.memory_space<vmem>>, vector<4x4xbf16>
    %c1_409 = arith.constant 1 : index
    %c0_410 = arith.constant 0 : index
    %c1_411 = arith.constant 1 : index
    %c0_412 = arith.constant 0 : index
    %c0_413 = arith.constant 0 : index
    %340 = vector.load %arg12[%c1_409, %c0_410, %c1_411, %c0_412, %c0_413] : memref<4x2x10x10x4xf32, #tpu.memory_space<vmem>>, vector<1x2x8x8x4xf32>
    %341 = vector.shape_cast %340 : vector<1x2x8x8x4xf32> to vector<2x8x8x4xf32>
    %342 = vector.shape_cast %341 : vector<2x8x8x4xf32> to vector<128x4xf32>
    %c0_414 = arith.constant 0 : index
    %c0_415 = arith.constant 0 : index
    %c1_416 = arith.constant 1 : index
    %c1_417 = arith.constant 1 : index
    %c0_418 = arith.constant 0 : index
    %343 = vector.load %arg12[%c0_414, %c0_415, %c1_416, %c1_417, %c0_418] : memref<4x2x10x10x4xf32, #tpu.memory_space<vmem>>, vector<1x2x8x8x4xf32>
    %344 = vector.shape_cast %343 : vector<1x2x8x8x4xf32> to vector<2x8x8x4xf32>
    %345 = vector.shape_cast %344 : vector<2x8x8x4xf32> to vector<128x4xf32>
    %c3_419 = arith.constant 3 : index
    %c0_420 = arith.constant 0 : index
    %c1_421 = arith.constant 1 : index
    %c0_422 = arith.constant 0 : index
    %c0_423 = arith.constant 0 : index
    %346 = vector.load %arg12[%c3_419, %c0_420, %c1_421, %c0_422, %c0_423] : memref<4x2x10x10x4xf32, #tpu.memory_space<vmem>>, vector<1x2x8x8x4xf32>
    %347 = vector.shape_cast %346 : vector<1x2x8x8x4xf32> to vector<2x8x8x4xf32>
    %348 = vector.shape_cast %347 : vector<2x8x8x4xf32> to vector<128x4xf32>
    %c2_424 = arith.constant 2 : index
    %c0_425 = arith.constant 0 : index
    %c1_426 = arith.constant 1 : index
    %c1_427 = arith.constant 1 : index
    %c0_428 = arith.constant 0 : index
    %349 = vector.load %arg12[%c2_424, %c0_425, %c1_426, %c1_427, %c0_428] : memref<4x2x10x10x4xf32, #tpu.memory_space<vmem>>, vector<1x2x8x8x4xf32>
    %350 = vector.shape_cast %349 : vector<1x2x8x8x4xf32> to vector<2x8x8x4xf32>
    %351 = vector.shape_cast %350 : vector<2x8x8x4xf32> to vector<128x4xf32>
    %352 = tpu.concatenate %342, %345, %348, %351 in 0 : vector<128x4xf32>, vector<128x4xf32>, vector<128x4xf32>, vector<128x4xf32> -> vector<512x4xf32>
    %353 = arith.truncf %352 : vector<512x4xf32> to vector<512x4xbf16>
    %cst_429 = arith.constant dense<0.000000e+00> : vector<512x4xf32>
    %354 = tpu.matmul %353, %339, %cst_429 {dimension_numbers = #tpu.dot_dimension_numbers<[1], [0], [0], [1], [0, 0, 1, 1], [], []>} : vector<512x4xbf16>, vector<4x4xbf16>, vector<512x4xf32> -> vector<512x4xf32>
    %355 = arith.addf %338, %354 : vector<512x4xf32>
    %c16_430 = arith.constant 16 : index
    %c0_431 = arith.constant 0 : index
    %356 = vector.load %arg7[%c16_430, %c0_431] : memref<36x4xbf16, #tpu.memory_space<vmem>>, vector<4x4xbf16>
    %c0_432 = arith.constant 0 : index
    %c0_433 = arith.constant 0 : index
    %c1_434 = arith.constant 1 : index
    %c1_435 = arith.constant 1 : index
    %c0_436 = arith.constant 0 : index
    %357 = vector.load %arg12[%c0_432, %c0_433, %c1_434, %c1_435, %c0_436] : memref<4x2x10x10x4xf32, #tpu.memory_space<vmem>>, vector<1x2x8x8x4xf32>
    %358 = vector.shape_cast %357 : vector<1x2x8x8x4xf32> to vector<2x8x8x4xf32>
    %359 = vector.shape_cast %358 : vector<2x8x8x4xf32> to vector<128x4xf32>
    %c1_437 = arith.constant 1 : index
    %c0_438 = arith.constant 0 : index
    %c1_439 = arith.constant 1 : index
    %c1_440 = arith.constant 1 : index
    %c0_441 = arith.constant 0 : index
    %360 = vector.load %arg12[%c1_437, %c0_438, %c1_439, %c1_440, %c0_441] : memref<4x2x10x10x4xf32, #tpu.memory_space<vmem>>, vector<1x2x8x8x4xf32>
    %361 = vector.shape_cast %360 : vector<1x2x8x8x4xf32> to vector<2x8x8x4xf32>
    %362 = vector.shape_cast %361 : vector<2x8x8x4xf32> to vector<128x4xf32>
    %c2_442 = arith.constant 2 : index
    %c0_443 = arith.constant 0 : index
    %c1_444 = arith.constant 1 : index
    %c1_445 = arith.constant 1 : index
    %c0_446 = arith.constant 0 : index
    %363 = vector.load %arg12[%c2_442, %c0_443, %c1_444, %c1_445, %c0_446] : memref<4x2x10x10x4xf32, #tpu.memory_space<vmem>>, vector<1x2x8x8x4xf32>
    %364 = vector.shape_cast %363 : vector<1x2x8x8x4xf32> to vector<2x8x8x4xf32>
    %365 = vector.shape_cast %364 : vector<2x8x8x4xf32> to vector<128x4xf32>
    %c3_447 = arith.constant 3 : index
    %c0_448 = arith.constant 0 : index
    %c1_449 = arith.constant 1 : index
    %c1_450 = arith.constant 1 : index
    %c0_451 = arith.constant 0 : index
    %366 = vector.load %arg12[%c3_447, %c0_448, %c1_449, %c1_450, %c0_451] : memref<4x2x10x10x4xf32, #tpu.memory_space<vmem>>, vector<1x2x8x8x4xf32>
    %367 = vector.shape_cast %366 : vector<1x2x8x8x4xf32> to vector<2x8x8x4xf32>
    %368 = vector.shape_cast %367 : vector<2x8x8x4xf32> to vector<128x4xf32>
    %369 = tpu.concatenate %359, %362, %365, %368 in 0 : vector<128x4xf32>, vector<128x4xf32>, vector<128x4xf32>, vector<128x4xf32> -> vector<512x4xf32>
    %370 = arith.truncf %369 : vector<512x4xf32> to vector<512x4xbf16>
    %cst_452 = arith.constant dense<0.000000e+00> : vector<512x4xf32>
    %371 = tpu.matmul %370, %356, %cst_452 {dimension_numbers = #tpu.dot_dimension_numbers<[1], [0], [0], [1], [0, 0, 1, 1], [], []>} : vector<512x4xbf16>, vector<4x4xbf16>, vector<512x4xf32> -> vector<512x4xf32>
    %372 = arith.addf %355, %371 : vector<512x4xf32>
    %c20 = arith.constant 20 : index
    %c0_453 = arith.constant 0 : index
    %373 = vector.load %arg7[%c20, %c0_453] : memref<36x4xbf16, #tpu.memory_space<vmem>>, vector<4x4xbf16>
    %c1_454 = arith.constant 1 : index
    %c0_455 = arith.constant 0 : index
    %c1_456 = arith.constant 1 : index
    %c1_457 = arith.constant 1 : index
    %c0_458 = arith.constant 0 : index
    %374 = vector.load %arg12[%c1_454, %c0_455, %c1_456, %c1_457, %c0_458] : memref<4x2x10x10x4xf32, #tpu.memory_space<vmem>>, vector<1x2x8x8x4xf32>
    %375 = vector.shape_cast %374 : vector<1x2x8x8x4xf32> to vector<2x8x8x4xf32>
    %376 = vector.shape_cast %375 : vector<2x8x8x4xf32> to vector<128x4xf32>
    %c0_459 = arith.constant 0 : index
    %c0_460 = arith.constant 0 : index
    %c1_461 = arith.constant 1 : index
    %c2_462 = arith.constant 2 : index
    %c0_463 = arith.constant 0 : index
    %377 = vector.load %arg12[%c0_459, %c0_460, %c1_461, %c2_462, %c0_463] : memref<4x2x10x10x4xf32, #tpu.memory_space<vmem>>, vector<1x2x8x8x4xf32>
    %378 = vector.shape_cast %377 : vector<1x2x8x8x4xf32> to vector<2x8x8x4xf32>
    %379 = vector.shape_cast %378 : vector<2x8x8x4xf32> to vector<128x4xf32>
    %c3_464 = arith.constant 3 : index
    %c0_465 = arith.constant 0 : index
    %c1_466 = arith.constant 1 : index
    %c1_467 = arith.constant 1 : index
    %c0_468 = arith.constant 0 : index
    %380 = vector.load %arg12[%c3_464, %c0_465, %c1_466, %c1_467, %c0_468] : memref<4x2x10x10x4xf32, #tpu.memory_space<vmem>>, vector<1x2x8x8x4xf32>
    %381 = vector.shape_cast %380 : vector<1x2x8x8x4xf32> to vector<2x8x8x4xf32>
    %382 = vector.shape_cast %381 : vector<2x8x8x4xf32> to vector<128x4xf32>
    %c2_469 = arith.constant 2 : index
    %c0_470 = arith.constant 0 : index
    %c1_471 = arith.constant 1 : index
    %c2_472 = arith.constant 2 : index
    %c0_473 = arith.constant 0 : index
    %383 = vector.load %arg12[%c2_469, %c0_470, %c1_471, %c2_472, %c0_473] : memref<4x2x10x10x4xf32, #tpu.memory_space<vmem>>, vector<1x2x8x8x4xf32>
    %384 = vector.shape_cast %383 : vector<1x2x8x8x4xf32> to vector<2x8x8x4xf32>
    %385 = vector.shape_cast %384 : vector<2x8x8x4xf32> to vector<128x4xf32>
    %386 = tpu.concatenate %376, %379, %382, %385 in 0 : vector<128x4xf32>, vector<128x4xf32>, vector<128x4xf32>, vector<128x4xf32> -> vector<512x4xf32>
    %387 = arith.truncf %386 : vector<512x4xf32> to vector<512x4xbf16>
    %cst_474 = arith.constant dense<0.000000e+00> : vector<512x4xf32>
    %388 = tpu.matmul %387, %373, %cst_474 {dimension_numbers = #tpu.dot_dimension_numbers<[1], [0], [0], [1], [0, 0, 1, 1], [], []>} : vector<512x4xbf16>, vector<4x4xbf16>, vector<512x4xf32> -> vector<512x4xf32>
    %389 = arith.addf %372, %388 : vector<512x4xf32>
    %c24_475 = arith.constant 24 : index
    %c0_476 = arith.constant 0 : index
    %390 = vector.load %arg7[%c24_475, %c0_476] : memref<36x4xbf16, #tpu.memory_space<vmem>>, vector<4x4xbf16>
    %c3_477 = arith.constant 3 : index
    %c0_478 = arith.constant 0 : index
    %c1_479 = arith.constant 1 : index
    %c0_480 = arith.constant 0 : index
    %c0_481 = arith.constant 0 : index
    %391 = vector.load %arg12[%c3_477, %c0_478, %c1_479, %c0_480, %c0_481] : memref<4x2x10x10x4xf32, #tpu.memory_space<vmem>>, vector<1x2x8x8x4xf32>
    %392 = vector.shape_cast %391 : vector<1x2x8x8x4xf32> to vector<2x8x8x4xf32>
    %393 = vector.shape_cast %392 : vector<2x8x8x4xf32> to vector<128x4xf32>
    %c2_482 = arith.constant 2 : index
    %c0_483 = arith.constant 0 : index
    %c1_484 = arith.constant 1 : index
    %c1_485 = arith.constant 1 : index
    %c0_486 = arith.constant 0 : index
    %394 = vector.load %arg12[%c2_482, %c0_483, %c1_484, %c1_485, %c0_486] : memref<4x2x10x10x4xf32, #tpu.memory_space<vmem>>, vector<1x2x8x8x4xf32>
    %395 = vector.shape_cast %394 : vector<1x2x8x8x4xf32> to vector<2x8x8x4xf32>
    %396 = vector.shape_cast %395 : vector<2x8x8x4xf32> to vector<128x4xf32>
    %c1_487 = arith.constant 1 : index
    %c0_488 = arith.constant 0 : index
    %c2_489 = arith.constant 2 : index
    %c0_490 = arith.constant 0 : index
    %c0_491 = arith.constant 0 : index
    %397 = vector.load %arg12[%c1_487, %c0_488, %c2_489, %c0_490, %c0_491] : memref<4x2x10x10x4xf32, #tpu.memory_space<vmem>>, vector<1x2x8x8x4xf32>
    %398 = vector.shape_cast %397 : vector<1x2x8x8x4xf32> to vector<2x8x8x4xf32>
    %399 = vector.shape_cast %398 : vector<2x8x8x4xf32> to vector<128x4xf32>
    %c0_492 = arith.constant 0 : index
    %c0_493 = arith.constant 0 : index
    %c2_494 = arith.constant 2 : index
    %c1_495 = arith.constant 1 : index
    %c0_496 = arith.constant 0 : index
    %400 = vector.load %arg12[%c0_492, %c0_493, %c2_494, %c1_495, %c0_496] : memref<4x2x10x10x4xf32, #tpu.memory_space<vmem>>, vector<1x2x8x8x4xf32>
    %401 = vector.shape_cast %400 : vector<1x2x8x8x4xf32> to vector<2x8x8x4xf32>
    %402 = vector.shape_cast %401 : vector<2x8x8x4xf32> to vector<128x4xf32>
    %403 = tpu.concatenate %393, %396, %399, %402 in 0 : vector<128x4xf32>, vector<128x4xf32>, vector<128x4xf32>, vector<128x4xf32> -> vector<512x4xf32>
    %404 = arith.truncf %403 : vector<512x4xf32> to vector<512x4xbf16>
    %cst_497 = arith.constant dense<0.000000e+00> : vector<512x4xf32>
    %405 = tpu.matmul %404, %390, %cst_497 {dimension_numbers = #tpu.dot_dimension_numbers<[1], [0], [0], [1], [0, 0, 1, 1], [], []>} : vector<512x4xbf16>, vector<4x4xbf16>, vector<512x4xf32> -> vector<512x4xf32>
    %406 = arith.addf %389, %405 : vector<512x4xf32>
    %c28 = arith.constant 28 : index
    %c0_498 = arith.constant 0 : index
    %407 = vector.load %arg7[%c28, %c0_498] : memref<36x4xbf16, #tpu.memory_space<vmem>>, vector<4x4xbf16>
    %c2_499 = arith.constant 2 : index
    %c0_500 = arith.constant 0 : index
    %c1_501 = arith.constant 1 : index
    %c1_502 = arith.constant 1 : index
    %c0_503 = arith.constant 0 : index
    %408 = vector.load %arg12[%c2_499, %c0_500, %c1_501, %c1_502, %c0_503] : memref<4x2x10x10x4xf32, #tpu.memory_space<vmem>>, vector<1x2x8x8x4xf32>
    %409 = vector.shape_cast %408 : vector<1x2x8x8x4xf32> to vector<2x8x8x4xf32>
    %410 = vector.shape_cast %409 : vector<2x8x8x4xf32> to vector<128x4xf32>
    %c3_504 = arith.constant 3 : index
    %c0_505 = arith.constant 0 : index
    %c1_506 = arith.constant 1 : index
    %c1_507 = arith.constant 1 : index
    %c0_508 = arith.constant 0 : index
    %411 = vector.load %arg12[%c3_504, %c0_505, %c1_506, %c1_507, %c0_508] : memref<4x2x10x10x4xf32, #tpu.memory_space<vmem>>, vector<1x2x8x8x4xf32>
    %412 = vector.shape_cast %411 : vector<1x2x8x8x4xf32> to vector<2x8x8x4xf32>
    %413 = vector.shape_cast %412 : vector<2x8x8x4xf32> to vector<128x4xf32>
    %c0_509 = arith.constant 0 : index
    %c0_510 = arith.constant 0 : index
    %c2_511 = arith.constant 2 : index
    %c1_512 = arith.constant 1 : index
    %c0_513 = arith.constant 0 : index
    %414 = vector.load %arg12[%c0_509, %c0_510, %c2_511, %c1_512, %c0_513] : memref<4x2x10x10x4xf32, #tpu.memory_space<vmem>>, vector<1x2x8x8x4xf32>
    %415 = vector.shape_cast %414 : vector<1x2x8x8x4xf32> to vector<2x8x8x4xf32>
    %416 = vector.shape_cast %415 : vector<2x8x8x4xf32> to vector<128x4xf32>
    %c1_514 = arith.constant 1 : index
    %c0_515 = arith.constant 0 : index
    %c2_516 = arith.constant 2 : index
    %c1_517 = arith.constant 1 : index
    %c0_518 = arith.constant 0 : index
    %417 = vector.load %arg12[%c1_514, %c0_515, %c2_516, %c1_517, %c0_518] : memref<4x2x10x10x4xf32, #tpu.memory_space<vmem>>, vector<1x2x8x8x4xf32>
    %418 = vector.shape_cast %417 : vector<1x2x8x8x4xf32> to vector<2x8x8x4xf32>
    %419 = vector.shape_cast %418 : vector<2x8x8x4xf32> to vector<128x4xf32>
    %420 = tpu.concatenate %410, %413, %416, %419 in 0 : vector<128x4xf32>, vector<128x4xf32>, vector<128x4xf32>, vector<128x4xf32> -> vector<512x4xf32>
    %421 = arith.truncf %420 : vector<512x4xf32> to vector<512x4xbf16>
    %cst_519 = arith.constant dense<0.000000e+00> : vector<512x4xf32>
    %422 = tpu.matmul %421, %407, %cst_519 {dimension_numbers = #tpu.dot_dimension_numbers<[1], [0], [0], [1], [0, 0, 1, 1], [], []>} : vector<512x4xbf16>, vector<4x4xbf16>, vector<512x4xf32> -> vector<512x4xf32>
    %423 = arith.addf %406, %422 : vector<512x4xf32>
    %c32_520 = arith.constant 32 : index
    %c0_521 = arith.constant 0 : index
    %424 = vector.load %arg7[%c32_520, %c0_521] : memref<36x4xbf16, #tpu.memory_space<vmem>>, vector<4x4xbf16>
    %c3_522 = arith.constant 3 : index
    %c0_523 = arith.constant 0 : index
    %c1_524 = arith.constant 1 : index
    %c1_525 = arith.constant 1 : index
    %c0_526 = arith.constant 0 : index
    %425 = vector.load %arg12[%c3_522, %c0_523, %c1_524, %c1_525, %c0_526] : memref<4x2x10x10x4xf32, #tpu.memory_space<vmem>>, vector<1x2x8x8x4xf32>
    %426 = vector.shape_cast %425 : vector<1x2x8x8x4xf32> to vector<2x8x8x4xf32>
    %427 = vector.shape_cast %426 : vector<2x8x8x4xf32> to vector<128x4xf32>
    %c2_527 = arith.constant 2 : index
    %c0_528 = arith.constant 0 : index
    %c1_529 = arith.constant 1 : index
    %c2_530 = arith.constant 2 : index
    %c0_531 = arith.constant 0 : index
    %428 = vector.load %arg12[%c2_527, %c0_528, %c1_529, %c2_530, %c0_531] : memref<4x2x10x10x4xf32, #tpu.memory_space<vmem>>, vector<1x2x8x8x4xf32>
    %429 = vector.shape_cast %428 : vector<1x2x8x8x4xf32> to vector<2x8x8x4xf32>
    %430 = vector.shape_cast %429 : vector<2x8x8x4xf32> to vector<128x4xf32>
    %c1_532 = arith.constant 1 : index
    %c0_533 = arith.constant 0 : index
    %c2_534 = arith.constant 2 : index
    %c1_535 = arith.constant 1 : index
    %c0_536 = arith.constant 0 : index
    %431 = vector.load %arg12[%c1_532, %c0_533, %c2_534, %c1_535, %c0_536] : memref<4x2x10x10x4xf32, #tpu.memory_space<vmem>>, vector<1x2x8x8x4xf32>
    %432 = vector.shape_cast %431 : vector<1x2x8x8x4xf32> to vector<2x8x8x4xf32>
    %433 = vector.shape_cast %432 : vector<2x8x8x4xf32> to vector<128x4xf32>
    %c0_537 = arith.constant 0 : index
    %c0_538 = arith.constant 0 : index
    %c2_539 = arith.constant 2 : index
    %c2_540 = arith.constant 2 : index
    %c0_541 = arith.constant 0 : index
    %434 = vector.load %arg12[%c0_537, %c0_538, %c2_539, %c2_540, %c0_541] : memref<4x2x10x10x4xf32, #tpu.memory_space<vmem>>, vector<1x2x8x8x4xf32>
    %435 = vector.shape_cast %434 : vector<1x2x8x8x4xf32> to vector<2x8x8x4xf32>
    %436 = vector.shape_cast %435 : vector<2x8x8x4xf32> to vector<128x4xf32>
    %437 = tpu.concatenate %427, %430, %433, %436 in 0 : vector<128x4xf32>, vector<128x4xf32>, vector<128x4xf32>, vector<128x4xf32> -> vector<512x4xf32>
    %438 = arith.truncf %437 : vector<512x4xf32> to vector<512x4xbf16>
    %cst_542 = arith.constant dense<0.000000e+00> : vector<512x4xf32>
    %439 = tpu.matmul %438, %424, %cst_542 {dimension_numbers = #tpu.dot_dimension_numbers<[1], [0], [0], [1], [0, 0, 1, 1], [], []>} : vector<512x4xbf16>, vector<4x4xbf16>, vector<512x4xf32> -> vector<512x4xf32>
    %440 = arith.addf %423, %439 : vector<512x4xf32>
    %cst_543 = arith.constant dense<0.000000e+00> : vector<4xf32>
    %441 = vector.multi_reduction <add>, %440, %cst_543 [0] : vector<512x4xf32> to vector<4xf32>
    %442 = vector.shape_cast %441 : vector<4xf32> to vector<1x4xf32>
    %443 = arith.mulf %440, %440 : vector<512x4xf32>
    %cst_544 = arith.constant dense<0.000000e+00> : vector<4xf32>
    %444 = vector.multi_reduction <add>, %443, %cst_544 [0] : vector<512x4xf32> to vector<4xf32>
    %445 = vector.shape_cast %444 : vector<4xf32> to vector<1x4xf32>
    %cst_545 = arith.constant 0.001953125 : f32
    %446 = vector.broadcast %cst_545 : f32 to vector<1x4xf32>
    %447 = arith.mulf %442, %446 : vector<1x4xf32>
    %cst_546 = arith.constant 0.001953125 : f32
    %448 = vector.broadcast %cst_546 : f32 to vector<1x4xf32>
    %449 = arith.mulf %445, %448 : vector<1x4xf32>
    %450 = arith.mulf %447, %447 : vector<1x4xf32>
    %451 = arith.subf %449, %450 : vector<1x4xf32>
    %cst_547 = arith.constant 0.000000e+00 : f32
    %452 = vector.broadcast %cst_547 : f32 to vector<1x4xf32>
    %453 = arith.maximumf %451, %452 : vector<1x4xf32>
    %cst_548 = arith.constant 9.99999974E-6 : f32
    %454 = vector.broadcast %cst_548 : f32 to vector<1x4xf32>
    %455 = arith.addf %453, %454 : vector<1x4xf32>
    %456 = math.rsqrt %455 : vector<1x4xf32>
    %c0_549 = arith.constant 0 : index
    %c0_550 = arith.constant 0 : index
    %457 = vector.load %arg8[%c0_549, %c0_550] : memref<1x4xf32, #tpu.memory_space<vmem>>, vector<1x4xf32>
    %458 = arith.mulf %456, %457 : vector<1x4xf32>
    %c0_551 = arith.constant 0 : index
    %c0_552 = arith.constant 0 : index
    %459 = vector.load %arg9[%c0_551, %c0_552] : memref<1x4xf32, #tpu.memory_space<vmem>>, vector<1x4xf32>
    %460 = arith.mulf %447, %458 : vector<1x4xf32>
    %461 = arith.subf %459, %460 : vector<1x4xf32>
    %462 = vector.broadcast %458 : vector<1x4xf32> to vector<512x4xf32>
    %463 = arith.mulf %440, %462 : vector<512x4xf32>
    %464 = vector.broadcast %461 : vector<1x4xf32> to vector<512x4xf32>
    %465 = arith.addf %463, %464 : vector<512x4xf32>
    %cst_553 = arith.constant 0.000000e+00 : f32
    %466 = vector.broadcast %cst_553 : f32 to vector<512x4xf32>
    %467 = arith.maximumf %465, %466 : vector<512x4xf32>
    %c0_554 = arith.constant 0 : index
    %c0_555 = arith.constant 0 : index
    %468 = vector.load %arg10[%c0_554, %c0_555] : memref<512x4xf32, #tpu.memory_space<vmem>>, vector<512x4xf32>
    tpu.vector_store %arg10[%c0_554, %c0_555], %467 {strides = array<i32>} : memref<512x4xf32, #tpu.memory_space<vmem>>, vector<512x4xf32>,
    return
  }
}

</mosaic_0001>

<bundles_post_ra>
// kernel: decoder_block_forward.1
= control target key start
LH: loop header
LB: loop body
LE: loop exit
PB: predicated region body
PF: predicated region fallthrough
CT: control target
= control target key end

     0   :  { %vm509_vm0 = vcmask 1043456   ;;  %vm36_vm1 = vcmask 64512   ;;  %s14201_s14 = smov 8   ;;  %s14202_s20 = smov 12   ;;  %vm232_vm2 = vcmask 31744   ;;  %vm71_vm3 = vcmask 57344   ;;  %s19479_s2 = inlined_call_operand.vmem [shape: bf16[8,16], index: 2, kind: input, shape index: {}]   ;;  %s19480_s0 = inlined_call_operand.vmem [shape: bf16[128,8], index: 0, kind: input, shape index: {}]   ;;  %s19481_s3 = inlined_call_operand.vmem [shape: f32[1,4], index: 3, kind: input, shape index: {}]   ;;  %s19482_s1 = inlined_call_operand.vmem [shape: bf16[4,2,8,8,4], index: 1, kind: input, shape index: {}]   ;;  %s19483_s4 = inlined_call_operand.vmem [shape: bf16[72,4], index: 4, kind: input, shape index: {}]   ;;  %s19484_s7 = inlined_call_operand.vmem [shape: bf16[36,4], index: 7, kind: input, shape index: {}]   ;;  %s19485_s5 = inlined_call_operand.vmem [shape: f32[1,4], index: 5, kind: input, shape index: {}]   ;;  %s19486_s6 = inlined_call_operand.vmem [shape: f32[1,4], index: 6, kind: input, shape index: {}]   ;;  %s19487_s8 = inlined_call_operand.vmem [shape: f32[1,4], index: 8, kind: input, shape index: {}]   ;;  %s19488_s9 = inlined_call_operand.vmem [shape: f32[1,4], index: 9, kind: input, shape index: {}]   ;;  %s19489_s10 = inlined_call_operand.vmem [shape: f32[512,4], index: 10, kind: output, shape index: {}]  }
   0x1   :  { %v444_v0 = vld [vmem:[%s19479_s2] sm:$0xf]  ;;  %v14175_v4 = vld [vmem:[%s19480_s0 + $0x8] sm:$0xff]   ;;  %v14177_v6 = vld [vmem:[%s19480_s0 + $0x10] sm:$0xff]   ;;  %s14203_s21 = smov 4   ;;  %v19490_v32 = vmov 0.0  }
   0x2   :  { %13996 = vmatprep.subr.msk.bf16.mxu0 %vm509_vm0, %v444_v0  ;;  %13997 = vmatprep.subr.msk.bf16.mxu1 %vm509_vm0, %v444_v0  ;;  %v511_v1 = vsel %vm509_vm0, %v444_v0, 0  ;;  %v14173_v2 = vld [vmem:[%s19480_s0] sm:$0xff]   ;;  %v14176_v5 = vld [vmem:[%s19480_s0 + $0x28] sm:$0xff]   ;;  %v14178_v7 = vld [vmem:[%s19480_s0 + $0x30] sm:$0xff]   ;;  %46 = vst.msk [vmem:[#allocation2 + $0x280] sm:$0xff] %vm36_vm1, %v19490_v32  ;;  %s14205_s24 = smov 120  }
   0x3   :  { %11765 = vmatpush3.bf16.msra.mxu0 %v511_v1  ;;  %12971 = vmatpush3.bf16.msra.mxu1 %v511_v1  ;;  %v14174_v3 = vld [vmem:[%s19480_s0 + $0x20] sm:$0xff]   ;;  %v11146_v9 = vld [vmem:[%s19482_s1 + $0x88] sm:$0xff]   ;;  %v14179_v10 = vld [vmem:[%s19480_s0 + $0x18] sm:$0xff]   ;;  %48 = vst.msk [vmem:[#allocation2 + $0x320] sm:$0xff] %vm36_vm1, %v19490_v32  ;;  %vm38_vm4 = vcmask 58368   ;;  %s14206_s13 = smov 116  }
   0x4   :  { %11766 = vmatprep.mubr.msk.bf16.mxu0 %vm36_vm1, %v14173_v2  ;;  %11774 = vmatprep.mubr.msk.bf16.mxu1 %vm36_vm1, %v14174_v3  ;;  %v14296_v8 = vld [vmem:[%s19481_s3] ss:$0 sm:$0xff]  ;;  %v14180_v11 = vld [vmem:[%s19480_s0 + $0x38] sm:$0xff]   ;;  %v11072_v12 = vunpack.c.l.bf16 %v11146_v9  ;;  %v11073_v13 = vunpack.c.h.bf16 %v11146_v9  ;;  %v11147_v19 = vld [vmem:[%s19482_s1 + $0x90] sm:$0xff]   ;;  %50 = vst.msk [vmem:[#allocation2 + $0x3c0] sm:$0xff] %vm36_vm1, %v19490_v32  ;;  %vm746_vm5 = vcmask 64544  }
   0x5   :  { %976 = vrot.lane.b32.xlu0 %v14296_v8, %s14201_s14  ;;  %v11145_v14 = vld [vmem:[%s19482_s1 + $0x80] sm:$0xff]   ;;  %v11148_v15 = vld [vmem:[%s19482_s1 + $0x98] sm:$0xff]   ;;  %v11076_v20 = vunpack.c.l.bf16 %v11147_v19  ;;  %v11077_v22 = vunpack.c.h.bf16 %v11147_v19  ;;  %v14327_v26 = vld [vmem:[%s19482_s1 + $0xa8] sm:$0xff]   ;;  %52 = vst.msk [vmem:[#allocation2 + $0x460] sm:$0xff] %vm36_vm1, %v19490_v32  ;;  %s14207_s29 = smov 124   ;;  %vm234_vm6 = vcmask 25600  }
   0x6   :  { %11767 = vmatmul.mubr.msk.bf16.vlgmr.msra.gmra.mrb[0].mxu0 %vm36_vm1, %v14175_v4  ;;  %11775 = vmatmul.mubr.msk.bf16.vlgmr.msra.gmra.mrb[0].mxu1 %vm36_vm1, %v14176_v5  ;;  %v11149_v16 = vld [vmem:[%s19482_s1 + $0xa0] sm:$0xff]   ;;  %v11068_v17 = vunpack.c.l.bf16 %v11145_v14  ;;  %v11069_v18 = vunpack.c.h.bf16 %v11145_v14  ;;  %v14028_v23 = vpack.i.bf16 %v11073_v13, %v11072_v12  ;;  %v11080_v24 = vunpack.c.l.bf16 %v11148_v15  ;;  %55 = vst.msk [vmem:[#allocation2 + $0x90] sm:$0xff] %vm36_vm1, %v19490_v32  ;;  %57 = vst.msk [vmem:[#allocation2 + $0x130] sm:$0xff] %vm36_vm1, %v19490_v32  ;;  %v11152_v9 = vld [vmem:[%s19482_s1 + $0xb8] sm:$0xff]  }
   0x7   :  { %11770 = vmatprep.mubr.msk.bf16.mxu0 %vm36_vm1, %v14177_v6  ;;  %11778 = vmatprep.mubr.msk.bf16.mxu1 %vm36_vm1, %v14178_v7  ;;  %v11084_v25 = vunpack.c.l.bf16 %v11149_v16  ;;  %v14033_v27 = vpack.i.bf16 %v11077_v22, %v11076_v20  ;;  %v11085_v29 = vunpack.c.h.bf16 %v11149_v16  ;;  %v11088_v30 = vunpack.c.l.bf16 %v14327_v26  ;;  %59 = vst.msk [vmem:[#allocation2 + $0x1d0] sm:$0xff] %vm36_vm1, %v19490_v32  ;;  %61 = vst.msk [vmem:[#allocation2 + $0x270] sm:$0xff] %vm36_vm1, %v19490_v32  ;;  %v11151_v7 = vld [vmem:[%s19482_s1 + $0xb0] sm:$0xff]   ;;  %v1501_v20 = vld [vmem:[%s19483_s4 + $0x4] sm:$0xf] }
   0x8   :  { %v14023_v21 = vpack.i.bf16 %v11069_v18, %v11068_v17  ;;  %93 = vst.msk [vmem:[#allocation2 + $0x150] sm:$0x1] %vm71_vm3, %v19490_v32  ;;  %94 = vst.msk [vmem:[#allocation2 + $0x160] sm:$0x1] %vm71_vm3, %v19490_v32  ;;  %v11093_v14 = vunpack.c.h.bf16 %v11151_v7  ;;  %v11096_v15 = vunpack.c.l.bf16 %v11152_v9  ;;  %13998 = vmatprep.subr.msk.bf16.mxu1 %vm509_vm0, %v1501_v20  ;;  %v11089_v22 = vunpack.c.h.bf16 %v14327_v26 }
   0x9   :  { %1189 = vrot.lane.b32.xlu0 %v14296_v8, %s14202_s20  ;;  %v14038_v28 = vpack.i.bf16 %v11084_v25, %v11080_v24  ;;  %v14043_v31 = vpack.i.bf16 %v11088_v30, %v11085_v29  ;;  %95 = vst.msk [vmem:[#allocation2 + $0x170] sm:$0x1] %vm71_vm3, %v19490_v32  ;;  %96 = vst.msk [vmem:[#allocation2 + $0x180] sm:$0x1] %vm71_vm3, %v19490_v32  ;;  %v1647_v24 = vsel %vm509_vm0, %v1501_v20, 0  ;;  %vm6119_vm7 = vcmask 1041408  }
   0xa   :  { %14024 = vrot.lane.b32.xlu1 %v14023_v21, %s14203_s21  ;;  %97 = vst.msk [vmem:[#allocation2 + $0x190] sm:$0x1] %vm71_vm3, %v19490_v32  ;;  %98 = vst.msk [vmem:[#allocation2 + $0x1a0] sm:$0x1] %vm71_vm3, %v19490_v32  ;;  %v14053_v21 = vpack.i.bf16 %v11096_v15, %v11093_v14  ;;  %11783 = vmatpush3.bf16.msra.mxu1 %v1647_v24  ;;  %v14721_v14 = vld [vmem:[%s19482_s1 + $0xf8] sm:$0xff]   ;;  %vm267_vm8 = vcmask 24576  }
   0xb   :  { %99 = vst.msk [vmem:[#allocation2 + $0x1b0] sm:$0x1] %vm71_vm3, %v19490_v32  ;;  %100 = vst.msk [vmem:[#allocation2 + $0x1c0] sm:$0x1] %vm71_vm3, %v19490_v32 }
   0xc   :  { %103 = vst.msk [vmem:[#allocation2 + $0x1f0] sm:$0x1] %vm71_vm3, %v19490_v32  ;;  %104 = vst.msk [vmem:[#allocation2 + $0x200] sm:$0x1] %vm71_vm3, %v19490_v32 }
   0xd   :  { %14029 = vrot.lane.b32.xlu0 %v14028_v23, %s14203_s21  ;;  %105 = vst.msk [vmem:[#allocation2 + $0x210] sm:$0x1] %vm71_vm3, %v19490_v32  ;;  %106 = vst.msk [vmem:[#allocation2 + $0x220] sm:$0x1] %vm71_vm3, %v19490_v32  ;;  %v11092_v23 = vunpack.c.l.bf16 %v11151_v7 }
   0xe   :  { %11771 = vmatmul.mubr.msk.bf16.gmra.mrb[4].mxu0 %vm36_vm1, %v14179_v10  ;;  %11779 = vmatmul.mubr.msk.bf16.gmra.mrb[4].mxu1 %vm36_vm1, %v14180_v11  ;;  %107 = vst.msk [vmem:[#allocation2 + $0x230] sm:$0x1] %vm71_vm3, %v19490_v32  ;;  %108 = vst.msk [vmem:[#allocation2 + $0x240] sm:$0x1] %vm71_vm3, %v19490_v32 }
   0xf   :  { %14034 = vrot.lane.b32.xlu1 %v14033_v27, %s14203_s21  ;;  %109 = vst.msk [vmem:[#allocation2 + $0x250] sm:$0x1] %vm71_vm3, %v19490_v32  ;;  %110 = vst.msk [vmem:[#allocation2 + $0x260] sm:$0x1] %vm71_vm3, %v19490_v32  ;;  %v14048_v27 = vpack.i.bf16 %v11092_v23, %v11089_v22  ;;  %v11130_v22 = vld [vmem:[%s19482_s1 + $0x8] sm:$0xff]  }
  0x10   :  { %133 = vst.msk [vmem:[#allocation2 + $0x3d0] sm:$0x1] %vm71_vm3, %v19490_v32  ;;  %134 = vst.msk [vmem:[#allocation2 + $0x3e0] sm:$0x1] %vm71_vm3, %v19490_v32 }
  0x11   :  { %14039 = vrot.lane.b32.xlu0 %v14038_v28, %s14203_s21  ;;  %135 = vst.msk [vmem:[#allocation2 + $0x3f0] sm:$0x1] %vm71_vm3, %v19490_v32  ;;  %136 = vst.msk [vmem:[#allocation2 + $0x400] sm:$0x1] %vm71_vm3, %v19490_v32  ;;  %v11153_v28 = vld [vmem:[%s19482_s1 + $0xc0] sm:$0xff]  }
  0x12   :  { %137 = vst.msk [vmem:[#allocation2 + $0x410] sm:$0x1] %vm71_vm3, %v19490_v32  ;;  %138 = vst.msk [vmem:[#allocation2 + $0x420] sm:$0x1] %vm71_vm3, %v19490_v32  ;;  %v11100_v26 = vunpack.c.l.bf16 %v11153_v28  ;;  %v11101_v30 = vunpack.c.h.bf16 %v11153_v28  ;;  %v11009_v28 = vunpack.c.h.bf16 %v11130_v22 }
  0x13   :  { %139 = vst.msk [vmem:[#allocation2 + $0x430] sm:$0x1] %vm71_vm3, %v19490_v32  ;;  %140 = vst.msk [vmem:[#allocation2 + $0x440] sm:$0x1] %vm71_vm3, %v19490_v32 }
  0x14   :  { %143 = vst.msk [vmem:[#allocation2 + $0x470] sm:$0x1] %vm71_vm3, %v19490_v32  ;;  %144 = vst.msk [vmem:[#allocation2 + $0x480] sm:$0x1] %vm71_vm3, %v19490_v32 }
  0x15   :  { %14044 = vrot.lane.b32.xlu0 %v14043_v31, %s14203_s21  ;;  %145 = vst.msk [vmem:[#allocation2 + $0x490] sm:$0x1] %vm71_vm3, %v19490_v32  ;;  %146 = vst.msk [vmem:[#allocation2 + $0x4a0] sm:$0x1] %vm71_vm3, %v19490_v32 }
  0x16   :  { %147 = vst.msk [vmem:[#allocation2 + $0x4b0] sm:$0x1] %vm71_vm3, %v19490_v32  ;;  %148 = vst.msk [vmem:[#allocation2 + $0x4c0] sm:$0x1] %vm71_vm3, %v19490_v32 }
  0x17   :  { %149 = vst.msk [vmem:[#allocation2 + $0x4d0] sm:$0x1] %vm71_vm3, %v19490_v32  ;;  %150 = vst.msk [vmem:[#allocation2 + $0x4e0] sm:$0x1] %vm71_vm3, %v19490_v32 }
  0x18   :  { %153 = vst.msk [vmem:[#allocation2 + $0x19] sm:$0x1] %vm71_vm3, %v19490_v32  ;;  %154 = vst.msk [vmem:[#allocation2 + $0x29] sm:$0x1] %vm71_vm3, %v19490_v32 }
  0x19   :  { %155 = vst.msk [vmem:[#allocation2 + $0x39] sm:$0x1] %vm71_vm3, %v19490_v32  ;;  %156 = vst.msk [vmem:[#allocation2 + $0x49] sm:$0x1] %vm71_vm3, %v19490_v32 }
  0x1a   :  { %157 = vst.msk [vmem:[#allocation2 + $0x59] sm:$0x1] %vm71_vm3, %v19490_v32  ;;  %158 = vst.msk [vmem:[#allocation2 + $0x69] sm:$0x1] %vm71_vm3, %v19490_v32 }
  0x1b   :  { %159 = vst.msk [vmem:[#allocation2 + $0x79] sm:$0x1] %vm71_vm3, %v19490_v32  ;;  %160 = vst.msk [vmem:[#allocation2 + $0x89] sm:$0x1] %vm71_vm3, %v19490_v32 }
  0x1c   :  { %163 = vst.msk [vmem:[#allocation2 + $0xb9] sm:$0x1] %vm71_vm3, %v19490_v32  ;;  %164 = vst.msk [vmem:[#allocation2 + $0xc9] sm:$0x1] %vm71_vm3, %v19490_v32 }
  0x1d   :  { %165 = vst.msk [vmem:[#allocation2 + $0xd9] sm:$0x1] %vm71_vm3, %v19490_v32  ;;  %166 = vst.msk [vmem:[#allocation2 + $0xe9] sm:$0x1] %vm71_vm3, %v19490_v32 }
  0x1e   :  { %167 = vst.msk [vmem:[#allocation2 + $0xf9] sm:$0x1] %vm71_vm3, %v19490_v32  ;;  %168 = vst.msk [vmem:[#allocation2 + $0x109] sm:$0x1] %vm71_vm3, %v19490_v32 }
  0x1f   :  { %169 = vst.msk [vmem:[#allocation2 + $0x119] sm:$0x1] %vm71_vm3, %v19490_v32  ;;  %170 = vst.msk [vmem:[#allocation2 + $0x129] sm:$0x1] %vm71_vm3, %v19490_v32 }
  0x20   :  { %193 = vst.msk [vmem:[#allocation2 + $0x299] sm:$0x1] %vm71_vm3, %v19490_v32  ;;  %194 = vst.msk [vmem:[#allocation2 + $0x2a9] sm:$0x1] %vm71_vm3, %v19490_v32 }
  0x21   :  { %195 = vst.msk [vmem:[#allocation2 + $0x2b9] sm:$0x1] %vm71_vm3, %v19490_v32  ;;  %196 = vst.msk [vmem:[#allocation2 + $0x2c9] sm:$0x1] %vm71_vm3, %v19490_v32 }
  0x22   :  { %197 = vst.msk [vmem:[#allocation2 + $0x2d9] sm:$0x1] %vm71_vm3, %v19490_v32  ;;  %198 = vst.msk [vmem:[#allocation2 + $0x2e9] sm:$0x1] %vm71_vm3, %v19490_v32 }
  0x23   :  { %199 = vst.msk [vmem:[#allocation2 + $0x2f9] sm:$0x1] %vm71_vm3, %v19490_v32  ;;  %200 = vst.msk [vmem:[#allocation2 + $0x309] sm:$0x1] %vm71_vm3, %v19490_v32 }
  0x24   :  { %203 = vst.msk [vmem:[#allocation2 + $0x339] sm:$0x1] %vm71_vm3, %v19490_v32  ;;  %204 = vst.msk [vmem:[#allocation2 + $0x349] sm:$0x1] %vm71_vm3, %v19490_v32 }
  0x25   :  { %205 = vst.msk [vmem:[#allocation2 + $0x359] sm:$0x1] %vm71_vm3, %v19490_v32  ;;  %206 = vst.msk [vmem:[#allocation2 + $0x369] sm:$0x1] %vm71_vm3, %v19490_v32 }
  0x26   :  { %207 = vst.msk [vmem:[#allocation2 + $0x379] sm:$0x1] %vm71_vm3, %v19490_v32  ;;  %208 = vst.msk [vmem:[#allocation2 + $0x389] sm:$0x1] %vm71_vm3, %v19490_v32 }
  0x27   :  { %209 = vst.msk [vmem:[#allocation2 + $0x399] sm:$0x1] %vm71_vm3, %v19490_v32  ;;  %210 = vst.msk [vmem:[#allocation2 + $0x3a9] sm:$0x1] %vm71_vm3, %v19490_v32 }
  0x28   :  { %242 = vst.msk [vmem:[#allocation3 + $0x280] sm:$0xff] %vm232_vm2, %v19490_v32  ;;  %244 = vst.msk [vmem:[#allocation3 + $0x320] sm:$0xff] %vm232_vm2, %v19490_v32 }
  0x29   :  { %246 = vst.msk [vmem:[#allocation3 + $0x3c0] sm:$0xff] %vm232_vm2, %v19490_v32  ;;  %248 = vst.msk [vmem:[#allocation3 + $0x460] sm:$0xff] %vm232_vm2, %v19490_v32 }
  0x2a   :  { %251 = vst.msk [vmem:[#allocation3 + $0x90] sm:$0xff] %vm232_vm2, %v19490_v32  ;;  %253 = vst.msk [vmem:[#allocation3 + $0x130] sm:$0xff] %vm232_vm2, %v19490_v32 }
  0x2b   :  { %255 = vst.msk [vmem:[#allocation3 + $0x1d0] sm:$0xff] %vm232_vm2, %v19490_v32  ;;  %257 = vst.msk [vmem:[#allocation3 + $0x270] sm:$0xff] %vm232_vm2, %v19490_v32 }
  0x2c   :  { %101 = vst.msk [vmem:[#allocation2 + $0x1d0] sm:$0x1] %vm71_vm3, %v19490_v32  ;;  %111 = vst.msk [vmem:[#allocation2 + $0x270] sm:$0x1] %vm71_vm3, %v19490_v32 }
  0x2d   :  { %132 = vst.msk [vmem:[#allocation2 + $0x3c0] sm:$0x1] %vm71_vm3, %v19490_v32  ;;  %142 = vst.msk [vmem:[#allocation2 + $0x460] sm:$0x1] %vm71_vm3, %v19490_v32 }
  0x2e   :  { %47 = vst.msk [vmem:[#allocation2 + $0x288] sm:$0x3] %vm38_vm4, %v19490_v32  ;;  %49 = vst.msk [vmem:[#allocation2 + $0x328] sm:$0x3] %vm38_vm4, %v19490_v32 }
  0x2f   :  { %51 = vst.msk [vmem:[#allocation2 + $0x3c8] sm:$0x3] %vm38_vm4, %v19490_v32  ;;  %53 = vst.msk [vmem:[#allocation2 + $0x468] sm:$0x3] %vm38_vm4, %v19490_v32 }
  0x30   :  { %56 = vst.msk [vmem:[#allocation2 + $0x98] sm:$0x3] %vm38_vm4, %v19490_v32  ;;  %58 = vst.msk [vmem:[#allocation2 + $0x138] sm:$0x3] %vm38_vm4, %v19490_v32 }
  0x31   :  { %60 = vst.msk [vmem:[#allocation2 + $0x1d8] sm:$0x3] %vm38_vm4, %v19490_v32  ;;  %62 = vst.msk [vmem:[#allocation2 + $0x278] sm:$0x3] %vm38_vm4, %v19490_v32 }
  0x32   :  { %192 = vst.msk [vmem:[#allocation2 + $0x289] sm:$0x1] %vm71_vm3, %v19490_v32  ;;  %161 = vst.msk [vmem:[#allocation2 + $0x99] sm:$0x1] %vm71_vm3, %v19490_v32 }
  0x33   :  { %171 = vst.msk [vmem:[#allocation2 + $0x139] sm:$0x1] %vm71_vm3, %v19490_v32  ;;  %202 = vst.msk [vmem:[#allocation2 + $0x329] sm:$0x1] %vm71_vm3, %v19490_v32 }
  0x77   :  { %v14502_v33 = vpop.permute.xlu0 %976 }
  0x7b   :  { %v14623_v12 = vpop.permute.xlu0 %1189 }
  0xd9   :  { %v14504_v34 = vpop.f32.mrb[0].mxu0  ;;  %v14508_v36 = vpop.f32.mrb[0].mxu1 }
  0xda   :  { %v619_v35 = vadd.f32 %v14504_v34, %v14296_v8  ;;  %v14510_v37 = vpop.f32.mrb[1].mxu0  ;;  %v981_v38 = vadd.f32 %v14504_v34, %v14502_v33  ;;  %v627_v39 = vadd.f32 %v14508_v36, %v14296_v8  ;;  %v14518_v41 = vpop.f32.mrb[1].mxu1  ;;  %v989_v43 = vadd.f32 %v14508_v36, %v14502_v33 }
  0xdb   :  { %v617_v40 = vadd.f32 %v14296_v8, %v14510_v37  ;;  %v14520_v42 = vpop.f32.mrb[2].mxu0  ;;  %v625_v44 = vadd.f32 %v14296_v8, %v14518_v41  ;;  %v14529_v46 = vpop.f32.mrb[2].mxu1  ;;  %v979_v53 = vadd.f32 %v14502_v33, %v14510_v37  ;;  %v987_v63 = vadd.f32 %v14502_v33, %v14518_v41 }
  0xdc   :  { %636 = vst.msk [vmem:[#allocation2 + $0x31] sm:$0xff] %vm232_vm2, %v619_v35  ;;  %v620_v45 = vadd.f32 %v14520_v42, %v14296_v8  ;;  %1015 = vrot.lane.b32.xlu0 %v981_v38, %s14205_s24  ;;  %v14532_v47 = vpop.f32.mrb[3].mxu0  ;;  %644 = vst.msk [vmem:[#allocation2 + $0xd1] sm:$0xff] %vm232_vm2, %v627_v39  ;;  %v628_v48 = vadd.f32 %v14529_v46, %v14296_v8  ;;  %1031 = vrot.lane.b32.xlu1 %v989_v43, %s14205_s24  ;;  %v14539_v49 = vpop.f32.mrb[3].mxu1  ;;  %v11154_v39 = vld [vmem:[%s19482_s1 + $0xc8] sm:$0xff]  }
  0xdd   :  { %634 = vst.msk [vmem:[#allocation2 + $0x11] sm:$0xff] %vm232_vm2, %v617_v40  ;;  %v618_v50 = vadd.f32 %v14296_v8, %v14532_v47  ;;  %642 = vst.msk [vmem:[#allocation2 + $0xb1] sm:$0xff] %vm232_vm2, %v625_v44  ;;  %v626_v51 = vadd.f32 %v14296_v8, %v14539_v49  ;;  %v988_v52 = vadd.f32 %v14502_v33, %v14539_v49  ;;  %v11104_v43 = vunpack.c.l.bf16 %v11154_v39 }
  0xde   :  { %637 = vst.msk [vmem:[#allocation2 + $0x41] sm:$0xff] %vm232_vm2, %v620_v45  ;;  %645 = vst.msk [vmem:[#allocation2 + $0xe1] sm:$0xff] %vm232_vm2, %v628_v48  ;;  %v982_v13 = vadd.f32 %v14520_v42, %v14502_v33  ;;  %v990_v19 = vadd.f32 %v14529_v46, %v14502_v33  ;;  %v980_v25 = vadd.f32 %v14502_v33, %v14532_v47  ;;  %v11105_v44 = vunpack.c.h.bf16 %v11154_v39 }
  0xdf   :  { %635 = vst.msk [vmem:[#allocation2 + $0x21] sm:$0xff] %vm232_vm2, %v618_v50  ;;  %643 = vst.msk [vmem:[#allocation2 + $0xc1] sm:$0xff] %vm232_vm2, %v626_v51  ;;  %v1193_v31 = vadd.f32 %v14623_v12, %v14532_v47  ;;  %v14058_v38 = vpack.i.bf16 %v11101_v30, %v11100_v26  ;;  %v1192_v40 = vadd.f32 %v14623_v12, %v14510_v37  ;;  %v14684_v50 = vld [vmem:[%s19482_s1 + $0xd8] sm:$0xff]   ;;  %v11157_v51 = vld [vmem:[%s19482_s1 + $0xe0] sm:$0xff]  }
  0xe0   :  { %1029 = vrot.lane.b32.xlu0 %v988_v52, %s14205_s24  ;;  %1011 = vrot.lane.b32.xlu1 %v979_v53, %s14205_s24  ;;  %v1194_v45 = vadd.f32 %v14504_v34, %v14623_v12  ;;  %v14063_v48 = vpack.i.bf16 %v11105_v44, %v11104_v43  ;;  %v11112_v53 = vunpack.c.l.bf16 %v14684_v50  ;;  %v1202_v24 = vadd.f32 %v14508_v36, %v14623_v12  ;;  %v11132_v30 = vld [vmem:[%s19482_s1 + $0x18] sm:$0xff]   ;;  %v11134_v43 = vld [vmem:[%s19482_s1 + $0x28] sm:$0xff]  }
  0xe1   :  { %v14556_v54 = vpop.f32.mrb[4].mxu0  ;;  %v14568_v56 = vpop.f32.mrb[4].mxu1  ;;  %v11017_v39 = vunpack.c.h.bf16 %v11132_v30  ;;  %v11003_v44 = vld [vmem:[%s19482_s1] sm:$0xff]  }
  0xe2   :  { %v623_v55 = vadd.f32 %v14556_v54, %v14296_v8  ;;  %v14570_v57 = vpop.f32.mrb[5].mxu0  ;;  %v985_v58 = vadd.f32 %v14556_v54, %v14502_v33  ;;  %v631_v59 = vadd.f32 %v14568_v56, %v14296_v8  ;;  %v14586_v61 = vpop.f32.mrb[5].mxu1  ;;  %v993_v11 = vadd.f32 %v14568_v56, %v14502_v33 }
  0xe3   :  { %v621_v60 = vadd.f32 %v14296_v8, %v14570_v57  ;;  %v14588_v62 = vpop.f32.mrb[6].mxu0  ;;  %v629_v0 = vadd.f32 %v14296_v8, %v14586_v61  ;;  %v14597_v2 = vpop.f32.mrb[6].mxu1  ;;  %v983_v18 = vadd.f32 %v14502_v33, %v14570_v57  ;;  %v991_v29 = vadd.f32 %v14502_v33, %v14586_v61 }
  0xe4   :  { %640 = vst.msk [vmem:[#allocation2 + $0x71] sm:$0xff] %vm232_vm2, %v623_v55  ;;  %v624_v1 = vadd.f32 %v14588_v62, %v14296_v8  ;;  %1023 = vrot.lane.b32.xlu0 %v985_v58, %s14205_s24  ;;  %v14600_v3 = vpop.f32.mrb[7].mxu0  ;;  %648 = vst.msk [vmem:[#allocation2 + $0x111] sm:$0xff] %vm232_vm2, %v631_v59  ;;  %v632_v4 = vadd.f32 %v14597_v2, %v14296_v8  ;;  %v14606_v5 = vpop.f32.mrb[7].mxu1  ;;  %1027 = vrot.lane.b32.xlu1 %v987_v63, %s14205_s24  ;;  %v11155_v58 = vld [vmem:[%s19482_s1 + $0xd0] sm:$0xff]  }
  0xe5   :  { %638 = vst.msk [vmem:[#allocation2 + $0x51] sm:$0xff] %vm232_vm2, %v621_v60  ;;  %v622_v6 = vadd.f32 %v14296_v8, %v14600_v3  ;;  %646 = vst.msk [vmem:[#allocation2 + $0xf1] sm:$0xff] %vm232_vm2, %v629_v0  ;;  %v630_v10 = vadd.f32 %v14296_v8, %v14606_v5  ;;  %v14633_v16 = vadd.f32 %v14588_v62, %v14623_v12  ;;  %v11108_v63 = vunpack.c.l.bf16 %v11155_v58 }
  0xe6   :  { %641 = vst.msk [vmem:[#allocation2 + $0x81] sm:$0xff] %vm232_vm2, %v624_v1  ;;  %649 = vst.msk [vmem:[#allocation2 + $0x121] sm:$0xff] %vm232_vm2, %v632_v4  ;;  %v14637_v17 = vadd.f32 %v14597_v2, %v14623_v12  ;;  %v984_v35 = vadd.f32 %v14502_v33, %v14600_v3  ;;  %v1196_v52 = vadd.f32 %v14623_v12, %v14570_v57  ;;  %v11109_v0 = vunpack.c.h.bf16 %v11155_v58  ;;  %v11158_v1 = vld [vmem:[%s19482_s1 + $0xe8] sm:$0xff]   ;;  %v11131_v58 = vld [vmem:[%s19482_s1 + $0x10] sm:$0xff]  }
  0xe7   :  { %639 = vst.msk [vmem:[#allocation2 + $0x61] sm:$0xff] %vm232_vm2, %v622_v6  ;;  %647 = vst.msk [vmem:[#allocation2 + $0x101] sm:$0xff] %vm232_vm2, %v630_v10  ;;  %v1198_v55 = vadd.f32 %v14556_v54, %v14623_v12  ;;  %v992_v59 = vadd.f32 %v14502_v33, %v14606_v5  ;;  %v1195_v4 = vadd.f32 %v14520_v42, %v14623_v12  ;;  %v11117_v6 = vunpack.c.h.bf16 %v11157_v51 }
  0xe8   :  { %1039 = vrot.lane.b32.xlu0 %v993_v11, %s14205_s24  ;;  %1017 = vrot.lane.b32.xlu1 %v982_v13, %s14205_s24  ;;  %v11120_v7 = vunpack.c.l.bf16 %v11158_v1  ;;  %v14068_v9 = vpack.i.bf16 %v11109_v0, %v11108_v63  ;;  %v1201_v10 = vadd.f32 %v14623_v12, %v14539_v49  ;;  %v1200_v13 = vadd.f32 %v14623_v12, %v14518_v41 }
  0xe9   :  { %v1204_v15 = vadd.f32 %v14623_v12, %v14586_v61  ;;  %v1206_v23 = vadd.f32 %v14568_v56, %v14623_v12 }
  0xea   :  { %v14078_v11 = vpack.i.bf16 %v11120_v7, %v11117_v6  ;;  %v11013_v6 = vunpack.c.h.bf16 %v11131_v58  ;;  %v11133_v7 = vld [vmem:[%s19482_s1 + $0x20] sm:$0xff]  }
  0xec   :  { %1019 = vrot.lane.b32.xlu0 %v983_v18, %s14205_s24  ;;  %1033 = vrot.lane.b32.xlu1 %v990_v19, %s14205_s24  ;;  %v1197_v18 = vadd.f32 %v14623_v12, %v14600_v3  ;;  %v11159_v19 = vld [vmem:[%s19482_s1 + $0xf0] sm:$0xff]  }
  0xed   :  { %v11125_v20 = vunpack.c.h.bf16 %v11159_v19  ;;  %v11124_v26 = vunpack.c.l.bf16 %v11159_v19 }
  0xf0   :  { %14054 = vrot.lane.b32.xlu0 %v14053_v21, %s14203_s21  ;;  %1013 = vrot.lane.b32.xlu1 %v980_v25, %s14205_s24  ;;  %v11128_v21 = vunpack.c.l.bf16 %v14721_v14 }
  0xf2   :  { %v14088_v25 = vpack.i.bf16 %v11128_v21, %v11125_v20  ;;  %v14030_v21 = vpop.permute.xlu0 %14029 }
  0xf4   :  { %1035 = vrot.lane.b32.xlu0 %v991_v29, %s14205_s24  ;;  %14049 = vrot.lane.b32.xlu1 %v14048_v27, %s14203_s21  ;;  %v11008_v27 = vunpack.c.l.bf16 %v11130_v22  ;;  %v11121_v29 = vunpack.c.h.bf16 %v11158_v1 }
  0xf6   :  { %v14040_v22 = vpop.permute.xlu0 %14039 }
  0xf8   :  { %1226 = vrot.lane.b32.xlu0 %v1193_v31, %s14206_s13  ;;  %1021 = vrot.lane.b32.xlu1 %v984_v35, %s14205_s24  ;;  %v1203_v31 = vadd.f32 %v14529_v46, %v14623_v12  ;;  %v14098_v35 = vpack.i.bf16 %v11009_v28, %v11008_v27  ;;  %v14031_v27 = vunpack.i.l.bf16 %v14030_v21 }
  0xfc   :  { %14059 = vrot.lane.b32.xlu0 %v14058_v38, %s14203_s21  ;;  %1224 = vrot.lane.b32.xlu1 %v1192_v40, %s14206_s13  ;;  %v11016_v38 = vunpack.c.l.bf16 %v11132_v30  ;;  %v14083_v40 = vpack.i.bf16 %v11124_v26, %v11121_v29 }
 0x100   :  { %763 = vrot.lane.b32.xlu0 %v14296_v8, %s14203_s21  ;;  %1228 = vrot.lane.b32.xlu1 %v1194_v45, %s14206_s13  ;;  %v11116_v8 = vunpack.c.l.bf16 %v11157_v51  ;;  %v14108_v45 = vpack.i.bf16 %v11017_v39, %v11016_v38  ;;  %v11025_v51 = vunpack.c.h.bf16 %v11134_v43  ;;  %v14041_v39 = vunpack.i.l.bf16 %v14040_v22 }
 0x102   :  { %v14073_v60 = vpack.i.bf16 %v11116_v8, %v11112_v53  ;;  %v11005_v53 = vunpack.c.h.bf16 %v11003_v44  ;;  %v11136_v8 = vld [vmem:[%s19482_s1 + $0x38] sm:$0xff]  }
 0x103   :  { %v11032_v63 = vunpack.c.l.bf16 %v11136_v8  ;;  %v11033_v0 = vunpack.c.h.bf16 %v11136_v8 }
 0x104   :  { %1232 = vrot.lane.b32.xlu0 %v1196_v52, %s14206_s13  ;;  %14064 = vrot.lane.b32.xlu1 %v14063_v48, %s14203_s21  ;;  %v11024_v48 = vunpack.c.l.bf16 %v11134_v43  ;;  %v11004_v52 = vunpack.c.l.bf16 %v11003_v44  ;;  %v14042_v43 = vunpack.i.h.bf16 %v14040_v22 }
 0x106   :  { %v14093_v1 = vpack.i.bf16 %v11005_v53, %v11004_v52 }
 0x108   :  { %1236 = vrot.lane.b32.xlu0 %v1198_v55, %s14206_s13  ;;  %1037 = vrot.lane.b32.xlu1 %v992_v59, %s14205_s24  ;;  %v14763_v55 = vld [vmem:[%s19483_s4] sm:$0xf]  ;;  %v1205_v59 = vadd.f32 %v14623_v12, %v14606_v5 }
 0x109   :  { %13999 = vmatprep.subr.msk.bf16.mxu1 %vm509_vm0, %v14763_v55 }
 0x10c   :  { %14074 = vrot.lane.b32.xlu0 %v14073_v60, %s14203_s21  ;;  %1230 = vrot.lane.b32.xlu1 %v1195_v4, %s14206_s13  ;;  %v14118_v60 = vpack.i.bf16 %v11025_v51, %v11024_v48  ;;  %v11012_v4 = vunpack.c.l.bf16 %v11131_v58  ;;  %v1421_v48 = vld [vmem:[#allocation2 + $0x281] sm:$0xff]  ;;  %v14032_v51 = vunpack.i.h.bf16 %v14030_v21 }
 0x10e   :  { %v14103_v12 = vpack.i.bf16 %v11013_v6, %v11012_v4 }
 0x110   :  { %1242 = vrot.lane.b32.xlu0 %v1201_v10, %s14206_s13  ;;  %14069 = vrot.lane.b32.xlu1 %v14068_v9, %s14203_s21  ;;  %v14128_v9 = vpack.i.bf16 %v11033_v0, %v11032_v63  ;;  %v11020_v10 = vunpack.c.l.bf16 %v11133_v7 }
 0x114   :  { %14079 = vrot.lane.b32.xlu0 %v14078_v11, %s14203_s21  ;;  %1240 = vrot.lane.b32.xlu1 %v1200_v13, %s14206_s13  ;;  %v11021_v11 = vunpack.c.h.bf16 %v11133_v7  ;;  %v11135_v13 = vld [vmem:[%s19482_s1 + $0x30] sm:$0xff]  }
 0x115   :  { %v11029_v19 = vunpack.c.h.bf16 %v11135_v13 }
 0x118   :  { %1248 = vrot.lane.b32.xlu0 %v1204_v15, %s14206_s13  ;;  %1234 = vrot.lane.b32.xlu1 %v1197_v18, %s14206_s13  ;;  %v14113_v15 = vpack.i.bf16 %v11021_v11, %v11020_v10  ;;  %v11028_v18 = vunpack.c.l.bf16 %v11135_v13 }
 0x11a   :  { %v14123_v20 = vpack.i.bf16 %v11029_v19, %v11028_v18 }
 0x11c   :  { %1252 = vrot.lane.b32.xlu0 %v1206_v23, %s14206_s13  ;;  %1244 = vrot.lane.b32.xlu1 %v1202_v24, %s14206_s13  ;;  %v14025_v23 = vpop.permute.xlu1 %14024  ;;  %v14045_v24 = vpop.permute.xlu0 %14044 }
 0x11d   :  { %v14047_v29 = vunpack.i.h.bf16 %v14045_v24  ;;  %v14026_v30 = vunpack.i.l.bf16 %v14025_v23 }
 0x120   :  { %14089 = vrot.lane.b32.xlu0 %v14088_v25, %s14203_s21  ;;  %1246 = vrot.lane.b32.xlu1 %v1203_v31, %s14206_s13  ;;  %v14786_v25 = vpop.permute.xlu1 %14034  ;;  %v14046_v31 = vunpack.i.l.bf16 %v14045_v24 }
 0x121   :  { %v14036_v53 = vunpack.i.l.bf16 %v14786_v25 }
 0x124   :  { %14099 = vrot.lane.b32.xlu0 %v14098_v35, %s14203_s21  ;;  %14084 = vrot.lane.b32.xlu1 %v14083_v40, %s14203_s21 }
 0x128   :  { %14109 = vrot.lane.b32.xlu0 %v14108_v45, %s14203_s21  ;;  %1250 = vrot.lane.b32.xlu1 %v1205_v59, %s14206_s13 }
 0x12c   :  { %14119 = vrot.lane.b32.xlu0 %v14118_v60, %s14203_s21  ;;  %14094 = vrot.lane.b32.xlu1 %v14093_v1, %s14203_s21  ;;  %v14027_v1 = vunpack.i.h.bf16 %v14025_v23 }
 0x130   :  { %14129 = vrot.lane.b32.xlu0 %v14128_v9, %s14203_s21  ;;  %14104 = vrot.lane.b32.xlu1 %v14103_v12, %s14203_s21 }
 0x134   :  { %14114 = vrot.lane.b32.xlu1 %v14113_v15, %s14203_s21 }
 0x138   :  { %14124 = vrot.lane.b32.xlu1 %v14123_v20, %s14203_s21  ;;  %v14037_v20 = vunpack.i.h.bf16 %v14786_v25 }
 0x14e   :  { %v1016_v28 = vpop.permute.xlu0 %1015  ;;  %v1032_v26 = vpop.permute.xlu1 %1031 }
 0x14f   :  { %1062 = vst.msk [vmem:[#allocation2 + $0x2b1] sm:$0xff] %vm232_vm2, %v1016_v28  ;;  %1070 = vst.msk [vmem:[#allocation2 + $0x351] sm:$0xff] %vm232_vm2, %v1032_v26 }
 0x150   :  { %1175 = vst.msk [vmem:[#allocation2 + $0x2b1] sm:$0xff] %vm746_vm5, %v14031_v27  ;;  %1183 = vst.msk [vmem:[#allocation2 + $0x351] sm:$0xff] %vm746_vm5, %v14047_v29 }
 0x152   :  { %v1030_v35 = vpop.permute.xlu0 %1029  ;;  %v1012_v38 = vpop.permute.xlu1 %1011 }
 0x153   :  { %1069 = vst.msk [vmem:[#allocation2 + $0x341] sm:$0xff] %vm232_vm2, %v1030_v35  ;;  %1060 = vst.msk [vmem:[#allocation2 + $0x291] sm:$0xff] %vm232_vm2, %v1012_v38 }
 0x154   :  { %1182 = vst.msk [vmem:[#allocation2 + $0x341] sm:$0xff] %vm746_vm5, %v14046_v31  ;;  %1173 = vst.msk [vmem:[#allocation2 + $0x291] sm:$0xff] %vm746_vm5, %v14026_v30  ;;  %v1987_v30 = vsel %vm509_vm0, %v14763_v55, 0  ;;  %v11138_v55 = vld [vmem:[%s19482_s1 + $0x48] sm:$0xff]  }
 0x156   :  { %v1024_v40 = vpop.permute.xlu0 %1023  ;;  %v1028_v44 = vpop.permute.xlu1 %1027 }
 0x157   :  { %1066 = vst.msk [vmem:[#allocation2 + $0x2f1] sm:$0xff] %vm232_vm2, %v1024_v40  ;;  %1068 = vst.msk [vmem:[#allocation2 + $0x331] sm:$0xff] %vm232_vm2, %v1028_v44  ;;  %v2282_v12 = vld [vmem:[#allocation2 + $0x2b2] sm:$0xff] }
 0x158   :  { %1179 = vst.msk [vmem:[#allocation2 + $0x2f1] sm:$0xff] %vm746_vm5, %v14041_v39  ;;  %1181 = vst.msk [vmem:[#allocation2 + $0x331] sm:$0xff] %vm746_vm5, %v14042_v43  ;;  %v1424_v28 = vld [vmem:[#allocation2 + $0x2b1] sm:$0xff] }
 0x159   :  { %v2290_v44 = vld [vmem:[#allocation2 + $0x352] sm:$0xff] }
 0x15a   :  { %v1040_v45 = vpop.permute.xlu0 %1039  ;;  %v1018_v52 = vpop.permute.xlu1 %1017 }
 0x15b   :  { %1074 = vst.msk [vmem:[#allocation2 + $0x391] sm:$0xff] %vm232_vm2, %v1040_v45  ;;  %1063 = vst.msk [vmem:[#allocation2 + $0x2c1] sm:$0xff] %vm232_vm2, %v1018_v52  ;;  %v1422_v8 = vld [vmem:[#allocation2 + $0x291] sm:$0xff]  ;;  %v2289_v0 = vld [vmem:[#allocation2 + $0x342] sm:$0xff] }
 0x15c   :  { %1176 = vst.msk [vmem:[#allocation2 + $0x2c1] sm:$0xff] %vm746_vm5, %v14032_v51  ;;  %v14804_v58 = vpack.c.bf16 %v1422_v8, %v1421_v48  ;;  %v2280_v22 = vld [vmem:[#allocation2 + $0x292] sm:$0xff]  ;;  %v11137_v51 = vld [vmem:[%s19482_s1 + $0x40] sm:$0xff]  }
 0x15e   :  { %v1020_v59 = vpop.permute.xlu0 %1019  ;;  %v1034_v60 = vpop.permute.xlu1 %1033  ;;  %11784 = vmatprep.mubr.msk.bf16.mxu1 %vm36_vm1, %v14804_v58 }
 0x15f   :  { %1064 = vst.msk [vmem:[#allocation2 + $0x2d1] sm:$0xff] %vm232_vm2, %v1020_v59  ;;  %1071 = vst.msk [vmem:[#allocation2 + $0x361] sm:$0xff] %vm232_vm2, %v1034_v60  ;;  %v2288_v63 = vld [vmem:[#allocation2 + $0x332] sm:$0xff]  ;;  %v1429_v60 = vld [vmem:[#allocation2 + $0x321] sm:$0xff] }
 0x160   :  { %1177 = vst.msk [vmem:[#allocation2 + $0x2d1] sm:$0xff] %vm746_vm5, %v14036_v53  ;;  %v14811_v4 = vpack.c.bf16 %v2289_v0, %v2288_v63  ;;  %v1430_v63 = vld [vmem:[#allocation2 + $0x331] sm:$0xff] }
 0x162   :  { %19681 = vst [vmem:[#allocation4_spill] sm:$0xff] %v14811_v4  ;;  %v14813_v6 = vpop.permute.xlu0 %14054  ;;  %v1014_v7 = vpop.permute.xlu1 %1013 }
 0x163   :  { %v14057_v9 = vunpack.i.h.bf16 %v14813_v6  ;;  %1061 = vst.msk [vmem:[#allocation2 + $0x2a1] sm:$0xff] %vm232_vm2, %v1014_v7  ;;  %v2283_v10 = vld [vmem:[#allocation2 + $0x2c2] sm:$0xff]  ;;  %v11040_v7 = vunpack.c.l.bf16 %v11138_v55 }
 0x164   :  { %1174 = vst.msk [vmem:[#allocation2 + $0x2a1] sm:$0xff] %vm746_vm5, %v14027_v1  ;;  %v14819_v11 = vpack.c.bf16 %v2283_v10, %v2282_v12  ;;  %v1425_v25 = vld [vmem:[#allocation2 + $0x2c1] sm:$0xff]  ;;  %v1428_v1 = vld [vmem:[#allocation2 + $0x2f1] sm:$0xff]  ;;  %v11041_v12 = vunpack.c.h.bf16 %v11138_v55  ;;  %v11036_v10 = vunpack.c.l.bf16 %v11137_v51 }
 0x165   :  { %1187 = vst.msk [vmem:[#allocation2 + $0x391] sm:$0xff] %vm746_vm5, %v14057_v9  ;;  %v1432_v55 = vld [vmem:[#allocation2 + $0x351] sm:$0xff] }
 0x166   :  { %19682 = vst [vmem:[#allocation5_spill] sm:$0xff] %v14819_v11  ;;  %v1036_v13 = vpop.permute.xlu0 %1035  ;;  %v14050_v15 = vpop.permute.xlu1 %14049 }
 0x167   :  { %1072 = vst.msk [vmem:[#allocation2 + $0x371] sm:$0xff] %vm232_vm2, %v1036_v13  ;;  %v14052_v18 = vunpack.i.h.bf16 %v14050_v15  ;;  %v14051_v19 = vunpack.i.l.bf16 %v14050_v15  ;;  %v1426_v24 = vld [vmem:[#allocation2 + $0x2d1] sm:$0xff]  ;;  %v14862_v15 = vpack.c.bf16 %v1430_v63, %v1429_v60 }
 0x168   :  { %v14834_v38 = vpack.c.bf16 %v1426_v24, %v1425_v25  ;;  %v14138_v24 = vpack.i.bf16 %v11041_v12, %v11040_v7 }
 0x169   :  { %1184 = vst.msk [vmem:[#allocation2 + $0x361] sm:$0xff] %vm746_vm5, %v14051_v19  ;;  %1185 = vst.msk [vmem:[#allocation2 + $0x371] sm:$0xff] %vm746_vm5, %v14052_v18 }
 0x16a   :  { %v1227_v21 = vpop.permute.xlu0 %1226  ;;  %v1022_v23 = vpop.permute.xlu1 %1021 }
 0x16b   :  { %1274 = vst.msk [vmem:[#allocation2 + $0x3e1] sm:$0xff] %vm232_vm2, %v1227_v21  ;;  %1065 = vst.msk [vmem:[#allocation2 + $0x2e1] sm:$0xff] %vm232_vm2, %v1022_v23  ;;  %v1423_v27 = vld [vmem:[#allocation2 + $0x2a1] sm:$0xff] }
 0x16c   :  { %v2281_v29 = vld [vmem:[#allocation2 + $0x2a2] sm:$0xff]  ;;  %1178 = vst.msk [vmem:[#allocation2 + $0x2e1] sm:$0xff] %vm746_vm5, %v14037_v20  ;;  %v14828_v26 = vpack.c.bf16 %v1424_v28, %v1423_v27 }
 0x16d   :  { %v14832_v31 = vpack.c.bf16 %v2281_v29, %v2280_v22  ;;  %v14875_v22 = vld [vmem:[#allocation2 + $0x2d2] sm:$0xff] }
 0x16e   :  { %v14060_v35 = vpop.permute.xlu0 %14059  ;;  %11785 = vmatmul.mubr.msk.bf16.vlgmr.msra.gmra.mrb[8].mxu1 %vm36_vm1, %v14828_v26  ;;  %v1225_v43 = vpop.permute.xlu1 %1224 }
 0x16f   :  { %19683 = vst [vmem:[#allocation6_spill] sm:$0xff] %v14832_v31  ;;  %v14062_v39 = vunpack.i.h.bf16 %v14060_v35  ;;  %v14061_v40 = vunpack.i.l.bf16 %v14060_v35  ;;  %1273 = vst.msk [vmem:[#allocation2 + $0x3d1] sm:$0xff] %vm232_vm2, %v1225_v43  ;;  %11788 = vmatprep.mubr.msk.bf16.mxu1 %vm36_vm1, %v14834_v38  ;;  %11849 = vmatpush3.bf16.msra.mxu1 %v1987_v30  ;;  %v1431_v30 = vld [vmem:[#allocation2 + $0x341] sm:$0xff]  ;;  %v11140_v35 = vld [vmem:[%s19482_s1 + $0x58] sm:$0xff]  }
 0x170   :  { %v2291_v45 = vld [vmem:[#allocation2 + $0x362] sm:$0xff]  ;;  %v1434_v28 = vld [vmem:[#allocation2 + $0x371] sm:$0xff] }
 0x171   :  { %1387 = vst.msk [vmem:[#allocation2 + $0x3e1] sm:$0xff] %vm746_vm5, %v14062_v39  ;;  %1386 = vst.msk [vmem:[#allocation2 + $0x3d1] sm:$0xff] %vm746_vm5, %v14061_v40  ;;  %v14851_v52 = vpack.c.bf16 %v2291_v45, %v2290_v44  ;;  %v14056_v40 = vunpack.i.l.bf16 %v14813_v6 }
 0x172   :  { %v14846_v48 = vpop.permute.xlu0 %763  ;;  %v1229_v53 = vpop.permute.xlu1 %1228 }
 0x173   :  { %19684 = vst [vmem:[#allocation7_spill] sm:$0xff] %v14851_v52  ;;  %v767_v8 = vadd.f32 %v14846_v48, %v14532_v47  ;;  %v766_v59 = vadd.f32 %v14846_v48, %v14510_v37  ;;  %1275 = vst.msk [vmem:[#allocation2 + $0x3f1] sm:$0xff] %vm232_vm2, %v1229_v53  ;;  %v1427_v0 = vld [vmem:[#allocation2 + $0x2e1] sm:$0xff]  ;;  %v11037_v47 = vunpack.c.h.bf16 %v11137_v51  ;;  %v769_v18 = vadd.f32 %v14520_v42, %v14846_v48 }
 0x174   :  { %v14860_v9 = vpack.c.bf16 %v1428_v1, %v1427_v0  ;;  %v768_v19 = vadd.f32 %v14504_v34, %v14846_v48  ;;  %v14877_v23 = vld [vmem:[#allocation2 + $0x2e2] sm:$0xff]  ;;  %v14903_v51 = vpack.c.bf16 %v1432_v55, %v1431_v30  ;;  %v11048_v53 = vunpack.c.l.bf16 %v11140_v35 }
 0x175   :  { %800 = vrot.lane.b32.xlu0 %v767_v8, %s14207_s29  ;;  %798 = vrot.lane.b32.xlu1 %v766_v59, %s14207_s29  ;;  %v14133_v27 = vpack.i.bf16 %v11037_v47, %v11036_v10  ;;  %v1433_v42 = vld [vmem:[#allocation2 + $0x361] sm:$0xff]  ;;  %v14885_v34 = vpack.c.bf16 %v14877_v23, %v14875_v22  ;;  %v11049_v8 = vunpack.c.h.bf16 %v11140_v35  ;;  %v11139_v59 = vld [vmem:[%s19482_s1 + $0x50] sm:$0xff]   ;;  %v773_v0 = vadd.f32 %v14588_v62, %v14846_v48 }
 0x176   :  { %v1233_v13 = vpop.permute.xlu0 %1232  ;;  %11789 = vmatmul.mubr.msk.bf16.gmra.mrb[12].mxu1 %vm36_vm1, %v14860_v9  ;;  %v14065_v37 = vpop.permute.xlu1 %14064  ;;  %v14898_v44 = vpack.c.bf16 %v1434_v28, %v1433_v42  ;;  %v770_v1 = vadd.f32 %v14846_v48, %v14570_v57  ;;  %v11044_v12 = vunpack.c.l.bf16 %v11139_v59  ;;  %v11045_v10 = vunpack.c.h.bf16 %v11139_v59 }
 0x177   :  { %1277 = vst.msk [vmem:[#allocation2 + $0x411] sm:$0xff] %vm232_vm2, %v1233_v13  ;;  %v14066_v20 = vunpack.i.l.bf16 %v14065_v37  ;;  %11792 = vmatprep.mubr.msk.bf16.mxu1 %vm36_vm1, %v14862_v15  ;;  %19685 = vst [vmem:[#allocation8_spill] sm:$0xff] %v14885_v34  ;;  %v14067_v45 = vunpack.i.h.bf16 %v14065_v37  ;;  %v14148_v7 = vpack.i.bf16 %v11049_v8, %v11048_v53  ;;  %v772_v13 = vadd.f32 %v14556_v54, %v14846_v48  ;;  %v1502_v37 = vld [vmem:[#allocation2 + $0x3c1] sm:$0xff] }
 0x178   :  { %v14873_v21 = vld [vmem:[#allocation2 + $0x3d0] sm:$0xff]  ;;  %v14881_v29 = vld [vmem:[#allocation2 + $0x3e0] sm:$0xff]  ;;  %v14143_v30 = vpack.i.bf16 %v11045_v10, %v11044_v12  ;;  %v771_v12 = vadd.f32 %v14846_v48, %v14600_v3 }
 0x179   :  { %804 = vrot.lane.b32.xlu0 %v769_v18, %s14207_s29  ;;  %802 = vrot.lane.b32.xlu1 %v768_v19, %s14207_s29  ;;  %1388 = vst.msk [vmem:[#allocation2 + $0x3f1] sm:$0xff] %vm746_vm5, %v14066_v20  ;;  %v14893_v39 = vpack.c.bf16 %v14881_v29, %v14873_v21  ;;  %v1503_v18 = vld [vmem:[#allocation2 + $0x3d1] sm:$0xff] }
 0x17a   :  { %v1237_v25 = vpop.permute.xlu0 %1236  ;;  %v1038_v43 = vpop.permute.xlu1 %1037  ;;  %v14924_v19 = vld [vmem:[#allocation2 + $0x372] sm:$0xff]  ;;  %v14933_v35 = vpack.c.bf16 %v1503_v18, %v1502_v37 }
 0x17b   :  { %19686 = vst [vmem:[#allocation9_spill] sm:$0xff] %v14893_v39  ;;  %1279 = vst.msk [vmem:[#allocation2 + $0x431] sm:$0xff] %vm232_vm2, %v1237_v25 }
 0x17c   :  { %1073 = vst.msk [vmem:[#allocation2 + $0x381] sm:$0xff] %vm232_vm2, %v1038_v43 }
 0x17d   :  { %1186 = vst.msk [vmem:[#allocation2 + $0x381] sm:$0xff] %vm746_vm5, %v14056_v40  ;;  %14139 = vrot.lane.b32.xlu0 %v14138_v24, %s14203_s21  ;;  %14134 = vrot.lane.b32.xlu1 %v14133_v27, %s14203_s21  ;;  %v1436_v27 = vld [vmem:[#allocation2 + $0x391] sm:$0xff] }
 0x17e   :  { %v14075_v6 = vpop.permute.xlu0 %14074  ;;  %11793 = vmatmul.mubr.msk.bf16.gmra.mrb[16].mxu1 %vm36_vm1, %v14903_v51  ;;  %v1231_v63 = vpop.permute.xlu1 %1230 }
 0x17f   :  { %v14076_v60 = vunpack.i.l.bf16 %v14075_v6  ;;  %1276 = vst.msk [vmem:[#allocation2 + $0x401] sm:$0xff] %vm232_vm2, %v1231_v63  ;;  %11796 = vmatprep.mubr.msk.bf16.mxu1 %vm36_vm1, %v14898_v44  ;;  %v14077_v28 = vunpack.i.h.bf16 %v14075_v6 }
 0x180   :  { %1389 = vst.msk [vmem:[#allocation2 + $0x401] sm:$0xff] %vm746_vm5, %v14067_v45  ;;  %v775_v45 = vadd.f32 %v14846_v48, %v14539_v49  ;;  %v14946_v53 = vld [vmem:[#allocation2 + $0x3f0] sm:$0xff]  ;;  %v11141_v49 = vld [vmem:[%s19482_s1 + $0x60] sm:$0xff]  }
 0x181   :  { %1392 = vst.msk [vmem:[#allocation2 + $0x431] sm:$0xff] %vm746_vm5, %v14076_v60  ;;  %812 = vrot.lane.b32.xlu0 %v773_v0, %s14207_s29  ;;  %806 = vrot.lane.b32.xlu1 %v770_v1, %s14207_s29  ;;  %v1505_v63 = vld [vmem:[#allocation2 + $0x3f1] sm:$0xff]  ;;  %v11142_v0 = vld [vmem:[%s19482_s1 + $0x68] sm:$0xff]  }
 0x182   :  { %v1243_v47 = vpop.permute.xlu0 %1242  ;;  %v14070_v57 = vpop.permute.xlu1 %14069 }
 0x183   :  { %1282 = vst.msk [vmem:[#allocation2 + $0x481] sm:$0xff] %vm232_vm2, %v1243_v47  ;;  %v14071_v20 = vunpack.i.l.bf16 %v14070_v57  ;;  %v14072_v6 = vunpack.i.h.bf16 %v14070_v57  ;;  %v1504_v47 = vld [vmem:[#allocation2 + $0x3e1] sm:$0xff]  ;;  %v11052_v57 = vunpack.c.l.bf16 %v11141_v49 }
 0x184   :  { %v1435_v24 = vld [vmem:[#allocation2 + $0x381] sm:$0xff]  ;;  %v14973_v18 = vpack.c.bf16 %v1505_v63, %v1504_v47 }
 0x185   :  { %v14926_v42 = vld [vmem:[#allocation2 + $0x382] sm:$0xff]  ;;  %14149 = vrot.lane.b32.xlu0 %v14148_v7, %s14203_s21  ;;  %810 = vrot.lane.b32.xlu1 %v772_v13, %s14207_s29  ;;  %v14930_v25 = vpack.c.bf16 %v1436_v27, %v1435_v24  ;;  %1390 = vst.msk [vmem:[#allocation2 + $0x411] sm:$0xff] %vm746_vm5, %v14071_v20  ;;  %v774_v7 = vadd.f32 %v14846_v48, %v14518_v41  ;;  %v11053_v13 = vunpack.c.h.bf16 %v11141_v49  ;;  %v11056_v20 = vunpack.c.l.bf16 %v11142_v0 }
 0x186   :  { %v14080_v54 = vpop.permute.xlu0 %14079  ;;  %v14937_v40 = vpack.c.bf16 %v14926_v42, %v14924_v19  ;;  %v1241_v55 = vpop.permute.xlu1 %1240  ;;  %v11057_v41 = vunpack.c.h.bf16 %v11142_v0  ;;  %v1510_v49 = vld [vmem:[#allocation2 + $0x461] sm:$0xff] }
 0x187   :  { %v14081_v43 = vunpack.i.l.bf16 %v14080_v54  ;;  %11797 = vmatmul.mubr.msk.bf16.gmra.mrb[20].mxu1 %vm36_vm1, %v14930_v25  ;;  %1281 = vst.msk [vmem:[#allocation2 + $0x471] sm:$0xff] %vm232_vm2, %v1241_v55  ;;  %v14948_v8 = vld [vmem:[#allocation2 + $0x400] sm:$0xff]  ;;  %v14082_v37 = vunpack.i.h.bf16 %v14080_v54  ;;  %v777_v54 = vadd.f32 %v14529_v46, %v14846_v48 }
 0x188   :  { %19687 = vst [vmem:[#allocation10_spill] sm:$0xff] %v14937_v40  ;;  %11800 = vmatprep.mubr.msk.bf16.mxu1 %vm36_vm1, %v14933_v35  ;;  %1394 = vst.msk [vmem:[#allocation2 + $0x471] sm:$0xff] %vm746_vm5, %v14077_v28  ;;  %v14959_v59 = vpack.c.bf16 %v14948_v8, %v14946_v53  ;;  %v1506_v10 = vld [vmem:[#allocation2 + $0x401] sm:$0xff]  ;;  %v1509_v63 = vld [vmem:[#allocation2 + $0x431] sm:$0xff] }
 0x189   :  { %1395 = vst.msk [vmem:[#allocation2 + $0x481] sm:$0xff] %vm746_vm5, %v14081_v43  ;;  %816 = vrot.lane.b32.xlu0 %v775_v45, %s14207_s29  ;;  %14144 = vrot.lane.b32.xlu1 %v14143_v30, %s14203_s21  ;;  %v776_v30 = vadd.f32 %v14508_v36, %v14846_v48  ;;  %v14158_v36 = vpack.i.bf16 %v11057_v41, %v11056_v20 }
 0x18a   :  { %19688 = vst [vmem:[#allocation11_spill] sm:$0xff] %v14959_v59  ;;  %v1249_v60 = vpop.permute.xlu0 %1248  ;;  %v1235_v1 = vpop.permute.xlu1 %1234 }
 0x18b   :  { %1285 = vst.msk [vmem:[#allocation2 + $0x4b1] sm:$0xff] %vm232_vm2, %v1249_v60  ;;  %1278 = vst.msk [vmem:[#allocation2 + $0x421] sm:$0xff] %vm232_vm2, %v1235_v1 }
 0x18c   :  { %1391 = vst.msk [vmem:[#allocation2 + $0x421] sm:$0xff] %vm746_vm5, %v14072_v6  ;;  %v1507_v24 = vld [vmem:[#allocation2 + $0x411] sm:$0xff]  ;;  %v14153_v6 = vpack.i.bf16 %v11053_v13, %v11052_v57 }
 0x18d   :  { %814 = vrot.lane.b32.xlu1 %v774_v7, %s14207_s29  ;;  %808 = vrot.lane.b32.xlu0 %v771_v12, %s14207_s29  ;;  %v14975_v3 = vpack.c.bf16 %v1507_v24, %v1506_v10  ;;  %v15003_v57 = vld [vmem:[#allocation2 + $0x410] sm:$0xff] }
 0x18e   :  { %v1253_v27 = vpop.permute.xlu0 %1252  ;;  %v1245_v28 = vpop.permute.xlu1 %1244 }
 0x18f   :  { %1287 = vst.msk [vmem:[#allocation2 + $0x4d1] sm:$0xff] %vm232_vm2, %v1253_v27  ;;  %11801 = vmatmul.mubr.msk.bf16.gmra.mrb[24].mxu1 %vm36_vm1, %v14973_v18  ;;  %1283 = vst.msk [vmem:[#allocation2 + $0x491] sm:$0xff] %vm232_vm2, %v1245_v28  ;;  %v1511_v43 = vld [vmem:[#allocation2 + $0x471] sm:$0xff] }
 0x190   :  { %11804 = vmatprep.mubr.msk.bf16.mxu1 %vm36_vm1, %v14975_v3  ;;  %v1512_v55 = vld [vmem:[#allocation2 + $0x481] sm:$0xff]  ;;  %v14987_v45 = vld [vmem:[#allocation2 + $0x470] sm:$0xff]  ;;  %1396 = vst.msk [vmem:[#allocation2 + $0x491] sm:$0xff] %vm746_vm5, %v14082_v37  ;;  %v15001_v47 = vpack.c.bf16 %v1511_v43, %v1510_v49  ;;  %v11144_v27 = vld [vmem:[%s19482_s1 + $0x78] sm:$0xff]  }
 0x191   :  { %818 = vrot.lane.b32.xlu1 %v776_v30, %s14207_s29  ;;  %820 = vrot.lane.b32.xlu0 %v777_v54, %s14207_s29  ;;  %v14992_v60 = vld [vmem:[#allocation2 + $0x480] sm:$0xff]  ;;  %v14994_v46 = vpack.c.bf16 %v1512_v55, %v1511_v43  ;;  %v11143_v37 = vld [vmem:[%s19482_s1 + $0x70] sm:$0xff]   ;;  %v778_v43 = vadd.f32 %v14846_v48, %v14586_v61  ;;  %v11065_v32 = vunpack.c.h.bf16 %v11144_v27 }
 0x192   :  { %v14090_v0 = vpop.permute.xlu0 %14089  ;;  %v14998_v1 = vpack.c.bf16 %v14992_v60, %v14987_v45  ;;  %v1247_v7 = vpop.permute.xlu1 %1246  ;;  %v11061_v61 = vunpack.c.h.bf16 %v11143_v37 }
 0x193   :  { %19689 = vst [vmem:[#allocation12_spill] sm:$0xff] %v14994_v46  ;;  %v14092_v12 = vunpack.i.h.bf16 %v14090_v0  ;;  %1284 = vst.msk [vmem:[#allocation2 + $0x4a1] sm:$0xff] %vm232_vm2, %v1247_v7  ;;  %v1508_v10 = vld [vmem:[#allocation2 + $0x421] sm:$0xff]  ;;  %v14091_v40 = vunpack.i.l.bf16 %v14090_v0 }
 0x194   :  { %19690 = vst [vmem:[#allocation13_spill] sm:$0xff] %v14998_v1  ;;  %v15005_v13 = vld [vmem:[#allocation2 + $0x420] sm:$0xff]  ;;  %v15012_v20 = vpack.c.bf16 %v1509_v63, %v1508_v10  ;;  %v15022_v30 = vpack.c.bf16 %v1508_v10, %v1507_v24  ;;  %v11064_v10 = vunpack.c.l.bf16 %v11144_v27 }
 0x195   :  { %14154 = vrot.lane.b32.xlu1 %v14153_v6, %s14203_s21  ;;  %14159 = vrot.lane.b32.xlu0 %v14158_v36, %s14203_s21  ;;  %1400 = vst.msk [vmem:[#allocation2 + $0x4d1] sm:$0xff] %vm746_vm5, %v14092_v12  ;;  %v15017_v41 = vpack.c.bf16 %v15005_v13, %v15003_v57  ;;  %v781_v6 = vadd.f32 %v14597_v2, %v14846_v48  ;;  %v11060_v12 = vunpack.c.l.bf16 %v11143_v37 }
 0x196   :  { %v14100_v28 = vpop.permute.xlu0 %14099  ;;  %19692 = vst [vmem:[#allocation15_spill] sm:$0xff] %v15022_v30  ;;  %v14085_v54 = vpop.permute.xlu1 %14084 }
 0x197   :  { %19691 = vst [vmem:[#allocation14_spill] sm:$0xff] %v15017_v41  ;;  %11805 = vmatmul.mubr.msk.bf16.gmra.mrb[28].mxu1 %vm36_vm1, %v15012_v20  ;;  %v14102_v36 = vunpack.i.h.bf16 %v14100_v28  ;;  %v14101_v49 = vunpack.i.l.bf16 %v14100_v28  ;;  %v14087_v63 = vunpack.i.h.bf16 %v14085_v54  ;;  %v14086_v7 = vunpack.i.l.bf16 %v14085_v54  ;;  %v1513_v24 = vld [vmem:[#allocation2 + $0x491] sm:$0xff] }
 0x198   :  { %11808 = vmatprep.mubr.msk.bf16.mxu1 %vm36_vm1, %v15001_v47  ;;  %v780_v28 = vadd.f32 %v14568_v56, %v14846_v48  ;;  %v15042_v37 = vpack.c.bf16 %v1513_v24, %v1512_v55 }
 0x199   :  { %822 = vrot.lane.b32.xlu1 %v778_v43, %s14207_s29  ;;  %828 = vrot.lane.b32.xlu0 %v781_v6, %s14207_s29  ;;  %750 = vst.msk [vmem:[#allocation2 + $0x41] sm:$0xff] %vm746_vm5, %v14102_v36  ;;  %749 = vst.msk [vmem:[#allocation2 + $0x31] sm:$0xff] %vm746_vm5, %v14101_v49  ;;  %v779_v43 = vadd.f32 %v14846_v48, %v14606_v5  ;;  %v14163_v6 = vpack.i.bf16 %v11061_v61, %v11060_v12 }
 0x19a   :  { %1398 = vst.msk [vmem:[#allocation2 + $0x4b1] sm:$0xff] %vm746_vm5, %v14087_v63  ;;  %1397 = vst.msk [vmem:[#allocation2 + $0x4a1] sm:$0xff] %vm746_vm5, %v14086_v7  ;;  %v14110_v54 = vpop.permute.xlu0 %14109  ;;  %v1251_v52 = vpop.permute.xlu1 %1250  ;;  %v14168_v36 = vpack.i.bf16 %v11065_v32, %v11064_v10  ;;  %v11113_v32 = vunpack.c.h.bf16 %v14684_v50 }
 0x19b   :  { %v14112_v27 = vunpack.i.h.bf16 %v14110_v54  ;;  %v14111_v0 = vunpack.i.l.bf16 %v14110_v54  ;;  %1286 = vst.msk [vmem:[#allocation2 + $0x4c1] sm:$0xff] %vm232_vm2, %v1251_v52  ;;  %v15052_v52 = vld [vmem:[#allocation2 + $0x490] sm:$0xff] }
 0x19c   :  { %1399 = vst.msk [vmem:[#allocation2 + $0x4c1] sm:$0xff] %vm746_vm5, %v14091_v40  ;;  %v15065_v10 = vld [vmem:[#allocation2 + $0x4d1] sm:$0xff] }
 0x19d   :  { %826 = vrot.lane.b32.xlu1 %v780_v28, %s14207_s29  ;;  %824 = vrot.lane.b32.xlu0 %v779_v43, %s14207_s29  ;;  %753 = vst.msk [vmem:[#allocation2 + $0x71] sm:$0xff] %vm746_vm5, %v14111_v0  ;;  %754 = vst.msk [vmem:[#allocation2 + $0x81] sm:$0xff] %vm746_vm5, %v14112_v27 }
 0x19e   :  { %v14120_v56 = vpop.permute.xlu0 %14119  ;;  %v14095_v5 = vpop.permute.xlu1 %14094  ;;  %19693 = vst [vmem:[#allocation16_spill] sm:$0xff] %v15065_v10 }
 0x19f   :  { %11809 = vmatmul.mubr.msk.bf16.gmra.mrb[32].mxu1 %vm36_vm1, %v15042_v37  ;;  %v14122_v48 = vunpack.i.h.bf16 %v14120_v56  ;;  %v14121_v55 = vunpack.i.l.bf16 %v14120_v56  ;;  %v14097_v49 = vunpack.i.h.bf16 %v14095_v5  ;;  %v14096_v63 = vunpack.i.l.bf16 %v14095_v5 }
 0x1a0   :  { %v15123_v34 = vld [vmem:[#allocation2 + $0x42] sm:$0xff] }
 0x1a1   :  { %14164 = vrot.lane.b32.xlu1 %v14163_v6, %s14203_s21  ;;  %14169 = vrot.lane.b32.xlu0 %v14168_v36, %s14203_s21  ;;  %v1514_v40 = vld [vmem:[#allocation2 + $0x4a1] sm:$0xff]  ;;  %v1515_v7 = vld [vmem:[#allocation2 + $0x4b1] sm:$0xff]  ;;  %758 = vst.msk [vmem:[#allocation2 + $0xe1] sm:$0xff] %vm746_vm5, %v14122_v48  ;;  %757 = vst.msk [vmem:[#allocation2 + $0xd1] sm:$0xff] %vm746_vm5, %v14121_v55  ;;  %v11129_v48 = vunpack.c.h.bf16 %v14721_v14 }
 0x1a2   :  { %v15059_v12 = vld [vmem:[#allocation2 + $0x4a0] sm:$0xff]  ;;  %748 = vst.msk [vmem:[#allocation2 + $0x21] sm:$0xff] %vm746_vm5, %v14097_v49  ;;  %747 = vst.msk [vmem:[#allocation2 + $0x11] sm:$0xff] %vm746_vm5, %v14096_v63  ;;  %v15063_v61 = vpack.c.bf16 %v1515_v7, %v1514_v40  ;;  %v14130_v28 = vpop.permute.xlu0 %14129  ;;  %v15071_v54 = vpack.c.bf16 %v1514_v40, %v1513_v24  ;;  %v14105_v43 = vpop.permute.xlu1 %14104  ;;  %v15073_v6 = vld [vmem:[#allocation2 + $0x4b0] sm:$0xff] }
 0x1a3   :  { %v15069_v50 = vpack.c.bf16 %v15059_v12, %v15052_v52  ;;  %v14132_v27 = vunpack.i.h.bf16 %v14130_v28  ;;  %v14131_v0 = vunpack.i.l.bf16 %v14130_v28  ;;  %v1516_v36 = vld [vmem:[#allocation2 + $0x4c1] sm:$0xff]  ;;  %v14107_v56 = vunpack.i.h.bf16 %v14105_v43  ;;  %19700 = vst [vmem:[#allocation23_spill] sm:$0xff] %v15123_v34 }
 0x1a4   :  { %19695 = vst [vmem:[#allocation18_spill] sm:$0xff] %v15071_v54  ;;  %11812 = vmatprep.mubr.msk.bf16.mxu1 %vm36_vm1, %v15063_v61  ;;  %v14106_v5 = vunpack.i.l.bf16 %v14105_v43  ;;  %v15082_v24 = vpack.c.bf16 %v15065_v10, %v1516_v36  ;;  %v15089_v55 = vld [vmem:[%s19483_s4 + $0x8] sm:$0xf]  ;;  %v15091_v49 = vld [vmem:[#allocation2 + $0x4c0] sm:$0xff]  ;;  %v15093_v63 = vpack.c.bf16 %v1516_v36, %v1515_v7  ;;  %v15105_v43 = vld [vmem:[#allocation2 + $0x32] sm:$0xff] }
 0x1a5   :  { %19694 = vst [vmem:[#allocation17_spill] sm:$0xff] %v15069_v50  ;;  %1238 = vrot.lane.b32.xlu1 %v14633_v16, %s14206_s13  ;;  %1352 = vrot.lane.b32.xlu0 %v11113_v32, %s14203_s21  ;;  %762 = vst.msk [vmem:[#allocation2 + $0x121] sm:$0xff] %vm746_vm5, %v14132_v27  ;;  %v15101_v16 = vpack.c.bf16 %v15091_v49, %v15073_v6  ;;  %v1455_v32 = vld [vmem:[#allocation2 + $0x31] sm:$0xff]  ;;  %v1456_v40 = vld [vmem:[#allocation2 + $0x41] sm:$0xff] }
 0x1a6   :  { %761 = vst.msk [vmem:[#allocation2 + $0x111] sm:$0xff] %vm746_vm5, %v14131_v0  ;;  %19696 = vst [vmem:[#allocation19_spill] sm:$0xff] %v15093_v63  ;;  %14000 = vmatprep.subr.msk.bf16.mxu1 %vm509_vm0, %v15089_v55  ;;  %v14115_v14 = vpop.permute.xlu1 %14114  ;;  %v14189_v27 = vld [vmem:[%s19482_s1 + $0x98] sm:$0xff]   ;;  %v15121_v4 = vpack.c.bf16 %v1456_v40, %v1455_v32 }
 0x1a7   :  { %751 = vst.msk [vmem:[#allocation2 + $0x51] sm:$0xff] %vm746_vm5, %v14106_v5  ;;  %752 = vst.msk [vmem:[#allocation2 + $0x61] sm:$0xff] %vm746_vm5, %v14107_v56  ;;  %11813 = vmatmul.mubr.msk.bf16.gmra.mrb[36].mxu1 %vm36_vm1, %v15082_v24  ;;  %v14117_v28 = vunpack.i.h.bf16 %v14115_v14  ;;  %v14116_v7 = vunpack.i.l.bf16 %v14115_v14  ;;  %v11081_v0 = vunpack.c.h.bf16 %v14189_v27 }
 0x1a8   :  { %19697 = vst [vmem:[#allocation20_spill] sm:$0xff] %v15101_v16  ;;  %19698 = vst [vmem:[#allocation21_spill] sm:$0xff] %v15105_v43  ;;  %v15162_v31 = vld [vmem:[#allocation2 + $0xe2] sm:$0xff] }
 0x1a9   :  { %1254 = vrot.lane.b32.xlu1 %v14637_v17, %s14206_s13  ;;  %1368 = vrot.lane.b32.xlu0 %v11129_v48, %s14203_s21  ;;  %v1453_v36 = vld [vmem:[#allocation2 + $0x11] sm:$0xff]  ;;  %v1454_v56 = vld [vmem:[#allocation2 + $0x21] sm:$0xff]  ;;  %756 = vst.msk [vmem:[#allocation2 + $0xc1] sm:$0xff] %vm746_vm5, %v14117_v28  ;;  %755 = vst.msk [vmem:[#allocation2 + $0xb1] sm:$0xff] %vm746_vm5, %v14116_v7  ;;  %v986_v17 = vadd.f32 %v14588_v62, %v14502_v33 }
 0x1aa   :  { %v15113_v5 = vpack.c.bf16 %v1454_v56, %v1453_v36  ;;  %v15117_v14 = vld [vmem:[#allocation2 + $0x22] sm:$0xff]  ;;  %v14125_v48 = vpop.permute.xlu1 %14124  ;;  %v15129_v56 = vld [vmem:[#allocation2 + $0x72] sm:$0xff]  ;;  %19706 = vst [vmem:[#allocation29_spill] sm:$0xff] %v15162_v31 }
 0x1ab   :  { %19699 = vst [vmem:[#allocation22_spill] sm:$0xff] %v15117_v14  ;;  %v14127_v36 = vunpack.i.h.bf16 %v14125_v48  ;;  %v14126_v28 = vunpack.i.l.bf16 %v14125_v48  ;;  %19701 = vst [vmem:[#allocation24_spill] sm:$0xff] %v15129_v56  ;;  %v14190_v62 = vld [vmem:[%s19482_s1 + $0xb8] sm:$0xff]  }
 0x1ac   :  { %11816 = vmatprep.mubr.msk.bf16.mxu1 %vm36_vm1, %v15113_v5  ;;  %v11097_v32 = vunpack.c.h.bf16 %v14190_v62  ;;  %v1468_v16 = vld [vmem:[#allocation2 + $0x121] sm:$0xff] }
 0x1ad   :  { %1025 = vrot.lane.b32.xlu1 %v986_v17, %s14205_s24  ;;  %1139 = vrot.lane.b32.xlu0 %v11081_v0, %s14203_s21  ;;  %760 = vst.msk [vmem:[#allocation2 + $0x101] sm:$0xff] %vm746_vm5, %v14127_v36  ;;  %759 = vst.msk [vmem:[#allocation2 + $0xf1] sm:$0xff] %vm746_vm5, %v14126_v28  ;;  %v994_v17 = vadd.f32 %v14597_v2, %v14502_v33  ;;  %v1459_v36 = vld [vmem:[#allocation2 + $0x71] sm:$0xff]  ;;  %v1460_v28 = vld [vmem:[#allocation2 + $0x81] sm:$0xff] }
 0x1ae   :  { %v1457_v40 = vld [vmem:[#allocation2 + $0x51] sm:$0xff]  ;;  %v1458_v7 = vld [vmem:[#allocation2 + $0x61] sm:$0xff]  ;;  %v15160_v2 = vpack.c.bf16 %v1460_v28, %v1459_v36 }
 0x1af   :  { %v15136_v11 = vld [vmem:[#allocation2 + $0x52] sm:$0xff]  ;;  %v15140_v48 = vpack.c.bf16 %v1458_v7, %v1457_v40  ;;  %v15142_v27 = vld [vmem:[#allocation2 + $0x62] sm:$0xff]  ;;  %11817 = vmatmul.mubr.msk.bf16.gmra.mrb[40].mxu1 %vm36_vm1, %v15121_v4 }
 0x1b0   :  { %19702 = vst [vmem:[#allocation25_spill] sm:$0xff] %v15136_v11  ;;  %19703 = vst [vmem:[#allocation26_spill] sm:$0xff] %v15142_v27  ;;  %v15154_v40 = vld [vmem:[#allocation2 + $0xd2] sm:$0xff]  ;;  %v1462_v0 = vld [vmem:[#allocation2 + $0xc1] sm:$0xff] }
 0x1b1   :  { %11820 = vmatprep.mubr.msk.bf16.mxu1 %vm36_vm1, %v15140_v48  ;;  %19704 = vst [vmem:[#allocation27_spill] sm:$0xff] %v15154_v40  ;;  %1041 = vrot.lane.b32.xlu1 %v994_v17, %s14205_s24  ;;  %v1461_v7 = vld [vmem:[#allocation2 + $0xb1] sm:$0xff]  ;;  %v15158_v33 = vld [vmem:[#allocation2 + $0xc2] sm:$0xff] }
 0x1b2   :  { %1155 = vrot.lane.b32.xlu0 %v11097_v32, %s14203_s21  ;;  %19705 = vst [vmem:[#allocation28_spill] sm:$0xff] %v15158_v33  ;;  %v15166_v10 = vpack.c.bf16 %v1462_v0, %v1461_v7  ;;  %v15168_v63 = vld [vmem:[#allocation2 + $0x112] sm:$0xff]  ;;  %v1464_v28 = vld [vmem:[#allocation2 + $0xe1] sm:$0xff] }
 0x1b3   :  { %19707 = vst [vmem:[#allocation30_spill] sm:$0xff] %v15168_v63  ;;  %v1463_v0 = vld [vmem:[#allocation2 + $0xd1] sm:$0xff] }
 0x1b4   :  { %v15170_v54 = vld [vmem:[#allocation2 + $0xf2] sm:$0xff]  ;;  %v15172_v17 = vld [vmem:[#allocation2 + $0x102] sm:$0xff]  ;;  %v15182_v46 = vpack.c.bf16 %v1464_v28, %v1463_v0 }
 0x1b5   :  { %19708 = vst [vmem:[#allocation31_spill] sm:$0xff] %v15170_v54  ;;  %19709 = vst [vmem:[#allocation32_spill] sm:$0xff] %v15172_v17  ;;  %v1465_v7 = vld [vmem:[#allocation2 + $0xf1] sm:$0xff]  ;;  %v1466_v62 = vld [vmem:[#allocation2 + $0x101] sm:$0xff] }
 0x1b6   :  { %v15184_v30 = vpack.c.bf16 %v1466_v62, %v1465_v7  ;;  %v1467_v32 = vld [vmem:[#allocation2 + $0x111] sm:$0xff] }
 0x1b7   :  { %11821 = vmatmul.mubr.msk.bf16.gmra.mrb[44].mxu1 %vm36_vm1, %v15160_v2  ;;  %v15190_v36 = vpack.c.bf16 %v1468_v16, %v1467_v32 }
 0x1b8   :  { %11824 = vmatprep.mubr.msk.bf16.mxu1 %vm36_vm1, %v15166_v10 }
 0x1bf   :  { %11825 = vmatmul.mubr.msk.bf16.gmra.mrb[48].mxu1 %vm36_vm1, %v15182_v46 }
 0x1c0   :  { %11828 = vmatprep.mubr.msk.bf16.mxu1 %vm36_vm1, %v15184_v30 }
 0x1c7   :  { %11829 = vmatmul.mubr.msk.bf16.gmra.mrb[52].mxu1 %vm36_vm1, %v15190_v36 }
 0x1e7   :  { %v801_v50 = vpop.permute.xlu0 %800  ;;  %v799_v1 = vpop.permute.xlu1 %798 }
 0x1e8   :  { %848 = vst.msk [vmem:[#allocation2 + $0x161] sm:$0xff] %vm232_vm2, %v801_v50  ;;  %847 = vst.msk [vmem:[#allocation2 + $0x151] sm:$0xff] %vm232_vm2, %v799_v1 }
 0x1eb   :  { %v805_v62 = vpop.permute.xlu0 %804  ;;  %v803_v0 = vpop.permute.xlu1 %802 }
 0x1ec   :  { %850 = vst.msk [vmem:[#allocation2 + $0x181] sm:$0xff] %vm232_vm2, %v805_v62  ;;  %849 = vst.msk [vmem:[#allocation2 + $0x171] sm:$0xff] %vm232_vm2, %v803_v0 }
 0x1ef   :  { %v14140_v28 = vpop.permute.xlu0 %14139  ;;  %v14135_v7 = vpop.permute.xlu1 %14134 }
 0x1f0   :  { %v14142_v41 = vunpack.i.h.bf16 %v14140_v28  ;;  %v14141_v16 = vunpack.i.l.bf16 %v14140_v28  ;;  %v14137_v32 = vunpack.i.h.bf16 %v14135_v7  ;;  %v14136_v59 = vunpack.i.l.bf16 %v14135_v7 }
 0x1f2   :  { %963 = vst.msk [vmem:[#allocation2 + $0x181] sm:$0xff] %vm746_vm5, %v14142_v41  ;;  %962 = vst.msk [vmem:[#allocation2 + $0x171] sm:$0xff] %vm746_vm5, %v14141_v16 }
 0x1f3   :  { %961 = vst.msk [vmem:[#allocation2 + $0x161] sm:$0xff] %vm746_vm5, %v14137_v32  ;;  %960 = vst.msk [vmem:[#allocation2 + $0x151] sm:$0xff] %vm746_vm5, %v14136_v59  ;;  %v813_v1 = vpop.permute.xlu0 %812  ;;  %v807_v50 = vpop.permute.xlu1 %806 }
 0x1f4   :  { %854 = vst.msk [vmem:[#allocation2 + $0x1c1] sm:$0xff] %vm232_vm2, %v813_v1  ;;  %851 = vst.msk [vmem:[#allocation2 + $0x191] sm:$0xff] %vm232_vm2, %v807_v50 }
 0x1f7   :  { %v14150_v62 = vpop.permute.xlu0 %14149  ;;  %v811_v0 = vpop.permute.xlu1 %810 }
 0x1f8   :  { %v14152_v39 = vunpack.i.h.bf16 %v14150_v62  ;;  %v14151_v28 = vunpack.i.l.bf16 %v14150_v62  ;;  %853 = vst.msk [vmem:[#allocation2 + $0x1b1] sm:$0xff] %vm232_vm2, %v811_v0 }
 0x1f9   :  { %v1520_v63 = vld [vmem:[#allocation2 + $0x171] sm:$0xff]  ;;  %v1521_v16 = vld [vmem:[#allocation2 + $0x181] sm:$0xff] }
 0x1fa   :  { %v1518_v7 = vld [vmem:[#allocation2 + $0x151] sm:$0xff]  ;;  %v1519_v41 = vld [vmem:[#allocation2 + $0x161] sm:$0xff]  ;;  %967 = vst.msk [vmem:[#allocation2 + $0x1c1] sm:$0xff] %vm746_vm5, %v14152_v39  ;;  %966 = vst.msk [vmem:[#allocation2 + $0x1b1] sm:$0xff] %vm746_vm5, %v14151_v28  ;;  %v15211_v17 = vpack.c.bf16 %v1521_v16, %v1520_v63 }
 0x1fb   :  { %v15207_v59 = vpack.c.bf16 %v1519_v41, %v1518_v7  ;;  %v15209_v32 = vld [vmem:[#allocation2 + $0x160] sm:$0xff]  ;;  %v817_v1 = vpop.permute.xlu0 %816  ;;  %v14145_v50 = vpop.permute.xlu1 %14144  ;;  %v15213_v54 = vld [vmem:[#allocation2 + $0x170] sm:$0xff] }
 0x1fc   :  { %19711 = vst [vmem:[#allocation34_spill] sm:$0xff] %v15211_v17  ;;  %856 = vst.msk [vmem:[#allocation2 + $0x201] sm:$0xff] %vm232_vm2, %v817_v1  ;;  %v14146_v62 = vunpack.i.l.bf16 %v14145_v50  ;;  %v14147_v0 = vunpack.i.h.bf16 %v14145_v50  ;;  %v15228_v16 = vld [vmem:[#allocation2 + $0x180] sm:$0xff] }
 0x1fd   :  { %19710 = vst [vmem:[#allocation33_spill] sm:$0xff] %v15207_v59  ;;  %11832 = vmatprep.mubr.msk.bf16.mxu1 %vm36_vm1, %v15207_v59 }
 0x1fe   :  { %11833 = vmatmul.mubr.msk.bf16.gmra.mrb[56].mxu1 %vm36_vm1, %v15211_v17  ;;  %964 = vst.msk [vmem:[#allocation2 + $0x191] sm:$0xff] %vm746_vm5, %v14146_v62 }
 0x1ff   :  { %v815_v28 = vpop.permute.xlu1 %814  ;;  %v809_v63 = vpop.permute.xlu0 %808 }
 0x200   :  { %855 = vst.msk [vmem:[#allocation2 + $0x1f1] sm:$0xff] %vm232_vm2, %v815_v28  ;;  %852 = vst.msk [vmem:[#allocation2 + $0x1a1] sm:$0xff] %vm232_vm2, %v809_v63 }
 0x201   :  { %965 = vst.msk [vmem:[#allocation2 + $0x1a1] sm:$0xff] %vm746_vm5, %v14147_v0  ;;  %v1524_v28 = vld [vmem:[#allocation2 + $0x1b1] sm:$0xff]  ;;  %v1525_v31 = vld [vmem:[#allocation2 + $0x1c1] sm:$0xff] }
 0x202   :  { %v15234_v63 = vld [vmem:[#allocation2 + $0x1b0] sm:$0xff] }
 0x203   :  { %v819_v7 = vpop.permute.xlu1 %818  ;;  %v821_v41 = vpop.permute.xlu0 %820 }
 0x204   :  { %857 = vst.msk [vmem:[#allocation2 + $0x211] sm:$0xff] %vm232_vm2, %v819_v7  ;;  %858 = vst.msk [vmem:[#allocation2 + $0x221] sm:$0xff] %vm232_vm2, %v821_v41 }
 0x205   :  { %v15230_v1 = vld [vmem:[#allocation2 + $0x190] sm:$0xff] }
 0x206   :  { %v1522_v7 = vld [vmem:[#allocation2 + $0x191] sm:$0xff] }
 0x207   :  { %v14155_v62 = vpop.permute.xlu1 %14154  ;;  %v14160_v39 = vpop.permute.xlu0 %14159 }
 0x208   :  { %v14157_v0 = vunpack.i.h.bf16 %v14155_v62  ;;  %v14156_v40 = vunpack.i.l.bf16 %v14155_v62  ;;  %v14162_v33 = vunpack.i.h.bf16 %v14160_v39  ;;  %v14161_v56 = vunpack.i.l.bf16 %v14160_v39  ;;  %v1523_v27 = vld [vmem:[#allocation2 + $0x1a1] sm:$0xff] }
 0x209   :  { %v15236_v41 = vld [vmem:[#allocation2 + $0x1a0] sm:$0xff]  ;;  %v15238_v11 = vpack.c.bf16 %v1523_v27, %v1522_v7  ;;  %v15246_v62 = vpack.c.bf16 %v1525_v31, %v1524_v28 }
 0x20a   :  { %969 = vst.msk [vmem:[#allocation2 + $0x201] sm:$0xff] %vm746_vm5, %v14157_v0  ;;  %968 = vst.msk [vmem:[#allocation2 + $0x1f1] sm:$0xff] %vm746_vm5, %v14156_v40 }
 0x20b   :  { %19712 = vst [vmem:[#allocation35_spill] sm:$0xff] %v15238_v11  ;;  %971 = vst.msk [vmem:[#allocation2 + $0x221] sm:$0xff] %vm746_vm5, %v14162_v33  ;;  %v823_v39 = vpop.permute.xlu1 %822  ;;  %v829_v50 = vpop.permute.xlu0 %828  ;;  %11836 = vmatprep.mubr.msk.bf16.mxu1 %vm36_vm1, %v15238_v11 }
 0x20c   :  { %970 = vst.msk [vmem:[#allocation2 + $0x211] sm:$0xff] %vm746_vm5, %v14161_v56  ;;  %19713 = vst [vmem:[#allocation36_spill] sm:$0xff] %v15246_v62  ;;  %11837 = vmatmul.mubr.msk.bf16.gmra.mrb[60].mxu1 %vm36_vm1, %v15246_v62 }
 0x20d   :  { %859 = vst.msk [vmem:[#allocation2 + $0x231] sm:$0xff] %vm232_vm2, %v823_v39  ;;  %862 = vst.msk [vmem:[#allocation2 + $0x261] sm:$0xff] %vm232_vm2, %v829_v50 }
 0x20f   :  { %v827_v27 = vpop.permute.xlu1 %826  ;;  %v825_v40 = vpop.permute.xlu0 %824 }
 0x210   :  { %861 = vst.msk [vmem:[#allocation2 + $0x251] sm:$0xff] %vm232_vm2, %v827_v27  ;;  %860 = vst.msk [vmem:[#allocation2 + $0x241] sm:$0xff] %vm232_vm2, %v825_v40 }
 0x211   :  { %v1526_v31 = vld [vmem:[#allocation2 + $0x1f1] sm:$0xff]  ;;  %v1527_v56 = vld [vmem:[#allocation2 + $0x201] sm:$0xff] }
 0x212   :  { %v15256_v28 = vpack.c.bf16 %v1527_v56, %v1526_v31  ;;  %v1529_v0 = vld [vmem:[#allocation2 + $0x221] sm:$0xff] }
 0x213   :  { %v1528_v33 = vld [vmem:[#allocation2 + $0x211] sm:$0xff]  ;;  %v15258_v7 = vld [vmem:[#allocation2 + $0x200] sm:$0xff]  ;;  %v14165_v39 = vpop.permute.xlu1 %14164  ;;  %v14170_v34 = vpop.permute.xlu0 %14169 }
 0x214   :  { %19714 = vst [vmem:[#allocation37_spill] sm:$0xff] %v15256_v28  ;;  %v15260_v50 = vpack.c.bf16 %v1529_v0, %v1528_v33  ;;  %v15262_v43 = vld [vmem:[#allocation2 + $0x210] sm:$0xff]  ;;  %v14167_v14 = vunpack.i.h.bf16 %v14165_v39  ;;  %v14166_v62 = vunpack.i.l.bf16 %v14165_v39  ;;  %v14172_v11 = vunpack.i.h.bf16 %v14170_v34  ;;  %11840 = vmatprep.mubr.msk.bf16.mxu1 %vm36_vm1, %v15256_v28  ;;  %v1404_v0 = vld [vmem:[#allocation2 + $0x3c0] sm:$0xff] }
 0x215   :  { %v14171_v27 = vunpack.i.l.bf16 %v14170_v34  ;;  %v15277_v39 = vld [vmem:[#allocation2 + $0x220] sm:$0xff] }
 0x216   :  { %19715 = vst [vmem:[#allocation38_spill] sm:$0xff] %v15260_v50  ;;  %11841 = vmatmul.mubr.msk.bf16.gmra.mrb[64].mxu1 %vm36_vm1, %v15260_v50  ;;  %972 = vst.msk [vmem:[#allocation2 + $0x231] sm:$0xff] %vm746_vm5, %v14166_v62 }
 0x217   :  { %973 = vst.msk [vmem:[#allocation2 + $0x241] sm:$0xff] %vm746_vm5, %v14167_v14  ;;  %975 = vst.msk [vmem:[#allocation2 + $0x261] sm:$0xff] %vm746_vm5, %v14172_v11  ;;  %v1239_v31 = vpop.permute.xlu1 %1238  ;;  %v1353_v56 = vpop.permute.xlu0 %1352 }
 0x218   :  { %974 = vst.msk [vmem:[#allocation2 + $0x251] sm:$0xff] %vm746_vm5, %v14171_v27 }
 0x219   :  { %1280 = vst.msk [vmem:[#allocation2 + $0x441] sm:$0xff] %vm232_vm2, %v1239_v31 }
 0x21a   :  { %1393 = vst.msk [vmem:[#allocation2 + $0x441] sm:$0xff] %vm746_vm5, %v1353_v56 }
 0x21b   :  { %v1255_v34 = vpop.permute.xlu1 %1254  ;;  %v1369_v33 = vpop.permute.xlu0 %1368 }
 0x21c   :  { %1288 = vst.msk [vmem:[#allocation2 + $0x4e1] sm:$0xff] %vm232_vm2, %v1255_v34 }
 0x21d   :  { %1401 = vst.msk [vmem:[#allocation2 + $0x4e1] sm:$0xff] %vm746_vm5, %v1369_v33  ;;  %v1530_v14 = vld [vmem:[#allocation2 + $0x231] sm:$0xff]  ;;  %v1469_v33 = vpack.c.bf16 %v14873_v21, %v1404_v0  ;;  %v2376_v21 = vsel %vm509_vm0, %v15089_v55, 0  ;;  %v2731_v0 = vld [vmem:[%s19483_s4 + $0xc] sm:$0xf] }
 0x21e   :  { %v1531_v62 = vld [vmem:[#allocation2 + $0x241] sm:$0xff]  ;;  %v15282_v50 = vld [vmem:[#allocation2 + $0x230] sm:$0xff] }
 0x21f   :  { %v1532_v11 = vld [vmem:[#allocation2 + $0x251] sm:$0xff]  ;;  %v15280_v40 = vpack.c.bf16 %v1531_v62, %v1530_v14  ;;  %v1533_v27 = vld [vmem:[#allocation2 + $0x261] sm:$0xff]  ;;  %v1026_v56 = vpop.permute.xlu1 %1025  ;;  %v1140_v28 = vpop.permute.xlu0 %1139 }
 0x220   :  { %v15284_v31 = vld [vmem:[#allocation2 + $0x240] sm:$0xff]  ;;  %v15286_v17 = vpack.c.bf16 %v1533_v27, %v1532_v11  ;;  %v15288_v34 = vld [vmem:[#allocation2 + $0x250] sm:$0xff]  ;;  %1067 = vst.msk [vmem:[#allocation2 + $0x301] sm:$0xff] %vm232_vm2, %v1026_v56  ;;  %v1470_v27 = vpack.c.bf16 %v14946_v53, %v14881_v29 }
 0x221   :  { %11844 = vmatprep.mubr.msk.bf16.mxu1 %vm36_vm1, %v15280_v40  ;;  %1180 = vst.msk [vmem:[#allocation2 + $0x301] sm:$0xff] %vm746_vm5, %v1140_v28  ;;  %v1471_v28 = vpack.c.bf16 %v15003_v57, %v14948_v8  ;;  %v15316_v56 = vld [vmem:[#allocation2 + $0x430] sm:$0xff]  ;;  %v1412_v29 = vld [vmem:[#allocation2 + $0x460] sm:$0xff]  ;;  %v1474_v8 = vpack.c.bf16 %v15052_v52, %v14992_v60  ;;  %v1475_v57 = vpack.c.bf16 %v15073_v6, %v15059_v12  ;;  %v2829_v6 = vsel %vm509_vm0, %v2731_v0, 0 }
 0x222   :  { %11845 = vmatmul.mubr.msk.bf16.gmra.mrb[68].mxu1 %vm36_vm1, %v15286_v17  ;;  %v1472_v53 = vpack.c.bf16 %v15316_v56, %v15005_v13  ;;  %v1473_v55 = vpack.c.bf16 %v14987_v45, %v1412_v29  ;;  %v1437_v45 = vld [vmem:[#allocation2 + $0x150] sm:$0xff]  ;;  %v15386_v60 = vpack.c.bf16 %v15284_v31, %v15282_v50  ;;  %v15392_v52 = vld [vmem:[#allocation2 + $0x260] sm:$0xff] }
 0x223   :  { %11850 = vmatprep.mubr.msk.bf16.mxu1 %vm36_vm1, %v1469_v33  ;;  %v1042_v62 = vpop.permute.xlu1 %1041  ;;  %v15329_v33 = vld [vmem:[#allocation2 + $0x4d0] sm:$0xff]  ;;  %v15396_v12 = vpack.c.bf16 %v15392_v52, %v15288_v34 }
 0x224   :  { %v1156_v11 = vpop.permute.xlu0 %1155  ;;  %1075 = vst.msk [vmem:[#allocation2 + $0x3a1] sm:$0xff] %vm232_vm2, %v1042_v62  ;;  %v1476_v13 = vpack.c.bf16 %v15329_v33, %v15091_v49  ;;  %v15422_v49 = vld [vmem:[%s19483_s4 + $0x10] sm:$0xf] }
 0x225   :  { %1188 = vst.msk [vmem:[#allocation2 + $0x3a1] sm:$0xff] %vm746_vm5, %v1156_v11  ;;  %v14193_v11 = vld [vmem:[#allocation2 + $0x2a2] sm:$0xff]  ;;  %v14197_v29 = vld [vmem:[#allocation2 + $0x352] sm:$0xff] }
 0x22a   :  { %11851 = vmatmul.mubr.msk.bf16.vlgmr.msra.gmra.mrb[8].mxu1 %vm36_vm1, %v1470_v27  ;;  %v14194_v27 = vld [vmem:[#allocation2 + $0x2c2] sm:$0xff] }
 0x22b   :  { %11915 = vmatpush3.bf16.msra.mxu1 %v2376_v21  ;;  %11854 = vmatprep.mubr.msk.bf16.mxu1 %vm36_vm1, %v1471_v28  ;;  %v14195_v28 = vld [vmem:[#allocation2 + $0x332] sm:$0xff] }
 0x22c   :  { %14001 = vmatprep.subr.msk.bf16.mxu1 %vm509_vm0, %v2731_v0  ;;  %v14196_v0 = vld [vmem:[#allocation2 + $0x342] sm:$0xff] }
 0x232   :  { %11855 = vmatmul.mubr.msk.bf16.gmra.mrb[12].mxu1 %vm36_vm1, %v1472_v53  ;;  %v2316_v53 = vpack.c.bf16 %v14197_v29, %v14196_v0  ;;  %v19729_v0 = vld [vmem:[#allocation28_spill] sm:$0xff] }
 0x233   :  { %11858 = vmatprep.mubr.msk.bf16.mxu1 %vm36_vm1, %v1473_v55 }
 0x23a   :  { %11859 = vmatmul.mubr.msk.bf16.gmra.mrb[16].mxu1 %vm36_vm1, %v1474_v8  ;;  %v15453_v8 = vld [vmem:[#allocation2 + $0x392] sm:$0xff] }
 0x23b   :  { %11862 = vmatprep.mubr.msk.bf16.mxu1 %vm36_vm1, %v1475_v57  ;;  %v19716_v57 = vmov %v15207_v59  ;;  %v19735_v59 = vld [vmem:[#allocation30_spill] sm:$0xff] }
 0x242   :  { %11863 = vmatmul.mubr.msk.bf16.gmra.mrb[20].mxu1 %vm36_vm1, %v1476_v13  ;;  %v19717_v13 = vld [vmem:[#allocation34_spill] sm:$0xff] }
 0x243   :  { %11866 = vmatprep.mubr.msk.bf16.mxu1 %vm36_vm1, %v14804_v58  ;;  %v15349_v58 = vpack.c.bf16 %v15209_v32, %v1437_v45  ;;  %v19718_v45 = vld [vmem:[#allocation35_spill] sm:$0xff] }
 0x24a   :  { %11867 = vmatmul.mubr.msk.bf16.gmra.mrb[24].mxu1 %vm36_vm1, %v14828_v26  ;;  %v15357_v26 = vpack.c.bf16 %v15228_v16, %v15213_v54 }
 0x24b   :  { %11870 = vmatprep.mubr.msk.bf16.mxu1 %vm36_vm1, %v14834_v38  ;;  %v15361_v38 = vpack.c.bf16 %v15236_v41, %v15230_v1 }
 0x252   :  { %11871 = vmatmul.mubr.msk.bf16.gmra.mrb[28].mxu1 %vm36_vm1, %v14860_v9  ;;  %v15367_v9 = vld [vmem:[#allocation2 + $0x1c0] sm:$0xff] }
 0x253   :  { %11874 = vmatprep.mubr.msk.bf16.mxu1 %vm36_vm1, %v14862_v15  ;;  %v1445_v15 = vld [vmem:[#allocation2 + $0x1f0] sm:$0xff] }
 0x25a   :  { %11875 = vmatmul.mubr.msk.bf16.gmra.mrb[32].mxu1 %vm36_vm1, %v14903_v51  ;;  %v15374_v51 = vpack.c.bf16 %v15258_v7, %v1445_v15  ;;  %v19720_v15 = vld [vmem:[#allocation37_spill] sm:$0xff] }
 0x25b   :  { %11878 = vmatprep.mubr.msk.bf16.mxu1 %vm36_vm1, %v14898_v44  ;;  %v15371_v44 = vpack.c.bf16 %v15367_v9, %v15234_v63 }
 0x262   :  { %11879 = vmatmul.mubr.msk.bf16.gmra.mrb[36].mxu1 %vm36_vm1, %v14930_v25  ;;  %v15382_v25 = vpack.c.bf16 %v15277_v39, %v15262_v43 }
 0x263   :  { %11882 = vmatprep.mubr.msk.bf16.mxu1 %vm36_vm1, %v15349_v58 }
 0x26a   :  { %11883 = vmatmul.mubr.msk.bf16.gmra.mrb[40].mxu1 %vm36_vm1, %v15357_v26 }
 0x26b   :  { %11886 = vmatprep.mubr.msk.bf16.mxu1 %vm36_vm1, %v15361_v38 }
 0x272   :  { %11887 = vmatmul.mubr.msk.bf16.gmra.mrb[44].mxu1 %vm36_vm1, %v15371_v44 }
 0x273   :  { %11890 = vmatprep.mubr.msk.bf16.mxu1 %vm36_vm1, %v15374_v51 }
 0x27a   :  { %11891 = vmatmul.mubr.msk.bf16.gmra.mrb[48].mxu1 %vm36_vm1, %v15382_v25 }
 0x27b   :  { %11894 = vmatprep.mubr.msk.bf16.mxu1 %vm36_vm1, %v15386_v60 }
 0x282   :  { %11895 = vmatmul.mubr.msk.bf16.gmra.mrb[52].mxu1 %vm36_vm1, %v15396_v12 }
 0x283   :  { %11898 = vmatprep.mubr.msk.bf16.mxu1 %vm36_vm1, %v15113_v5 }
 0x28a   :  { %11899 = vmatmul.mubr.msk.bf16.gmra.mrb[56].mxu1 %vm36_vm1, %v15121_v4 }
 0x28b   :  { %11902 = vmatprep.mubr.msk.bf16.mxu1 %vm36_vm1, %v15140_v48 }
 0x292   :  { %11903 = vmatmul.mubr.msk.bf16.gmra.mrb[60].mxu1 %vm36_vm1, %v15160_v2 }
 0x293   :  { %11906 = vmatprep.mubr.msk.bf16.mxu1 %vm36_vm1, %v15166_v10 }
 0x29a   :  { %11907 = vmatmul.mubr.msk.bf16.gmra.mrb[64].mxu1 %vm36_vm1, %v15182_v46 }
 0x29b   :  { %11910 = vmatprep.mubr.msk.bf16.mxu1 %vm36_vm1, %v15184_v30 }
 0x2a2   :  { %11911 = vmatmul.mubr.msk.bf16.gmra.mrb[68].mxu1 %vm36_vm1, %v15190_v36 }
 0x2a3   :  { %11916 = vmatprep.mubr.msk.bf16.mxu1 %vm36_vm1, %v14933_v35  ;;  %v2279_v35 = vld [vmem:[#allocation2 + $0x282] sm:$0xff] }
 0x2aa   :  { %11917 = vmatmul.mubr.msk.bf16.vlgmr.msra.gmra.mrb[8].mxu1 %vm36_vm1, %v14973_v18  ;;  %v14191_v18 = vld [vmem:[#allocation2 + $0x292] sm:$0xff] }
 0x2ab   :  { %11981 = vmatpush3.bf16.msra.mxu1 %v2829_v6  ;;  %11920 = vmatprep.mubr.msk.bf16.mxu1 %vm36_vm1, %v14975_v3  ;;  %v2311_v62 = vpack.c.bf16 %v14191_v18, %v2279_v35  ;;  %v14192_v3 = vld [vmem:[#allocation2 + $0x2b2] sm:$0xff] }
 0x2ac   :  { %14002 = vmatprep.subr.msk.bf16.mxu1 %vm509_vm0, %v15422_v49  ;;  %v19721_v6 = vld [vmem:[#allocation38_spill] sm:$0xff] }
 0x2ad   :  { %v19722_v35 = vld [vmem:[#allocation22_spill] sm:$0xff] }
 0x2b2   :  { %11921 = vmatmul.mubr.msk.bf16.gmra.mrb[12].mxu1 %vm36_vm1, %v15012_v20  ;;  %v2312_v20 = vpack.c.bf16 %v14192_v3, %v14193_v11  ;;  %v19724_v3 = vld [vmem:[#allocation23_spill] sm:$0xff] }
 0x2b3   :  { %11924 = vmatprep.mubr.msk.bf16.mxu1 %vm36_vm1, %v15001_v47  ;;  %v2313_v47 = vpack.c.bf16 %v14875_v22, %v14194_v27  ;;  %v14198_v22 = vld [vmem:[#allocation2 + $0x362] sm:$0xff]  ;;  %v19726_v27 = vld [vmem:[#allocation26_spill] sm:$0xff] }
 0x2b4   :  { %v2317_v55 = vpack.c.bf16 %v14924_v19, %v14198_v22  ;;  %v19719_v19 = vld [vmem:[#allocation36_spill] sm:$0xff]  ;;  %v19731_v22 = vld [vmem:[#allocation29_spill] sm:$0xff] }
 0x2ba   :  { %11925 = vmatmul.mubr.msk.bf16.gmra.mrb[16].mxu1 %vm36_vm1, %v15042_v37  ;;  %v2287_v37 = vld [vmem:[#allocation2 + $0x322] sm:$0xff] }
 0x2bb   :  { %11928 = vmatprep.mubr.msk.bf16.mxu1 %vm36_vm1, %v15063_v61  ;;  %v15444_v61 = vld [vmem:[#allocation2 + $0x2f2] sm:$0xff] }
 0x2bc   :  { %v2314_v21 = vpack.c.bf16 %v15444_v61, %v14877_v23  ;;  %v2318_v23 = vpack.c.bf16 %v15453_v8, %v14926_v42  ;;  %v2295_v42 = vld [vmem:[#allocation2 + $0x12] sm:$0xff] }
 0x2bd   :  { %v15473_v18 = vpack.c.bf16 %v19722_v35, %v2295_v42  ;;  %v19733_v42 = vld [vmem:[#allocation32_spill] sm:$0xff] }
 0x2c2   :  { %11929 = vmatmul.mubr.msk.bf16.gmra.mrb[20].mxu1 %vm36_vm1, %v15082_v24  ;;  %v2315_v24 = vpack.c.bf16 %v14195_v28, %v2287_v37  ;;  %v15491_v37 = vld [vmem:[#allocation2 + $0x82] sm:$0xff] }
 0x2c3   :  { %11932 = vmatprep.mubr.msk.bf16.mxu1 %vm36_vm1, %v2311_v62  ;;  %v19723_v62 = vld [vmem:[#allocation21_spill] sm:$0xff]  ;;  %19727 = vst [vmem:[#allocation33_spill] sm:$0xff] %v15491_v37  ;;  %v19728_v28 = vld [vmem:[#allocation24_spill] sm:$0xff] }
 0x2c4   :  { %v15481_v11 = vpack.c.bf16 %v19724_v3, %v19723_v62  ;;  %v2757_v3 = vld [vmem:[#allocation2 + $0x341] sm:$0xff] }
 0x2ca   :  { %11933 = vmatmul.mubr.msk.bf16.gmra.mrb[24].mxu1 %vm36_vm1, %v2312_v20  ;;  %v19725_v20 = vld [vmem:[#allocation25_spill] sm:$0xff] }
 0x2cb   :  { %11936 = vmatprep.mubr.msk.bf16.mxu1 %vm36_vm1, %v2313_v47  ;;  %v15485_v47 = vpack.c.bf16 %v19726_v27, %v19725_v20 }
 0x2d2   :  { %11937 = vmatmul.mubr.msk.bf16.gmra.mrb[28].mxu1 %vm36_vm1, %v2314_v21  ;;  %v2303_v21 = vld [vmem:[#allocation2 + $0xb2] sm:$0xff] }
 0x2d3   :  { %11940 = vmatprep.mubr.msk.bf16.mxu1 %vm36_vm1, %v2315_v24  ;;  %v15495_v24 = vpack.c.bf16 %v15491_v37, %v19728_v28  ;;  %v15498_v29 = vpack.c.bf16 %v19729_v0, %v2303_v21  ;;  %v15516_v21 = vld [vmem:[#allocation2 + $0x122] sm:$0xff]  ;;  %v2750_v37 = vld [vmem:[#allocation2 + $0x2b1] sm:$0xff] }
 0x2d4   :  { %19734 = vst [vmem:[#allocation34_spill] sm:$0xff] %v15516_v21  ;;  %v15520_v0 = vpack.c.bf16 %v15516_v21, %v19735_v59  ;;  %v2749_v21 = vld [vmem:[#allocation2 + $0x2a1] sm:$0xff] }
 0x2da   :  { %11941 = vmatmul.mubr.msk.bf16.gmra.mrb[32].mxu1 %vm36_vm1, %v2316_v53  ;;  %v19730_v53 = vld [vmem:[#allocation27_spill] sm:$0xff] }
 0x2db   :  { %11944 = vmatprep.mubr.msk.bf16.mxu1 %vm36_vm1, %v2317_v55  ;;  %v15506_v55 = vpack.c.bf16 %v19731_v22, %v19730_v53  ;;  %v15531_v22 = vld [vmem:[%s19483_s4 + $0x14] sm:$0xf]  ;;  %v2753_v53 = vld [vmem:[#allocation2 + $0x2e1] sm:$0xff] }
 0x2e2   :  { %11945 = vmatmul.mubr.msk.bf16.gmra.mrb[36].mxu1 %vm36_vm1, %v2318_v23  ;;  %v19732_v23 = vld [vmem:[#allocation31_spill] sm:$0xff] }
 0x2e3   :  { %11948 = vmatprep.mubr.msk.bf16.mxu1 %vm36_vm1, %v19716_v57  ;;  %v15510_v14 = vpack.c.bf16 %v19733_v42, %v19732_v23  ;;  %v3234_v42 = vsel %vm509_vm0, %v15422_v49, 0  ;;  %v2747_v49 = vld [vmem:[#allocation2 + $0x4e0] sm:$0xff]  ;;  %v2752_v23 = vld [vmem:[#allocation2 + $0x2d1] sm:$0xff] }
 0x2e4   :  { %v15583_v59 = vpack.c.bf16 %v2747_v49, %v15329_v33  ;;  %v15593_v28 = vpack.c.bf16 %v2753_v53, %v2752_v23  ;;  %v2755_v33 = vld [vmem:[#allocation2 + $0x301] sm:$0xff]  ;;  %v2754_v49 = vld [vmem:[#allocation2 + $0x2f1] sm:$0xff] }
 0x2e5   :  { %v2760_v53 = vld [vmem:[#allocation2 + $0x371] sm:$0xff]  ;;  %v2761_v23 = vld [vmem:[#allocation2 + $0x381] sm:$0xff] }
 0x2e6   :  { %v15609_v62 = vpack.c.bf16 %v2761_v23, %v2760_v53  ;;  %v19743_v23 = vld [vmem:[#allocation12_spill] sm:$0xff] }
 0x2ea   :  { %11949 = vmatmul.mubr.msk.bf16.gmra.mrb[40].mxu1 %vm36_vm1, %v19717_v13 }
 0x2eb   :  { %11952 = vmatprep.mubr.msk.bf16.mxu1 %vm36_vm1, %v19718_v45 }
 0x2f2   :  { %11953 = vmatmul.mubr.msk.bf16.gmra.mrb[44].mxu1 %vm36_vm1, %v19719_v19 }
 0x2f3   :  { %11956 = vmatprep.mubr.msk.bf16.mxu1 %vm36_vm1, %v19720_v15 }
 0x2fa   :  { %11957 = vmatmul.mubr.msk.bf16.gmra.mrb[48].mxu1 %vm36_vm1, %v19721_v6 }
 0x2fb   :  { %11960 = vmatprep.mubr.msk.bf16.mxu1 %vm36_vm1, %v15280_v40 }
 0x302   :  { %11961 = vmatmul.mubr.msk.bf16.gmra.mrb[52].mxu1 %vm36_vm1, %v15286_v17 }
 0x303   :  { %11964 = vmatprep.mubr.msk.bf16.mxu1 %vm36_vm1, %v15473_v18 }
 0x30a   :  { %11965 = vmatmul.mubr.msk.bf16.gmra.mrb[56].mxu1 %vm36_vm1, %v15481_v11 }
 0x30b   :  { %11968 = vmatprep.mubr.msk.bf16.mxu1 %vm36_vm1, %v15485_v47 }
 0x312   :  { %11969 = vmatmul.mubr.msk.bf16.gmra.mrb[60].mxu1 %vm36_vm1, %v15495_v24 }
 0x313   :  { %11972 = vmatprep.mubr.msk.bf16.mxu1 %vm36_vm1, %v15498_v29 }
 0x31a   :  { %11973 = vmatmul.mubr.msk.bf16.gmra.mrb[64].mxu1 %vm36_vm1, %v15506_v55 }
 0x31b   :  { %11976 = vmatprep.mubr.msk.bf16.mxu1 %vm36_vm1, %v15510_v14 }
 0x322   :  { %11977 = vmatmul.mubr.msk.bf16.gmra.mrb[68].mxu1 %vm36_vm1, %v15520_v0 }
 0x323   :  { %11982 = vmatprep.mubr.msk.bf16.mxu1 %vm36_vm1, %v15349_v58  ;;  %v19736_v58 = vld [vmem:[#allocation9_spill] sm:$0xff] }
 0x32a   :  { %11983 = vmatmul.mubr.msk.bf16.vlgmr.msra.gmra.mrb[8].mxu1 %vm36_vm1, %v15357_v26  ;;  %v19737_v26 = vld [vmem:[#allocation11_spill] sm:$0xff] }
 0x32b   :  { %12047 = vmatpush3.bf16.msra.mxu1 %v3234_v42  ;;  %11986 = vmatprep.mubr.msk.bf16.mxu1 %vm36_vm1, %v15361_v38  ;;  %v19738_v38 = vld [vmem:[#allocation14_spill] sm:$0xff] }
 0x32c   :  { %14003 = vmatprep.subr.msk.bf16.mxu1 %vm509_vm0, %v15531_v22  ;;  %v2748_v42 = vld [vmem:[#allocation2 + $0x291] sm:$0xff] }
 0x332   :  { %11987 = vmatmul.mubr.msk.bf16.gmra.mrb[12].mxu1 %vm36_vm1, %v15371_v44  ;;  %v2739_v44 = vld [vmem:[#allocation2 + $0x440] sm:$0xff] }
 0x333   :  { %11990 = vmatprep.mubr.msk.bf16.mxu1 %vm36_vm1, %v15374_v51  ;;  %v15572_v51 = vpack.c.bf16 %v2739_v44, %v15316_v56  ;;  %v15585_v56 = vpack.c.bf16 %v2749_v21, %v2748_v42  ;;  %v2751_v44 = vld [vmem:[#allocation2 + $0x2c1] sm:$0xff]  ;;  %v2756_v21 = vld [vmem:[#allocation2 + $0x331] sm:$0xff]  ;;  %v15599_v42 = vpack.c.bf16 %v2755_v33, %v2754_v49  ;;  %v3639_v49 = vsel %vm509_vm0, %v15531_v22, 0 }
 0x334   :  { %v15591_v27 = vpack.c.bf16 %v2751_v44, %v2750_v37  ;;  %v15601_v20 = vpack.c.bf16 %v2757_v3, %v2756_v21  ;;  %v2759_v37 = vld [vmem:[#allocation2 + $0x361] sm:$0xff]  ;;  %v2758_v44 = vld [vmem:[#allocation2 + $0x351] sm:$0xff] }
 0x335   :  { %v15607_v35 = vpack.c.bf16 %v2759_v37, %v2758_v44  ;;  %v2763_v3 = vld [vmem:[#allocation2 + $0x3a1] sm:$0xff]  ;;  %v2762_v33 = vld [vmem:[#allocation2 + $0x391] sm:$0xff] }
 0x336   :  { %v15615_v21 = vpack.c.bf16 %v2763_v3, %v2762_v33  ;;  %v3994_v37 = vld [vmem:[%s19483_s4 + $0x18] sm:$0xf]  ;;  %v19744_v44 = vld [vmem:[#allocation18_spill] sm:$0xff]  ;;  %v3200_v33 = vld [vmem:[#allocation2 + $0x4e1] sm:$0xff] }
 0x337   :  { %v14200_v22 = vld [vmem:[#allocation2 + $0x431] sm:$0xff] }
 0x338   :  { %v19745_v3 = vld [vmem:[#allocation19_spill] sm:$0xff] }
 0x33a   :  { %11991 = vmatmul.mubr.msk.bf16.gmra.mrb[16].mxu1 %vm36_vm1, %v15382_v25  ;;  %v19739_v25 = vld [vmem:[#allocation13_spill] sm:$0xff] }
 0x33b   :  { %11994 = vmatprep.mubr.msk.bf16.mxu1 %vm36_vm1, %v15386_v60  ;;  %v19740_v60 = vld [vmem:[#allocation17_spill] sm:$0xff] }
 0x342   :  { %11995 = vmatmul.mubr.msk.bf16.gmra.mrb[20].mxu1 %vm36_vm1, %v15396_v12  ;;  %v19741_v12 = vld [vmem:[#allocation20_spill] sm:$0xff] }
 0x343   :  { %11998 = vmatprep.mubr.msk.bf16.mxu1 %vm36_vm1, %v15113_v5 }
 0x34a   :  { %11999 = vmatmul.mubr.msk.bf16.gmra.mrb[24].mxu1 %vm36_vm1, %v15121_v4 }
 0x34b   :  { %12002 = vmatprep.mubr.msk.bf16.mxu1 %vm36_vm1, %v15140_v48 }
 0x352   :  { %12003 = vmatmul.mubr.msk.bf16.gmra.mrb[28].mxu1 %vm36_vm1, %v15160_v2 }
 0x353   :  { %12006 = vmatprep.mubr.msk.bf16.mxu1 %vm36_vm1, %v15166_v10 }
 0x35a   :  { %12007 = vmatmul.mubr.msk.bf16.gmra.mrb[32].mxu1 %vm36_vm1, %v15182_v46 }
 0x35b   :  { %12010 = vmatprep.mubr.msk.bf16.mxu1 %vm36_vm1, %v15184_v30 }
 0x362   :  { %12011 = vmatmul.mubr.msk.bf16.gmra.mrb[36].mxu1 %vm36_vm1, %v15190_v36 }
 0x363   :  { %12014 = vmatprep.mubr.msk.bf16.mxu1 %vm36_vm1, %v19736_v58 }
 0x36a   :  { %12015 = vmatmul.mubr.msk.bf16.gmra.mrb[40].mxu1 %vm36_vm1, %v19737_v26 }
 0x36b   :  { %12018 = vmatprep.mubr.msk.bf16.mxu1 %vm36_vm1, %v19738_v38 }
 0x372   :  { %12019 = vmatmul.mubr.msk.bf16.gmra.mrb[44].mxu1 %vm36_vm1, %v15572_v51 }
 0x373   :  { %12022 = vmatprep.mubr.msk.bf16.mxu1 %vm36_vm1, %v19739_v25 }
 0x37a   :  { %12023 = vmatmul.mubr.msk.bf16.gmra.mrb[48].mxu1 %vm36_vm1, %v19740_v60 }
 0x37b   :  { %12026 = vmatprep.mubr.msk.bf16.mxu1 %vm36_vm1, %v19741_v12 }
 0x382   :  { %12027 = vmatmul.mubr.msk.bf16.gmra.mrb[52].mxu1 %vm36_vm1, %v15583_v59 }
 0x383   :  { %12030 = vmatprep.mubr.msk.bf16.mxu1 %vm36_vm1, %v15585_v56 }
 0x38a   :  { %12031 = vmatmul.mubr.msk.bf16.gmra.mrb[56].mxu1 %vm36_vm1, %v15591_v27 }
 0x38b   :  { %12034 = vmatprep.mubr.msk.bf16.mxu1 %vm36_vm1, %v15593_v28 }
 0x392   :  { %12035 = vmatmul.mubr.msk.bf16.gmra.mrb[60].mxu1 %vm36_vm1, %v15599_v42 }
 0x393   :  { %12038 = vmatprep.mubr.msk.bf16.mxu1 %vm36_vm1, %v15601_v20 }
 0x39a   :  { %12039 = vmatmul.mubr.msk.bf16.gmra.mrb[64].mxu1 %vm36_vm1, %v15607_v35 }
 0x39b   :  { %12042 = vmatprep.mubr.msk.bf16.mxu1 %vm36_vm1, %v15609_v62 }
 0x3a2   :  { %12043 = vmatmul.mubr.msk.bf16.gmra.mrb[68].mxu1 %vm36_vm1, %v15615_v21 }
 0x3a3   :  { %12048 = vmatprep.mubr.msk.bf16.mxu1 %vm36_vm1, %v15113_v5  ;;  %v14199_v5 = vld [vmem:[#allocation2 + $0x401] sm:$0xff] }
 0x3aa   :  { %12049 = vmatmul.mubr.msk.bf16.vlgmr.msra.gmra.mrb[8].mxu1 %vm36_vm1, %v15121_v4  ;;  %v3185_v4 = vld [vmem:[#allocation2 + $0x3d1] sm:$0xff] }
 0x3ab   :  { %12113 = vmatpush3.bf16.msra.mxu1 %v3639_v49  ;;  %12052 = vmatprep.mubr.msk.bf16.mxu1 %vm36_vm1, %v15140_v48  ;;  %v19746_v49 = vld [vmem:[#allocation16_spill] sm:$0xff] }
 0x3ac   :  { %14004 = vmatprep.subr.msk.bf16.mxu1 %vm509_vm0, %v3994_v37 }
 0x3b2   :  { %12053 = vmatmul.mubr.msk.bf16.gmra.mrb[12].mxu1 %vm36_vm1, %v15160_v2  ;;  %v19742_v2 = vld [vmem:[#allocation15_spill] sm:$0xff] }
 0x3b3   :  { %12056 = vmatprep.mubr.msk.bf16.mxu1 %vm36_vm1, %v15166_v10  ;;  %v3187_v10 = vld [vmem:[#allocation2 + $0x3f1] sm:$0xff] }
 0x3b4   :  { %v15677_v48 = vpack.c.bf16 %v14199_v5, %v3187_v10  ;;  %v4449_v10 = vld [vmem:[%s19483_s4 + $0x1c] sm:$0xf] }
 0x3ba   :  { %12057 = vmatmul.mubr.msk.bf16.gmra.mrb[16].mxu1 %vm36_vm1, %v15182_v46  ;;  %v3186_v46 = vld [vmem:[#allocation2 + $0x3e1] sm:$0xff] }
 0x3bb   :  { %12060 = vmatprep.mubr.msk.bf16.mxu1 %vm36_vm1, %v15184_v30  ;;  %v15671_v30 = vpack.c.bf16 %v3186_v46, %v3185_v4  ;;  %v15694_v4 = vpack.c.bf16 %v3200_v33, %v19746_v49  ;;  %v4094_v46 = vsel %vm509_vm0, %v3994_v37, 0  ;;  %v4026_v37 = vld [vmem:[#allocation2 + $0x111] sm:$0xff] }
 0x3bc   :  { %v4028_v33 = vld [vmem:[#allocation2 + $0x131] sm:$0xff] }
 0x3c2   :  { %12061 = vmatmul.mubr.msk.bf16.gmra.mrb[20].mxu1 %vm36_vm1, %v15190_v36  ;;  %v3192_v36 = vld [vmem:[#allocation2 + $0x441] sm:$0xff] }
 0x3c3   :  { %12064 = vmatprep.mubr.msk.bf16.mxu1 %vm36_vm1, %v19716_v57  ;;  %v15683_v53 = vpack.c.bf16 %v3192_v36, %v14200_v22  ;;  %v4027_v22 = vld [vmem:[#allocation2 + $0x121] sm:$0xff] }
 0x3c4   :  { %v4044_v49 = vpack.c.bf16 %v4028_v33, %v4027_v22 }
 0x3ca   :  { %12065 = vmatmul.mubr.msk.bf16.gmra.mrb[24].mxu1 %vm36_vm1, %v19717_v13 }
 0x3cb   :  { %12068 = vmatprep.mubr.msk.bf16.mxu1 %vm36_vm1, %v19718_v45 }
 0x3d2   :  { %12069 = vmatmul.mubr.msk.bf16.gmra.mrb[28].mxu1 %vm36_vm1, %v19719_v19 }
 0x3d3   :  { %12072 = vmatprep.mubr.msk.bf16.mxu1 %vm36_vm1, %v19720_v15 }
 0x3da   :  { %12073 = vmatmul.mubr.msk.bf16.gmra.mrb[32].mxu1 %vm36_vm1, %v19721_v6 }
 0x3db   :  { %12076 = vmatprep.mubr.msk.bf16.mxu1 %vm36_vm1, %v15280_v40 }
 0x3e2   :  { %12077 = vmatmul.mubr.msk.bf16.gmra.mrb[36].mxu1 %vm36_vm1, %v15286_v17 }
 0x3e3   :  { %12080 = vmatprep.mubr.msk.bf16.mxu1 %vm36_vm1, %v15585_v56 }
 0x3ea   :  { %12081 = vmatmul.mubr.msk.bf16.gmra.mrb[40].mxu1 %vm36_vm1, %v15591_v27 }
 0x3eb   :  { %12084 = vmatprep.mubr.msk.bf16.mxu1 %vm36_vm1, %v15593_v28 }
 0x3f2   :  { %12085 = vmatmul.mubr.msk.bf16.gmra.mrb[44].mxu1 %vm36_vm1, %v15599_v42 }
 0x3f3   :  { %12088 = vmatprep.mubr.msk.bf16.mxu1 %vm36_vm1, %v15601_v20 }
 0x3fa   :  { %12089 = vmatmul.mubr.msk.bf16.gmra.mrb[48].mxu1 %vm36_vm1, %v15607_v35 }
 0x3fb   :  { %12092 = vmatprep.mubr.msk.bf16.mxu1 %vm36_vm1, %v15609_v62 }
 0x402   :  { %12093 = vmatmul.mubr.msk.bf16.gmra.mrb[52].mxu1 %vm36_vm1, %v15615_v21 }
 0x403   :  { %12096 = vmatprep.mubr.msk.bf16.mxu1 %vm36_vm1, %v15671_v30 }
 0x40a   :  { %12097 = vmatmul.mubr.msk.bf16.gmra.mrb[56].mxu1 %vm36_vm1, %v15677_v48 }
 0x40b   :  { %12100 = vmatprep.mubr.msk.bf16.mxu1 %vm36_vm1, %v19742_v2 }
 0x412   :  { %12101 = vmatmul.mubr.msk.bf16.gmra.mrb[60].mxu1 %vm36_vm1, %v15683_v53 }
 0x413   :  { %12104 = vmatprep.mubr.msk.bf16.mxu1 %vm36_vm1, %v19743_v23 }
 0x41a   :  { %12105 = vmatmul.mubr.msk.bf16.gmra.mrb[64].mxu1 %vm36_vm1, %v19744_v44 }
 0x41b   :  { %12108 = vmatprep.mubr.msk.bf16.mxu1 %vm36_vm1, %v19745_v3 }
 0x422   :  { %12109 = vmatmul.mubr.msk.bf16.gmra.mrb[68].mxu1 %vm36_vm1, %v15694_v4 }
 0x423   :  { %12114 = vmatprep.mubr.msk.bf16.mxu1 %vm36_vm1, %v19716_v57  ;;  %v3597_v57 = vld [vmem:[#allocation2 + $0x302] sm:$0xff] }
 0x42a   :  { %12115 = vmatmul.mubr.msk.bf16.vlgmr.msra.gmra.mrb[8].mxu1 %vm36_vm1, %v19717_v13  ;;  %v15758_v13 = vpack.c.bf16 %v3597_v57, %v15444_v61  ;;  %v4499_v61 = vsel %vm509_vm0, %v4449_v10, 0  ;;  %v4456_v57 = vld [vmem:[#allocation2 + $0x1c1] sm:$0xff] }
 0x42b   :  { %12179 = vmatpush3.bf16.msra.mxu1 %v4094_v46  ;;  %12118 = vmatprep.mubr.msk.bf16.mxu1 %vm36_vm1, %v19718_v45  ;;  %v19750_v45 = vld [vmem:[#allocation4_spill] sm:$0xff] }
 0x42c   :  { %14005 = vmatprep.subr.msk.bf16.mxu1 %vm509_vm0, %v4449_v10 }
 0x432   :  { %12119 = vmatmul.mubr.msk.bf16.gmra.mrb[12].mxu1 %vm36_vm1, %v19719_v19  ;;  %v19751_v19 = vld [vmem:[#allocation7_spill] sm:$0xff] }
 0x433   :  { %12122 = vmatprep.mubr.msk.bf16.mxu1 %vm36_vm1, %v19720_v15  ;;  %v19752_v15 = vld [vmem:[#allocation10_spill] sm:$0xff] }
 0x43a   :  { %12123 = vmatmul.mubr.msk.bf16.gmra.mrb[16].mxu1 %vm36_vm1, %v19721_v6  ;;  %v3605_v6 = vld [vmem:[#allocation2 + $0x3a2] sm:$0xff] }
 0x43b   :  { %12126 = vmatprep.mubr.msk.bf16.mxu1 %vm36_vm1, %v15280_v40  ;;  %v19748_v40 = vld [vmem:[#allocation5_spill] sm:$0xff] }
 0x442   :  { %12127 = vmatmul.mubr.msk.bf16.gmra.mrb[20].mxu1 %vm36_vm1, %v15286_v17  ;;  %v19747_v17 = vld [vmem:[#allocation6_spill] sm:$0xff] }
 0x443   :  { %12130 = vmatprep.mubr.msk.bf16.mxu1 %vm36_vm1, %v15473_v18  ;;  %v15769_v18 = vpack.c.bf16 %v3605_v6, %v15453_v8  ;;  %v19754_v8 = vpack.c.bf16 %v15230_v1, %v15228_v16  ;;  %v19758_v16 = vpack.c.bf16 %v15288_v34, %v15284_v31  ;;  %v4011_v1 = vld [vmem:[#allocation2 + $0x270] sm:$0xff]  ;;  %v4019_v31 = vld [vmem:[#allocation2 + $0x81] sm:$0xff] }
 0x444   :  { %v4020_v34 = vld [vmem:[#allocation2 + $0x91] sm:$0xff] }
 0x445   :  { %v4457_v6 = vld [vmem:[#allocation2 + $0x1d1] sm:$0xff] }
 0x44a   :  { %12131 = vmatmul.mubr.msk.bf16.gmra.mrb[24].mxu1 %vm36_vm1, %v15481_v11  ;;  %v15779_v11 = vld [vmem:[%s19483_s4 + $0x20] sm:$0xf] }
 0x44b   :  { %12134 = vmatprep.mubr.msk.bf16.mxu1 %vm36_vm1, %v15485_v47  ;;  %v19755_v47 = vpack.c.bf16 %v15234_v63, %v15236_v41  ;;  %v4013_v63 = vld [vmem:[#allocation2 + $0x21] sm:$0xff]  ;;  %v4014_v41 = vld [vmem:[#allocation2 + $0x31] sm:$0xff]  ;;  %v4904_v46 = vsel %vm509_vm0, %v15779_v11, 0 }
 0x452   :  { %12135 = vmatmul.mubr.msk.bf16.gmra.mrb[28].mxu1 %vm36_vm1, %v15495_v24  ;;  %v4003_v24 = vld [vmem:[#allocation2 + $0x1d0] sm:$0xff] }
 0x453   :  { %12138 = vmatprep.mubr.msk.bf16.mxu1 %vm36_vm1, %v15498_v29  ;;  %v4037_v29 = vpack.c.bf16 %v4014_v41, %v4013_v63  ;;  %v4465_v63 = vld [vmem:[#allocation2 + $0x271] sm:$0xff] }
 0x45a   :  { %12139 = vmatmul.mubr.msk.bf16.gmra.mrb[32].mxu1 %vm36_vm1, %v15506_v55 }
 0x45b   :  { %12142 = vmatprep.mubr.msk.bf16.mxu1 %vm36_vm1, %v15510_v14  ;;  %v19749_v14 = vld [vmem:[#allocation8_spill] sm:$0xff] }
 0x462   :  { %12143 = vmatmul.mubr.msk.bf16.gmra.mrb[36].mxu1 %vm36_vm1, %v15520_v0  ;;  %v4032_v0 = vpack.c.bf16 %v4003_v24, %v15367_v9  ;;  %v4036_v9 = vpack.c.bf16 %v4011_v1, %v15392_v52  ;;  %v4040_v52 = vpack.c.bf16 %v4020_v34, %v4019_v31  ;;  %v4462_v24 = vld [vmem:[#allocation2 + $0x241] sm:$0xff] }
 0x463   :  { %12146 = vmatprep.mubr.msk.bf16.mxu1 %vm36_vm1, %v15671_v30  ;;  %v4464_v1 = vld [vmem:[#allocation2 + $0x261] sm:$0xff] }
 0x464   :  { %v4473_v41 = vpack.c.bf16 %v4465_v63, %v4464_v1 }
 0x46a   :  { %12147 = vmatmul.mubr.msk.bf16.gmra.mrb[40].mxu1 %vm36_vm1, %v15677_v48 }
 0x46b   :  { %12150 = vmatprep.mubr.msk.bf16.mxu1 %vm36_vm1, %v19742_v2 }
 0x472   :  { %12151 = vmatmul.mubr.msk.bf16.gmra.mrb[44].mxu1 %vm36_vm1, %v15683_v53 }
 0x473   :  { %12154 = vmatprep.mubr.msk.bf16.mxu1 %vm36_vm1, %v19743_v23 }
 0x47a   :  { %12155 = vmatmul.mubr.msk.bf16.gmra.mrb[48].mxu1 %vm36_vm1, %v19744_v44 }
 0x47b   :  { %12158 = vmatprep.mubr.msk.bf16.mxu1 %vm36_vm1, %v19745_v3 }
 0x482   :  { %12159 = vmatmul.mubr.msk.bf16.gmra.mrb[52].mxu1 %vm36_vm1, %v15694_v4 }
 0x483   :  { %12162 = vmatprep.mubr.msk.bf16.mxu1 %vm36_vm1, %v19747_v17 }
 0x48a   :  { %12163 = vmatmul.mubr.msk.bf16.gmra.mrb[56].mxu1 %vm36_vm1, %v19748_v40 }
 0x48b   :  { %12166 = vmatprep.mubr.msk.bf16.mxu1 %vm36_vm1, %v19749_v14 }
 0x492   :  { %12167 = vmatmul.mubr.msk.bf16.gmra.mrb[60].mxu1 %vm36_vm1, %v15758_v13 }
 0x493   :  { %12170 = vmatprep.mubr.msk.bf16.mxu1 %vm36_vm1, %v19750_v45 }
 0x49a   :  { %12171 = vmatmul.mubr.msk.bf16.gmra.mrb[64].mxu1 %vm36_vm1, %v19751_v19 }
 0x49b   :  { %12174 = vmatprep.mubr.msk.bf16.mxu1 %vm36_vm1, %v19752_v15 }
 0x4a2   :  { %12175 = vmatmul.mubr.msk.bf16.gmra.mrb[68].mxu1 %vm36_vm1, %v15769_v18 }
 0x4a3   :  { %12180 = vmatprep.mubr.msk.bf16.mxu1 %vm36_vm1, %v19736_v58 }
 0x4aa   :  { %12181 = vmatmul.mubr.msk.bf16.vlgmr.msra.gmra.mrb[8].mxu1 %vm36_vm1, %v19737_v26  ;;  %v4021_v26 = vld [vmem:[#allocation2 + $0xc1] sm:$0xff] }
 0x4ab   :  { %12245 = vmatpush3.bf16.msra.mxu1 %v4499_v61  ;;  %12184 = vmatprep.mubr.msk.bf16.mxu1 %vm36_vm1, %v19738_v38  ;;  %v4022_v38 = vld [vmem:[#allocation2 + $0xd1] sm:$0xff]  ;;  %v4458_v61 = vld [vmem:[#allocation2 + $0x201] sm:$0xff] }
 0x4ac   :  { %14006 = vmatprep.subr.msk.bf16.mxu1 %vm509_vm0, %v15779_v11  ;;  %v4459_v11 = vld [vmem:[#allocation2 + $0x211] sm:$0xff] }
 0x4b2   :  { %12185 = vmatmul.mubr.msk.bf16.gmra.mrb[12].mxu1 %vm36_vm1, %v15572_v51  ;;  %v4041_v51 = vpack.c.bf16 %v4022_v38, %v4021_v26 }
 0x4b3   :  { %12188 = vmatprep.mubr.msk.bf16.mxu1 %vm36_vm1, %v19739_v25  ;;  %v4023_v25 = vld [vmem:[#allocation2 + $0xe1] sm:$0xff] }
 0x4ba   :  { %12189 = vmatmul.mubr.msk.bf16.gmra.mrb[16].mxu1 %vm36_vm1, %v19740_v60  ;;  %v4024_v60 = vld [vmem:[#allocation2 + $0xf1] sm:$0xff] }
 0x4bb   :  { %12192 = vmatprep.mubr.msk.bf16.mxu1 %vm36_vm1, %v19741_v12  ;;  %v4025_v12 = vld [vmem:[#allocation2 + $0x101] sm:$0xff]  ;;  %v4042_v5 = vpack.c.bf16 %v4024_v60, %v4023_v25 }
 0x4bc   :  { %v4043_v36 = vpack.c.bf16 %v4026_v37, %v4025_v12 }
 0x4c2   :  { %12193 = vmatmul.mubr.msk.bf16.gmra.mrb[20].mxu1 %vm36_vm1, %v15583_v59  ;;  %v19753_v59 = vpack.c.bf16 %v15213_v54, %v15209_v32  ;;  %v19756_v54 = vpack.c.bf16 %v15262_v43, %v15258_v7  ;;  %v19757_v32 = vpack.c.bf16 %v15282_v50, %v15277_v39  ;;  %v4015_v43 = vld [vmem:[#allocation2 + $0x41] sm:$0xff]  ;;  %v4016_v7 = vld [vmem:[#allocation2 + $0x51] sm:$0xff] }
 0x4c3   :  { %12196 = vmatprep.mubr.msk.bf16.mxu1 %vm36_vm1, %v15585_v56  ;;  %v4017_v50 = vld [vmem:[#allocation2 + $0x61] sm:$0xff]  ;;  %v4018_v39 = vld [vmem:[#allocation2 + $0x71] sm:$0xff]  ;;  %v4038_v55 = vpack.c.bf16 %v4016_v7, %v4015_v43 }
 0x4c4   :  { %v4039_v58 = vpack.c.bf16 %v4018_v39, %v4017_v50  ;;  %v19775_v43 = vld [vmem:[#allocation30_spill] sm:$0xff]  ;;  %v19776_v7 = vld [vmem:[#allocation32_spill] sm:$0xff] }
 0x4c5   :  { %v19777_v50 = vpack.c.bf16 %v19775_v43, %v19776_v7  ;;  %v4870_v39 = vld [vmem:[#allocation2 + $0x132] sm:$0xff] }
 0x4ca   :  { %12197 = vmatmul.mubr.msk.bf16.gmra.mrb[24].mxu1 %vm36_vm1, %v15591_v27 }
 0x4cb   :  { %12200 = vmatprep.mubr.msk.bf16.mxu1 %vm36_vm1, %v15593_v28 }
 0x4d2   :  { %12201 = vmatmul.mubr.msk.bf16.gmra.mrb[28].mxu1 %vm36_vm1, %v15599_v42 }
 0x4d3   :  { %12204 = vmatprep.mubr.msk.bf16.mxu1 %vm36_vm1, %v15601_v20 }
 0x4da   :  { %12205 = vmatmul.mubr.msk.bf16.gmra.mrb[32].mxu1 %vm36_vm1, %v15607_v35 }
 0x4db   :  { %12208 = vmatprep.mubr.msk.bf16.mxu1 %vm36_vm1, %v15609_v62 }
 0x4e2   :  { %12209 = vmatmul.mubr.msk.bf16.gmra.mrb[36].mxu1 %vm36_vm1, %v15615_v21 }
 0x4e3   :  { %12212 = vmatprep.mubr.msk.bf16.mxu1 %vm36_vm1, %v19753_v59  ;;  %v4469_v59 = vpack.c.bf16 %v4457_v6, %v4456_v57 }
 0x4ea   :  { %12213 = vmatmul.mubr.msk.bf16.gmra.mrb[40].mxu1 %vm36_vm1, %v19754_v8  ;;  %v4470_v8 = vpack.c.bf16 %v4459_v11, %v4458_v61 }
 0x4eb   :  { %12216 = vmatprep.mubr.msk.bf16.mxu1 %vm36_vm1, %v19755_v47  ;;  %v4461_v47 = vld [vmem:[#allocation2 + $0x231] sm:$0xff] }
 0x4f2   :  { %12217 = vmatmul.mubr.msk.bf16.gmra.mrb[44].mxu1 %vm36_vm1, %v4032_v0  ;;  %v4463_v0 = vld [vmem:[#allocation2 + $0x251] sm:$0xff] }
 0x4f3   :  { %12220 = vmatprep.mubr.msk.bf16.mxu1 %vm36_vm1, %v19756_v54  ;;  %v4460_v54 = vld [vmem:[#allocation2 + $0x221] sm:$0xff] }
 0x4fa   :  { %12221 = vmatmul.mubr.msk.bf16.gmra.mrb[48].mxu1 %vm36_vm1, %v19757_v32  ;;  %v4471_v32 = vpack.c.bf16 %v4461_v47, %v4460_v54 }
 0x4fb   :  { %12224 = vmatprep.mubr.msk.bf16.mxu1 %vm36_vm1, %v19758_v16  ;;  %v4472_v16 = vpack.c.bf16 %v4463_v0, %v4462_v24 }
 0x502   :  { %12225 = vmatmul.mubr.msk.bf16.gmra.mrb[52].mxu1 %vm36_vm1, %v4036_v9  ;;  %v19773_v9 = vld [vmem:[#allocation29_spill] sm:$0xff] }
 0x503   :  { %12228 = vmatprep.mubr.msk.bf16.mxu1 %vm36_vm1, %v4037_v29 }
 0x50a   :  { %12229 = vmatmul.mubr.msk.bf16.gmra.mrb[56].mxu1 %vm36_vm1, %v4038_v55 }
 0x50b   :  { %12232 = vmatprep.mubr.msk.bf16.mxu1 %vm36_vm1, %v4039_v58 }
 0x512   :  { %12233 = vmatmul.mubr.msk.bf16.gmra.mrb[60].mxu1 %vm36_vm1, %v4040_v52 }
 0x513   :  { %12236 = vmatprep.mubr.msk.bf16.mxu1 %vm36_vm1, %v4041_v51 }
 0x51a   :  { %12237 = vmatmul.mubr.msk.bf16.gmra.mrb[64].mxu1 %vm36_vm1, %v4042_v5 }
 0x51b   :  { %12240 = vmatprep.mubr.msk.bf16.mxu1 %vm36_vm1, %v4043_v36 }
 0x522   :  { %12241 = vmatmul.mubr.msk.bf16.gmra.mrb[68].mxu1 %vm36_vm1, %v4044_v49 }
 0x523   :  { %12246 = vmatprep.mubr.msk.bf16.mxu1 %vm36_vm1, %v15585_v56  ;;  %v4452_v56 = vld [vmem:[#allocation2 + $0x181] sm:$0xff] }
 0x52a   :  { %12247 = vmatmul.mubr.msk.bf16.vlgmr.msra.gmra.mrb[8].mxu1 %vm36_vm1, %v15591_v27  ;;  %v4453_v27 = vld [vmem:[#allocation2 + $0x191] sm:$0xff] }
 0x52b   :  { %12311 = vmatpush3.bf16.msra.mxu1 %v4904_v46  ;;  %12250 = vmatprep.mubr.msk.bf16.mxu1 %vm36_vm1, %v15593_v28  ;;  %v4454_v28 = vld [vmem:[#allocation2 + $0x1a1] sm:$0xff] }
 0x532   :  { %12251 = vmatmul.mubr.msk.bf16.gmra.mrb[12].mxu1 %vm36_vm1, %v15599_v42  ;;  %v4467_v42 = vpack.c.bf16 %v4453_v27, %v4452_v56 }
 0x533   :  { %12254 = vmatprep.mubr.msk.bf16.mxu1 %vm36_vm1, %v15601_v20 }
 0x53a   :  { %12255 = vmatmul.mubr.msk.bf16.gmra.mrb[16].mxu1 %vm36_vm1, %v15607_v35  ;;  %v4450_v35 = vld [vmem:[#allocation2 + $0x161] sm:$0xff] }
 0x53b   :  { %12258 = vmatprep.mubr.msk.bf16.mxu1 %vm36_vm1, %v15609_v62  ;;  %v4451_v62 = vld [vmem:[#allocation2 + $0x171] sm:$0xff] }
 0x53c   :  { %v4466_v20 = vpack.c.bf16 %v4451_v62, %v4450_v35 }
 0x542   :  { %12259 = vmatmul.mubr.msk.bf16.gmra.mrb[20].mxu1 %vm36_vm1, %v15615_v21  ;;  %v4455_v21 = vld [vmem:[#allocation2 + $0x1b1] sm:$0xff] }
 0x543   :  { %12262 = vmatprep.mubr.msk.bf16.mxu1 %vm36_vm1, %v15671_v30  ;;  %v4468_v10 = vpack.c.bf16 %v4455_v21, %v4454_v28 }
 0x54a   :  { %12263 = vmatmul.mubr.msk.bf16.gmra.mrb[24].mxu1 %vm36_vm1, %v15677_v48 }
 0x54b   :  { %12266 = vmatprep.mubr.msk.bf16.mxu1 %vm36_vm1, %v19742_v2 }
 0x552   :  { %12267 = vmatmul.mubr.msk.bf16.gmra.mrb[28].mxu1 %vm36_vm1, %v15683_v53 }
 0x553   :  { %12270 = vmatprep.mubr.msk.bf16.mxu1 %vm36_vm1, %v19743_v23 }
 0x55a   :  { %12271 = vmatmul.mubr.msk.bf16.gmra.mrb[32].mxu1 %vm36_vm1, %v19744_v44 }
 0x55b   :  { %12274 = vmatprep.mubr.msk.bf16.mxu1 %vm36_vm1, %v19745_v3 }
 0x562   :  { %12275 = vmatmul.mubr.msk.bf16.gmra.mrb[36].mxu1 %vm36_vm1, %v15694_v4 }
 0x563   :  { %12278 = vmatprep.mubr.msk.bf16.mxu1 %vm36_vm1, %v4037_v29 }
 0x56a   :  { %12279 = vmatmul.mubr.msk.bf16.gmra.mrb[40].mxu1 %vm36_vm1, %v4038_v55  ;;  %v19778_v55 = vld [vmem:[#allocation34_spill] sm:$0xff] }
 0x56b   :  { %12282 = vmatprep.mubr.msk.bf16.mxu1 %vm36_vm1, %v4039_v58  ;;  %v4878_v58 = vpack.c.bf16 %v4870_v39, %v19778_v55 }
 0x572   :  { %12283 = vmatmul.mubr.msk.bf16.gmra.mrb[44].mxu1 %vm36_vm1, %v4040_v52 }
 0x573   :  { %12286 = vmatprep.mubr.msk.bf16.mxu1 %vm36_vm1, %v4041_v51 }
 0x57a   :  { %12287 = vmatmul.mubr.msk.bf16.gmra.mrb[48].mxu1 %vm36_vm1, %v4042_v5 }
 0x57b   :  { %12290 = vmatprep.mubr.msk.bf16.mxu1 %vm36_vm1, %v4043_v36 }
 0x582   :  { %12291 = vmatmul.mubr.msk.bf16.gmra.mrb[52].mxu1 %vm36_vm1, %v4044_v49 }
 0x583   :  { %12294 = vmatprep.mubr.msk.bf16.mxu1 %vm36_vm1, %v4466_v20 }
 0x58a   :  { %12295 = vmatmul.mubr.msk.bf16.gmra.mrb[56].mxu1 %vm36_vm1, %v4467_v42 }
 0x58b   :  { %12298 = vmatprep.mubr.msk.bf16.mxu1 %vm36_vm1, %v4468_v10 }
 0x592   :  { %12299 = vmatmul.mubr.msk.bf16.gmra.mrb[60].mxu1 %vm36_vm1, %v4469_v59 }
 0x593   :  { %12302 = vmatprep.mubr.msk.bf16.mxu1 %vm36_vm1, %v4470_v8 }
 0x59a   :  { %12303 = vmatmul.mubr.msk.bf16.gmra.mrb[64].mxu1 %vm36_vm1, %v4471_v32 }
 0x59b   :  { %12306 = vmatprep.mubr.msk.bf16.mxu1 %vm36_vm1, %v4472_v16 }
 0x5a2   :  { %12307 = vmatmul.mubr.msk.bf16.gmra.mrb[68].mxu1 %vm36_vm1, %v4473_v41 }
 0x5a3   :  { %12312 = vmatprep.mubr.msk.bf16.mxu1 %vm36_vm1, %v15671_v30  ;;  %v19759_v30 = vld [vmem:[#allocation21_spill] sm:$0xff] }
 0x5aa   :  { %12313 = vmatmul.mubr.msk.bf16.vlgmr.msra.gmra.mrb[8].mxu1 %vm36_vm1, %v15677_v48  ;;  %v19760_v48 = vld [vmem:[#allocation22_spill] sm:$0xff] }
 0x5ab   :  { %12316 = vmatprep.mubr.msk.bf16.mxu1 %vm36_vm1, %v19742_v2  ;;  %v19761_v2 = vpack.c.bf16 %v19759_v30, %v19760_v48 }
 0x5b2   :  { %12317 = vmatmul.mubr.msk.bf16.gmra.mrb[12].mxu1 %vm36_vm1, %v15683_v53  ;;  %v19762_v53 = vld [vmem:[#allocation25_spill] sm:$0xff] }
 0x5b3   :  { %12320 = vmatprep.mubr.msk.bf16.mxu1 %vm36_vm1, %v19743_v23  ;;  %v19763_v23 = vld [vmem:[#allocation23_spill] sm:$0xff] }
 0x5ba   :  { %12321 = vmatmul.mubr.msk.bf16.gmra.mrb[16].mxu1 %vm36_vm1, %v19744_v44  ;;  %v19764_v44 = vpack.c.bf16 %v19762_v53, %v19763_v23 }
 0x5bb   :  { %12324 = vmatprep.mubr.msk.bf16.mxu1 %vm36_vm1, %v19745_v3  ;;  %v19765_v3 = vld [vmem:[#allocation24_spill] sm:$0xff] }
 0x5c2   :  { %12325 = vmatmul.mubr.msk.bf16.gmra.mrb[20].mxu1 %vm36_vm1, %v15694_v4  ;;  %v19766_v4 = vld [vmem:[#allocation26_spill] sm:$0xff] }
 0x5c3   :  { %12328 = vmatprep.mubr.msk.bf16.mxu1 %vm36_vm1, %v19747_v17  ;;  %v19767_v17 = vpack.c.bf16 %v19765_v3, %v19766_v4 }
 0x5ca   :  { %12329 = vmatmul.mubr.msk.bf16.gmra.mrb[24].mxu1 %vm36_vm1, %v19748_v40  ;;  %v4862_v40 = vld [vmem:[#allocation2 + $0x92] sm:$0xff] }
 0x5cb   :  { %12332 = vmatprep.mubr.msk.bf16.mxu1 %vm36_vm1, %v19749_v14  ;;  %v19768_v14 = vld [vmem:[#allocation33_spill] sm:$0xff] }
 0x5d2   :  { %12333 = vmatmul.mubr.msk.bf16.gmra.mrb[28].mxu1 %vm36_vm1, %v15758_v13  ;;  %v4874_v13 = vpack.c.bf16 %v4862_v40, %v19768_v14 }
 0x5d3   :  { %12336 = vmatprep.mubr.msk.bf16.mxu1 %vm36_vm1, %v19750_v45  ;;  %v19769_v45 = vld [vmem:[#allocation27_spill] sm:$0xff] }
 0x5da   :  { %12337 = vmatmul.mubr.msk.bf16.gmra.mrb[32].mxu1 %vm36_vm1, %v19751_v19  ;;  %v19770_v19 = vld [vmem:[#allocation28_spill] sm:$0xff] }
 0x5db   :  { %12340 = vmatprep.mubr.msk.bf16.mxu1 %vm36_vm1, %v19752_v15  ;;  %v19771_v15 = vpack.c.bf16 %v19769_v45, %v19770_v19 }
 0x5e2   :  { %12341 = vmatmul.mubr.msk.bf16.gmra.mrb[36].mxu1 %vm36_vm1, %v15769_v18  ;;  %v19772_v18 = vld [vmem:[#allocation31_spill] sm:$0xff] }
 0x5e3   :  { %12344 = vmatprep.mubr.msk.bf16.mxu1 %vm36_vm1, %v4466_v20  ;;  %v19774_v29 = vpack.c.bf16 %v19772_v18, %v19773_v9 }
 0x5ea   :  { %12345 = vmatmul.mubr.msk.bf16.gmra.mrb[40].mxu1 %vm36_vm1, %v4467_v42 }
 0x5eb   :  { %12348 = vmatprep.mubr.msk.bf16.mxu1 %vm36_vm1, %v4468_v10 }
 0x5f2   :  { %12349 = vmatmul.mubr.msk.bf16.gmra.mrb[44].mxu1 %vm36_vm1, %v4469_v59 }
 0x5f3   :  { %12352 = vmatprep.mubr.msk.bf16.mxu1 %vm36_vm1, %v4470_v8 }
 0x5fa   :  { %12353 = vmatmul.mubr.msk.bf16.gmra.mrb[48].mxu1 %vm36_vm1, %v4471_v32 }
 0x5fb   :  { %12356 = vmatprep.mubr.msk.bf16.mxu1 %vm36_vm1, %v4472_v16 }
 0x602   :  { %12357 = vmatmul.mubr.msk.bf16.gmra.mrb[52].mxu1 %vm36_vm1, %v4473_v41 }
 0x603   :  { %12360 = vmatprep.mubr.msk.bf16.mxu1 %vm36_vm1, %v19761_v2 }
 0x60a   :  { %12361 = vmatmul.mubr.msk.bf16.gmra.mrb[56].mxu1 %vm36_vm1, %v19764_v44 }
 0x60b   :  { %12364 = vmatprep.mubr.msk.bf16.mxu1 %vm36_vm1, %v19767_v17 }
 0x612   :  { %12365 = vmatmul.mubr.msk.bf16.gmra.mrb[60].mxu1 %vm36_vm1, %v4874_v13 }
 0x613   :  { %12368 = vmatprep.mubr.msk.bf16.mxu1 %vm36_vm1, %v19771_v15 }
 0x61a   :  { %12369 = vmatmul.mubr.msk.bf16.gmra.mrb[64].mxu1 %vm36_vm1, %v19774_v29 }
 0x61b   :  { %12372 = vmatprep.mubr.msk.bf16.mxu1 %vm36_vm1, %v19777_v50 }
 0x622   :  { %12373 = vmatmul.mubr.msk.bf16.gmra.mrb[68].mxu1 %vm36_vm1, %v4878_v58 }
 0x67d   :  { %v15967_v31 = vpop.f32.mrb[8].mxu1 }
 0x67e   :  { %v15969_v34 = vpop.f32.mrb[9].mxu1  ;;  %v5394_v51 = vmul.f32 %v15967_v31, %v15967_v31  ;;  %v5262_v5 = vsel %vm232_vm2, %v15967_v31, 0.0 }
 0x67f   :  { %v5392_v26 = vmul.f32 %v15969_v34, %v15969_v34  ;;  %v15973_v38 = vpop.f32.mrb[10].mxu1  ;;  %v5259_v25 = vsel %vm232_vm2, %v15969_v34, 0.0 }
 0x680   :  { %v15975_v52 = vpop.f32.mrb[11].mxu1  ;;  %v5395_v22 = vmul.f32 %v15973_v38, %v15973_v38  ;;  %v5459_v35 = vsel %vm232_vm2, %v5394_v51, 0.0  ;;  %v5264_v62 = vsel %vm232_vm2, %v15973_v38, 0.0 }
 0x681   :  { %v5260_v60 = vsel %vm232_vm2, %v15975_v52, 0.0  ;;  %v5393_v12 = vmul.f32 %v15975_v52, %v15975_v52  ;;  %v5456_v36 = vsel %vm232_vm2, %v5392_v26, 0.0 }
 0x682   :  { %v5261_v37 = vadd.f32 %v5260_v60, %v5259_v25  ;;  %v5461_v42 = vsel %vm232_vm2, %v5395_v22, 0.0 }
 0x683   :  { %v5457_v33 = vsel %vm232_vm2, %v5393_v12, 0.0 }
 0x684   :  { %v5263_v49 = vadd.f32 %v5262_v5, %v5261_v37  ;;  %v5458_v46 = vadd.f32 %v5457_v33, %v5456_v36 }
 0x685   :  { %v15994_v20 = vpop.f32.mrb[12].mxu1 }
 0x686   :  { %v5460_v27 = vadd.f32 %v5459_v35, %v5458_v46  ;;  %v15996_v28 = vpop.f32.mrb[13].mxu1  ;;  %v5265_v56 = vadd.f32 %v5264_v62, %v5263_v49  ;;  %v5398_v59 = vmul.f32 %v15994_v20, %v15994_v20  ;;  %v5270_v32 = vsel %vm232_vm2, %v15994_v20, 0.0 }
 0x687   :  { %v5266_v21 = vsel %vm232_vm2, %v15996_v28, 0.0  ;;  %v5396_v10 = vmul.f32 %v15996_v28, %v15996_v28  ;;  %v16003_v57 = vpop.f32.mrb[14].mxu1 }
 0x688   :  { %v5267_v6 = vadd.f32 %v5266_v21, %v5265_v56  ;;  %v5462_v61 = vadd.f32 %v5461_v42, %v5460_v27  ;;  %v16005_v11 = vpop.f32.mrb[15].mxu1  ;;  %v5399_v16 = vmul.f32 %v16003_v57, %v16003_v57  ;;  %v5467_v30 = vsel %vm232_vm2, %v5398_v59, 0.0 }
 0x689   :  { %v5463_v8 = vsel %vm232_vm2, %v5396_v10, 0.0  ;;  %v5268_v47 = vsel %vm232_vm2, %v16005_v11, 0.0  ;;  %v5397_v24 = vmul.f32 %v16005_v11, %v16005_v11  ;;  %v5272_v48 = vsel %vm232_vm2, %v16003_v57, 0.0 }
 0x68a   :  { %v5464_v0 = vadd.f32 %v5463_v8, %v5462_v61  ;;  %v5269_v54 = vadd.f32 %v5268_v47, %v5267_v6  ;;  %v5469_v3 = vsel %vm232_vm2, %v5399_v16, 0.0 }
 0x68b   :  { %v5465_v1 = vsel %vm232_vm2, %v5397_v24, 0.0 }
 0x68c   :  { %v5271_v63 = vadd.f32 %v5270_v32, %v5269_v54  ;;  %v5466_v41 = vadd.f32 %v5465_v1, %v5464_v0 }
 0x68d   :  { %v16022_v2 = vpop.f32.mrb[16].mxu1 }
 0x68e   :  { %v5468_v53 = vadd.f32 %v5467_v30, %v5466_v41  ;;  %v16024_v23 = vpop.f32.mrb[17].mxu1  ;;  %v5273_v44 = vadd.f32 %v5272_v48, %v5271_v63  ;;  %v5402_v19 = vmul.f32 %v16022_v2, %v16022_v2  ;;  %v5278_v7 = vsel %vm232_vm2, %v16022_v2, 0.0 }
 0x68f   :  { %v5274_v4 = vsel %vm232_vm2, %v16024_v23, 0.0  ;;  %v5400_v17 = vmul.f32 %v16024_v23, %v16024_v23  ;;  %v16031_v40 = vpop.f32.mrb[18].mxu1 }
 0x690   :  { %v5275_v14 = vadd.f32 %v5274_v4, %v5273_v44  ;;  %v5470_v13 = vadd.f32 %v5469_v3, %v5468_v53  ;;  %v16033_v45 = vpop.f32.mrb[19].mxu1  ;;  %v5403_v50 = vmul.f32 %v16031_v40, %v16031_v40  ;;  %v5475_v26 = vsel %vm232_vm2, %v5402_v19, 0.0 }
 0x691   :  { %v5471_v15 = vsel %vm232_vm2, %v5400_v17, 0.0  ;;  %v5276_v18 = vsel %vm232_vm2, %v16033_v45, 0.0  ;;  %v5401_v9 = vmul.f32 %v16033_v45, %v16033_v45  ;;  %v5280_v51 = vsel %vm232_vm2, %v16031_v40, 0.0 }
 0x692   :  { %v5472_v29 = vadd.f32 %v5471_v15, %v5470_v13  ;;  %v5277_v43 = vadd.f32 %v5276_v18, %v5275_v14  ;;  %v5477_v5 = vsel %vm232_vm2, %v5403_v50, 0.0 }
 0x693   :  { %v5473_v39 = vsel %vm232_vm2, %v5401_v9, 0.0 }
 0x694   :  { %v5279_v55 = vadd.f32 %v5278_v7, %v5277_v43  ;;  %v5474_v58 = vadd.f32 %v5473_v39, %v5472_v29 }
 0x695   :  { %v16050_v25 = vpop.f32.mrb[20].mxu1 }
 0x696   :  { %v5476_v60 = vadd.f32 %v5475_v26, %v5474_v58  ;;  %v16052_v12 = vpop.f32.mrb[21].mxu1  ;;  %v5281_v37 = vadd.f32 %v5280_v51, %v5279_v55  ;;  %v5406_v62 = vmul.f32 %v16050_v25, %v16050_v25  ;;  %v5286_v6 = vsel %vm232_vm2, %v16050_v25, 0.0 }
 0x697   :  { %v5282_v36 = vsel %vm232_vm2, %v16052_v12, 0.0  ;;  %v5404_v22 = vmul.f32 %v16052_v12, %v16052_v12  ;;  %v16059_v33 = vpop.f32.mrb[22].mxu1 }
 0x698   :  { %v5283_v49 = vadd.f32 %v5282_v36, %v5281_v37  ;;  %v5478_v46 = vadd.f32 %v5477_v5, %v5476_v60  ;;  %v16061_v35 = vpop.f32.mrb[23].mxu1  ;;  %v5407_v61 = vmul.f32 %v16059_v33, %v16059_v33  ;;  %v5483_v24 = vsel %vm232_vm2, %v5406_v62, 0.0 }
 0x699   :  { %v5479_v27 = vsel %vm232_vm2, %v5404_v22, 0.0  ;;  %v5284_v56 = vsel %vm232_vm2, %v16061_v35, 0.0  ;;  %v5405_v42 = vmul.f32 %v16061_v35, %v16061_v35  ;;  %v5288_v0 = vsel %vm232_vm2, %v16059_v33, 0.0 }
 0x69a   :  { %v5480_v21 = vadd.f32 %v5479_v27, %v5478_v46  ;;  %v5285_v10 = vadd.f32 %v5284_v56, %v5283_v49  ;;  %v5485_v63 = vsel %vm232_vm2, %v5407_v61, 0.0 }
 0x69b   :  { %v5481_v59 = vsel %vm232_vm2, %v5405_v42, 0.0 }
 0x69c   :  { %v5287_v8 = vadd.f32 %v5286_v6, %v5285_v10  ;;  %v5482_v47 = vadd.f32 %v5481_v59, %v5480_v21 }
 0x69d   :  { %v16078_v54 = vpop.f32.mrb[24].mxu1 }
 0x69e   :  { %v5484_v32 = vadd.f32 %v5483_v24, %v5482_v47  ;;  %v16080_v16 = vpop.f32.mrb[25].mxu1  ;;  %v5289_v1 = vadd.f32 %v5288_v0, %v5287_v8  ;;  %v5410_v4 = vmul.f32 %v16078_v54, %v16078_v54  ;;  %v5294_v18 = vsel %vm232_vm2, %v16078_v54, 0.0 }
 0x69f   :  { %v5290_v41 = vsel %vm232_vm2, %v16080_v16, 0.0  ;;  %v5408_v30 = vmul.f32 %v16080_v16, %v16080_v16  ;;  %v16087_v48 = vpop.f32.mrb[26].mxu1 }
 0x6a0   :  { %v5291_v53 = vadd.f32 %v5290_v41, %v5289_v1  ;;  %v5486_v44 = vadd.f32 %v5485_v63, %v5484_v32  ;;  %v16089_v3 = vpop.f32.mrb[27].mxu1  ;;  %v5411_v9 = vmul.f32 %v16087_v48, %v16087_v48  ;;  %v5491_v50 = vsel %vm232_vm2, %v5410_v4, 0.0 }
 0x6a1   :  { %v5487_v17 = vsel %vm232_vm2, %v5408_v30, 0.0  ;;  %v5292_v14 = vsel %vm232_vm2, %v16089_v3, 0.0  ;;  %v5409_v13 = vmul.f32 %v16089_v3, %v16089_v3  ;;  %v5296_v39 = vsel %vm232_vm2, %v16087_v48, 0.0 }
 0x6a2   :  { %v5488_v19 = vadd.f32 %v5487_v17, %v5486_v44  ;;  %v5293_v15 = vadd.f32 %v5292_v14, %v5291_v53  ;;  %v5493_v60 = vsel %vm232_vm2, %v5411_v9, 0.0 }
 0x6a3   :  { %v5489_v29 = vsel %vm232_vm2, %v5409_v13, 0.0 }
 0x6a4   :  { %v5295_v43 = vadd.f32 %v5294_v18, %v5293_v15  ;;  %v5490_v7 = vadd.f32 %v5489_v29, %v5488_v19 }
 0x6a5   :  { %v16106_v55 = vpop.f32.mrb[28].mxu1 }
 0x6a6   :  { %v5492_v58 = vadd.f32 %v5491_v50, %v5490_v7  ;;  %v16108_v26 = vpop.f32.mrb[29].mxu1  ;;  %v5297_v51 = vadd.f32 %v5296_v39, %v5295_v43  ;;  %v5414_v62 = vmul.f32 %v16106_v55, %v16106_v55  ;;  %v5302_v6 = vsel %vm232_vm2, %v16106_v55, 0.0 }
 0x6a7   :  { %v5298_v37 = vsel %vm232_vm2, %v16108_v26, 0.0  ;;  %v5412_v5 = vmul.f32 %v16108_v26, %v16108_v26  ;;  %v16115_v36 = vpop.f32.mrb[30].mxu1 }
 0x6a8   :  { %v5299_v22 = vadd.f32 %v5298_v37, %v5297_v51  ;;  %v5494_v49 = vadd.f32 %v5493_v60, %v5492_v58  ;;  %v16117_v46 = vpop.f32.mrb[31].mxu1  ;;  %v5415_v61 = vmul.f32 %v16115_v36, %v16115_v36  ;;  %v5499_v24 = vsel %vm232_vm2, %v5414_v62, 0.0 }
 0x6a9   :  { %v5495_v27 = vsel %vm232_vm2, %v5412_v5, 0.0  ;;  %v5300_v56 = vsel %vm232_vm2, %v16117_v46, 0.0  ;;  %v5413_v42 = vmul.f32 %v16117_v46, %v16117_v46  ;;  %v5304_v0 = vsel %vm232_vm2, %v16115_v36, 0.0 }
 0x6aa   :  { %v5496_v21 = vadd.f32 %v5495_v27, %v5494_v49  ;;  %v5301_v10 = vadd.f32 %v5300_v56, %v5299_v22  ;;  %v5501_v30 = vsel %vm232_vm2, %v5415_v61, 0.0 }
 0x6ab   :  { %v5497_v59 = vsel %vm232_vm2, %v5413_v42, 0.0 }
 0x6ac   :  { %v5303_v8 = vadd.f32 %v5302_v6, %v5301_v10  ;;  %v5498_v47 = vadd.f32 %v5497_v59, %v5496_v21 }
 0x6ad   :  { %v16134_v32 = vpop.f32.mrb[32].mxu1 }
 0x6ae   :  { %v5500_v1 = vadd.f32 %v5499_v24, %v5498_v47  ;;  %v16136_v63 = vpop.f32.mrb[33].mxu1  ;;  %v5305_v41 = vadd.f32 %v5304_v0, %v5303_v8  ;;  %v5418_v19 = vmul.f32 %v16134_v32, %v16134_v32  ;;  %v5310_v50 = vsel %vm232_vm2, %v16134_v32, 0.0 }
 0x6af   :  { %v5306_v53 = vsel %vm232_vm2, %v16136_v63, 0.0  ;;  %v5416_v44 = vmul.f32 %v16136_v63, %v16136_v63  ;;  %v16143_v4 = vpop.f32.mrb[34].mxu1 }
 0x6b0   :  { %v5307_v17 = vadd.f32 %v5306_v53, %v5305_v41  ;;  %v5502_v14 = vadd.f32 %v5501_v30, %v5500_v1  ;;  %v16145_v13 = vpop.f32.mrb[35].mxu1  ;;  %v5419_v43 = vmul.f32 %v16143_v4, %v16143_v4  ;;  %v5507_v60 = vsel %vm232_vm2, %v5418_v19, 0.0 }
 0x6b1   :  { %v5503_v15 = vsel %vm232_vm2, %v5416_v44, 0.0  ;;  %v5308_v18 = vsel %vm232_vm2, %v16145_v13, 0.0  ;;  %v5417_v9 = vmul.f32 %v16145_v13, %v16145_v13  ;;  %v5312_v37 = vsel %vm232_vm2, %v16143_v4, 0.0 }
 0x6b2   :  { %v5504_v29 = vadd.f32 %v5503_v15, %v5502_v14  ;;  %v5309_v7 = vadd.f32 %v5308_v18, %v5307_v17  ;;  %v5509_v22 = vsel %vm232_vm2, %v5419_v43, 0.0 }
 0x6b3   :  { %v5505_v39 = vsel %vm232_vm2, %v5417_v9, 0.0 }
 0x6b4   :  { %v5311_v58 = vadd.f32 %v5310_v50, %v5309_v7  ;;  %v5506_v51 = vadd.f32 %v5505_v39, %v5504_v29 }
 0x6b5   :  { %v16162_v5 = vpop.f32.mrb[36].mxu1 }
 0x6b6   :  { %v5508_v49 = vadd.f32 %v5507_v60, %v5506_v51  ;;  %v16165_v62 = vpop.f32.mrb[37].mxu1  ;;  %v5313_v27 = vadd.f32 %v5312_v37, %v5311_v58  ;;  %v5422_v59 = vmul.f32 %v16162_v5, %v16162_v5  ;;  %v5318_v41 = vsel %vm232_vm2, %v16162_v5, 0.0 }
 0x6b7   :  { %v5314_v56 = vsel %vm232_vm2, %v16165_v62, 0.0  ;;  %v5420_v42 = vmul.f32 %v16165_v62, %v16165_v62  ;;  %v16171_v21 = vpop.f32.mrb[38].mxu1 }
 0x6b8   :  { %v5315_v10 = vadd.f32 %v5314_v56, %v5313_v27  ;;  %v5510_v6 = vadd.f32 %v5509_v22, %v5508_v49  ;;  %v16173_v61 = vpop.f32.mrb[39].mxu1  ;;  %v5423_v30 = vmul.f32 %v16171_v21, %v16171_v21  ;;  %v5515_v14 = vsel %vm232_vm2, %v5422_v59, 0.0 }
 0x6b9   :  { %v5511_v8 = vsel %vm232_vm2, %v5420_v42, 0.0  ;;  %v5316_v47 = vsel %vm232_vm2, %v16173_v61, 0.0  ;;  %v5421_v24 = vmul.f32 %v16173_v61, %v16173_v61  ;;  %v5320_v19 = vsel %vm232_vm2, %v16171_v21, 0.0 }
 0x6ba   :  { %v5512_v0 = vadd.f32 %v5511_v8, %v5510_v6  ;;  %v5317_v1 = vadd.f32 %v5316_v47, %v5315_v10  ;;  %v5517_v43 = vsel %vm232_vm2, %v5423_v30, 0.0 }
 0x6bb   :  { %v5513_v53 = vsel %vm232_vm2, %v5421_v24, 0.0 }
 0x6bc   :  { %v5319_v44 = vadd.f32 %v5318_v41, %v5317_v1  ;;  %v5514_v17 = vadd.f32 %v5513_v53, %v5512_v0 }
 0x6bd   :  { %v16190_v15 = vpop.f32.mrb[40].mxu1 }
 0x6be   :  { %v5516_v18 = vadd.f32 %v5515_v14, %v5514_v17  ;;  %v16192_v9 = vpop.f32.mrb[41].mxu1  ;;  %v5321_v29 = vadd.f32 %v5320_v19, %v5319_v44  ;;  %v5426_v37 = vmul.f32 %v16190_v15, %v16190_v15  ;;  %v5326_v10 = vsel %vm232_vm2, %v16190_v15, 0.0 }
 0x6bf   :  { %v5322_v7 = vsel %vm232_vm2, %v16192_v9, 0.0  ;;  %v5424_v50 = vmul.f32 %v16192_v9, %v16192_v9  ;;  %v16199_v39 = vpop.f32.mrb[42].mxu1 }
 0x6c0   :  { %v5323_v58 = vadd.f32 %v5322_v7, %v5321_v29  ;;  %v5518_v51 = vadd.f32 %v5517_v43, %v5516_v18  ;;  %v16201_v60 = vpop.f32.mrb[43].mxu1  ;;  %v5427_v6 = vmul.f32 %v16199_v39, %v16199_v39  ;;  %v5523_v24 = vsel %vm232_vm2, %v5426_v37, 0.0 }
 0x6c1   :  { %v5519_v22 = vsel %vm232_vm2, %v5424_v50, 0.0  ;;  %v5324_v49 = vsel %vm232_vm2, %v16201_v60, 0.0  ;;  %v5425_v27 = vmul.f32 %v16201_v60, %v16201_v60  ;;  %v5328_v0 = vsel %vm232_vm2, %v16199_v39, 0.0 }
 0x6c2   :  { %v5520_v56 = vadd.f32 %v5519_v22, %v5518_v51  ;;  %v5325_v42 = vadd.f32 %v5324_v49, %v5323_v58  ;;  %v5525_v44 = vsel %vm232_vm2, %v5427_v6, 0.0 }
 0x6c3   :  { %v5521_v59 = vsel %vm232_vm2, %v5425_v27, 0.0 }
 0x6c4   :  { %v5327_v8 = vadd.f32 %v5326_v10, %v5325_v42  ;;  %v5522_v47 = vadd.f32 %v5521_v59, %v5520_v56 }
 0x6c5   :  { %v16218_v1 = vpop.f32.mrb[44].mxu1 }
 0x6c6   :  { %v5524_v41 = vadd.f32 %v5523_v24, %v5522_v47  ;;  %v16220_v30 = vpop.f32.mrb[45].mxu1  ;;  %v5329_v53 = vadd.f32 %v5328_v0, %v5327_v8  ;;  %v5430_v7 = vmul.f32 %v16218_v1, %v16218_v1  ;;  %v5334_v49 = vsel %vm232_vm2, %v16218_v1, 0.0 }
 0x6c7   :  { %v5330_v17 = vsel %vm232_vm2, %v16220_v30, 0.0  ;;  %v5428_v14 = vmul.f32 %v16220_v30, %v16220_v30  ;;  %v16227_v19 = vpop.f32.mrb[46].mxu1 }
 0x6c8   :  { %19779 = vst [vmem:[#allocation35_spill] sm:$0xff] %v16227_v19  ;;  %v5331_v18 = vadd.f32 %v5330_v17, %v5329_v53  ;;  %v5526_v29 = vadd.f32 %v5525_v44, %v5524_v41  ;;  %v16229_v43 = vpop.f32.mrb[47].mxu1  ;;  %v5431_v27 = vmul.f32 %v16227_v19, %v16227_v19  ;;  %v5531_v6 = vsel %vm232_vm2, %v5430_v7, 0.0 }
 0x6c9   :  { %v5527_v50 = vsel %vm232_vm2, %v5428_v14, 0.0  ;;  %v5332_v58 = vsel %vm232_vm2, %v16229_v43, 0.0  ;;  %v5429_v51 = vmul.f32 %v16229_v43, %v16229_v43  ;;  %v5336_v59 = vsel %vm232_vm2, %v16227_v19, 0.0 }
 0x6ca   :  { %v5528_v37 = vadd.f32 %v5527_v50, %v5526_v29  ;;  %v5333_v22 = vadd.f32 %v5332_v58, %v5331_v18  ;;  %v5533_v41 = vsel %vm232_vm2, %v5431_v27, 0.0 }
 0x6cb   :  { %v5529_v56 = vsel %vm232_vm2, %v5429_v51, 0.0 }
 0x6cc   :  { %v5335_v42 = vadd.f32 %v5334_v49, %v5333_v22  ;;  %v5530_v10 = vadd.f32 %v5529_v56, %v5528_v37 }
 0x6cd   :  { %v16246_v8 = vpop.f32.mrb[48].mxu1 }
 0x6ce   :  { %19780 = vst [vmem:[#allocation36_spill] sm:$0xff] %v16246_v8  ;;  %v5532_v47 = vadd.f32 %v5531_v6, %v5530_v10  ;;  %v16248_v24 = vpop.f32.mrb[49].mxu1  ;;  %v5337_v0 = vadd.f32 %v5336_v59, %v5335_v42  ;;  %v5434_v7 = vmul.f32 %v16246_v8, %v16246_v8  ;;  %v5342_v49 = vsel %vm232_vm2, %v16246_v8, 0.0 }
 0x6cf   :  { %19781 = vst [vmem:[#allocation37_spill] sm:$0xff] %v16248_v24  ;;  %v5338_v53 = vsel %vm232_vm2, %v16248_v24, 0.0  ;;  %v5432_v44 = vmul.f32 %v16248_v24, %v16248_v24  ;;  %v16255_v17 = vpop.f32.mrb[50].mxu1 }
 0x6d0   :  { %19782 = vst [vmem:[#allocation38_spill] sm:$0xff] %v16255_v17  ;;  %v5339_v14 = vadd.f32 %v5338_v53, %v5337_v0  ;;  %v5534_v18 = vadd.f32 %v5533_v41, %v5532_v47  ;;  %v16257_v29 = vpop.f32.mrb[51].mxu1  ;;  %v5435_v27 = vmul.f32 %v16255_v17, %v16255_v17  ;;  %v5539_v6 = vsel %vm232_vm2, %v5434_v7, 0.0 }
 0x6d1   :  { %19783 = vst [vmem:[#allocation9_spill] sm:$0xff] %v16257_v29  ;;  %v5535_v50 = vsel %vm232_vm2, %v5432_v44, 0.0  ;;  %v5340_v58 = vsel %vm232_vm2, %v16257_v29, 0.0  ;;  %v5433_v51 = vmul.f32 %v16257_v29, %v16257_v29  ;;  %v5344_v59 = vsel %vm232_vm2, %v16255_v17, 0.0 }
 0x6d2   :  { %v5536_v37 = vadd.f32 %v5535_v50, %v5534_v18  ;;  %v5341_v22 = vadd.f32 %v5340_v58, %v5339_v14  ;;  %v19786_v44 = vmov 0.0   ;;  %v5541_v14 = vsel %vm232_vm2, %v5435_v27, 0.0  ;;  %v16296_v58 = vld [vmem:[%s19484_s7] ss:$0 sps:$4 sm:$0xcc]  }
 0x6d3   :  { %v5537_v56 = vsel %vm232_vm2, %v5433_v51, 0.0  ;;  %243 = vst.msk [vmem:[#allocation3 + $0x288] sm:$0x3] %vm234_vm6, %v19786_v44  ;;  %245 = vst.msk [vmem:[#allocation3 + $0x328] sm:$0x3] %vm234_vm6, %v19786_v44 }
 0x6d4   :  { %v5343_v42 = vadd.f32 %v5342_v49, %v5341_v22  ;;  %v5538_v10 = vadd.f32 %v5537_v56, %v5536_v37  ;;  %247 = vst.msk [vmem:[#allocation3 + $0x3c8] sm:$0x3] %vm234_vm6, %v19786_v44  ;;  %249 = vst.msk [vmem:[#allocation3 + $0x468] sm:$0x3] %vm234_vm6, %v19786_v44 }
 0x6d5   :  { %v16274_v47 = vpop.f32.mrb[52].mxu1  ;;  %252 = vst.msk [vmem:[#allocation3 + $0x98] sm:$0x3] %vm234_vm6, %v19786_v44  ;;  %254 = vst.msk [vmem:[#allocation3 + $0x138] sm:$0x3] %vm234_vm6, %v19786_v44 }
 0x6d6   :  { %19784 = vst [vmem:[#allocation11_spill] sm:$0xff] %v16274_v47  ;;  %v5540_v0 = vadd.f32 %v5539_v6, %v5538_v10  ;;  %v16276_v41 = vpop.f32.mrb[53].mxu1  ;;  %v5345_v53 = vadd.f32 %v5344_v59, %v5343_v42  ;;  %256 = vst.msk [vmem:[#allocation3 + $0x1d8] sm:$0x3] %vm234_vm6, %v19786_v44  ;;  %v16300_v51 = vmul.f32 %v16274_v47, %v16274_v47  ;;  %v6022_v59 = vrot.slane %v16296_v58, 2 }
 0x6d7   :  { %19785 = vst [vmem:[#allocation14_spill] sm:$0xff] %v16276_v41  ;;  %258 = vst.msk [vmem:[#allocation3 + $0x278] sm:$0x3] %vm234_vm6, %v19786_v44  ;;  %v5346_v18 = vsel %vm232_vm2, %v16276_v41, 0.0  ;;  %v5436_v7 = vmul.f32 %v16276_v41, %v16276_v41  ;;  %v16291_v50 = vpop.f32.mrb[54].mxu1 }
 0x6d8   :  { %19787 = vst [vmem:[#allocation13_spill] sm:$0xff] %v16291_v50  ;;  %v5347_v37 = vadd.f32 %v5346_v18, %v5345_v53  ;;  %v5542_v22 = vadd.f32 %v5541_v14, %v5540_v0  ;;  %v16302_v49 = vpop.f32.mrb[55].mxu1  ;;  %v16316_v0 = vsel %vm232_vm2, %v16274_v47, 0.0  ;;  %v16320_v53 = vmul.f32 %v16291_v50, %v16291_v50  ;;  %289 = vst.msk [vmem:[#allocation3 + $0x150] sm:$0x1] %vm267_vm8, %v19786_v44 }
 0x6d9   :  { %19788 = vst [vmem:[#allocation17_spill] sm:$0xff] %v16302_v49  ;;  %v5543_v27 = vsel %vm232_vm2, %v5436_v7, 0.0  ;;  %v5348_v56 = vsel %vm232_vm2, %v16302_v49, 0.0  ;;  %v5437_v42 = vmul.f32 %v16302_v49, %v16302_v49  ;;  %290 = vst.msk [vmem:[#allocation3 + $0x160] sm:$0x1] %vm267_vm8, %v19786_v44  ;;  %14007 = vmatprep.subr.msk.bf16.mxu0 %vm6119_vm7, %v6022_v59 }
 0x6da   :  { %v16309_v10 = vadd.f32 %v5543_v27, %v5542_v22  ;;  %v16311_v6 = vadd.f32 %v5348_v56, %v5347_v37  ;;  %291 = vst.msk [vmem:[#allocation3 + $0x170] sm:$0x1] %vm267_vm8, %v19786_v44  ;;  %292 = vst.msk [vmem:[#allocation3 + $0x180] sm:$0x1] %vm267_vm8, %v19786_v44  ;;  %v16466_v18 = vld [vmem:[%s19484_s7] sm:$0x3] }
 0x6db   :  { %v16323_v14 = vsel %vm232_vm2, %v5437_v42, 0.0  ;;  %293 = vst.msk [vmem:[#allocation3 + $0x190] sm:$0x1] %vm267_vm8, %v19786_v44  ;;  %294 = vst.msk [vmem:[#allocation3 + $0x1a0] sm:$0x1] %vm267_vm8, %v19786_v44  ;;  %v6121_v22 = vsel %vm6119_vm7, %v6022_v59, 0 }
 0x6dc   :  { %295 = vst.msk [vmem:[#allocation3 + $0x1b0] sm:$0x1] %vm267_vm8, %v19786_v44  ;;  %296 = vst.msk [vmem:[#allocation3 + $0x1c0] sm:$0x1] %vm267_vm8, %v19786_v44  ;;  %v5351_v7 = vadd.f32 %v16316_v0, %v16311_v6  ;;  %v5546_v37 = vadd.f32 %v16323_v14, %v16309_v10  ;;  %v5547_v27 = vsel %vm232_vm2, %v16300_v51, 0.0  ;;  %12377 = vmatpush3.bf16.msra.mxu0 %v6121_v22  ;;  %v5549_v58 = vsel %vm232_vm2, %v16320_v53, 0.0 }
 0x6dd   :  { %297 = vst.msk [vmem:[#allocation3 + $0x1d0] sm:$0x1] %vm267_vm8, %v19786_v44  ;;  %299 = vst.msk [vmem:[#allocation3 + $0x1f0] sm:$0x1] %vm267_vm8, %v19786_v44  ;;  %v16488_v56 = vpop.f32.mrb[56].mxu1  ;;  %14008 = vmatprep.subr.msk.bf16.mxu0 %vm6119_vm7, %v16466_v18 }
 0x6de   :  { %300 = vst.msk [vmem:[#allocation3 + $0x200] sm:$0x1] %vm267_vm8, %v19786_v44  ;;  %301 = vst.msk [vmem:[#allocation3 + $0x210] sm:$0x1] %vm267_vm8, %v19786_v44  ;;  %v5548_v42 = vadd.f32 %v5547_v27, %v5546_v37  ;;  %v16490_v6 = vpop.f32.mrb[57].mxu1 }
 0x6df   :  { %302 = vst.msk [vmem:[#allocation3 + $0x220] sm:$0x1] %vm267_vm8, %v19786_v44  ;;  %303 = vst.msk [vmem:[#allocation3 + $0x230] sm:$0x1] %vm267_vm8, %v19786_v44  ;;  %v5354_v59 = vsel %vm232_vm2, %v16490_v6, 0.0  ;;  %v5440_v51 = vmul.f32 %v16490_v6, %v16490_v6  ;;  %v16500_v0 = vpop.f32.mrb[58].mxu1 }
 0x6e0   :  { %304 = vst.msk [vmem:[#allocation3 + $0x240] sm:$0x1] %vm267_vm8, %v19786_v44  ;;  %305 = vst.msk [vmem:[#allocation3 + $0x250] sm:$0x1] %vm267_vm8, %v19786_v44  ;;  %v5550_v22 = vadd.f32 %v5549_v58, %v5548_v42  ;;  %v16502_v37 = vpop.f32.mrb[59].mxu1  ;;  %v5443_v42 = vmul.f32 %v16500_v0, %v16500_v0  ;;  %v5360_v47 = vsel %vm232_vm2, %v16500_v0, 0.0 }
 0x6e1   :  { %306 = vst.msk [vmem:[#allocation3 + $0x260] sm:$0x1] %vm267_vm8, %v19786_v44  ;;  %307 = vst.msk [vmem:[#allocation3 + $0x270] sm:$0x1] %vm267_vm8, %v19786_v44  ;;  %v5551_v27 = vsel %vm232_vm2, %v5440_v51, 0.0  ;;  %v5356_v53 = vsel %vm232_vm2, %v16502_v37, 0.0 }
 0x6e2   :  { %328 = vst.msk [vmem:[#allocation3 + $0x3c0] sm:$0x1] %vm267_vm8, %v19786_v44  ;;  %329 = vst.msk [vmem:[#allocation3 + $0x3d0] sm:$0x1] %vm267_vm8, %v19786_v44 }
 0x6e3   :  { %330 = vst.msk [vmem:[#allocation3 + $0x3e0] sm:$0x1] %vm267_vm8, %v19786_v44  ;;  %331 = vst.msk [vmem:[#allocation3 + $0x3f0] sm:$0x1] %vm267_vm8, %v19786_v44 }
 0x6e4   :  { %332 = vst.msk [vmem:[#allocation3 + $0x400] sm:$0x1] %vm267_vm8, %v19786_v44  ;;  %333 = vst.msk [vmem:[#allocation3 + $0x410] sm:$0x1] %vm267_vm8, %v19786_v44 }
 0x6e5   :  { %334 = vst.msk [vmem:[#allocation3 + $0x420] sm:$0x1] %vm267_vm8, %v19786_v44  ;;  %335 = vst.msk [vmem:[#allocation3 + $0x430] sm:$0x1] %vm267_vm8, %v19786_v44  ;;  %v16519_v49 = vpop.f32.mrb[60].mxu1 }
 0x6e6   :  { %336 = vst.msk [vmem:[#allocation3 + $0x440] sm:$0x1] %vm267_vm8, %v19786_v44  ;;  %338 = vst.msk [vmem:[#allocation3 + $0x460] sm:$0x1] %vm267_vm8, %v19786_v44 }
 0x6e7   :  { %339 = vst.msk [vmem:[#allocation3 + $0x470] sm:$0x1] %vm267_vm8, %v19786_v44  ;;  %340 = vst.msk [vmem:[#allocation3 + $0x480] sm:$0x1] %vm267_vm8, %v19786_v44 }
 0x6e8   :  { %341 = vst.msk [vmem:[#allocation3 + $0x490] sm:$0x1] %vm267_vm8, %v19786_v44  ;;  %342 = vst.msk [vmem:[#allocation3 + $0x4a0] sm:$0x1] %vm267_vm8, %v19786_v44 }
 0x6e9   :  { %343 = vst.msk [vmem:[#allocation3 + $0x4b0] sm:$0x1] %vm267_vm8, %v19786_v44  ;;  %344 = vst.msk [vmem:[#allocation3 + $0x4c0] sm:$0x1] %vm267_vm8, %v19786_v44 }
 0x6ea   :  { %345 = vst.msk [vmem:[#allocation3 + $0x4d0] sm:$0x1] %vm267_vm8, %v19786_v44  ;;  %346 = vst.msk [vmem:[#allocation3 + $0x4e0] sm:$0x1] %vm267_vm8, %v19786_v44 }
 0x6eb   :  { %349 = vst.msk [vmem:[#allocation3 + $0x19] sm:$0x1] %vm267_vm8, %v19786_v44  ;;  %350 = vst.msk [vmem:[#allocation3 + $0x29] sm:$0x1] %vm267_vm8, %v19786_v44 }
 0x6ec   :  { %351 = vst.msk [vmem:[#allocation3 + $0x39] sm:$0x1] %vm267_vm8, %v19786_v44  ;;  %352 = vst.msk [vmem:[#allocation3 + $0x49] sm:$0x1] %vm267_vm8, %v19786_v44 }
 0x6ed   :  { %353 = vst.msk [vmem:[#allocation3 + $0x59] sm:$0x1] %vm267_vm8, %v19786_v44  ;;  %354 = vst.msk [vmem:[#allocation3 + $0x69] sm:$0x1] %vm267_vm8, %v19786_v44 }
 0x6ee   :  { %355 = vst.msk [vmem:[#allocation3 + $0x79] sm:$0x1] %vm267_vm8, %v19786_v44  ;;  %356 = vst.msk [vmem:[#allocation3 + $0x89] sm:$0x1] %vm267_vm8, %v19786_v44 }
 0x6ef   :  { %359 = vst.msk [vmem:[#allocation3 + $0xb9] sm:$0x1] %vm267_vm8, %v19786_v44  ;;  %360 = vst.msk [vmem:[#allocation3 + $0xc9] sm:$0x1] %vm267_vm8, %v19786_v44 }
 0x6f0   :  { %361 = vst.msk [vmem:[#allocation3 + $0xd9] sm:$0x1] %vm267_vm8, %v19786_v44  ;;  %362 = vst.msk [vmem:[#allocation3 + $0xe9] sm:$0x1] %vm267_vm8, %v19786_v44 }
 0x6f1   :  { %363 = vst.msk [vmem:[#allocation3 + $0xf9] sm:$0x1] %vm267_vm8, %v19786_v44  ;;  %364 = vst.msk [vmem:[#allocation3 + $0x109] sm:$0x1] %vm267_vm8, %v19786_v44 }
 0x6f2   :  { %365 = vst.msk [vmem:[#allocation3 + $0x119] sm:$0x1] %vm267_vm8, %v19786_v44  ;;  %366 = vst.msk [vmem:[#allocation3 + $0x129] sm:$0x1] %vm267_vm8, %v19786_v44 }
 0x6f3   :  { %388 = vst.msk [vmem:[#allocation3 + $0x289] sm:$0x1] %vm267_vm8, %v19786_v44  ;;  %389 = vst.msk [vmem:[#allocation3 + $0x299] sm:$0x1] %vm267_vm8, %v19786_v44 }
 0x6f4   :  { %390 = vst.msk [vmem:[#allocation3 + $0x2a9] sm:$0x1] %vm267_vm8, %v19786_v44  ;;  %391 = vst.msk [vmem:[#allocation3 + $0x2b9] sm:$0x1] %vm267_vm8, %v19786_v44 }
 0x6f5   :  { %392 = vst.msk [vmem:[#allocation3 + $0x2c9] sm:$0x1] %vm267_vm8, %v19786_v44  ;;  %393 = vst.msk [vmem:[#allocation3 + $0x2d9] sm:$0x1] %vm267_vm8, %v19786_v44 }
 0x6f6   :  { %394 = vst.msk [vmem:[#allocation3 + $0x2e9] sm:$0x1] %vm267_vm8, %v19786_v44  ;;  %395 = vst.msk [vmem:[#allocation3 + $0x2f9] sm:$0x1] %vm267_vm8, %v19786_v44 }
 0x6f7   :  { %396 = vst.msk [vmem:[#allocation3 + $0x309] sm:$0x1] %vm267_vm8, %v19786_v44  ;;  %399 = vst.msk [vmem:[#allocation3 + $0x339] sm:$0x1] %vm267_vm8, %v19786_v44 }
 0x6f8   :  { %400 = vst.msk [vmem:[#allocation3 + $0x349] sm:$0x1] %vm267_vm8, %v19786_v44  ;;  %401 = vst.msk [vmem:[#allocation3 + $0x359] sm:$0x1] %vm267_vm8, %v19786_v44 }
 0x6f9   :  { %402 = vst.msk [vmem:[#allocation3 + $0x369] sm:$0x1] %vm267_vm8, %v19786_v44  ;;  %403 = vst.msk [vmem:[#allocation3 + $0x379] sm:$0x1] %vm267_vm8, %v19786_v44 }
 0x6fa   :  { %404 = vst.msk [vmem:[#allocation3 + $0x389] sm:$0x1] %vm267_vm8, %v19786_v44  ;;  %405 = vst.msk [vmem:[#allocation3 + $0x399] sm:$0x1] %vm267_vm8, %v19786_v44 }
 0x6fb   :  { %406 = vst.msk [vmem:[#allocation3 + $0x3a9] sm:$0x1] %vm267_vm8, %v19786_v44  ;;  %19789 = vst [vmem:[#allocation20_spill] sm:$0xff] %v16466_v18  ;;  %v5552_v18 = vadd.f32 %v5551_v27, %v5550_v22  ;;  %v16521_v22 = vpop.f32.mrb[61].mxu1  ;;  %v5557_v27 = vsel %vm232_vm2, %v5443_v42, 0.0 }
 0x6fc   :  { %357 = vst.msk [vmem:[#allocation3 + $0x99] sm:$0x1] %vm267_vm8, %v19786_v44  ;;  %367 = vst.msk [vmem:[#allocation3 + $0x139] sm:$0x1] %vm267_vm8, %v19786_v44 }
 0x6fd   :  { %398 = vst.msk [vmem:[#allocation3 + $0x329] sm:$0x1] %vm267_vm8, %v19786_v44  ;;  %v5352_v44 = vsel %vm232_vm2, %v16291_v50, 0.0  ;;  %19790 = vst [vmem:[#allocation15_spill] sm:$0xff] %v16488_v56 }
 0x6fe   :  { %19791 = vst [vmem:[#allocation12_spill] sm:$0xff] %v16490_v6  ;;  %v5353_v10 = vadd.f32 %v5352_v44, %v5351_v7  ;;  %19792 = vst [vmem:[#allocation18_spill] sm:$0xff] %v16500_v0  ;;  %v5442_v7 = vmul.f32 %v16488_v56, %v16488_v56  ;;  %v5441_v44 = vmul.f32 %v16502_v37, %v16502_v37  ;;  %v5358_v6 = vsel %vm232_vm2, %v16488_v56, 0.0 }
 0x6ff   :  { %19793 = vst [vmem:[#allocation19_spill] sm:$0xff] %v16502_v37  ;;  %19794 = vst [vmem:[#allocation16_spill] sm:$0xff] %v16519_v49 }
 0x700   :  { %v5355_v14 = vadd.f32 %v5354_v59, %v5353_v10  ;;  %v5553_v10 = vsel %vm232_vm2, %v5441_v44, 0.0  ;;  %v5555_v51 = vsel %vm232_vm2, %v5442_v7, 0.0  ;;  %19795 = vst [vmem:[#allocation6_spill] sm:$0xff] %v16521_v22 }
 0x701   :  { %v5554_v59 = vadd.f32 %v5553_v10, %v5552_v18  ;;  %v16528_v18 = vpop.f32.mrb[62].mxu1  ;;  %v5446_v10 = vmul.f32 %v16519_v49, %v16519_v49 }
 0x702   :  { %v5357_v50 = vadd.f32 %v5356_v53, %v5355_v14  ;;  %v5362_v53 = vsel %vm232_vm2, %v16521_v22, 0.0  ;;  %19796 = vst [vmem:[#allocation5_spill] sm:$0xff] %v16528_v18  ;;  %v16530_v44 = vpop.f32.mrb[63].mxu1  ;;  %v5368_v0 = vsel %vm232_vm2, %v16528_v18, 0.0 }
 0x703   :  { %v5556_v37 = vadd.f32 %v5555_v51, %v5554_v59  ;;  %19797 = vst [vmem:[#allocation8_spill] sm:$0xff] %v16530_v44  ;;  %v5445_v42 = vmul.f32 %v16530_v44, %v16530_v44  ;;  %v16547_v56 = vpop.f32.mrb[64].mxu1 }
 0x704   :  { %v5359_v58 = vadd.f32 %v5358_v6, %v5357_v50  ;;  %v5444_v50 = vmul.f32 %v16521_v22, %v16521_v22  ;;  %v5366_v22 = vsel %vm232_vm2, %v16519_v49, 0.0  ;;  %19798 = vst [vmem:[#allocation4_spill] sm:$0xff] %v16547_v56 }
 0x705   :  { %v5558_v7 = vadd.f32 %v5557_v27, %v5556_v37  ;;  %v5447_v37 = vmul.f32 %v16528_v18, %v16528_v18 }
 0x706   :  { %v5361_v14 = vadd.f32 %v5360_v47, %v5359_v58  ;;  %v5559_v59 = vsel %vm232_vm2, %v5444_v50, 0.0  ;;  %v5364_v47 = vsel %vm232_vm2, %v16530_v44, 0.0  ;;  %v5563_v50 = vsel %vm232_vm2, %v5446_v10, 0.0 }
 0x707   :  { %v5560_v58 = vadd.f32 %v5559_v59, %v5558_v7  ;;  %v16549_v7 = vpop.f32.mrb[65].mxu1  ;;  %v5565_v59 = vsel %vm232_vm2, %v5447_v37, 0.0 }
 0x708   :  { %v5363_v6 = vadd.f32 %v5362_v53, %v5361_v14  ;;  %v5561_v14 = vsel %vm232_vm2, %v5445_v42, 0.0  ;;  %19799 = vst [vmem:[#allocation7_spill] sm:$0xff] %v16549_v7  ;;  %v16556_v42 = vpop.f32.mrb[66].mxu1 }
 0x709   :  { %v5562_v53 = vadd.f32 %v5561_v14, %v5560_v58  ;;  %19800 = vst [vmem:[#allocation10_spill] sm:$0xff] %v16556_v42  ;;  %v5450_v14 = vmul.f32 %v16547_v56, %v16547_v56  ;;  %v5376_v18 = vsel %vm232_vm2, %v16556_v42, 0.0 }
 0x70a   :  { %v5365_v51 = vadd.f32 %v5364_v47, %v5363_v6  ;;  %v5370_v47 = vsel %vm232_vm2, %v16549_v7, 0.0 }
 0x70b   :  { %v5564_v44 = vadd.f32 %v5563_v50, %v5562_v53 }
 0x70c   :  { %v5367_v27 = vadd.f32 %v5366_v22, %v5365_v51  ;;  %v5448_v22 = vmul.f32 %v16549_v7, %v16549_v7  ;;  %v16558_v51 = vpop.f32.mrb[67].mxu1  ;;  %v5374_v7 = vsel %vm232_vm2, %v16547_v56, 0.0 }
 0x70d   :  { %v5566_v58 = vadd.f32 %v5565_v59, %v5564_v44  ;;  %19801 = vst [vmem:[#allocation21_spill] sm:$0xff] %v16558_v51  ;;  %v5449_v37 = vmul.f32 %v16558_v51, %v16558_v51  ;;  %v5451_v44 = vmul.f32 %v16556_v42, %v16556_v42  ;;  %v16575_v49 = vpop.f32.mrb[68].mxu1 }
 0x70e   :  { %v5369_v6 = vadd.f32 %v5368_v0, %v5367_v27  ;;  %v5567_v53 = vsel %vm232_vm2, %v5448_v22, 0.0  ;;  %v5372_v0 = vsel %vm232_vm2, %v16558_v51, 0.0  ;;  %v5571_v22 = vsel %vm232_vm2, %v5450_v14, 0.0  ;;  %19802 = vst [vmem:[#allocation22_spill] sm:$0xff] %v16575_v49 }
 0x70f   :  { %v5568_v27 = vadd.f32 %v5567_v53, %v5566_v58  ;;  %v16577_v58 = vpop.f32.mrb[69].mxu1  ;;  %v5573_v53 = vsel %vm232_vm2, %v5451_v44, 0.0  ;;  %v5382_v42 = vsel %vm232_vm2, %v16575_v49, 0.0 }
 0x710   :  { %v5371_v10 = vadd.f32 %v5370_v47, %v5369_v6  ;;  %v5569_v6 = vsel %vm232_vm2, %v5449_v37, 0.0  ;;  %19803 = vst [vmem:[#allocation25_spill] sm:$0xff] %v16577_v58  ;;  %v16584_v37 = vpop.f32.mrb[70].mxu1 }
 0x711   :  { %v5570_v47 = vadd.f32 %v5569_v6, %v5568_v27  ;;  %19804 = vst [vmem:[#allocation23_spill] sm:$0xff] %v16584_v37  ;;  %v5454_v6 = vmul.f32 %v16575_v49, %v16575_v49 }
 0x712   :  { %v5373_v50 = vadd.f32 %v5372_v0, %v5371_v10  ;;  %v5378_v0 = vsel %vm232_vm2, %v16577_v58, 0.0 }
 0x713   :  { %v5572_v51 = vadd.f32 %v5571_v22, %v5570_v47 }
 0x714   :  { %v5375_v59 = vadd.f32 %v5374_v7, %v5373_v50  ;;  %v5452_v7 = vmul.f32 %v16577_v58, %v16577_v58  ;;  %v5183_v50 = vpop.f32.mrb[71].mxu1  ;;  %v5455_v58 = vmul.f32 %v16584_v37, %v16584_v37 }
 0x715   :  { %v5574_v27 = vadd.f32 %v5573_v53, %v5572_v51 }
 0x716   :  { %v5377_v10 = vadd.f32 %v5376_v18, %v5375_v59  ;;  %v5575_v47 = vsel %vm232_vm2, %v5452_v7, 0.0  ;;  %v5380_v18 = vsel %vm232_vm2, %v5183_v50, 0.0  ;;  %v5453_v59 = vmul.f32 %v5183_v50, %v5183_v50 }
 0x717   :  { %v5576_v44 = vadd.f32 %v5575_v47, %v5574_v27  ;;  %v5384_v7 = vsel %vm232_vm2, %v16584_v37, 0.0  ;;  %v5581_v27 = vsel %vm232_vm2, %v5455_v58, 0.0  ;;  %v5601_v58 = vlaneseq }
 0x718   :  { %v5379_v14 = vadd.f32 %v5378_v0, %v5377_v10  ;;  %v5577_v10 = vsel %vm232_vm2, %v5453_v59, 0.0  ;;  %v5579_v0 = vsel %vm232_vm2, %v5454_v6, 0.0 }
 0x719   :  { %v5578_v53 = vadd.f32 %v5577_v10, %v5576_v44 }
 0x71a   :  { %v5381_v22 = vadd.f32 %v5380_v18, %v5379_v14 }
 0x71b   :  { %v5580_v41 = vadd.f32 %v5579_v0, %v5578_v53 }
 0x71c   :  { %v5383_v51 = vadd.f32 %v5382_v42, %v5381_v22 }
 0x71d   :  { %v5582_v47 = vadd.f32 %v5581_v27, %v5580_v41  ;;  %v5602_v41 = vshrl.u32 %v5601_v58, 7 }
 0x71e   :  { %v5385_v56 = vadd.f32 %v5384_v7, %v5383_v51 }
 0x71f   :  { %v5583_v49 = vrot.slane %v5582_v47, 4 }
 0x720   :  { %v5386_v14 = vrot.slane %v5385_v56, 4 }
 0x721   :  { %v5584_v8 = vadd.f32 %v5583_v49, %v5582_v47  ;;  %v5596_v49 = vld [vmem:[%s19485_s5] sm:$0x1] }
 0x722   :  { %v5387_v18 = vadd.f32 %v5386_v14, %v5385_v56 }
 0x723   :  { %v5585_v24 = vrot.slane %v5584_v8, 2 }
 0x724   :  { %v5388_v17 = vrot.slane %v5387_v18, 2 }
 0x725   :  { %v5586_v42 = vadd.f32 %v5585_v24, %v5584_v8  ;;  %v5598_v24 = vld [vmem:[%s19486_s6] sm:$0x1] }
 0x726   :  { %v5389_v29 = vadd.f32 %v5388_v17, %v5387_v18  ;;  %v16602_v17 = vsub.s32 0, %v5602_v41  ;;  %v19812_v41 = vld [vmem:[#allocation17_spill] sm:$0xff] }
 0x727   :  { %v5587_v22 = vrot.slane %v5586_v42, 1 }
 0x728   :  { %v5390_v59 = vrot.slane %v5389_v29, 1  ;;  %19805 = vst [vmem:[#allocation24_spill] sm:$0xff] %v16602_v17 }
 0x729   :  { %v5588_v6 = vadd.f32 %v5587_v22, %v5586_v42  ;;  %v19806_v22 = vld [vmem:[#allocation35_spill] sm:$0xff] }
 0x72a   :  { %v5391_v44 = vadd.f32 %v5390_v59, %v5389_v29 }
 0x72b   :  { %v5590_v19 = vmul.f32 0.001953125, %v5588_v6  ;;  %v19807_v6 = vld [vmem:[#allocation37_spill] sm:$0xff] }
 0x72c   :  { %v5589_v10 = vmul.f32 0.001953125, %v5391_v44 }
 0x72e   :  { %v5591_v37 = vmul.f32 %v5589_v10, %v5589_v10 }
 0x730   :  { %v5592_v51 = vsub.f32 %v5590_v19, %v5591_v37 }
 0x732   :  { %v5593_v53 = vmax.f32 %v5592_v51, 0.0  ;;  %v19809_v51 = vld [vmem:[#allocation36_spill] sm:$0xff] }
 0x734   :  { %v5594_v0 = vadd.f32 1e-05, %v5593_v53  ;;  %v19810_v53 = vld [vmem:[#allocation38_spill] sm:$0xff] }
 0x736   :  { %14185 = vrsqrt.f32 %v5594_v0  ;;  %v19811_v0 = vld [vmem:[#allocation14_spill] sm:$0xff] }
 0x740   :  { %v14186_v56 = vpop.eup %14185 }
 0x741   :  { %v5597_v8 = vmul.f32 %v14186_v56, %v5596_v49  ;;  %v19813_v56 = vld [vmem:[#allocation11_spill] sm:$0xff] }
 0x743   :  { %v5599_v29 = vmul.f32 %v5597_v8, %v5589_v10  ;;  %v16608_v19 = vrot.slane %v5597_v8, %v16602_v17  ;;  %v19808_v10 = vld [vmem:[#allocation9_spill] sm:$0xff] }
 0x745   :  { %v5600_v37 = vsub.f32 %v5598_v24, %v5599_v29  ;;  %v5819_v7 = vmul.f32 %v16608_v19, %v5183_v50  ;;  %v16613_v27 = vmul.f32 %v16608_v19, %v15969_v34  ;;  %v16617_v14 = vmul.f32 %v16608_v19, %v15975_v52  ;;  %v19814_v24 = vld [vmem:[#allocation13_spill] sm:$0xff] }
 0x746   :  { %v16621_v47 = vmul.f32 %v15967_v31, %v16608_v19  ;;  %v16625_v18 = vmul.f32 %v15973_v38, %v16608_v19  ;;  %v16629_v59 = vmul.f32 %v16608_v19, %v15996_v28  ;;  %v16633_v34 = vmul.f32 %v16608_v19, %v16005_v11 }
 0x747   :  { %v16636_v50 = vrot.slane %v5600_v37, %v16602_v17  ;;  %v16640_v52 = vmul.f32 %v15994_v20, %v16608_v19  ;;  %v16644_v31 = vmul.f32 %v16003_v57, %v16608_v19  ;;  %v16648_v38 = vmul.f32 %v16608_v19, %v16024_v23  ;;  %v19815_v37 = vld [vmem:[#allocation12_spill] sm:$0xff]  ;;  %v19831_v17 = vld [vmem:[#allocation7_spill] sm:$0xff] }
 0x748   :  { %v16652_v28 = vmul.f32 %v16608_v19, %v16033_v45  ;;  %v16656_v11 = vmul.f32 %v16022_v2, %v16608_v19  ;;  %v16660_v20 = vmul.f32 %v16031_v40, %v16608_v19  ;;  %v16664_v57 = vmul.f32 %v16608_v19, %v16052_v12 }
 0x749   :  { %v5835_v42 = vadd.f32 %v5819_v7, %v16636_v50  ;;  %v16669_v23 = vmul.f32 %v16608_v19, %v16061_v35  ;;  %v16673_v45 = vmul.f32 %v16050_v25, %v16608_v19  ;;  %v16677_v2 = vmul.f32 %v16059_v33, %v16608_v19 }
 0x74a   :  { %v16681_v40 = vmul.f32 %v16608_v19, %v16080_v16  ;;  %v16685_v12 = vmul.f32 %v16608_v19, %v16089_v3  ;;  %v16689_v35 = vmul.f32 %v16078_v54, %v16608_v19  ;;  %v16693_v25 = vmul.f32 %v16087_v48, %v16608_v19 }
 0x74b   :  { %v5851_v44 = vmax.f32 %v5835_v42, 0.0  ;;  %v16697_v33 = vmul.f32 %v16608_v19, %v16108_v26  ;;  %v16701_v16 = vmul.f32 %v16608_v19, %v16117_v46  ;;  %v16705_v3 = vmul.f32 %v16106_v55, %v16608_v19  ;;  %v19817_v42 = vld [vmem:[#allocation19_spill] sm:$0xff] }
 0x74c   :  { %v16709_v54 = vmul.f32 %v16115_v36, %v16608_v19  ;;  %v16713_v48 = vmul.f32 %v16608_v19, %v16136_v63  ;;  %v16717_v26 = vmul.f32 %v16608_v19, %v16145_v13  ;;  %v16721_v46 = vmul.f32 %v16134_v32, %v16608_v19 }
 0x74d   :  { %5868 = vst.msk [vmem:[#allocation3 + $0x4c1] sm:$0xff] %vm232_vm2, %v5851_v44  ;;  %v16726_v55 = vmul.f32 %v16143_v4, %v16608_v19  ;;  %v16730_v36 = vmul.f32 %v16608_v19, %v16165_v62  ;;  %v16734_v63 = vmul.f32 %v16608_v19, %v16173_v61  ;;  %v16738_v13 = vmul.f32 %v16162_v5, %v16608_v19 }
 0x74e   :  { %v16742_v32 = vmul.f32 %v16171_v21, %v16608_v19  ;;  %v16746_v4 = vmul.f32 %v16608_v19, %v16192_v9  ;;  %v16750_v62 = vmul.f32 %v16608_v19, %v16201_v60  ;;  %v16754_v61 = vmul.f32 %v16190_v15, %v16608_v19 }
 0x74f   :  { %v16758_v5 = vmul.f32 %v16199_v39, %v16608_v19  ;;  %v16762_v21 = vmul.f32 %v16608_v19, %v16220_v30  ;;  %v16766_v9 = vmul.f32 %v16608_v19, %v16229_v43  ;;  %v16770_v60 = vmul.f32 %v16218_v1, %v16608_v19 }
 0x750   :  { %v16774_v15 = vmul.f32 %v19806_v22, %v16608_v19  ;;  %v16778_v39 = vmul.f32 %v16608_v19, %v19807_v6  ;;  %v16782_v30 = vmul.f32 %v16608_v19, %v19808_v10  ;;  %v16786_v43 = vmul.f32 %v19809_v51, %v16608_v19  ;;  %v19819_v22 = vld [vmem:[#allocation15_spill] sm:$0xff]  ;;  %v19821_v10 = vld [vmem:[#allocation18_spill] sm:$0xff] }
 0x751   :  { %v16790_v1 = vmul.f32 %v19810_v53, %v16608_v19  ;;  %v16794_v58 = vmul.f32 %v16608_v19, %v19811_v0  ;;  %v16798_v49 = vmul.f32 %v16608_v19, %v19812_v41  ;;  %v16802_v8 = vmul.f32 %v19813_v56, %v16608_v19  ;;  %v19823_v53 = vld [vmem:[#allocation6_spill] sm:$0xff]  ;;  %v19825_v41 = vld [vmem:[#allocation8_spill] sm:$0xff] }
 0x752   :  { %v16806_v29 = vmul.f32 %v19814_v24, %v16608_v19  ;;  %v16810_v7 = vmul.f32 %v16608_v19, %v19815_v37  ;;  %v16814_v44 = vmul.f32 %v16608_v19, %v19817_v42  ;;  %v16818_v6 = vmul.f32 %v19819_v22, %v16608_v19  ;;  %v19827_v24 = vld [vmem:[#allocation16_spill] sm:$0xff]  ;;  %v19829_v42 = vld [vmem:[#allocation5_spill] sm:$0xff] }
 0x753   :  { %v16822_v51 = vmul.f32 %v19821_v10, %v16608_v19  ;;  %v16826_v0 = vmul.f32 %v16608_v19, %v19823_v53  ;;  %v16830_v56 = vmul.f32 %v16608_v19, %v19825_v41  ;;  %v16834_v37 = vmul.f32 %v19827_v24, %v16608_v19 }
 0x754   :  { %19816 = vst [vmem:[#allocation26_spill] sm:$0xff] %v16810_v7  ;;  %19818 = vst [vmem:[#allocation33_spill] sm:$0xff] %v16814_v44  ;;  %v16838_v22 = vmul.f32 %v19829_v42, %v16608_v19  ;;  %v16842_v10 = vmul.f32 %v16608_v19, %v19831_v17 }
 0x755   :  { %19820 = vst [vmem:[#allocation27_spill] sm:$0xff] %v16818_v6  ;;  %19822 = vst [vmem:[#allocation28_spill] sm:$0xff] %v16822_v51  ;;  %v19833_v51 = vld [vmem:[#allocation21_spill] sm:$0xff] }
 0x756   :  { %19824 = vst [vmem:[#allocation31_spill] sm:$0xff] %v16826_v0  ;;  %19826 = vst [vmem:[#allocation29_spill] sm:$0xff] %v16830_v56  ;;  %v16846_v53 = vmul.f32 %v16608_v19, %v19833_v51  ;;  %v19835_v0 = vld [vmem:[#allocation4_spill] sm:$0xff]  ;;  %v19837_v56 = vld [vmem:[#allocation10_spill] sm:$0xff] }
 0x757   :  { %19828 = vst [vmem:[#allocation30_spill] sm:$0xff] %v16834_v37  ;;  %19830 = vst [vmem:[#allocation32_spill] sm:$0xff] %v16838_v22  ;;  %v16850_v41 = vmul.f32 %v19835_v0, %v16608_v19  ;;  %v16854_v24 = vmul.f32 %v19837_v56, %v16608_v19  ;;  %v19839_v37 = vld [vmem:[#allocation25_spill] sm:$0xff]  ;;  %v19841_v22 = vld [vmem:[#allocation22_spill] sm:$0xff]  ;;  %v5627_v0 = vadd.f32 %v16636_v50, %v16613_v27 }
 0x758   :  { %19832 = vst [vmem:[#allocation34_spill] sm:$0xff] %v16842_v10  ;;  %19834 = vst [vmem:[#allocation35_spill] sm:$0xff] %v16846_v53  ;;  %v16858_v42 = vmul.f32 %v16608_v19, %v19839_v37  ;;  %v16862_v17 = vmul.f32 %v19841_v22, %v16608_v19  ;;  %v19843_v10 = vld [vmem:[#allocation23_spill] sm:$0xff]  ;;  %v5629_v56 = vadd.f32 %v16636_v50, %v16621_v47 }
 0x759   :  { %19836 = vst [vmem:[#allocation37_spill] sm:$0xff] %v16850_v41  ;;  %19838 = vst [vmem:[#allocation9_spill] sm:$0xff] %v16854_v24  ;;  %v16866_v51 = vmul.f32 %v19843_v10, %v16608_v19  ;;  %v5628_v41 = vadd.f32 %v16636_v50, %v16617_v14  ;;  %v5630_v37 = vadd.f32 %v16636_v50, %v16625_v18  ;;  %v5643_v10 = vmax.f32 %v5627_v0, 0.0 }
 0x75a   :  { %19840 = vst [vmem:[#allocation36_spill] sm:$0xff] %v16858_v42  ;;  %19842 = vst [vmem:[#allocation38_spill] sm:$0xff] %v16862_v17  ;;  %v5631_v22 = vadd.f32 %v16636_v50, %v16629_v59  ;;  %v5632_v17 = vadd.f32 %v16636_v50, %v16633_v34  ;;  %v5633_v19 = vadd.f32 %v16636_v50, %v16640_v52 }
 0x75b   :  { %19844 = vst [vmem:[#allocation14_spill] sm:$0xff] %v16866_v51  ;;  %v5634_v27 = vadd.f32 %v16636_v50, %v16644_v31  ;;  %v5635_v14 = vadd.f32 %v16636_v50, %v16648_v38  ;;  %v5636_v47 = vadd.f32 %v16636_v50, %v16652_v28  ;;  %v5637_v18 = vadd.f32 %v16636_v50, %v16656_v11 }
 0x75c   :  { %v5638_v59 = vadd.f32 %v16636_v50, %v16660_v20  ;;  %v5639_v34 = vadd.f32 %v16636_v50, %v16664_v57  ;;  %v5640_v52 = vadd.f32 %v16636_v50, %v16669_v23  ;;  %v5641_v31 = vadd.f32 %v16636_v50, %v16673_v45  ;;  %5660 = vst.msk [vmem:[#allocation3 + $0x11] sm:$0xff] %vm232_vm2, %v5643_v10 }
 0x75d   :  { %v5642_v38 = vadd.f32 %v16636_v50, %v16677_v2  ;;  %v5644_v28 = vmax.f32 %v5628_v41, 0.0  ;;  %v5645_v51 = vmax.f32 %v5629_v56, 0.0  ;;  %v5646_v42 = vmax.f32 %v5630_v37, 0.0 }
 0x75e   :  { %v5647_v11 = vmax.f32 %v5631_v22, 0.0  ;;  %v5648_v24 = vmax.f32 %v5632_v17, 0.0  ;;  %v5649_v53 = vmax.f32 %v5633_v19, 0.0  ;;  %v5650_v20 = vmax.f32 %v5634_v27, 0.0 }
 0x75f   :  { %v5651_v6 = vmax.f32 %v5635_v14, 0.0  ;;  %v5652_v44 = vmax.f32 %v5636_v47, 0.0  ;;  %v5653_v57 = vmax.f32 %v5637_v18, 0.0  ;;  %v5654_v7 = vmax.f32 %v5638_v59, 0.0  ;;  %5661 = vst.msk [vmem:[#allocation3 + $0x21] sm:$0xff] %vm232_vm2, %v5644_v28  ;;  %5662 = vst.msk [vmem:[#allocation3 + $0x31] sm:$0xff] %vm232_vm2, %v5645_v51 }
 0x760   :  { %5663 = vst.msk [vmem:[#allocation3 + $0x41] sm:$0xff] %vm232_vm2, %v5646_v42  ;;  %v5655_v23 = vmax.f32 %v5639_v34, 0.0  ;;  %v5656_v45 = vmax.f32 %v5640_v52, 0.0  ;;  %v5657_v2 = vmax.f32 %v5641_v31, 0.0  ;;  %v5658_v41 = vmax.f32 %v5642_v38, 0.0  ;;  %5664 = vst.msk [vmem:[#allocation3 + $0x51] sm:$0xff] %vm232_vm2, %v5647_v11 }
 0x761   :  { %5665 = vst.msk [vmem:[#allocation3 + $0x61] sm:$0xff] %vm232_vm2, %v5648_v24  ;;  %5666 = vst.msk [vmem:[#allocation3 + $0x71] sm:$0xff] %vm232_vm2, %v5649_v53  ;;  %v5692_v42 = vadd.f32 %v16681_v40, %v16636_v50  ;;  %v5693_v17 = vadd.f32 %v16685_v12, %v16636_v50  ;;  %v5694_v24 = vadd.f32 %v16689_v35, %v16636_v50 }
 0x762   :  { %5667 = vst.msk [vmem:[#allocation3 + $0x81] sm:$0xff] %vm232_vm2, %v5650_v20  ;;  %5668 = vst.msk [vmem:[#allocation3 + $0xb1] sm:$0xff] %vm232_vm2, %v5651_v6  ;;  %v5695_v53 = vadd.f32 %v16693_v25, %v16636_v50  ;;  %v5696_v40 = vadd.f32 %v16697_v33, %v16636_v50  ;;  %v5697_v12 = vadd.f32 %v16701_v16, %v16636_v50 }
 0x763   :  { %5669 = vst.msk [vmem:[#allocation3 + $0xc1] sm:$0xff] %vm232_vm2, %v5652_v44  ;;  %5670 = vst.msk [vmem:[#allocation3 + $0xd1] sm:$0xff] %vm232_vm2, %v5653_v57  ;;  %v5698_v35 = vadd.f32 %v16705_v3, %v16636_v50  ;;  %v5699_v25 = vadd.f32 %v16709_v54, %v16636_v50  ;;  %v5701_v44 = vadd.f32 %v16717_v26, %v16636_v50  ;;  %v5708_v51 = vmax.f32 %v5692_v42, 0.0 }
 0x764   :  { %5671 = vst.msk [vmem:[#allocation3 + $0xe1] sm:$0xff] %vm232_vm2, %v5654_v7  ;;  %5672 = vst.msk [vmem:[#allocation3 + $0xf1] sm:$0xff] %vm232_vm2, %v5655_v23  ;;  %v5700_v7 = vadd.f32 %v16713_v48, %v16636_v50  ;;  %v5702_v6 = vadd.f32 %v16721_v46, %v16636_v50  ;;  %v5703_v33 = vadd.f32 %v16726_v55, %v16636_v50  ;;  %v5709_v26 = vmax.f32 %v5693_v17, 0.0  ;;  %v19845_v17 = vld [vmem:[#allocation26_spill] sm:$0xff] }
 0x765   :  { %5673 = vst.msk [vmem:[#allocation3 + $0x101] sm:$0xff] %vm232_vm2, %v5656_v45  ;;  %5674 = vst.msk [vmem:[#allocation3 + $0x111] sm:$0xff] %vm232_vm2, %v5657_v2  ;;  %v5704_v16 = vadd.f32 %v16730_v36, %v16636_v50  ;;  %v5705_v3 = vadd.f32 %v16734_v63, %v16636_v50  ;;  %v5706_v54 = vadd.f32 %v16738_v13, %v16636_v50  ;;  %v5710_v0 = vmax.f32 %v5694_v24, 0.0 }
 0x766   :  { %5675 = vst.msk [vmem:[#allocation3 + $0x121] sm:$0xff] %vm232_vm2, %v5658_v41  ;;  %v5707_v48 = vadd.f32 %v16742_v32, %v16636_v50  ;;  %v5711_v56 = vmax.f32 %v5695_v53, 0.0  ;;  %v5712_v46 = vmax.f32 %v5696_v40, 0.0  ;;  %v5713_v37 = vmax.f32 %v5697_v12, 0.0  ;;  %5725 = vst.msk [vmem:[#allocation3 + $0x151] sm:$0xff] %vm232_vm2, %v5708_v51  ;;  %v19846_v53 = vld [vmem:[#allocation33_spill] sm:$0xff] }
 0x767   :  { %v5714_v22 = vmax.f32 %v5698_v35, 0.0  ;;  %v5715_v55 = vmax.f32 %v5699_v25, 0.0  ;;  %v5716_v19 = vmax.f32 %v5700_v7, 0.0  ;;  %v5717_v27 = vmax.f32 %v5701_v44, 0.0  ;;  %5726 = vst.msk [vmem:[#allocation3 + $0x161] sm:$0xff] %vm232_vm2, %v5709_v26  ;;  %5727 = vst.msk [vmem:[#allocation3 + $0x171] sm:$0xff] %vm232_vm2, %v5710_v0 }
 0x768   :  { %v5718_v36 = vmax.f32 %v5702_v6, 0.0  ;;  %v5719_v14 = vmax.f32 %v5703_v33, 0.0  ;;  %5728 = vst.msk [vmem:[#allocation3 + $0x181] sm:$0xff] %vm232_vm2, %v5711_v56  ;;  %v5720_v63 = vmax.f32 %v5704_v16, 0.0  ;;  %v5721_v13 = vmax.f32 %v5705_v3, 0.0  ;;  %5729 = vst.msk [vmem:[#allocation3 + $0x191] sm:$0xff] %vm232_vm2, %v5712_v46 }
 0x769   :  { %v5722_v32 = vmax.f32 %v5706_v54, 0.0  ;;  %v5723_v47 = vmax.f32 %v5707_v48, 0.0  ;;  %5730 = vst.msk [vmem:[#allocation3 + $0x1a1] sm:$0xff] %vm232_vm2, %v5713_v37  ;;  %5731 = vst.msk [vmem:[#allocation3 + $0x1b1] sm:$0xff] %vm232_vm2, %v5714_v22  ;;  %v5757_v18 = vadd.f32 %v16746_v4, %v16636_v50  ;;  %v5758_v59 = vadd.f32 %v16750_v62, %v16636_v50  ;;  %v19847_v12 = vld [vmem:[#allocation27_spill] sm:$0xff]  ;;  %v19848_v25 = vld [vmem:[#allocation28_spill] sm:$0xff] }
 0x76a   :  { %5732 = vst.msk [vmem:[#allocation3 + $0x1c1] sm:$0xff] %vm232_vm2, %v5715_v55  ;;  %5733 = vst.msk [vmem:[#allocation3 + $0x1f1] sm:$0xff] %vm232_vm2, %v5716_v19  ;;  %v5759_v34 = vadd.f32 %v16754_v61, %v16636_v50  ;;  %v5760_v52 = vadd.f32 %v16758_v5, %v16636_v50  ;;  %v5761_v4 = vadd.f32 %v16762_v21, %v16636_v50  ;;  %v19849_v44 = vld [vmem:[#allocation31_spill] sm:$0xff]  ;;  %v19850_v33 = vld [vmem:[#allocation29_spill] sm:$0xff] }
 0x76b   :  { %5734 = vst.msk [vmem:[#allocation3 + $0x201] sm:$0xff] %vm232_vm2, %v5717_v27  ;;  %5735 = vst.msk [vmem:[#allocation3 + $0x211] sm:$0xff] %vm232_vm2, %v5718_v36  ;;  %v5762_v62 = vadd.f32 %v16766_v9, %v16636_v50  ;;  %v5763_v61 = vadd.f32 %v16770_v60, %v16636_v50  ;;  %v5764_v5 = vadd.f32 %v16774_v15, %v16636_v50  ;;  %v5773_v28 = vmax.f32 %v5757_v18, 0.0  ;;  %v19851_v3 = vld [vmem:[#allocation30_spill] sm:$0xff]  ;;  %v19852_v48 = vld [vmem:[#allocation32_spill] sm:$0xff] }
 0x76c   :  { %5736 = vst.msk [vmem:[#allocation3 + $0x221] sm:$0xff] %vm232_vm2, %v5719_v14  ;;  %5737 = vst.msk [vmem:[#allocation3 + $0x231] sm:$0xff] %vm232_vm2, %v5720_v63  ;;  %v5765_v31 = vadd.f32 %v16778_v39, %v16636_v50  ;;  %v5766_v38 = vadd.f32 %v16782_v30, %v16636_v50  ;;  %v5767_v10 = vadd.f32 %v16786_v43, %v16636_v50  ;;  %v5774_v30 = vmax.f32 %v5758_v59, 0.0  ;;  %v19853_v26 = vld [vmem:[#allocation34_spill] sm:$0xff]  ;;  %v19854_v56 = vld [vmem:[#allocation35_spill] sm:$0xff] }
 0x76d   :  { %5738 = vst.msk [vmem:[#allocation3 + $0x241] sm:$0xff] %vm232_vm2, %v5721_v13  ;;  %5739 = vst.msk [vmem:[#allocation3 + $0x251] sm:$0xff] %vm232_vm2, %v5722_v32  ;;  %v5768_v21 = vadd.f32 %v16790_v1, %v16636_v50  ;;  %v5769_v9 = vadd.f32 %v16794_v58, %v16636_v50  ;;  %v5770_v60 = vadd.f32 %v16798_v49, %v16636_v50  ;;  %v5775_v11 = vmax.f32 %v5759_v34, 0.0  ;;  %v19855_v37 = vld [vmem:[#allocation37_spill] sm:$0xff]  ;;  %v19857_v27 = vld [vmem:[#allocation36_spill] sm:$0xff] }
 0x76e   :  { %5740 = vst.msk [vmem:[#allocation3 + $0x261] sm:$0xff] %vm232_vm2, %v5723_v47  ;;  %v5771_v15 = vadd.f32 %v16802_v8, %v16636_v50  ;;  %v5772_v39 = vadd.f32 %v16806_v29, %v16636_v50  ;;  %v5776_v20 = vmax.f32 %v5760_v52, 0.0  ;;  %v5777_v43 = vmax.f32 %v5761_v4, 0.0  ;;  %5790 = vst.msk [vmem:[#allocation3 + $0x291] sm:$0xff] %vm232_vm2, %v5773_v28  ;;  %v19856_v55 = vld [vmem:[#allocation9_spill] sm:$0xff]  ;;  %v19858_v14 = vld [vmem:[#allocation38_spill] sm:$0xff] }
 0x76f   :  { %v5778_v57 = vmax.f32 %v5762_v62, 0.0  ;;  %v5779_v23 = vmax.f32 %v5763_v61, 0.0  ;;  %v5780_v1 = vmax.f32 %v5764_v5, 0.0  ;;  %v5781_v45 = vmax.f32 %v5765_v31, 0.0  ;;  %5791 = vst.msk [vmem:[#allocation3 + $0x2a1] sm:$0xff] %vm232_vm2, %v5774_v30  ;;  %5792 = vst.msk [vmem:[#allocation3 + $0x2b1] sm:$0xff] %vm232_vm2, %v5775_v11 }
 0x770   :  { %v5782_v2 = vmax.f32 %v5766_v38, 0.0  ;;  %v5783_v58 = vmax.f32 %v5767_v10, 0.0  ;;  %v5784_v41 = vmax.f32 %v5768_v21, 0.0  ;;  %5793 = vst.msk [vmem:[#allocation3 + $0x2c1] sm:$0xff] %vm232_vm2, %v5776_v20  ;;  %v5785_v49 = vmax.f32 %v5769_v9, 0.0  ;;  %5794 = vst.msk [vmem:[#allocation3 + $0x2d1] sm:$0xff] %vm232_vm2, %v5777_v43 }
 0x771   :  { %v5786_v8 = vmax.f32 %v5770_v60, 0.0  ;;  %v5787_v29 = vmax.f32 %v5771_v15, 0.0  ;;  %v5788_v42 = vmax.f32 %v5772_v39, 0.0  ;;  %5795 = vst.msk [vmem:[#allocation3 + $0x2e1] sm:$0xff] %vm232_vm2, %v5778_v57  ;;  %5796 = vst.msk [vmem:[#allocation3 + $0x2f1] sm:$0xff] %vm232_vm2, %v5779_v23  ;;  %v5822_v24 = vadd.f32 %v19845_v17, %v16636_v50  ;;  %v19859_v13 = vld [vmem:[#allocation14_spill] sm:$0xff] }
 0x772   :  { %5797 = vst.msk [vmem:[#allocation3 + $0x301] sm:$0xff] %vm232_vm2, %v5780_v1  ;;  %5798 = vst.msk [vmem:[#allocation3 + $0x331] sm:$0xff] %vm232_vm2, %v5781_v45  ;;  %v5823_v40 = vadd.f32 %v19846_v53, %v16636_v50  ;;  %v5824_v35 = vadd.f32 %v19847_v12, %v16636_v50  ;;  %v5825_v7 = vadd.f32 %v19848_v25, %v16636_v50  ;;  %v5890_v4 = vld [vmem:[#allocation3 + $0x281] sm:$0xff] }
 0x773   :  { %5799 = vst.msk [vmem:[#allocation3 + $0x341] sm:$0xff] %vm232_vm2, %v5782_v2  ;;  %5800 = vst.msk [vmem:[#allocation3 + $0x351] sm:$0xff] %vm232_vm2, %v5783_v58  ;;  %v5826_v6 = vadd.f32 %v19849_v44, %v16636_v50  ;;  %v5827_v16 = vadd.f32 %v19850_v33, %v16636_v50  ;;  %v5828_v54 = vadd.f32 %v19851_v3, %v16636_v50  ;;  %v5838_v47 = vmax.f32 %v5822_v24, 0.0  ;;  %v19860_v57 = vld [vmem:[#allocation20_spill] sm:$0xff] }
 0x774   :  { %5801 = vst.msk [vmem:[#allocation3 + $0x361] sm:$0xff] %vm232_vm2, %v5784_v41  ;;  %5802 = vst.msk [vmem:[#allocation3 + $0x371] sm:$0xff] %vm232_vm2, %v5785_v49  ;;  %v5829_v51 = vadd.f32 %v19852_v48, %v16636_v50  ;;  %v5830_v0 = vadd.f32 %v19853_v26, %v16636_v50  ;;  %v5831_v46 = vadd.f32 %v19854_v56, %v16636_v50  ;;  %v5839_v18 = vmax.f32 %v5823_v40, 0.0  ;;  %v17070_v45 = vld [vmem:[%s19484_s7 + $0x4] sm:$0x3] }
 0x775   :  { %5803 = vst.msk [vmem:[#allocation3 + $0x381] sm:$0xff] %vm232_vm2, %v5786_v8  ;;  %5804 = vst.msk [vmem:[#allocation3 + $0x391] sm:$0xff] %vm232_vm2, %v5787_v29  ;;  %v5832_v22 = vadd.f32 %v19855_v37, %v16636_v50  ;;  %v5833_v19 = vadd.f32 %v19856_v55, %v16636_v50  ;;  %v5834_v36 = vadd.f32 %v19857_v27, %v16636_v50  ;;  %v5840_v59 = vmax.f32 %v5824_v35, 0.0  ;;  %v5891_v38 = vld [vmem:[#allocation3 + $0x291] sm:$0xff]  ;;  %v5898_v41 = vld [vmem:[#allocation3 + $0x321] sm:$0xff] }
 0x776   :  { %5805 = vst.msk [vmem:[#allocation3 + $0x3a1] sm:$0xff] %vm232_vm2, %v5788_v42  ;;  %v5836_v63 = vadd.f32 %v19858_v14, %v16636_v50  ;;  %v5837_v32 = vadd.f32 %v19859_v13, %v16636_v50  ;;  %v5841_v34 = vmax.f32 %v5825_v7, 0.0  ;;  %v5842_v52 = vmax.f32 %v5826_v6, 0.0  ;;  %5855 = vst.msk [vmem:[#allocation3 + $0x3d1] sm:$0xff] %vm232_vm2, %v5838_v47  ;;  %v5892_v10 = vld [vmem:[#allocation3 + $0x2a1] sm:$0xff]  ;;  %v5893_v50 = vld [vmem:[#allocation3 + $0x2b1] sm:$0xff] }
 0x777   :  { %v5843_v62 = vmax.f32 %v5827_v16, 0.0  ;;  %v5844_v61 = vmax.f32 %v5828_v54, 0.0  ;;  %v5845_v5 = vmax.f32 %v5829_v51, 0.0  ;;  %v5846_v31 = vmax.f32 %v5830_v0, 0.0  ;;  %5856 = vst.msk [vmem:[#allocation3 + $0x3e1] sm:$0xff] %vm232_vm2, %v5839_v18  ;;  %5857 = vst.msk [vmem:[#allocation3 + $0x3f1] sm:$0xff] %vm232_vm2, %v5840_v59 }
 0x778   :  { %v5847_v21 = vmax.f32 %v5831_v46, 0.0  ;;  %v5848_v9 = vmax.f32 %v5832_v22, 0.0  ;;  %v5849_v60 = vmax.f32 %v5833_v19, 0.0  ;;  %v5850_v15 = vmax.f32 %v5834_v36, 0.0  ;;  %5858 = vst.msk [vmem:[#allocation3 + $0x401] sm:$0xff] %vm232_vm2, %v5841_v34  ;;  %5859 = vst.msk [vmem:[#allocation3 + $0x411] sm:$0xff] %vm232_vm2, %v5842_v52 }
 0x779   :  { %v5894_v39 = vld [vmem:[#allocation3 + $0x2c1] sm:$0xff]  ;;  %v5852_v28 = vmax.f32 %v5836_v63, 0.0  ;;  %v5853_v30 = vmax.f32 %v5837_v32, 0.0  ;;  %5860 = vst.msk [vmem:[#allocation3 + $0x421] sm:$0xff] %vm232_vm2, %v5843_v62  ;;  %5861 = vst.msk [vmem:[#allocation3 + $0x431] sm:$0xff] %vm232_vm2, %v5844_v61  ;;  %v17051_v11 = vpack.c.bf16 %v5891_v38, %v5890_v4  ;;  %v17053_v20 = vpack.c.bf16 %v5893_v50, %v5892_v10  ;;  %v5895_v43 = vld [vmem:[#allocation3 + $0x2d1] sm:$0xff] }
 0x77a   :  { %5862 = vst.msk [vmem:[#allocation3 + $0x441] sm:$0xff] %vm232_vm2, %v5845_v5  ;;  %5863 = vst.msk [vmem:[#allocation3 + $0x471] sm:$0xff] %vm232_vm2, %v5846_v31  ;;  %v6461_v23 = vsel %vm6119_vm7, %v19860_v57, 0  ;;  %v17065_v1 = vpack.c.bf16 %v5895_v43, %v5894_v39  ;;  %v5896_v2 = vld [vmem:[#allocation3 + $0x2e1] sm:$0xff]  ;;  %v17078_v58 = vld [vmem:[#allocation3 + $0x2f1] sm:$0xff]  ;;  %v17103_v16 = vpack.c.bf16 %v5892_v10, %v5891_v38  ;;  %v17105_v3 = vpack.c.bf16 %v5894_v39, %v5893_v50 }
 0x77b   :  { %5864 = vst.msk [vmem:[#allocation3 + $0x481] sm:$0xff] %vm232_vm2, %v5847_v21  ;;  %5865 = vst.msk [vmem:[#allocation3 + $0x491] sm:$0xff] %vm232_vm2, %v5848_v9  ;;  %12378 = vmatprep.mubr.msk.bf16.mxu0 %vm232_vm2, %v17051_v11  ;;  %v5899_v49 = vld [vmem:[#allocation3 + $0x331] sm:$0xff]  ;;  %v17083_v29 = vpack.c.bf16 %v17078_v58, %v5896_v2  ;;  %v5900_v42 = vld [vmem:[#allocation3 + $0x341] sm:$0xff]  ;;  %v17131_v55 = vpack.c.bf16 %v5896_v2, %v5895_v43 }
 0x77c   :  { %5866 = vst.msk [vmem:[#allocation3 + $0x4a1] sm:$0xff] %vm232_vm2, %v5849_v60  ;;  %5867 = vst.msk [vmem:[#allocation3 + $0x4b1] sm:$0xff] %vm232_vm2, %v5850_v15  ;;  %12379 = vmatmul.mubr.msk.bf16.vlgmr.msra.gmra.mrb[8].mxu0 %vm232_vm2, %v17053_v20  ;;  %v5901_v17 = vld [vmem:[#allocation3 + $0x351] sm:$0xff]  ;;  %v17085_v24 = vld [vmem:[#allocation3 + $0x361] sm:$0xff]  ;;  %v17089_v40 = vpack.c.bf16 %v5899_v49, %v5898_v41  ;;  %v17147_v13 = vpack.c.bf16 %v5900_v42, %v5899_v49 }
 0x77d   :  { %5869 = vst.msk [vmem:[#allocation3 + $0x4d1] sm:$0xff] %vm232_vm2, %v5852_v28  ;;  %5870 = vst.msk [vmem:[#allocation3 + $0x4e1] sm:$0xff] %vm232_vm2, %v5853_v30  ;;  %12443 = vmatpush3.bf16.msra.mxu0 %v6461_v23  ;;  %12382 = vmatprep.mubr.msk.bf16.mxu0 %vm232_vm2, %v17065_v1  ;;  %v17080_v8 = vld [vmem:[#allocation3 + $0x3d0] sm:$0xff]  ;;  %v17087_v53 = vld [vmem:[#allocation3 + $0x4c0] sm:$0xff]  ;;  %v17160_v34 = vpack.c.bf16 %v17085_v24, %v5901_v17  ;;  %v17211_v23 = vpack.c.bf16 %v5901_v17, %v5900_v42 }
 0x77e   :  { %14009 = vmatprep.subr.msk.bf16.mxu0 %vm6119_vm7, %v17070_v45  ;;  %19861 = vst [vmem:[#allocation17_spill] sm:$0xff] %v17078_v58  ;;  %v5903_v12 = vld [vmem:[#allocation3 + $0x371] sm:$0xff]  ;;  %v17091_v35 = vld [vmem:[#allocation3 + $0x381] sm:$0xff]  ;;  %19862 = vst [vmem:[#allocation11_spill] sm:$0xff] %v17103_v16 }
 0x77f   :  { %v17093_v25 = vld [vmem:[#allocation3 + $0x3d1] sm:$0xff]  ;;  %v17095_v7 = vld [vmem:[#allocation3 + $0x3e1] sm:$0xff]  ;;  %19863 = vst [vmem:[#allocation13_spill] sm:$0xff] %v17105_v3  ;;  %19866 = vst [vmem:[#allocation15_spill] sm:$0xff] %v17131_v55  ;;  %v17185_v9 = vpack.c.bf16 %v17091_v35, %v5903_v12  ;;  %v17236_v17 = vpack.c.bf16 %v5903_v12, %v17085_v24 }
 0x780   :  { %v17097_v44 = vld [vmem:[#allocation3 + $0x3e0] sm:$0xff]  ;;  %v17099_v6 = vld [vmem:[#allocation3 + $0x3f0] sm:$0xff]  ;;  %19868 = vst [vmem:[#allocation6_spill] sm:$0xff] %v17147_v13  ;;  %19870 = vst [vmem:[#allocation16_spill] sm:$0xff] %v17160_v34  ;;  %v17189_v60 = vpack.c.bf16 %v17095_v7, %v17093_v25 }
 0x781   :  { %v17101_v33 = vld [vmem:[#allocation3 + $0x400] sm:$0xff]  ;;  %v17109_v54 = vld [vmem:[#allocation3 + $0x3f1] sm:$0xff]  ;;  %v17125_v37 = vpack.c.bf16 %v17097_v44, %v17080_v8  ;;  %19876 = vst [vmem:[#allocation25_spill] sm:$0xff] %v17185_v9 }
 0x782   :  { %v17111_v48 = vld [vmem:[#allocation3 + $0x401] sm:$0xff]  ;;  %v17113_v51 = vld [vmem:[#allocation3 + $0x411] sm:$0xff]  ;;  %v17129_v22 = vpack.c.bf16 %v17101_v33, %v17099_v6  ;;  %19877 = vst [vmem:[#allocation22_spill] sm:$0xff] %v17189_v60 }
 0x783   :  { %v17115_v26 = vld [vmem:[#allocation3 + $0x421] sm:$0xff]  ;;  %v17117_v0 = vld [vmem:[#allocation3 + $0x471] sm:$0xff]  ;;  %19864 = vst [vmem:[#allocation12_spill] sm:$0xff] %v17125_v37  ;;  %v17201_v30 = vpack.c.bf16 %v17111_v48, %v17109_v54 }
 0x784   :  { %12383 = vmatmul.mubr.msk.bf16.gmra.mrb[12].mxu0 %vm232_vm2, %v17083_v29  ;;  %v17119_v56 = vld [vmem:[#allocation3 + $0x410] sm:$0xff]  ;;  %v17121_v46 = vld [vmem:[#allocation3 + $0x420] sm:$0xff]  ;;  %19865 = vst [vmem:[#allocation19_spill] sm:$0xff] %v17129_v22  ;;  %v17205_v43 = vpack.c.bf16 %v17115_v26, %v17113_v51 }
 0x785   :  { %12386 = vmatprep.mubr.msk.bf16.mxu0 %vm232_vm2, %v17089_v40  ;;  %v17135_v19 = vld [vmem:[#allocation3 + $0x4c1] sm:$0xff]  ;;  %v17137_v27 = vld [vmem:[#allocation3 + $0x470] sm:$0xff]  ;;  %v17145_v63 = vpack.c.bf16 %v17121_v46, %v17119_v56  ;;  %19882 = vst [vmem:[#allocation28_spill] sm:$0xff] %v17201_v30 }
 0x786   :  { %v17139_v36 = vld [vmem:[#allocation3 + $0x480] sm:$0xff]  ;;  %v17141_v14 = vld [vmem:[#allocation3 + $0x490] sm:$0xff]  ;;  %19883 = vst [vmem:[#allocation31_spill] sm:$0xff] %v17205_v43 }
 0x787   :  { %19867 = vst [vmem:[#allocation18_spill] sm:$0xff] %v17145_v63  ;;  %v17149_v32 = vld [vmem:[#allocation3 + $0x481] sm:$0xff]  ;;  %v17153_v18 = vld [vmem:[#allocation3 + $0x4b0] sm:$0xff]  ;;  %v17157_v59 = vpack.c.bf16 %v17139_v36, %v17137_v27 }
 0x788   :  { %v17151_v47 = vld [vmem:[#allocation3 + $0x4a0] sm:$0xff]  ;;  %v17162_v52 = vld [vmem:[#allocation3 + $0x491] sm:$0xff]  ;;  %v17176_v31 = vpack.c.bf16 %v17087_v53, %v17153_v18  ;;  %v17209_v57 = vpack.c.bf16 %v17149_v32, %v17117_v0 }
 0x789   :  { %19869 = vst [vmem:[#allocation8_spill] sm:$0xff] %v17157_v59  ;;  %v17164_v4 = vld [vmem:[#allocation3 + $0x4a1] sm:$0xff]  ;;  %v17166_v62 = vld [vmem:[#allocation3 + $0x4b1] sm:$0xff]  ;;  %v17172_v5 = vpack.c.bf16 %v17151_v47, %v17141_v14 }
 0x78a   :  { %v17168_v61 = vld [vmem:[#allocation3 + $0x160] sm:$0xff]  ;;  %19872 = vst [vmem:[#allocation7_spill] sm:$0xff] %v17176_v31  ;;  %v17178_v38 = vld [vmem:[#allocation3 + $0x170] sm:$0xff]  ;;  %19884 = vst [vmem:[#allocation29_spill] sm:$0xff] %v17209_v57  ;;  %v17229_v43 = vpack.c.bf16 %v17164_v4, %v17162_v52  ;;  %v17233_v42 = vpack.c.bf16 %v17135_v19, %v17166_v62 }
 0x78b   :  { %19871 = vst [vmem:[#allocation5_spill] sm:$0xff] %v17172_v5  ;;  %19873 = vst [vmem:[#allocation21_spill] sm:$0xff] %v17178_v38  ;;  %v17180_v10 = vld [vmem:[#allocation3 + $0x180] sm:$0xff]  ;;  %v17182_v21 = vld [vmem:[#allocation3 + $0x190] sm:$0xff]  ;;  %v17392_v38 = vpack.c.bf16 %v17109_v54, %v17095_v7  ;;  %v17417_v54 = vpack.c.bf16 %v17162_v52, %v17149_v32 }
 0x78c   :  { %19874 = vst [vmem:[#allocation4_spill] sm:$0xff] %v17180_v10  ;;  %19875 = vst [vmem:[#allocation10_spill] sm:$0xff] %v17182_v21  ;;  %v17191_v15 = vld [vmem:[#allocation3 + $0x1a0] sm:$0xff]  ;;  %v17193_v50 = vld [vmem:[#allocation3 + $0x1b0] sm:$0xff]  ;;  %12387 = vmatmul.mubr.msk.bf16.gmra.mrb[16].mxu0 %vm232_vm2, %v17211_v23 }
 0x78d   :  { %19878 = vst [vmem:[#allocation23_spill] sm:$0xff] %v17191_v15  ;;  %19879 = vst [vmem:[#allocation26_spill] sm:$0xff] %v17193_v50  ;;  %v17195_v39 = vld [vmem:[#allocation3 + $0x292] sm:$0xff]  ;;  %v17197_v28 = vld [vmem:[#allocation3 + $0x2a2] sm:$0xff]  ;;  %12390 = vmatprep.mubr.msk.bf16.mxu0 %vm232_vm2, %v17236_v17  ;;  %v17396_v50 = vpack.c.bf16 %v17113_v51, %v17111_v48  ;;  %v17421_v48 = vpack.c.bf16 %v17166_v62, %v17164_v4 }
 0x78e   :  { %19880 = vst [vmem:[#allocation33_spill] sm:$0xff] %v17195_v39  ;;  %19881 = vst [vmem:[#allocation27_spill] sm:$0xff] %v17197_v28  ;;  %v17213_v2 = vld [vmem:[#allocation3 + $0x200] sm:$0xff]  ;;  %v17215_v41 = vld [vmem:[#allocation3 + $0x210] sm:$0xff]  ;;  %v17246_v55 = vpack.c.bf16 %v17197_v28, %v17195_v39 }
 0x78f   :  { %19885 = vst [vmem:[#allocation30_spill] sm:$0xff] %v17213_v2  ;;  %19886 = vst [vmem:[#allocation32_spill] sm:$0xff] %v17215_v41  ;;  %v17217_v49 = vld [vmem:[#allocation3 + $0x220] sm:$0xff]  ;;  %v17219_v60 = vld [vmem:[#allocation3 + $0x230] sm:$0xff] }
 0x790   :  { %19887 = vst [vmem:[#allocation34_spill] sm:$0xff] %v17217_v49  ;;  %19888 = vst [vmem:[#allocation35_spill] sm:$0xff] %v17219_v60  ;;  %v17221_v9 = vld [vmem:[#allocation3 + $0x2b2] sm:$0xff]  ;;  %v17223_v30 = vld [vmem:[#allocation3 + $0x2c2] sm:$0xff] }
 0x791   :  { %19889 = vst [vmem:[#allocation37_spill] sm:$0xff] %v17221_v9  ;;  %19890 = vst [vmem:[#allocation9_spill] sm:$0xff] %v17223_v30  ;;  %v17225_v34 = vld [vmem:[#allocation3 + $0x2d2] sm:$0xff]  ;;  %v17238_v57 = vld [vmem:[#allocation3 + $0x240] sm:$0xff] }
 0x792   :  { %19891 = vst [vmem:[#allocation36_spill] sm:$0xff] %v17225_v34  ;;  %19892 = vst [vmem:[#allocation38_spill] sm:$0xff] %v17229_v43  ;;  %v17240_v13 = vld [vmem:[#allocation3 + $0x2e2] sm:$0xff]  ;;  %v17242_v58 = vld [vmem:[#allocation3 + $0x332] sm:$0xff]  ;;  %v17250_v43 = vpack.c.bf16 %v17223_v30, %v17221_v9 }
 0x793   :  { %19893 = vst [vmem:[#allocation14_spill] sm:$0xff] %v17233_v42  ;;  %19894 = vst [vmem:[#allocation20_spill] sm:$0xff] %v17238_v57  ;;  %v17254_v42 = vld [vmem:[#allocation3 + $0x21] sm:$0xff]  ;;  %v17256_v24 = vld [vmem:[#allocation3 + $0x31] sm:$0xff] }
 0x794   :  { %19895 = vst [vmem:[#allocation39_spill] sm:$0xff] %v17240_v13  ;;  %19896 = vst [vmem:[#allocation40_spill] sm:$0xff] %v17242_v58  ;;  %v17258_v12 = vld [vmem:[#allocation3 + $0x41] sm:$0xff]  ;;  %v17262_v16 = vld [vmem:[#allocation3 + $0x352] sm:$0xff]  ;;  %v17322_v28 = vpack.c.bf16 %v17256_v24, %v17254_v42 }
 0x795   :  { %19897 = vst [vmem:[#allocation41_spill] sm:$0xff] %v17246_v55  ;;  %19898 = vst [vmem:[#allocation42_spill] sm:$0xff] %v17250_v43  ;;  %v17260_v3 = vld [vmem:[#allocation3 + $0x342] sm:$0xff]  ;;  %v17268_v55 = vpack.c.bf16 %v17240_v13, %v17225_v34  ;;  %v17274_v5 = vld [vmem:[#allocation3 + $0x250] sm:$0xff]  ;;  %v17442_v52 = vpack.c.bf16 %v17258_v12, %v17256_v24 }
 0x796   :  { %19899 = vst [vmem:[#allocation43_spill] sm:$0xff] %v17260_v3  ;;  %19900 = vst [vmem:[#allocation44_spill] sm:$0xff] %v17262_v16  ;;  %v17264_v31 = vld [vmem:[#allocation3 + $0x362] sm:$0xff]  ;;  %v17276_v59 = vld [vmem:[#allocation3 + $0x372] sm:$0xff]  ;;  %v17282_v22 = vpack.c.bf16 %v17260_v3, %v17242_v58 }
 0x797   :  { %19901 = vst [vmem:[#allocation45_spill] sm:$0xff] %v17264_v31  ;;  %19902 = vst [vmem:[#allocation46_spill] sm:$0xff] %v17268_v55  ;;  %v17278_v63 = vld [vmem:[#allocation3 + $0x382] sm:$0xff]  ;;  %v17286_v37 = vpack.c.bf16 %v17264_v31, %v17262_v16  ;;  %v17290_v55 = vld [vmem:[#allocation3 + $0x51] sm:$0xff] }
 0x798   :  { %19903 = vst [vmem:[#allocation47_spill] sm:$0xff] %v17274_v5  ;;  %19904 = vst [vmem:[#allocation48_spill] sm:$0xff] %v17276_v59  ;;  %v17292_v13 = vld [vmem:[#allocation3 + $0x61] sm:$0xff]  ;;  %v17294_v34 = vld [vmem:[#allocation3 + $0x71] sm:$0xff]  ;;  %v17298_v30 = vpack.c.bf16 %v17278_v63, %v17276_v59  ;;  %v17326_v43 = vpack.c.bf16 %v17290_v55, %v17258_v12 }
 0x799   :  { %19905 = vst [vmem:[#allocation49_spill] sm:$0xff] %v17278_v63  ;;  %19906 = vst [vmem:[#allocation50_spill] sm:$0xff] %v17282_v22  ;;  %v17302_v3 = vld [vmem:[#allocation3 + $0x391] sm:$0xff]  ;;  %v17304_v31 = vld [vmem:[#allocation3 + $0xc1] sm:$0xff]  ;;  %v17330_v16 = vpack.c.bf16 %v17294_v34, %v17292_v13  ;;  %v17446_v4 = vpack.c.bf16 %v17292_v13, %v17290_v55 }
 0x79a   :  { %19907 = vst [vmem:[#allocation51_spill] sm:$0xff] %v17286_v37  ;;  %19908 = vst [vmem:[#allocation52_spill] sm:$0xff] %v17298_v30  ;;  %v17306_v37 = vld [vmem:[#allocation3 + $0xd1] sm:$0xff]  ;;  %v5971_v58 = vld [vmem:[#allocation3 + $0x3c1] sm:$0xff]  ;;  %v17334_v39 = vpack.c.bf16 %v17302_v3, %v17091_v35 }
 0x79b   :  { %19909 = vst [vmem:[#allocation53_spill] sm:$0xff] %v17302_v3  ;;  %v17312_v9 = vld [vmem:[#allocation3 + $0xe1] sm:$0xff]  ;;  %v17314_v63 = vld [vmem:[#allocation3 + $0xf1] sm:$0xff]  ;;  %19910 = vst [vmem:[#allocation54_spill] sm:$0xff] %v17322_v28  ;;  %v17344_v28 = vpack.c.bf16 %v17306_v37, %v17304_v31 }
 0x79c   :  { %v5935_v30 = vld [vmem:[#allocation3 + $0x101] sm:$0xff]  ;;  %v17318_v59 = vld [vmem:[#allocation3 + $0x111] sm:$0xff]  ;;  %19911 = vst [vmem:[#allocation55_spill] sm:$0xff] %v17326_v43  ;;  %19912 = vst [vmem:[#allocation56_spill] sm:$0xff] %v17330_v16  ;;  %v17347_v43 = vpack.c.bf16 %v17093_v25, %v5971_v58  ;;  %v17357_v35 = vpack.c.bf16 %v17314_v63, %v17312_v9  ;;  %12391 = vmatmul.mubr.msk.bf16.gmra.mrb[20].mxu0 %vm232_vm2, %v17334_v39  ;;  %v17467_v55 = vpack.c.bf16 %v17312_v9, %v17306_v37 }
 0x79d   :  { %v17336_v22 = vld [vmem:[#allocation3 + $0x22] sm:$0xff]  ;;  %v17338_v5 = vld [vmem:[#allocation3 + $0x32] sm:$0xff]  ;;  %19913 = vst [vmem:[#allocation57_spill] sm:$0xff] %v17344_v28  ;;  %v17368_v58 = vpack.c.bf16 %v17318_v59, %v5935_v30  ;;  %v17470_v13 = vpack.c.bf16 %v5935_v30, %v17314_v63 }
 0x79e   :  { %v17340_v57 = vld [vmem:[#allocation3 + $0x42] sm:$0xff]  ;;  %19914 = vst [vmem:[#allocation58_spill] sm:$0xff] %v17347_v43  ;;  %v17349_v60 = vld [vmem:[#allocation3 + $0x52] sm:$0xff]  ;;  %19917 = vst [vmem:[#allocation61_spill] sm:$0xff] %v17357_v35  ;;  %12394 = vmatprep.mubr.msk.bf16.mxu0 %vm232_vm2, %v17347_v43 }
 0x79f   :  { %v17351_v16 = vld [vmem:[#allocation3 + $0x62] sm:$0xff]  ;;  %v17353_v49 = vld [vmem:[#allocation3 + $0x72] sm:$0xff]  ;;  %19921 = vst [vmem:[#allocation65_spill] sm:$0xff] %v17368_v58 }
 0x7a0   :  { %19915 = vst [vmem:[#allocation59_spill] sm:$0xff] %v17351_v16  ;;  %19916 = vst [vmem:[#allocation60_spill] sm:$0xff] %v17353_v49  ;;  %v17361_v3 = vld [vmem:[#allocation3 + $0xc2] sm:$0xff]  ;;  %v17363_v41 = vld [vmem:[#allocation3 + $0xd2] sm:$0xff] }
 0x7a1   :  { %19918 = vst [vmem:[#allocation62_spill] sm:$0xff] %v17361_v3  ;;  %19919 = vst [vmem:[#allocation63_spill] sm:$0xff] %v17363_v41  ;;  %v17365_v28 = vld [vmem:[#allocation3 + $0xe2] sm:$0xff]  ;;  %v17372_v25 = vld [vmem:[#allocation3 + $0xf2] sm:$0xff] }
 0x7a2   :  { %19920 = vst [vmem:[#allocation64_spill] sm:$0xff] %v17365_v28  ;;  %19922 = vst [vmem:[#allocation66_spill] sm:$0xff] %v17372_v25  ;;  %v17374_v2 = vld [vmem:[#allocation3 + $0x102] sm:$0xff]  ;;  %v17376_v35 = vld [vmem:[#allocation3 + $0x112] sm:$0xff] }
 0x7a3   :  { %19923 = vst [vmem:[#allocation67_spill] sm:$0xff] %v17374_v2  ;;  %19924 = vst [vmem:[#allocation68_spill] sm:$0xff] %v17376_v35  ;;  %v17402_v58 = vld [vmem:[#allocation3 + $0x431] sm:$0xff]  ;;  %v5979_v43 = vld [vmem:[#allocation3 + $0x461] sm:$0xff] }
 0x7a4   :  { %12395 = vmatmul.mubr.msk.bf16.gmra.mrb[24].mxu0 %vm232_vm2, %v17392_v38  ;;  %19925 = vst [vmem:[#allocation69_spill] sm:$0xff] %v17402_v58  ;;  %v17406_v10 = vpack.c.bf16 %v17402_v58, %v17115_v26  ;;  %v17409_v7 = vpack.c.bf16 %v17117_v0, %v5979_v43  ;;  %v17427_v51 = vld [vmem:[#allocation3 + $0x4d1] sm:$0xff]  ;;  %v5988_v24 = vld [vmem:[#allocation3 + $0x161] sm:$0xff] }
 0x7a5   :  { %12398 = vmatprep.mubr.msk.bf16.mxu0 %vm232_vm2, %v17396_v50  ;;  %19926 = vst [vmem:[#allocation70_spill] sm:$0xff] %v17427_v51  ;;  %v5922_v26 = vld [vmem:[#allocation3 + $0x11] sm:$0xff]  ;;  %v17431_v0 = vpack.c.bf16 %v17427_v51, %v17135_v19  ;;  %v17452_v19 = vld [vmem:[#allocation3 + $0x81] sm:$0xff] }
 0x7a6   :  { %v17434_v32 = vpack.c.bf16 %v17254_v42, %v5922_v26  ;;  %19927 = vst [vmem:[#allocation71_spill] sm:$0xff] %v17452_v19  ;;  %v5930_v62 = vld [vmem:[#allocation3 + $0xb1] sm:$0xff]  ;;  %v17456_v43 = vpack.c.bf16 %v17452_v19, %v17294_v34  ;;  %v17476_v34 = vld [vmem:[#allocation3 + $0x121] sm:$0xff] }
 0x7a7   :  { %v17459_v42 = vpack.c.bf16 %v17304_v31, %v5930_v62  ;;  %19928 = vst [vmem:[#allocation72_spill] sm:$0xff] %v17476_v34  ;;  %v5987_v31 = vld [vmem:[#allocation3 + $0x151] sm:$0xff]  ;;  %v17480_v12 = vpack.c.bf16 %v17476_v34, %v17318_v59  ;;  %v5990_v63 = vld [vmem:[#allocation3 + $0x181] sm:$0xff] }
 0x7a8   :  { %v17482_v26 = vpack.c.bf16 %v5988_v24, %v5987_v31  ;;  %v5989_v37 = vld [vmem:[#allocation3 + $0x171] sm:$0xff]  ;;  %v5992_v30 = vld [vmem:[#allocation3 + $0x1a1] sm:$0xff] }
 0x7a9   :  { %v5991_v9 = vld [vmem:[#allocation3 + $0x191] sm:$0xff]  ;;  %v17488_v62 = vpack.c.bf16 %v5990_v63, %v5989_v37  ;;  %v5994_v31 = vld [vmem:[#allocation3 + $0x1c1] sm:$0xff] }
 0x7aa   :  { %v17490_v21 = vpack.c.bf16 %v5992_v30, %v5991_v9  ;;  %v5993_v59 = vld [vmem:[#allocation3 + $0x1b1] sm:$0xff]  ;;  %v5996_v15 = vld [vmem:[#allocation3 + $0x201] sm:$0xff] }
 0x7ab   :  { %v5995_v24 = vld [vmem:[#allocation3 + $0x1f1] sm:$0xff]  ;;  %v17496_v34 = vpack.c.bf16 %v5994_v31, %v5993_v59  ;;  %v5998_v63 = vld [vmem:[#allocation3 + $0x221] sm:$0xff] }
 0x7ac   :  { %12399 = vmatmul.mubr.msk.bf16.gmra.mrb[28].mxu0 %vm232_vm2, %v17406_v10  ;;  %v17498_v19 = vpack.c.bf16 %v5996_v15, %v5995_v24  ;;  %v5997_v37 = vld [vmem:[#allocation3 + $0x211] sm:$0xff]  ;;  %v6000_v30 = vld [vmem:[#allocation3 + $0x241] sm:$0xff] }
 0x7ad   :  { %12402 = vmatprep.mubr.msk.bf16.mxu0 %vm232_vm2, %v17409_v7  ;;  %v5999_v9 = vld [vmem:[#allocation3 + $0x231] sm:$0xff]  ;;  %v17504_v51 = vpack.c.bf16 %v5998_v63, %v5997_v37  ;;  %v6002_v59 = vld [vmem:[#allocation3 + $0x261] sm:$0xff]  ;;  %v5939_v63 = vpack.c.bf16 %v17099_v6, %v17097_v44 }
 0x7ae   :  { %v17506_v58 = vpack.c.bf16 %v6000_v30, %v5999_v9  ;;  %v6001_v15 = vld [vmem:[#allocation3 + $0x251] sm:$0xff]  ;;  %v5873_v31 = vld [vmem:[#allocation3 + $0x3c0] sm:$0xff]  ;;  %v6850_v9 = vsel %vm6119_vm7, %v17070_v45, 0  ;;  %v5943_v45 = vpack.c.bf16 %v17141_v14, %v17139_v36 }
 0x7af   :  { %v17512_v24 = vpack.c.bf16 %v6002_v59, %v6001_v15  ;;  %v5938_v35 = vpack.c.bf16 %v17080_v8, %v5873_v31  ;;  %v14182_v37 = vld [vmem:[%s19484_s7 + $0x4] ss:$0 sps:$4 sm:$0xcc]   ;;  %v5940_v15 = vpack.c.bf16 %v17119_v56, %v17101_v33  ;;  %v17530_v8 = vld [vmem:[#allocation3 + $0x430] sm:$0xff]  ;;  %v5944_v33 = vpack.c.bf16 %v17153_v18, %v17151_v47 }
 0x7b0   :  { %v7257_v30 = vrot.slane %v14182_v37, 2  ;;  %v5941_v44 = vpack.c.bf16 %v17530_v8, %v17121_v46  ;;  %v17543_v56 = vld [vmem:[#allocation3 + $0x4d0] sm:$0xff]  ;;  %v17581_v14 = vld [vmem:[#allocation3 + $0x1c0] sm:$0xff] }
 0x7b1   :  { %v5945_v46 = vpack.c.bf16 %v17543_v56, %v17087_v53  ;;  %v5906_v53 = vld [vmem:[#allocation3 + $0x150] sm:$0xff]  ;;  %v19935_v59 = vld [vmem:[#allocation32_spill] sm:$0xff] }
 0x7b2   :  { %v5914_v47 = vld [vmem:[#allocation3 + $0x1f0] sm:$0xff] }
 0x7b3   :  { %v19933_v18 = vld [vmem:[#allocation26_spill] sm:$0xff] }
 0x7b4   :  { %12403 = vmatmul.mubr.msk.bf16.gmra.mrb[32].mxu0 %vm232_vm2, %v17417_v54  ;;  %v19936_v31 = vld [vmem:[#allocation34_spill] sm:$0xff] }
 0x7b5   :  { %12406 = vmatprep.mubr.msk.bf16.mxu0 %vm232_vm2, %v17421_v48  ;;  %v17596_v37 = vpack.c.bf16 %v19936_v31, %v19935_v59 }
 0x7bc   :  { %12407 = vmatmul.mubr.msk.bf16.gmra.mrb[36].mxu0 %vm232_vm2, %v17431_v0 }
 0x7bd   :  { %12410 = vmatprep.mubr.msk.bf16.mxu0 %vm232_vm2, %v17434_v32 }
 0x7c4   :  { %12411 = vmatmul.mubr.msk.bf16.gmra.mrb[40].mxu0 %vm232_vm2, %v17442_v52 }
 0x7c5   :  { %12414 = vmatprep.mubr.msk.bf16.mxu0 %vm232_vm2, %v17446_v4 }
 0x7cc   :  { %12415 = vmatmul.mubr.msk.bf16.gmra.mrb[44].mxu0 %vm232_vm2, %v17456_v43 }
 0x7cd   :  { %12418 = vmatprep.mubr.msk.bf16.mxu0 %vm232_vm2, %v17459_v42 }
 0x7d4   :  { %12419 = vmatmul.mubr.msk.bf16.gmra.mrb[48].mxu0 %vm232_vm2, %v17467_v55 }
 0x7d5   :  { %12422 = vmatprep.mubr.msk.bf16.mxu0 %vm232_vm2, %v17470_v13 }
 0x7dc   :  { %12423 = vmatmul.mubr.msk.bf16.gmra.mrb[52].mxu0 %vm232_vm2, %v17480_v12 }
 0x7dd   :  { %12426 = vmatprep.mubr.msk.bf16.mxu0 %vm232_vm2, %v17482_v26 }
 0x7e4   :  { %12427 = vmatmul.mubr.msk.bf16.gmra.mrb[56].mxu0 %vm232_vm2, %v17488_v62 }
 0x7e5   :  { %12430 = vmatprep.mubr.msk.bf16.mxu0 %vm232_vm2, %v17490_v21 }
 0x7ec   :  { %12431 = vmatmul.mubr.msk.bf16.gmra.mrb[60].mxu0 %vm232_vm2, %v17496_v34 }
 0x7ed   :  { %12434 = vmatprep.mubr.msk.bf16.mxu0 %vm232_vm2, %v17498_v19 }
 0x7f4   :  { %12435 = vmatmul.mubr.msk.bf16.gmra.mrb[64].mxu0 %vm232_vm2, %v17504_v51 }
 0x7f5   :  { %12438 = vmatprep.mubr.msk.bf16.mxu0 %vm232_vm2, %v17506_v58 }
 0x7fc   :  { %12439 = vmatmul.mubr.msk.bf16.gmra.mrb[68].mxu0 %vm232_vm2, %v17512_v24 }
 0x7fd   :  { %12444 = vmatprep.mubr.msk.bf16.mxu0 %vm232_vm2, %v5938_v35  ;;  %v5881_v35 = vld [vmem:[#allocation3 + $0x460] sm:$0xff] }
 0x7fe   :  { %v5942_v6 = vpack.c.bf16 %v17137_v27, %v5881_v35  ;;  %v19932_v27 = vld [vmem:[#allocation23_spill] sm:$0xff]  ;;  %v17606_v35 = vld [vmem:[#allocation3 + $0x260] sm:$0xff] }
 0x804   :  { %12445 = vmatmul.mubr.msk.bf16.vlgmr.msra.gmra.mrb[8].mxu0 %vm232_vm2, %v5939_v63  ;;  %v19937_v63 = vld [vmem:[#allocation35_spill] sm:$0xff] }
 0x805   :  { %12509 = vmatpush3.bf16.msra.mxu0 %v6850_v9  ;;  %12448 = vmatprep.mubr.msk.bf16.mxu0 %vm232_vm2, %v5940_v15  ;;  %v19938_v9 = vld [vmem:[#allocation20_spill] sm:$0xff] }
 0x806   :  { %14010 = vmatprep.subr.msk.bf16.mxu0 %vm6119_vm7, %v7257_v30  ;;  %v17600_v15 = vpack.c.bf16 %v19938_v9, %v19937_v63  ;;  %v19953_v9 = vld [vmem:[#allocation49_spill] sm:$0xff] }
 0x80c   :  { %12449 = vmatmul.mubr.msk.bf16.gmra.mrb[12].mxu0 %vm232_vm2, %v5941_v44  ;;  %v19940_v44 = vld [vmem:[#allocation47_spill] sm:$0xff] }
 0x80d   :  { %12452 = vmatprep.mubr.msk.bf16.mxu0 %vm232_vm2, %v5942_v6  ;;  %v17610_v6 = vpack.c.bf16 %v17606_v35, %v19940_v44 }
 0x814   :  { %12453 = vmatmul.mubr.msk.bf16.gmra.mrb[16].mxu0 %vm232_vm2, %v5943_v45  ;;  %v19941_v45 = vld [vmem:[#allocation58_spill] sm:$0xff] }
 0x815   :  { %12456 = vmatprep.mubr.msk.bf16.mxu0 %vm232_vm2, %v5944_v33  ;;  %v7307_v33 = vsel %vm6119_vm7, %v7257_v30, 0  ;;  %v6753_v30 = vld [vmem:[#allocation3 + $0x282] sm:$0xff] }
 0x81c   :  { %12457 = vmatmul.mubr.msk.bf16.gmra.mrb[20].mxu0 %vm232_vm2, %v5945_v46  ;;  %v7662_v46 = vld [vmem:[%s19484_s7 + $0x8] sm:$0x3] }
 0x81d   :  { %12460 = vmatprep.mubr.msk.bf16.mxu0 %vm232_vm2, %v17051_v11  ;;  %v17563_v11 = vpack.c.bf16 %v17168_v61, %v5906_v53 }
 0x824   :  { %12461 = vmatmul.mubr.msk.bf16.gmra.mrb[24].mxu0 %vm232_vm2, %v17053_v20  ;;  %v19929_v20 = vld [vmem:[#allocation21_spill] sm:$0xff] }
 0x825   :  { %12464 = vmatprep.mubr.msk.bf16.mxu0 %vm232_vm2, %v17065_v1  ;;  %v19930_v1 = vld [vmem:[#allocation4_spill] sm:$0xff]  ;;  %19939 = vst [vmem:[#allocation21_spill] sm:$0xff] %v17606_v35  ;;  %v19947_v35 = vld [vmem:[#allocation39_spill] sm:$0xff] }
 0x82c   :  { %12465 = vmatmul.mubr.msk.bf16.gmra.mrb[28].mxu0 %vm232_vm2, %v17083_v29  ;;  %v17571_v29 = vpack.c.bf16 %v19930_v1, %v19929_v20 }
 0x82d   :  { %12468 = vmatprep.mubr.msk.bf16.mxu0 %vm232_vm2, %v17089_v40  ;;  %v19931_v40 = vld [vmem:[#allocation10_spill] sm:$0xff] }
 0x82e   :  { %v17575_v36 = vpack.c.bf16 %v19932_v27, %v19931_v40 }
 0x834   :  { %12469 = vmatmul.mubr.msk.bf16.gmra.mrb[32].mxu0 %vm232_vm2, %v17211_v23  ;;  %v19934_v23 = vld [vmem:[#allocation30_spill] sm:$0xff] }
 0x835   :  { %12472 = vmatprep.mubr.msk.bf16.mxu0 %vm232_vm2, %v17236_v17  ;;  %v17588_v17 = vpack.c.bf16 %v19934_v23, %v5914_v47  ;;  %v19944_v47 = vld [vmem:[#allocation37_spill] sm:$0xff] }
 0x83c   :  { %12473 = vmatmul.mubr.msk.bf16.gmra.mrb[36].mxu0 %vm232_vm2, %v17334_v39  ;;  %v17585_v39 = vpack.c.bf16 %v17581_v14, %v19933_v18 }
 0x83d   :  { %12476 = vmatprep.mubr.msk.bf16.mxu0 %vm232_vm2, %v17563_v11 }
 0x844   :  { %12477 = vmatmul.mubr.msk.bf16.gmra.mrb[40].mxu0 %vm232_vm2, %v17571_v29 }
 0x845   :  { %12480 = vmatprep.mubr.msk.bf16.mxu0 %vm232_vm2, %v17575_v36 }
 0x84c   :  { %12481 = vmatmul.mubr.msk.bf16.gmra.mrb[44].mxu0 %vm232_vm2, %v17585_v39 }
 0x84d   :  { %12484 = vmatprep.mubr.msk.bf16.mxu0 %vm232_vm2, %v17588_v17 }
 0x854   :  { %12485 = vmatmul.mubr.msk.bf16.gmra.mrb[48].mxu0 %vm232_vm2, %v17596_v37 }
 0x855   :  { %12488 = vmatprep.mubr.msk.bf16.mxu0 %vm232_vm2, %v17600_v15 }
 0x85c   :  { %12489 = vmatmul.mubr.msk.bf16.gmra.mrb[52].mxu0 %vm232_vm2, %v17610_v6 }
 0x85d   :  { %12492 = vmatprep.mubr.msk.bf16.mxu0 %vm232_vm2, %v17434_v32 }
 0x864   :  { %12493 = vmatmul.mubr.msk.bf16.gmra.mrb[56].mxu0 %vm232_vm2, %v17442_v52 }
 0x865   :  { %12496 = vmatprep.mubr.msk.bf16.mxu0 %vm232_vm2, %v17446_v4 }
 0x86c   :  { %12497 = vmatmul.mubr.msk.bf16.gmra.mrb[60].mxu0 %vm232_vm2, %v17456_v43 }
 0x86d   :  { %12500 = vmatprep.mubr.msk.bf16.mxu0 %vm232_vm2, %v17459_v42 }
 0x874   :  { %12501 = vmatmul.mubr.msk.bf16.gmra.mrb[64].mxu0 %vm232_vm2, %v17467_v55 }
 0x875   :  { %12504 = vmatprep.mubr.msk.bf16.mxu0 %vm232_vm2, %v17470_v13 }
 0x87c   :  { %12505 = vmatmul.mubr.msk.bf16.gmra.mrb[68].mxu0 %vm232_vm2, %v17480_v12 }
 0x87d   :  { %12510 = vmatprep.mubr.msk.bf16.mxu0 %vm232_vm2, %v19941_v45  ;;  %v19945_v45 = vld [vmem:[#allocation9_spill] sm:$0xff] }
 0x884   :  { %12511 = vmatmul.mubr.msk.bf16.vlgmr.msra.gmra.mrb[8].mxu0 %vm232_vm2, %v17392_v38  ;;  %v19942_v38 = vld [vmem:[#allocation33_spill] sm:$0xff] }
 0x885   :  { %12575 = vmatpush3.bf16.msra.mxu0 %v7307_v33  ;;  %12514 = vmatprep.mubr.msk.bf16.mxu0 %vm232_vm2, %v17396_v50  ;;  %v6785_v53 = vpack.c.bf16 %v19942_v38, %v6753_v30  ;;  %v19943_v50 = vld [vmem:[#allocation27_spill] sm:$0xff]  ;;  %v19946_v33 = vld [vmem:[#allocation36_spill] sm:$0xff] }
 0x886   :  { %14011 = vmatprep.subr.msk.bf16.mxu0 %vm6119_vm7, %v7662_v46  ;;  %v19948_v38 = vld [vmem:[#allocation40_spill] sm:$0xff] }
 0x88c   :  { %12515 = vmatmul.mubr.msk.bf16.gmra.mrb[12].mxu0 %vm232_vm2, %v17406_v10  ;;  %v6786_v10 = vpack.c.bf16 %v19944_v47, %v19943_v50  ;;  %v19950_v50 = vld [vmem:[#allocation44_spill] sm:$0xff] }
 0x88d   :  { %12518 = vmatprep.mubr.msk.bf16.mxu0 %vm232_vm2, %v17409_v7  ;;  %v6787_v7 = vpack.c.bf16 %v19946_v33, %v19945_v45  ;;  %v19951_v45 = vld [vmem:[#allocation45_spill] sm:$0xff]  ;;  %v19952_v33 = vld [vmem:[#allocation48_spill] sm:$0xff] }
 0x894   :  { %12519 = vmatmul.mubr.msk.bf16.gmra.mrb[16].mxu0 %vm232_vm2, %v17417_v54  ;;  %v17659_v54 = vld [vmem:[#allocation3 + $0x2f2] sm:$0xff] }
 0x895   :  { %12522 = vmatprep.mubr.msk.bf16.mxu0 %vm232_vm2, %v17421_v48  ;;  %v6761_v48 = vld [vmem:[#allocation3 + $0x322] sm:$0xff]  ;;  %v6788_v30 = vpack.c.bf16 %v17659_v54, %v19947_v35 }
 0x89c   :  { %12523 = vmatmul.mubr.msk.bf16.gmra.mrb[20].mxu0 %vm232_vm2, %v17431_v0  ;;  %v6789_v0 = vpack.c.bf16 %v19948_v38, %v6761_v48  ;;  %v17704_v38 = vpack.c.bf16 %v17351_v16, %v17349_v60 }
 0x89d   :  { %12526 = vmatprep.mubr.msk.bf16.mxu0 %vm232_vm2, %v6785_v53  ;;  %v19949_v53 = vld [vmem:[#allocation43_spill] sm:$0xff] }
 0x89e   :  { %v6790_v47 = vpack.c.bf16 %v19950_v50, %v19949_v53  ;;  %v6777_v53 = vld [vmem:[#allocation3 + $0xb2] sm:$0xff] }
 0x8a4   :  { %12527 = vmatmul.mubr.msk.bf16.gmra.mrb[24].mxu0 %vm232_vm2, %v6786_v10  ;;  %v6791_v10 = vpack.c.bf16 %v19952_v33, %v19951_v45  ;;  %v17725_v45 = vpack.c.bf16 %v17365_v28, %v17363_v41  ;;  %v17729_v33 = vpack.c.bf16 %v17374_v2, %v17372_v25  ;;  %v7712_v2 = vsel %vm6119_vm7, %v7662_v46, 0  ;;  %v7237_v41 = vld [vmem:[#allocation3 + $0x3a1] sm:$0xff] }
 0x8a5   :  { %12530 = vmatprep.mubr.msk.bf16.mxu0 %vm232_vm2, %v6787_v7  ;;  %v17672_v7 = vld [vmem:[#allocation3 + $0x392] sm:$0xff] }
 0x8a6   :  { %v6792_v35 = vpack.c.bf16 %v17672_v7, %v19953_v9  ;;  %v6769_v9 = vld [vmem:[#allocation3 + $0x12] sm:$0xff] }
 0x8a7   :  { %v17692_v48 = vpack.c.bf16 %v17336_v22, %v6769_v9 }
 0x8ac   :  { %12531 = vmatmul.mubr.msk.bf16.gmra.mrb[28].mxu0 %vm232_vm2, %v6788_v30  ;;  %v17700_v30 = vpack.c.bf16 %v17340_v57, %v17338_v5 }
 0x8ad   :  { %12534 = vmatprep.mubr.msk.bf16.mxu0 %vm232_vm2, %v6789_v0  ;;  %v17710_v0 = vld [vmem:[#allocation3 + $0x82] sm:$0xff] }
 0x8ae   :  { %19954 = vst [vmem:[#allocation4_spill] sm:$0xff] %v17710_v0  ;;  %v17714_v50 = vpack.c.bf16 %v17710_v0, %v17353_v49  ;;  %v19970_v0 = vld [vmem:[#allocation53_spill] sm:$0xff] }
 0x8af   :  { %v17820_v16 = vpack.c.bf16 %v7237_v41, %v19970_v0  ;;  %v19972_v41 = vld [vmem:[#allocation28_spill] sm:$0xff]  ;;  %v19978_v0 = vld [vmem:[#allocation70_spill] sm:$0xff] }
 0x8b4   :  { %12535 = vmatmul.mubr.msk.bf16.gmra.mrb[32].mxu0 %vm232_vm2, %v6790_v47  ;;  %v17717_v47 = vpack.c.bf16 %v17361_v3, %v6777_v53  ;;  %v14183_v53 = vld [vmem:[%s19484_s7 + $0x8] ss:$0 sps:$4 sm:$0xcc]  }
 0x8b5   :  { %12538 = vmatprep.mubr.msk.bf16.mxu0 %vm232_vm2, %v6791_v10  ;;  %v17735_v10 = vld [vmem:[#allocation3 + $0x122] sm:$0xff]  ;;  %v8095_v28 = vrot.slane %v14183_v53, 2 }
 0x8b6   :  { %19955 = vst [vmem:[#allocation10_spill] sm:$0xff] %v17735_v10  ;;  %v19964_v53 = vld [vmem:[#allocation13_spill] sm:$0xff] }
 0x8b7   :  { %v19969_v3 = vld [vmem:[#allocation25_spill] sm:$0xff] }
 0x8bc   :  { %12539 = vmatmul.mubr.msk.bf16.gmra.mrb[36].mxu0 %vm232_vm2, %v6792_v35  ;;  %v19956_v35 = vld [vmem:[#allocation68_spill] sm:$0xff] }
 0x8bd   :  { %12542 = vmatprep.mubr.msk.bf16.mxu0 %vm232_vm2, %v17482_v26  ;;  %v17739_v9 = vpack.c.bf16 %v17735_v10, %v19956_v35  ;;  %v7229_v10 = vld [vmem:[#allocation3 + $0x301] sm:$0xff] }
 0x8be   :  { %v19966_v35 = vld [vmem:[#allocation17_spill] sm:$0xff] }
 0x8bf   :  { %v17809_v25 = vpack.c.bf16 %v7229_v10, %v19966_v35  ;;  %v8121_v10 = vsel %vm6119_vm7, %v8095_v28, 0  ;;  %v8476_v35 = vld [vmem:[%s19484_s7 + $0xc] sm:$0x3] }
 0x8c4   :  { %12543 = vmatmul.mubr.msk.bf16.gmra.mrb[40].mxu0 %vm232_vm2, %v17488_v62 }
 0x8c5   :  { %12546 = vmatprep.mubr.msk.bf16.mxu0 %vm232_vm2, %v17490_v21 }
 0x8cc   :  { %12547 = vmatmul.mubr.msk.bf16.gmra.mrb[44].mxu0 %vm232_vm2, %v17496_v34 }
 0x8cd   :  { %12550 = vmatprep.mubr.msk.bf16.mxu0 %vm232_vm2, %v17498_v19 }
 0x8d4   :  { %12551 = vmatmul.mubr.msk.bf16.gmra.mrb[48].mxu0 %vm232_vm2, %v17504_v51 }
 0x8d5   :  { %12554 = vmatprep.mubr.msk.bf16.mxu0 %vm232_vm2, %v17506_v58 }
 0x8dc   :  { %12555 = vmatmul.mubr.msk.bf16.gmra.mrb[52].mxu0 %vm232_vm2, %v17512_v24 }
 0x8dd   :  { %12558 = vmatprep.mubr.msk.bf16.mxu0 %vm232_vm2, %v17692_v48 }
 0x8e4   :  { %12559 = vmatmul.mubr.msk.bf16.gmra.mrb[56].mxu0 %vm232_vm2, %v17700_v30 }
 0x8e5   :  { %12562 = vmatprep.mubr.msk.bf16.mxu0 %vm232_vm2, %v17704_v38 }
 0x8ec   :  { %12563 = vmatmul.mubr.msk.bf16.gmra.mrb[60].mxu0 %vm232_vm2, %v17714_v50 }
 0x8ed   :  { %12566 = vmatprep.mubr.msk.bf16.mxu0 %vm232_vm2, %v17717_v47 }
 0x8f4   :  { %12567 = vmatmul.mubr.msk.bf16.gmra.mrb[64].mxu0 %vm232_vm2, %v17725_v45 }
 0x8f5   :  { %12570 = vmatprep.mubr.msk.bf16.mxu0 %vm232_vm2, %v17729_v33 }
 0x8fc   :  { %12571 = vmatmul.mubr.msk.bf16.gmra.mrb[68].mxu0 %vm232_vm2, %v17739_v9 }
 0x8fd   :  { %12576 = vmatprep.mubr.msk.bf16.mxu0 %vm232_vm2, %v17563_v11  ;;  %v19958_v11 = vld [vmem:[#allocation19_spill] sm:$0xff] }
 0x904   :  { %12577 = vmatmul.mubr.msk.bf16.vlgmr.msra.gmra.mrb[8].mxu0 %vm232_vm2, %v17571_v29  ;;  %v19959_v29 = vld [vmem:[#allocation18_spill] sm:$0xff] }
 0x905   :  { %12641 = vmatpush3.bf16.msra.mxu0 %v7712_v2  ;;  %12580 = vmatprep.mubr.msk.bf16.mxu0 %vm232_vm2, %v17575_v36  ;;  %v19957_v2 = vld [vmem:[#allocation12_spill] sm:$0xff] }
 0x906   :  { %14012 = vmatprep.subr.msk.bf16.mxu0 %vm6119_vm7, %v8095_v28  ;;  %v7213_v36 = vld [vmem:[#allocation3 + $0x440] sm:$0xff]  ;;  %v19971_v28 = vld [vmem:[#allocation22_spill] sm:$0xff] }
 0x90c   :  { %12581 = vmatmul.mubr.msk.bf16.gmra.mrb[12].mxu0 %vm232_vm2, %v17585_v39  ;;  %v17787_v39 = vpack.c.bf16 %v7213_v36, %v17530_v8  ;;  %v19963_v8 = vld [vmem:[#allocation11_spill] sm:$0xff] }
 0x90d   :  { %12584 = vmatprep.mubr.msk.bf16.mxu0 %vm232_vm2, %v17588_v17  ;;  %v19960_v17 = vld [vmem:[#allocation8_spill] sm:$0xff]  ;;  %v19965_v36 = vld [vmem:[#allocation15_spill] sm:$0xff] }
 0x914   :  { %12585 = vmatmul.mubr.msk.bf16.gmra.mrb[16].mxu0 %vm232_vm2, %v17596_v37  ;;  %v19961_v37 = vld [vmem:[#allocation5_spill] sm:$0xff] }
 0x915   :  { %12588 = vmatprep.mubr.msk.bf16.mxu0 %vm232_vm2, %v17600_v15  ;;  %v19962_v15 = vld [vmem:[#allocation7_spill] sm:$0xff] }
 0x91c   :  { %12589 = vmatmul.mubr.msk.bf16.gmra.mrb[20].mxu0 %vm232_vm2, %v17610_v6  ;;  %v7221_v6 = vld [vmem:[#allocation3 + $0x4e0] sm:$0xff] }
 0x91d   :  { %12592 = vmatprep.mubr.msk.bf16.mxu0 %vm232_vm2, %v17434_v32  ;;  %v17798_v46 = vpack.c.bf16 %v7221_v6, %v17543_v56  ;;  %v19967_v56 = vld [vmem:[#allocation6_spill] sm:$0xff]  ;;  %v19968_v6 = vld [vmem:[#allocation16_spill] sm:$0xff] }
 0x924   :  { %12593 = vmatmul.mubr.msk.bf16.gmra.mrb[24].mxu0 %vm232_vm2, %v17442_v52 }
 0x925   :  { %12596 = vmatprep.mubr.msk.bf16.mxu0 %vm232_vm2, %v17446_v4 }
 0x92c   :  { %12597 = vmatmul.mubr.msk.bf16.gmra.mrb[28].mxu0 %vm232_vm2, %v17456_v43 }
 0x92d   :  { %12600 = vmatprep.mubr.msk.bf16.mxu0 %vm232_vm2, %v17459_v42 }
 0x934   :  { %12601 = vmatmul.mubr.msk.bf16.gmra.mrb[32].mxu0 %vm232_vm2, %v17467_v55 }
 0x935   :  { %12604 = vmatprep.mubr.msk.bf16.mxu0 %vm232_vm2, %v17470_v13 }
 0x93c   :  { %12605 = vmatmul.mubr.msk.bf16.gmra.mrb[36].mxu0 %vm232_vm2, %v17480_v12 }
 0x93d   :  { %12608 = vmatprep.mubr.msk.bf16.mxu0 %vm232_vm2, %v19957_v2 }
 0x944   :  { %12609 = vmatmul.mubr.msk.bf16.gmra.mrb[40].mxu0 %vm232_vm2, %v19958_v11 }
 0x945   :  { %12612 = vmatprep.mubr.msk.bf16.mxu0 %vm232_vm2, %v19959_v29 }
 0x94c   :  { %12613 = vmatmul.mubr.msk.bf16.gmra.mrb[44].mxu0 %vm232_vm2, %v17787_v39 }
 0x94d   :  { %12616 = vmatprep.mubr.msk.bf16.mxu0 %vm232_vm2, %v19960_v17 }
 0x954   :  { %12617 = vmatmul.mubr.msk.bf16.gmra.mrb[48].mxu0 %vm232_vm2, %v19961_v37 }
 0x955   :  { %12620 = vmatprep.mubr.msk.bf16.mxu0 %vm232_vm2, %v19962_v15 }
 0x95c   :  { %12621 = vmatmul.mubr.msk.bf16.gmra.mrb[52].mxu0 %vm232_vm2, %v17798_v46 }
 0x95d   :  { %12624 = vmatprep.mubr.msk.bf16.mxu0 %vm232_vm2, %v19963_v8 }
 0x964   :  { %12625 = vmatmul.mubr.msk.bf16.gmra.mrb[56].mxu0 %vm232_vm2, %v19964_v53 }
 0x965   :  { %12628 = vmatprep.mubr.msk.bf16.mxu0 %vm232_vm2, %v19965_v36 }
 0x96c   :  { %12629 = vmatmul.mubr.msk.bf16.gmra.mrb[60].mxu0 %vm232_vm2, %v17809_v25 }
 0x96d   :  { %12632 = vmatprep.mubr.msk.bf16.mxu0 %vm232_vm2, %v19967_v56 }
 0x974   :  { %12633 = vmatmul.mubr.msk.bf16.gmra.mrb[64].mxu0 %vm232_vm2, %v19968_v6 }
 0x975   :  { %12636 = vmatprep.mubr.msk.bf16.mxu0 %vm232_vm2, %v19969_v3 }
 0x97c   :  { %12637 = vmatmul.mubr.msk.bf16.gmra.mrb[68].mxu0 %vm232_vm2, %v17820_v16 }
 0x97d   :  { %12642 = vmatprep.mubr.msk.bf16.mxu0 %vm232_vm2, %v17434_v32  ;;  %v19973_v32 = vld [vmem:[#allocation31_spill] sm:$0xff] }
 0x984   :  { %12643 = vmatmul.mubr.msk.bf16.vlgmr.msra.gmra.mrb[8].mxu0 %vm232_vm2, %v17442_v52  ;;  %v7670_v52 = vld [vmem:[#allocation3 + $0x441] sm:$0xff] }
 0x985   :  { %12707 = vmatpush3.bf16.msra.mxu0 %v8121_v10  ;;  %12646 = vmatprep.mubr.msk.bf16.mxu0 %vm232_vm2, %v17446_v4  ;;  %v19974_v4 = vld [vmem:[#allocation69_spill] sm:$0xff] }
 0x986   :  { %14013 = vmatprep.subr.msk.bf16.mxu0 %vm6119_vm7, %v8476_v35 }
 0x98c   :  { %12647 = vmatmul.mubr.msk.bf16.gmra.mrb[12].mxu0 %vm232_vm2, %v17456_v43  ;;  %v17884_v43 = vpack.c.bf16 %v7670_v52, %v19974_v4  ;;  %v14184_v52 = vld [vmem:[%s19484_s7 + $0xc] ss:$0 sps:$4 sm:$0xcc]   ;;  %v8576_v4 = vsel %vm6119_vm7, %v8476_v35, 0  ;;  %v8939_v35 = vld [vmem:[#allocation3 + $0x1d1] sm:$0xff] }
 0x98d   :  { %12650 = vmatprep.mubr.msk.bf16.mxu0 %vm232_vm2, %v17459_v42  ;;  %v19975_v42 = vld [vmem:[#allocation29_spill] sm:$0xff]  ;;  %v8959_v49 = vrot.slane %v14184_v52, 2 }
 0x994   :  { %12651 = vmatmul.mubr.msk.bf16.gmra.mrb[16].mxu0 %vm232_vm2, %v17467_v55  ;;  %v19976_v55 = vld [vmem:[#allocation38_spill] sm:$0xff] }
 0x995   :  { %12654 = vmatprep.mubr.msk.bf16.mxu0 %vm232_vm2, %v17470_v13  ;;  %v19977_v13 = vld [vmem:[#allocation14_spill] sm:$0xff] }
 0x99c   :  { %12655 = vmatmul.mubr.msk.bf16.gmra.mrb[20].mxu0 %vm232_vm2, %v17480_v12  ;;  %v7678_v12 = vld [vmem:[#allocation3 + $0x4e1] sm:$0xff] }
 0x99d   :  { %12658 = vmatprep.mubr.msk.bf16.mxu0 %vm232_vm2, %v17482_v26  ;;  %v17895_v10 = vpack.c.bf16 %v7678_v12, %v19978_v0  ;;  %v8940_v12 = vld [vmem:[#allocation3 + $0x201] sm:$0xff]  ;;  %v8941_v0 = vld [vmem:[#allocation3 + $0x211] sm:$0xff] }
 0x9a4   :  { %12659 = vmatmul.mubr.msk.bf16.gmra.mrb[24].mxu0 %vm232_vm2, %v17488_v62 }
 0x9a5   :  { %12662 = vmatprep.mubr.msk.bf16.mxu0 %vm232_vm2, %v17490_v21 }
 0x9ac   :  { %12663 = vmatmul.mubr.msk.bf16.gmra.mrb[28].mxu0 %vm232_vm2, %v17496_v34 }
 0x9ad   :  { %12666 = vmatprep.mubr.msk.bf16.mxu0 %vm232_vm2, %v17498_v19 }
 0x9b4   :  { %12667 = vmatmul.mubr.msk.bf16.gmra.mrb[32].mxu0 %vm232_vm2, %v17504_v51 }
 0x9b5   :  { %12670 = vmatprep.mubr.msk.bf16.mxu0 %vm232_vm2, %v17506_v58 }
 0x9bc   :  { %12671 = vmatmul.mubr.msk.bf16.gmra.mrb[36].mxu0 %vm232_vm2, %v17512_v24 }
 0x9bd   :  { %12674 = vmatprep.mubr.msk.bf16.mxu0 %vm232_vm2, %v19963_v8 }
 0x9c4   :  { %12675 = vmatmul.mubr.msk.bf16.gmra.mrb[40].mxu0 %vm232_vm2, %v19964_v53 }
 0x9c5   :  { %12678 = vmatprep.mubr.msk.bf16.mxu0 %vm232_vm2, %v19965_v36 }
 0x9cc   :  { %12679 = vmatmul.mubr.msk.bf16.gmra.mrb[44].mxu0 %vm232_vm2, %v17809_v25 }
 0x9cd   :  { %12682 = vmatprep.mubr.msk.bf16.mxu0 %vm232_vm2, %v19967_v56 }
 0x9d4   :  { %12683 = vmatmul.mubr.msk.bf16.gmra.mrb[48].mxu0 %vm232_vm2, %v19968_v6 }
 0x9d5   :  { %12686 = vmatprep.mubr.msk.bf16.mxu0 %vm232_vm2, %v19969_v3 }
 0x9dc   :  { %12687 = vmatmul.mubr.msk.bf16.gmra.mrb[52].mxu0 %vm232_vm2, %v17820_v16 }
 0x9dd   :  { %12690 = vmatprep.mubr.msk.bf16.mxu0 %vm232_vm2, %v19971_v28 }
 0x9e4   :  { %12691 = vmatmul.mubr.msk.bf16.gmra.mrb[56].mxu0 %vm232_vm2, %v19972_v41 }
 0x9e5   :  { %12694 = vmatprep.mubr.msk.bf16.mxu0 %vm232_vm2, %v19973_v32 }
 0x9ec   :  { %12695 = vmatmul.mubr.msk.bf16.gmra.mrb[60].mxu0 %vm232_vm2, %v17884_v43 }
 0x9ed   :  { %12698 = vmatprep.mubr.msk.bf16.mxu0 %vm232_vm2, %v19975_v42 }
 0x9f4   :  { %12699 = vmatmul.mubr.msk.bf16.gmra.mrb[64].mxu0 %vm232_vm2, %v19976_v55 }
 0x9f5   :  { %12702 = vmatprep.mubr.msk.bf16.mxu0 %vm232_vm2, %v19977_v13 }
 0x9fc   :  { %12703 = vmatmul.mubr.msk.bf16.gmra.mrb[68].mxu0 %vm232_vm2, %v17895_v10 }
 0x9fd   :  { %12708 = vmatprep.mubr.msk.bf16.mxu0 %vm232_vm2, %v17482_v26  ;;  %v19982_v26 = vld [vmem:[#allocation50_spill] sm:$0xff] }
 0xa04   :  { %12709 = vmatmul.mubr.msk.bf16.vlgmr.msra.gmra.mrb[8].mxu0 %vm232_vm2, %v17488_v62  ;;  %v19983_v62 = vld [vmem:[#allocation51_spill] sm:$0xff] }
 0xa05   :  { %12773 = vmatpush3.bf16.msra.mxu0 %v8576_v4  ;;  %12712 = vmatprep.mubr.msk.bf16.mxu0 %vm232_vm2, %v17490_v21  ;;  %v19979_v21 = vld [vmem:[#allocation41_spill] sm:$0xff]  ;;  %v8952_v4 = vpack.c.bf16 %v8941_v0, %v8940_v12 }
 0xa06   :  { %14014 = vmatprep.subr.msk.bf16.mxu0 %vm6119_vm7, %v8959_v49 }
 0xa0c   :  { %12713 = vmatmul.mubr.msk.bf16.gmra.mrb[12].mxu0 %vm232_vm2, %v17496_v34 }
 0xa0d   :  { %12716 = vmatprep.mubr.msk.bf16.mxu0 %vm232_vm2, %v17498_v19  ;;  %v8075_v19 = vld [vmem:[#allocation3 + $0x302] sm:$0xff] }
 0xa0e   :  { %v17959_v34 = vpack.c.bf16 %v8075_v19, %v17659_v54  ;;  %v8985_v54 = vsel %vm6119_vm7, %v8959_v49, 0  ;;  %v19985_v49 = vpack.c.bf16 %v19929_v20, %v17168_v61  ;;  %v19988_v61 = vpack.c.bf16 %v19935_v59, %v19934_v23  ;;  %v19994_v23 = vld [vmem:[#allocation55_spill] sm:$0xff]  ;;  %v19995_v59 = vld [vmem:[#allocation56_spill] sm:$0xff] }
 0xa0f   :  { %v19989_v20 = vpack.c.bf16 %v19937_v63, %v19936_v31  ;;  %v8502_v31 = vld [vmem:[#allocation3 + $0x91] sm:$0xff]  ;;  %v8942_v19 = vld [vmem:[#allocation3 + $0x221] sm:$0xff] }
 0xa10   :  { %v19996_v63 = vld [vmem:[#allocation71_spill] sm:$0xff] }
 0xa14   :  { %12717 = vmatmul.mubr.msk.bf16.gmra.mrb[16].mxu0 %vm232_vm2, %v17504_v51  ;;  %v19981_v51 = vld [vmem:[#allocation46_spill] sm:$0xff] }
 0xa15   :  { %12720 = vmatprep.mubr.msk.bf16.mxu0 %vm232_vm2, %v17506_v58  ;;  %v19980_v58 = vld [vmem:[#allocation42_spill] sm:$0xff] }
 0xa1c   :  { %12721 = vmatmul.mubr.msk.bf16.gmra.mrb[20].mxu0 %vm232_vm2, %v17512_v24  ;;  %v19984_v24 = vld [vmem:[#allocation52_spill] sm:$0xff] }
 0xa1d   :  { %12724 = vmatprep.mubr.msk.bf16.mxu0 %vm232_vm2, %v17692_v48  ;;  %v8083_v48 = vld [vmem:[#allocation3 + $0x3a2] sm:$0xff] }
 0xa24   :  { %12725 = vmatmul.mubr.msk.bf16.gmra.mrb[24].mxu0 %vm232_vm2, %v17700_v30  ;;  %v17970_v30 = vpack.c.bf16 %v8083_v48, %v17672_v7  ;;  %v19986_v7 = vpack.c.bf16 %v19931_v40, %v19930_v1  ;;  %v19990_v1 = vld [vmem:[#allocation20_spill] sm:$0xff]  ;;  %v8943_v48 = vld [vmem:[#allocation3 + $0x231] sm:$0xff] }
 0xa25   :  { %12728 = vmatprep.mubr.msk.bf16.mxu0 %vm232_vm2, %v17704_v38  ;;  %v9340_v38 = vld [vmem:[%s19484_s7 + $0x10] sm:$0x3]  ;;  %v19991_v40 = vpack.c.bf16 %v19940_v44, %v19990_v1  ;;  %v19997_v44 = vld [vmem:[#allocation57_spill] sm:$0xff] }
 0xa2c   :  { %12729 = vmatmul.mubr.msk.bf16.gmra.mrb[28].mxu0 %vm232_vm2, %v17714_v50  ;;  %v19987_v50 = vpack.c.bf16 %v19933_v18, %v19932_v27  ;;  %v8493_v27 = vld [vmem:[#allocation3 + $0x270] sm:$0xff]  ;;  %v19992_v18 = vld [vmem:[#allocation21_spill] sm:$0xff] }
 0xa2d   :  { %12732 = vmatprep.mubr.msk.bf16.mxu0 %vm232_vm2, %v17717_v47  ;;  %v8485_v47 = vld [vmem:[#allocation3 + $0x1d0] sm:$0xff] }
 0xa34   :  { %12733 = vmatmul.mubr.msk.bf16.gmra.mrb[32].mxu0 %vm232_vm2, %v17725_v45  ;;  %v8514_v45 = vpack.c.bf16 %v8485_v47, %v17581_v14  ;;  %v8518_v14 = vpack.c.bf16 %v8493_v27, %v19992_v18  ;;  %v8947_v47 = vld [vmem:[#allocation3 + $0x271] sm:$0xff] }
 0xa35   :  { %12736 = vmatprep.mubr.msk.bf16.mxu0 %vm232_vm2, %v17729_v33  ;;  %v19993_v33 = vld [vmem:[#allocation54_spill] sm:$0xff] }
 0xa3c   :  { %12737 = vmatmul.mubr.msk.bf16.gmra.mrb[36].mxu0 %vm232_vm2, %v17739_v9  ;;  %v8522_v9 = vpack.c.bf16 %v8502_v31, %v19996_v63 }
 0xa3d   :  { %12740 = vmatprep.mubr.msk.bf16.mxu0 %vm232_vm2, %v19971_v28 }
 0xa44   :  { %12741 = vmatmul.mubr.msk.bf16.gmra.mrb[40].mxu0 %vm232_vm2, %v19972_v41 }
 0xa45   :  { %12744 = vmatprep.mubr.msk.bf16.mxu0 %vm232_vm2, %v19973_v32 }
 0xa4c   :  { %12745 = vmatmul.mubr.msk.bf16.gmra.mrb[44].mxu0 %vm232_vm2, %v17884_v43 }
 0xa4d   :  { %12748 = vmatprep.mubr.msk.bf16.mxu0 %vm232_vm2, %v19975_v42 }
 0xa54   :  { %12749 = vmatmul.mubr.msk.bf16.gmra.mrb[48].mxu0 %vm232_vm2, %v19976_v55 }
 0xa55   :  { %12752 = vmatprep.mubr.msk.bf16.mxu0 %vm232_vm2, %v19977_v13 }
 0xa5c   :  { %12753 = vmatmul.mubr.msk.bf16.gmra.mrb[52].mxu0 %vm232_vm2, %v17895_v10 }
 0xa5d   :  { %12756 = vmatprep.mubr.msk.bf16.mxu0 %vm232_vm2, %v19979_v21 }
 0xa64   :  { %12757 = vmatmul.mubr.msk.bf16.gmra.mrb[56].mxu0 %vm232_vm2, %v19980_v58 }
 0xa65   :  { %12760 = vmatprep.mubr.msk.bf16.mxu0 %vm232_vm2, %v19981_v51 }
 0xa6c   :  { %12761 = vmatmul.mubr.msk.bf16.gmra.mrb[60].mxu0 %vm232_vm2, %v17959_v34 }
 0xa6d   :  { %12764 = vmatprep.mubr.msk.bf16.mxu0 %vm232_vm2, %v19982_v26 }
 0xa74   :  { %12765 = vmatmul.mubr.msk.bf16.gmra.mrb[64].mxu0 %vm232_vm2, %v19983_v62 }
 0xa75   :  { %12768 = vmatprep.mubr.msk.bf16.mxu0 %vm232_vm2, %v19984_v24 }
 0xa7c   :  { %12769 = vmatmul.mubr.msk.bf16.gmra.mrb[68].mxu0 %vm232_vm2, %v17970_v30 }
 0xa7d   :  { %12774 = vmatprep.mubr.msk.bf16.mxu0 %vm232_vm2, %v19957_v2  ;;  %v19998_v2 = vld [vmem:[#allocation61_spill] sm:$0xff] }
 0xa84   :  { %12775 = vmatmul.mubr.msk.bf16.vlgmr.msra.gmra.mrb[8].mxu0 %vm232_vm2, %v19958_v11  ;;  %v19999_v11 = vld [vmem:[#allocation65_spill] sm:$0xff] }
 0xa85   :  { %12839 = vmatpush3.bf16.msra.mxu0 %v8985_v54  ;;  %12778 = vmatprep.mubr.msk.bf16.mxu0 %vm232_vm2, %v19959_v29  ;;  %v8510_v29 = vld [vmem:[#allocation3 + $0x131] sm:$0xff]  ;;  %v8944_v54 = vld [vmem:[#allocation3 + $0x241] sm:$0xff] }
 0xa86   :  { %14015 = vmatprep.subr.msk.bf16.mxu0 %vm6119_vm7, %v9340_v38 }
 0xa8c   :  { %12779 = vmatmul.mubr.msk.bf16.gmra.mrb[12].mxu0 %vm232_vm2, %v17787_v39  ;;  %v20000_v39 = vld [vmem:[#allocation72_spill] sm:$0xff] }
 0xa8d   :  { %12782 = vmatprep.mubr.msk.bf16.mxu0 %vm232_vm2, %v19960_v17  ;;  %v8526_v17 = vpack.c.bf16 %v8510_v29, %v20000_v39 }
 0xa94   :  { %12783 = vmatmul.mubr.msk.bf16.gmra.mrb[16].mxu0 %vm232_vm2, %v19961_v37  ;;  %v9390_v37 = vsel %vm6119_vm7, %v9340_v38, 0  ;;  %v8945_v38 = vld [vmem:[#allocation3 + $0x251] sm:$0xff] }
 0xa95   :  { %12786 = vmatprep.mubr.msk.bf16.mxu0 %vm232_vm2, %v19962_v15  ;;  %v8934_v15 = vld [vmem:[#allocation3 + $0x181] sm:$0xff] }
 0xa9c   :  { %12787 = vmatmul.mubr.msk.bf16.gmra.mrb[20].mxu0 %vm232_vm2, %v17798_v46  ;;  %v8935_v46 = vld [vmem:[#allocation3 + $0x191] sm:$0xff] }
 0xa9d   :  { %12790 = vmatprep.mubr.msk.bf16.mxu0 %vm232_vm2, %v19963_v8 }
 0xaa4   :  { %12791 = vmatmul.mubr.msk.bf16.gmra.mrb[24].mxu0 %vm232_vm2, %v19964_v53 }
 0xaa5   :  { %12794 = vmatprep.mubr.msk.bf16.mxu0 %vm232_vm2, %v19965_v36 }
 0xaac   :  { %12795 = vmatmul.mubr.msk.bf16.gmra.mrb[28].mxu0 %vm232_vm2, %v17809_v25 }
 0xaad   :  { %12798 = vmatprep.mubr.msk.bf16.mxu0 %vm232_vm2, %v19967_v56 }
 0xab4   :  { %12799 = vmatmul.mubr.msk.bf16.gmra.mrb[32].mxu0 %vm232_vm2, %v19968_v6 }
 0xab5   :  { %12802 = vmatprep.mubr.msk.bf16.mxu0 %vm232_vm2, %v19969_v3 }
 0xabc   :  { %12803 = vmatmul.mubr.msk.bf16.gmra.mrb[36].mxu0 %vm232_vm2, %v17820_v16 }
 0xabd   :  { %12806 = vmatprep.mubr.msk.bf16.mxu0 %vm232_vm2, %v19985_v49  ;;  %v8953_v49 = vpack.c.bf16 %v8943_v48, %v8942_v19 }
 0xac4   :  { %12807 = vmatmul.mubr.msk.bf16.gmra.mrb[40].mxu0 %vm232_vm2, %v19986_v7  ;;  %v8954_v7 = vpack.c.bf16 %v8945_v38, %v8944_v54 }
 0xac5   :  { %12810 = vmatprep.mubr.msk.bf16.mxu0 %vm232_vm2, %v19987_v50  ;;  %v8946_v50 = vld [vmem:[#allocation3 + $0x261] sm:$0xff] }
 0xacc   :  { %12811 = vmatmul.mubr.msk.bf16.gmra.mrb[44].mxu0 %vm232_vm2, %v8514_v45  ;;  %v8955_v45 = vpack.c.bf16 %v8947_v47, %v8946_v50 }
 0xacd   :  { %12814 = vmatprep.mubr.msk.bf16.mxu0 %vm232_vm2, %v19988_v61 }
 0xad4   :  { %12815 = vmatmul.mubr.msk.bf16.gmra.mrb[48].mxu0 %vm232_vm2, %v19989_v20 }
 0xad5   :  { %12818 = vmatprep.mubr.msk.bf16.mxu0 %vm232_vm2, %v19991_v40 }
 0xadc   :  { %12819 = vmatmul.mubr.msk.bf16.gmra.mrb[52].mxu0 %vm232_vm2, %v8518_v14 }
 0xadd   :  { %12822 = vmatprep.mubr.msk.bf16.mxu0 %vm232_vm2, %v19993_v33 }
 0xae4   :  { %12823 = vmatmul.mubr.msk.bf16.gmra.mrb[56].mxu0 %vm232_vm2, %v19994_v23 }
 0xae5   :  { %12826 = vmatprep.mubr.msk.bf16.mxu0 %vm232_vm2, %v19995_v59 }
 0xaec   :  { %12827 = vmatmul.mubr.msk.bf16.gmra.mrb[60].mxu0 %vm232_vm2, %v8522_v9 }
 0xaed   :  { %12830 = vmatprep.mubr.msk.bf16.mxu0 %vm232_vm2, %v19997_v44 }
 0xaf4   :  { %12831 = vmatmul.mubr.msk.bf16.gmra.mrb[64].mxu0 %vm232_vm2, %v19998_v2 }
 0xaf5   :  { %12834 = vmatprep.mubr.msk.bf16.mxu0 %vm232_vm2, %v19999_v11 }
 0xafc   :  { %12835 = vmatmul.mubr.msk.bf16.gmra.mrb[68].mxu0 %vm232_vm2, %v8526_v17 }
 0xafd   :  { %12840 = vmatprep.mubr.msk.bf16.mxu0 %vm232_vm2, %v19963_v8  ;;  %v8936_v8 = vld [vmem:[#allocation3 + $0x1a1] sm:$0xff] }
 0xb04   :  { %12841 = vmatmul.mubr.msk.bf16.vlgmr.msra.gmra.mrb[8].mxu0 %vm232_vm2, %v19964_v53  ;;  %v8937_v53 = vld [vmem:[#allocation3 + $0x1b1] sm:$0xff] }
 0xb05   :  { %12905 = vmatpush3.bf16.msra.mxu0 %v9390_v37  ;;  %12844 = vmatprep.mubr.msk.bf16.mxu0 %vm232_vm2, %v19965_v36  ;;  %v8949_v36 = vpack.c.bf16 %v8935_v46, %v8934_v15 }
 0xb0c   :  { %12845 = vmatmul.mubr.msk.bf16.gmra.mrb[12].mxu0 %vm232_vm2, %v17809_v25 }
 0xb0d   :  { %12848 = vmatprep.mubr.msk.bf16.mxu0 %vm232_vm2, %v19967_v56  ;;  %v8950_v56 = vpack.c.bf16 %v8937_v53, %v8936_v8 }
 0xb14   :  { %12849 = vmatmul.mubr.msk.bf16.gmra.mrb[16].mxu0 %vm232_vm2, %v19968_v6  ;;  %v8938_v6 = vld [vmem:[#allocation3 + $0x1c1] sm:$0xff] }
 0xb15   :  { %12852 = vmatprep.mubr.msk.bf16.mxu0 %vm232_vm2, %v19969_v3  ;;  %v8933_v3 = vld [vmem:[#allocation3 + $0x171] sm:$0xff]  ;;  %v8951_v52 = vpack.c.bf16 %v8939_v35, %v8938_v6 }
 0xb1c   :  { %12853 = vmatmul.mubr.msk.bf16.gmra.mrb[20].mxu0 %vm232_vm2, %v17820_v16  ;;  %v8932_v16 = vld [vmem:[#allocation3 + $0x161] sm:$0xff] }
 0xb1d   :  { %12856 = vmatprep.mubr.msk.bf16.mxu0 %vm232_vm2, %v19971_v28  ;;  %v8948_v25 = vpack.c.bf16 %v8933_v3, %v8932_v16 }
 0xb24   :  { %12857 = vmatmul.mubr.msk.bf16.gmra.mrb[24].mxu0 %vm232_vm2, %v19972_v41 }
 0xb25   :  { %12860 = vmatprep.mubr.msk.bf16.mxu0 %vm232_vm2, %v19973_v32 }
 0xb2c   :  { %12861 = vmatmul.mubr.msk.bf16.gmra.mrb[28].mxu0 %vm232_vm2, %v17884_v43 }
 0xb2d   :  { %12864 = vmatprep.mubr.msk.bf16.mxu0 %vm232_vm2, %v19975_v42 }
 0xb34   :  { %12865 = vmatmul.mubr.msk.bf16.gmra.mrb[32].mxu0 %vm232_vm2, %v19976_v55 }
 0xb35   :  { %12868 = vmatprep.mubr.msk.bf16.mxu0 %vm232_vm2, %v19977_v13 }
 0xb3c   :  { %12869 = vmatmul.mubr.msk.bf16.gmra.mrb[36].mxu0 %vm232_vm2, %v17895_v10 }
 0xb3d   :  { %12872 = vmatprep.mubr.msk.bf16.mxu0 %vm232_vm2, %v19993_v33 }
 0xb44   :  { %12873 = vmatmul.mubr.msk.bf16.gmra.mrb[40].mxu0 %vm232_vm2, %v19994_v23 }
 0xb45   :  { %12876 = vmatprep.mubr.msk.bf16.mxu0 %vm232_vm2, %v19995_v59 }
 0xb4c   :  { %12877 = vmatmul.mubr.msk.bf16.gmra.mrb[44].mxu0 %vm232_vm2, %v8522_v9 }
 0xb4d   :  { %12880 = vmatprep.mubr.msk.bf16.mxu0 %vm232_vm2, %v19997_v44 }
 0xb54   :  { %12881 = vmatmul.mubr.msk.bf16.gmra.mrb[48].mxu0 %vm232_vm2, %v19998_v2 }
 0xb55   :  { %12884 = vmatprep.mubr.msk.bf16.mxu0 %vm232_vm2, %v19999_v11 }
 0xb5c   :  { %12885 = vmatmul.mubr.msk.bf16.gmra.mrb[52].mxu0 %vm232_vm2, %v8526_v17 }
 0xb5d   :  { %12888 = vmatprep.mubr.msk.bf16.mxu0 %vm232_vm2, %v8948_v25 }
 0xb64   :  { %12889 = vmatmul.mubr.msk.bf16.gmra.mrb[56].mxu0 %vm232_vm2, %v8949_v36 }
 0xb65   :  { %12892 = vmatprep.mubr.msk.bf16.mxu0 %vm232_vm2, %v8950_v56 }
 0xb6c   :  { %12893 = vmatmul.mubr.msk.bf16.gmra.mrb[60].mxu0 %vm232_vm2, %v8951_v52 }
 0xb6d   :  { %12896 = vmatprep.mubr.msk.bf16.mxu0 %vm232_vm2, %v8952_v4 }
 0xb74   :  { %12897 = vmatmul.mubr.msk.bf16.gmra.mrb[64].mxu0 %vm232_vm2, %v8953_v49 }
 0xb75   :  { %12900 = vmatprep.mubr.msk.bf16.mxu0 %vm232_vm2, %v8954_v7 }
 0xb7c   :  { %12901 = vmatmul.mubr.msk.bf16.gmra.mrb[68].mxu0 %vm232_vm2, %v8955_v45 }
 0xb7d   :  { %12906 = vmatprep.mubr.msk.bf16.mxu0 %vm232_vm2, %v19971_v28  ;;  %v20001_v28 = vpack.c.bf16 %v17338_v5, %v17336_v22  ;;  %v20010_v5 = vld [vmem:[#allocation66_spill] sm:$0xff] }
 0xb84   :  { %12907 = vmatmul.mubr.msk.bf16.vlgmr.msra.gmra.mrb[8].mxu0 %vm232_vm2, %v19972_v41  ;;  %v20002_v41 = vpack.c.bf16 %v17349_v60, %v17340_v57  ;;  %v20013_v57 = vld [vmem:[#allocation68_spill] sm:$0xff] }
 0xb85   :  { %12910 = vmatprep.mubr.msk.bf16.mxu0 %vm232_vm2, %v19973_v32  ;;  %v20003_v32 = vld [vmem:[#allocation60_spill] sm:$0xff] }
 0xb8c   :  { %12911 = vmatmul.mubr.msk.bf16.gmra.mrb[12].mxu0 %vm232_vm2, %v17884_v43  ;;  %v20004_v43 = vld [vmem:[#allocation59_spill] sm:$0xff] }
 0xb8d   :  { %12914 = vmatprep.mubr.msk.bf16.mxu0 %vm232_vm2, %v19975_v42  ;;  %v20005_v42 = vpack.c.bf16 %v20003_v32, %v20004_v43 }
 0xb94   :  { %12915 = vmatmul.mubr.msk.bf16.gmra.mrb[16].mxu0 %vm232_vm2, %v19976_v55  ;;  %v9348_v55 = vld [vmem:[#allocation3 + $0x92] sm:$0xff] }
 0xb95   :  { %12918 = vmatprep.mubr.msk.bf16.mxu0 %vm232_vm2, %v19977_v13  ;;  %v20006_v13 = vld [vmem:[#allocation4_spill] sm:$0xff] }
 0xb9c   :  { %12919 = vmatmul.mubr.msk.bf16.gmra.mrb[20].mxu0 %vm232_vm2, %v17895_v10  ;;  %v9360_v10 = vpack.c.bf16 %v9348_v55, %v20006_v13 }
 0xb9d   :  { %12922 = vmatprep.mubr.msk.bf16.mxu0 %vm232_vm2, %v19979_v21  ;;  %v20007_v21 = vld [vmem:[#allocation63_spill] sm:$0xff] }
 0xba4   :  { %12923 = vmatmul.mubr.msk.bf16.gmra.mrb[24].mxu0 %vm232_vm2, %v19980_v58  ;;  %v20008_v58 = vld [vmem:[#allocation62_spill] sm:$0xff] }
 0xba5   :  { %12926 = vmatprep.mubr.msk.bf16.mxu0 %vm232_vm2, %v19981_v51  ;;  %v20009_v22 = vpack.c.bf16 %v20007_v21, %v20008_v58  ;;  %v20011_v51 = vld [vmem:[#allocation64_spill] sm:$0xff] }
 0xba6   :  { %v20012_v60 = vpack.c.bf16 %v20010_v5, %v20011_v51 }
 0xbac   :  { %12927 = vmatmul.mubr.msk.bf16.gmra.mrb[28].mxu0 %vm232_vm2, %v17959_v34  ;;  %v20014_v34 = vld [vmem:[#allocation67_spill] sm:$0xff] }
 0xbad   :  { %12930 = vmatprep.mubr.msk.bf16.mxu0 %vm232_vm2, %v19982_v26  ;;  %v20015_v26 = vpack.c.bf16 %v20013_v57, %v20014_v34 }
 0xbb4   :  { %12931 = vmatmul.mubr.msk.bf16.gmra.mrb[32].mxu0 %vm232_vm2, %v19983_v62  ;;  %v9356_v62 = vld [vmem:[#allocation3 + $0x132] sm:$0xff] }
 0xbb5   :  { %12934 = vmatprep.mubr.msk.bf16.mxu0 %vm232_vm2, %v19984_v24  ;;  %v20016_v24 = vld [vmem:[#allocation10_spill] sm:$0xff] }
 0xbbc   :  { %12935 = vmatmul.mubr.msk.bf16.gmra.mrb[36].mxu0 %vm232_vm2, %v17970_v30  ;;  %v9364_v30 = vpack.c.bf16 %v9356_v62, %v20016_v24 }
 0xbbd   :  { %12938 = vmatprep.mubr.msk.bf16.mxu0 %vm232_vm2, %v8948_v25 }
 0xbc4   :  { %12939 = vmatmul.mubr.msk.bf16.gmra.mrb[40].mxu0 %vm232_vm2, %v8949_v36 }
 0xbc5   :  { %12942 = vmatprep.mubr.msk.bf16.mxu0 %vm232_vm2, %v8950_v56 }
 0xbcc   :  { %12943 = vmatmul.mubr.msk.bf16.gmra.mrb[44].mxu0 %vm232_vm2, %v8951_v52 }
 0xbcd   :  { %12946 = vmatprep.mubr.msk.bf16.mxu0 %vm232_vm2, %v8952_v4 }
 0xbd4   :  { %12947 = vmatmul.mubr.msk.bf16.gmra.mrb[48].mxu0 %vm232_vm2, %v8953_v49 }
 0xbd5   :  { %12950 = vmatprep.mubr.msk.bf16.mxu0 %vm232_vm2, %v8954_v7 }
 0xbdc   :  { %12951 = vmatmul.mubr.msk.bf16.gmra.mrb[52].mxu0 %vm232_vm2, %v8955_v45 }
 0xbdd   :  { %12954 = vmatprep.mubr.msk.bf16.mxu0 %vm232_vm2, %v20001_v28 }
 0xbe4   :  { %12955 = vmatmul.mubr.msk.bf16.gmra.mrb[56].mxu0 %vm232_vm2, %v20002_v41 }
 0xbe5   :  { %12958 = vmatprep.mubr.msk.bf16.mxu0 %vm232_vm2, %v20005_v42 }
 0xbec   :  { %12959 = vmatmul.mubr.msk.bf16.gmra.mrb[60].mxu0 %vm232_vm2, %v9360_v10 }
 0xbed   :  { %12962 = vmatprep.mubr.msk.bf16.mxu0 %vm232_vm2, %v20009_v22 }
 0xbf4   :  { %12963 = vmatmul.mubr.msk.bf16.gmra.mrb[64].mxu0 %vm232_vm2, %v20012_v60 }
 0xbf5   :  { %12966 = vmatprep.mubr.msk.bf16.mxu0 %vm232_vm2, %v20015_v26 }
 0xbfc   :  { %12967 = vmatmul.mubr.msk.bf16.gmra.mrb[68].mxu0 %vm232_vm2, %v9364_v30 }
 0xc57   :  { %v18178_v61 = vpop.f32.mrb[8].mxu0 }
 0xc58   :  { %v18180_v20 = vpop.f32.mrb[9].mxu0  ;;  %v9880_v18 = vmul.f32 %v18178_v61, %v18178_v61  ;;  %v9748_v31 = vsel %vm232_vm2, %v18178_v61, 0.0 }
 0xc59   :  { %v9878_v1 = vmul.f32 %v18180_v20, %v18180_v20  ;;  %v18184_v40 = vpop.f32.mrb[10].mxu0  ;;  %v9745_v14 = vsel %vm232_vm2, %v18180_v20, 0.0 }
 0xc5a   :  { %v18186_v27 = vpop.f32.mrb[11].mxu0  ;;  %v9881_v9 = vmul.f32 %v18184_v40, %v18184_v40  ;;  %v9945_v29 = vsel %vm232_vm2, %v9880_v18, 0.0  ;;  %v9750_v39 = vsel %vm232_vm2, %v18184_v40, 0.0 }
 0xc5b   :  { %v9746_v33 = vsel %vm232_vm2, %v18186_v27, 0.0  ;;  %v9879_v23 = vmul.f32 %v18186_v27, %v18186_v27  ;;  %v9942_v63 = vsel %vm232_vm2, %v9878_v1, 0.0 }
 0xc5c   :  { %v9747_v59 = vadd.f32 %v9746_v33, %v9745_v14  ;;  %v9947_v25 = vsel %vm232_vm2, %v9881_v9, 0.0 }
 0xc5d   :  { %v9943_v44 = vsel %vm232_vm2, %v9879_v23, 0.0 }
 0xc5e   :  { %v9749_v2 = vadd.f32 %v9748_v31, %v9747_v59  ;;  %v9944_v11 = vadd.f32 %v9943_v44, %v9942_v63 }
 0xc5f   :  { %v18205_v17 = vpop.f32.mrb[12].mxu0 }
 0xc60   :  { %v9946_v37 = vadd.f32 %v9945_v29, %v9944_v11  ;;  %v18207_v16 = vpop.f32.mrb[13].mxu0  ;;  %v9751_v3 = vadd.f32 %v9750_v39, %v9749_v2  ;;  %v9884_v6 = vmul.f32 %v18205_v17, %v18205_v17  ;;  %v9756_v19 = vsel %vm232_vm2, %v18205_v17, 0.0 }
 0xc61   :  { %v9752_v15 = vsel %vm232_vm2, %v18207_v16, 0.0  ;;  %v9882_v46 = vmul.f32 %v18207_v16, %v18207_v16  ;;  %v18214_v8 = vpop.f32.mrb[14].mxu0 }
 0xc62   :  { %v9753_v53 = vadd.f32 %v9752_v15, %v9751_v3  ;;  %v9948_v36 = vadd.f32 %v9947_v25, %v9946_v37  ;;  %v18216_v56 = vpop.f32.mrb[15].mxu0  ;;  %v9885_v48 = vmul.f32 %v18214_v8, %v18214_v8  ;;  %v9953_v7 = vsel %vm232_vm2, %v9884_v6, 0.0 }
 0xc63   :  { %v9949_v35 = vsel %vm232_vm2, %v9882_v46, 0.0  ;;  %v9754_v12 = vsel %vm232_vm2, %v18216_v56, 0.0  ;;  %v9883_v0 = vmul.f32 %v18216_v56, %v18216_v56  ;;  %v9758_v50 = vsel %vm232_vm2, %v18214_v8, 0.0 }
 0xc64   :  { %v9950_v52 = vadd.f32 %v9949_v35, %v9948_v36  ;;  %v9755_v4 = vadd.f32 %v9754_v12, %v9753_v53  ;;  %v9955_v32 = vsel %vm232_vm2, %v9885_v48, 0.0 }
 0xc65   :  { %v9951_v54 = vsel %vm232_vm2, %v9883_v0, 0.0 }
 0xc66   :  { %v9757_v38 = vadd.f32 %v9756_v19, %v9755_v4  ;;  %v9952_v49 = vadd.f32 %v9951_v54, %v9950_v52 }
 0xc67   :  { %v18233_v47 = vpop.f32.mrb[16].mxu0 }
 0xc68   :  { %v9954_v45 = vadd.f32 %v9953_v7, %v9952_v49  ;;  %v18235_v28 = vpop.f32.mrb[17].mxu0  ;;  %v9759_v41 = vadd.f32 %v9758_v50, %v9757_v38  ;;  %v9888_v58 = vmul.f32 %v18233_v47, %v18233_v47  ;;  %v9764_v34 = vsel %vm232_vm2, %v18233_v47, 0.0 }
 0xc69   :  { %v9760_v43 = vsel %vm232_vm2, %v18235_v28, 0.0  ;;  %v9886_v42 = vmul.f32 %v18235_v28, %v18235_v28  ;;  %v18242_v55 = vpop.f32.mrb[18].mxu0 }
 0xc6a   :  { %v9761_v13 = vadd.f32 %v9760_v43, %v9759_v41  ;;  %v9956_v10 = vadd.f32 %v9955_v32, %v9954_v45  ;;  %v18244_v21 = vpop.f32.mrb[19].mxu0  ;;  %v9889_v26 = vmul.f32 %v18242_v55, %v18242_v55  ;;  %v9961_v1 = vsel %vm232_vm2, %v9888_v58, 0.0 }
 0xc6b   :  { %v9957_v22 = vsel %vm232_vm2, %v9886_v42, 0.0  ;;  %v9762_v5 = vsel %vm232_vm2, %v18244_v21, 0.0  ;;  %v9887_v51 = vmul.f32 %v18244_v21, %v18244_v21  ;;  %v9766_v18 = vsel %vm232_vm2, %v18242_v55, 0.0 }
 0xc6c   :  { %v9958_v60 = vadd.f32 %v9957_v22, %v9956_v10  ;;  %v9763_v57 = vadd.f32 %v9762_v5, %v9761_v13  ;;  %v9963_v31 = vsel %vm232_vm2, %v9889_v26, 0.0 }
 0xc6d   :  { %v9959_v62 = vsel %vm232_vm2, %v9887_v51, 0.0 }
 0xc6e   :  { %v9765_v24 = vadd.f32 %v9764_v34, %v9763_v57  ;;  %v9960_v30 = vadd.f32 %v9959_v62, %v9958_v60 }
 0xc6f   :  { %v18261_v14 = vpop.f32.mrb[20].mxu0 }
 0xc70   :  { %v9962_v33 = vadd.f32 %v9961_v1, %v9960_v30  ;;  %v18263_v23 = vpop.f32.mrb[21].mxu0  ;;  %v9767_v59 = vadd.f32 %v9766_v18, %v9765_v24  ;;  %v9892_v39 = vmul.f32 %v18261_v14, %v18261_v14  ;;  %v9772_v53 = vsel %vm232_vm2, %v18261_v14, 0.0 }
 0xc71   :  { %v9768_v63 = vsel %vm232_vm2, %v18263_v23, 0.0  ;;  %v9890_v9 = vmul.f32 %v18263_v23, %v18263_v23  ;;  %v18270_v44 = vpop.f32.mrb[22].mxu0 }
 0xc72   :  { %v9769_v2 = vadd.f32 %v9768_v63, %v9767_v59  ;;  %v9964_v11 = vadd.f32 %v9963_v31, %v9962_v33  ;;  %v18272_v29 = vpop.f32.mrb[23].mxu0  ;;  %v9893_v36 = vmul.f32 %v18270_v44, %v18270_v44  ;;  %v9969_v0 = vsel %vm232_vm2, %v9892_v39, 0.0 }
 0xc73   :  { %v9965_v37 = vsel %vm232_vm2, %v9890_v9, 0.0  ;;  %v9770_v3 = vsel %vm232_vm2, %v18272_v29, 0.0  ;;  %v9891_v25 = vmul.f32 %v18272_v29, %v18272_v29  ;;  %v9774_v52 = vsel %vm232_vm2, %v18270_v44, 0.0 }
 0xc74   :  { %v9966_v15 = vadd.f32 %v9965_v37, %v9964_v11  ;;  %v9771_v46 = vadd.f32 %v9770_v3, %v9769_v2  ;;  %v9971_v38 = vsel %vm232_vm2, %v9893_v36, 0.0 }
 0xc75   :  { %v9967_v6 = vsel %vm232_vm2, %v9891_v25, 0.0 }
 0xc76   :  { %v9773_v35 = vadd.f32 %v9772_v53, %v9771_v46  ;;  %v9968_v12 = vadd.f32 %v9967_v6, %v9966_v15 }
 0xc77   :  { %v18289_v4 = vpop.f32.mrb[24].mxu0 }
 0xc78   :  { %v9970_v19 = vadd.f32 %v9969_v0, %v9968_v12  ;;  %v18291_v48 = vpop.f32.mrb[25].mxu0  ;;  %v9775_v54 = vadd.f32 %v9774_v52, %v9773_v35  ;;  %v9896_v43 = vmul.f32 %v18289_v4, %v18289_v4  ;;  %v9780_v5 = vsel %vm232_vm2, %v18289_v4, 0.0 }
 0xc79   :  { %v9776_v49 = vsel %vm232_vm2, %v18291_v48, 0.0  ;;  %v9894_v7 = vmul.f32 %v18291_v48, %v18291_v48  ;;  %v18298_v50 = vpop.f32.mrb[26].mxu0 }
 0xc7a   :  { %v9777_v45 = vadd.f32 %v9776_v49, %v9775_v54  ;;  %v9972_v41 = vadd.f32 %v9971_v38, %v9970_v19  ;;  %v18300_v32 = vpop.f32.mrb[27].mxu0  ;;  %v9897_v51 = vmul.f32 %v18298_v50, %v18298_v50  ;;  %v9977_v26 = vsel %vm232_vm2, %v9896_v43, 0.0 }
 0xc7b   :  { %v9973_v42 = vsel %vm232_vm2, %v9894_v7, 0.0  ;;  %v9778_v13 = vsel %vm232_vm2, %v18300_v32, 0.0  ;;  %v9895_v10 = vmul.f32 %v18300_v32, %v18300_v32  ;;  %v9782_v62 = vsel %vm232_vm2, %v18298_v50, 0.0 }
 0xc7c   :  { %v9974_v58 = vadd.f32 %v9973_v42, %v9972_v41  ;;  %v9779_v22 = vadd.f32 %v9778_v13, %v9777_v45  ;;  %v9979_v33 = vsel %vm232_vm2, %v9897_v51, 0.0 }
 0xc7d   :  { %v9975_v60 = vsel %vm232_vm2, %v9895_v10, 0.0 }
 0xc7e   :  { %v9781_v57 = vadd.f32 %v9780_v5, %v9779_v22  ;;  %v9976_v34 = vadd.f32 %v9975_v60, %v9974_v58 }
 0xc7f   :  { %v18317_v24 = vpop.f32.mrb[28].mxu0 }
 0xc80   :  { %v9978_v30 = vadd.f32 %v9977_v26, %v9976_v34  ;;  %v18319_v1 = vpop.f32.mrb[29].mxu0  ;;  %v9783_v18 = vadd.f32 %v9782_v62, %v9781_v57  ;;  %v9900_v39 = vmul.f32 %v18317_v24, %v18317_v24  ;;  %v9788_v53 = vsel %vm232_vm2, %v18317_v24, 0.0 }
 0xc81   :  { %v9784_v59 = vsel %vm232_vm2, %v18319_v1, 0.0  ;;  %v9898_v31 = vmul.f32 %v18319_v1, %v18319_v1  ;;  %v18326_v63 = vpop.f32.mrb[30].mxu0 }
 0xc82   :  { %v9785_v9 = vadd.f32 %v9784_v59, %v9783_v18  ;;  %v9980_v2 = vadd.f32 %v9979_v33, %v9978_v30  ;;  %v18328_v11 = vpop.f32.mrb[31].mxu0  ;;  %v9901_v36 = vmul.f32 %v18326_v63, %v18326_v63  ;;  %v9985_v0 = vsel %vm232_vm2, %v9900_v39, 0.0 }
 0xc83   :  { %v9981_v37 = vsel %vm232_vm2, %v9898_v31, 0.0  ;;  %v9786_v3 = vsel %vm232_vm2, %v18328_v11, 0.0  ;;  %v9899_v25 = vmul.f32 %v18328_v11, %v18328_v11  ;;  %v9790_v52 = vsel %vm232_vm2, %v18326_v63, 0.0 }
 0xc84   :  { %v9982_v15 = vadd.f32 %v9981_v37, %v9980_v2  ;;  %v9787_v46 = vadd.f32 %v9786_v3, %v9785_v9  ;;  %v9987_v7 = vsel %vm232_vm2, %v9901_v36, 0.0 }
 0xc85   :  { %v9983_v6 = vsel %vm232_vm2, %v9899_v25, 0.0 }
 0xc86   :  { %v9789_v35 = vadd.f32 %v9788_v53, %v9787_v46  ;;  %v9984_v12 = vadd.f32 %v9983_v6, %v9982_v15 }
 0xc87   :  { %v18345_v19 = vpop.f32.mrb[32].mxu0 }
 0xc88   :  { %v9986_v54 = vadd.f32 %v9985_v0, %v9984_v12  ;;  %v18347_v38 = vpop.f32.mrb[33].mxu0  ;;  %v9791_v49 = vadd.f32 %v9790_v52, %v9789_v35  ;;  %v9904_v58 = vmul.f32 %v18345_v19, %v18345_v19  ;;  %v9796_v34 = vsel %vm232_vm2, %v18345_v19, 0.0 }
 0xc89   :  { %v9792_v45 = vsel %vm232_vm2, %v18347_v38, 0.0  ;;  %v9902_v41 = vmul.f32 %v18347_v38, %v18347_v38  ;;  %v18354_v43 = vpop.f32.mrb[34].mxu0 }
 0xc8a   :  { %v9793_v42 = vadd.f32 %v9792_v45, %v9791_v49  ;;  %v9988_v13 = vadd.f32 %v9987_v7, %v9986_v54  ;;  %v18356_v10 = vpop.f32.mrb[35].mxu0  ;;  %v9905_v26 = vmul.f32 %v18354_v43, %v18354_v43  ;;  %v9993_v33 = vsel %vm232_vm2, %v9904_v58, 0.0 }
 0xc8b   :  { %v9989_v22 = vsel %vm232_vm2, %v9902_v41, 0.0  ;;  %v9794_v5 = vsel %vm232_vm2, %v18356_v10, 0.0  ;;  %v9903_v51 = vmul.f32 %v18356_v10, %v18356_v10  ;;  %v9798_v59 = vsel %vm232_vm2, %v18354_v43, 0.0 }
 0xc8c   :  { %v9990_v60 = vadd.f32 %v9989_v22, %v9988_v13  ;;  %v9795_v57 = vadd.f32 %v9794_v5, %v9793_v42  ;;  %v9995_v37 = vsel %vm232_vm2, %v9905_v26, 0.0 }
 0xc8d   :  { %v9991_v62 = vsel %vm232_vm2, %v9903_v51, 0.0 }
 0xc8e   :  { %v9797_v30 = vadd.f32 %v9796_v34, %v9795_v57  ;;  %v9992_v18 = vadd.f32 %v9991_v62, %v9990_v60 }
 0xc8f   :  { %v18373_v31 = vpop.f32.mrb[36].mxu0 }
 0xc90   :  { %v9994_v9 = vadd.f32 %v9993_v33, %v9992_v18  ;;  %v18375_v2 = vpop.f32.mrb[37].mxu0  ;;  %v9799_v39 = vadd.f32 %v9798_v59, %v9797_v30  ;;  %v9908_v6 = vmul.f32 %v18373_v31, %v18373_v31  ;;  %v9804_v49 = vsel %vm232_vm2, %v18373_v31, 0.0 }
 0xc91   :  { %v9800_v3 = vsel %vm232_vm2, %v18375_v2, 0.0  ;;  %v9906_v25 = vmul.f32 %v18375_v2, %v18375_v2  ;;  %v18382_v15 = vpop.f32.mrb[38].mxu0 }
 0xc92   :  { %v9801_v46 = vadd.f32 %v9800_v3, %v9799_v39  ;;  %v9996_v53 = vadd.f32 %v9995_v37, %v9994_v9  ;;  %v18384_v36 = vpop.f32.mrb[39].mxu0  ;;  %v9909_v7 = vmul.f32 %v18382_v15, %v18382_v15  ;;  %v10001_v13 = vsel %vm232_vm2, %v9908_v6, 0.0 }
 0xc93   :  { %v9997_v35 = vsel %vm232_vm2, %v9906_v25, 0.0  ;;  %v9802_v12 = vsel %vm232_vm2, %v18384_v36, 0.0  ;;  %v9907_v0 = vmul.f32 %v18384_v36, %v18384_v36  ;;  %v9806_v58 = vsel %vm232_vm2, %v18382_v15, 0.0 }
 0xc94   :  { %v9998_v52 = vadd.f32 %v9997_v35, %v9996_v53  ;;  %v9803_v54 = vadd.f32 %v9802_v12, %v9801_v46  ;;  %v10003_v57 = vsel %vm232_vm2, %v9909_v7, 0.0 }
 0xc95   :  { %v9999_v45 = vsel %vm232_vm2, %v9907_v0, 0.0 }
 0xc96   :  { %v9805_v41 = vadd.f32 %v9804_v49, %v9803_v54  ;;  %v10000_v42 = vadd.f32 %v9999_v45, %v9998_v52 }
 0xc97   :  { %v18401_v22 = vpop.f32.mrb[40].mxu0 }
 0xc98   :  { %v10002_v5 = vadd.f32 %v10001_v13, %v10000_v42  ;;  %v18403_v51 = vpop.f32.mrb[41].mxu0  ;;  %v9807_v60 = vadd.f32 %v9806_v58, %v9805_v41  ;;  %v9912_v59 = vmul.f32 %v18401_v22, %v18401_v22  ;;  %v9812_v46 = vsel %vm232_vm2, %v18401_v22, 0.0 }
 0xc99   :  { %v9808_v34 = vsel %vm232_vm2, %v18403_v51, 0.0  ;;  %v9910_v26 = vmul.f32 %v18403_v51, %v18403_v51  ;;  %v18410_v62 = vpop.f32.mrb[42].mxu0 }
 0xc9a   :  { %v9809_v30 = vadd.f32 %v9808_v34, %v9807_v60  ;;  %v10004_v18 = vadd.f32 %v10003_v57, %v10002_v5  ;;  %v18412_v33 = vpop.f32.mrb[43].mxu0  ;;  %v9913_v53 = vmul.f32 %v18410_v62, %v18410_v62  ;;  %v10009_v0 = vsel %vm232_vm2, %v9912_v59, 0.0 }
 0xc9b   :  { %v10005_v9 = vsel %vm232_vm2, %v9910_v26, 0.0  ;;  %v9810_v39 = vsel %vm232_vm2, %v18412_v33, 0.0  ;;  %v9911_v37 = vmul.f32 %v18412_v33, %v18412_v33  ;;  %v9814_v52 = vsel %vm232_vm2, %v18410_v62, 0.0 }
 0xc9c   :  { %v10006_v3 = vadd.f32 %v10005_v9, %v10004_v18  ;;  %v9811_v25 = vadd.f32 %v9810_v39, %v9809_v30  ;;  %v10011_v41 = vsel %vm232_vm2, %v9913_v53, 0.0 }
 0xc9d   :  { %v10007_v6 = vsel %vm232_vm2, %v9911_v37, 0.0 }
 0xc9e   :  { %v9813_v35 = vadd.f32 %v9812_v46, %v9811_v25  ;;  %v10008_v12 = vadd.f32 %v10007_v6, %v10006_v3 }
 0xc9f   :  { %v18429_v54 = vpop.f32.mrb[44].mxu0 }
 0xca0   :  { %v10010_v49 = vadd.f32 %v10009_v0, %v10008_v12  ;;  %v18431_v7 = vpop.f32.mrb[45].mxu0  ;;  %v9815_v45 = vadd.f32 %v9814_v52, %v9813_v35  ;;  %v9916_v34 = vmul.f32 %v18429_v54, %v18429_v54  ;;  %v9820_v39 = vsel %vm232_vm2, %v18429_v54, 0.0 }
 0xca1   :  { %v9816_v42 = vsel %vm232_vm2, %v18431_v7, 0.0  ;;  %v9914_v13 = vmul.f32 %v18431_v7, %v18431_v7  ;;  %v18438_v58 = vpop.f32.mrb[46].mxu0 }
 0xca2   :  { %v9817_v5 = vadd.f32 %v9816_v42, %v9815_v45  ;;  %v10012_v60 = vadd.f32 %v10011_v41, %v10010_v49  ;;  %v18440_v57 = vpop.f32.mrb[47].mxu0  ;;  %v9917_v37 = vmul.f32 %v18438_v58, %v18438_v58  ;;  %v10017_v53 = vsel %vm232_vm2, %v9916_v34, 0.0 }
 0xca3   :  { %v10013_v26 = vsel %vm232_vm2, %v9914_v13, 0.0  ;;  %v9818_v30 = vsel %vm232_vm2, %v18440_v57, 0.0  ;;  %v9915_v18 = vmul.f32 %v18440_v57, %v18440_v57  ;;  %v9822_v6 = vsel %vm232_vm2, %v18438_v58, 0.0 }
 0xca4   :  { %v10014_v59 = vadd.f32 %v10013_v26, %v10012_v60  ;;  %v9819_v9 = vadd.f32 %v9818_v30, %v9817_v5  ;;  %v10019_v49 = vsel %vm232_vm2, %v9917_v37, 0.0 }
 0xca5   :  { %v10015_v3 = vsel %vm232_vm2, %v9915_v18, 0.0 }
 0xca6   :  { %v9821_v25 = vadd.f32 %v9820_v39, %v9819_v9  ;;  %v10016_v46 = vadd.f32 %v10015_v3, %v10014_v59 }
 0xca7   :  { %v18457_v35 = vpop.f32.mrb[48].mxu0 }
 0xca8   :  { %20017 = vst [vmem:[#allocation23_spill] sm:$0xff] %v18457_v35  ;;  %v10018_v12 = vadd.f32 %v10017_v53, %v10016_v46  ;;  %v18459_v0 = vpop.f32.mrb[49].mxu0  ;;  %v9823_v52 = vadd.f32 %v9822_v6, %v9821_v25  ;;  %v9920_v34 = vmul.f32 %v18457_v35, %v18457_v35  ;;  %v9828_v39 = vsel %vm232_vm2, %v18457_v35, 0.0 }
 0xca9   :  { %20018 = vst [vmem:[#allocation26_spill] sm:$0xff] %v18459_v0  ;;  %v9824_v45 = vsel %vm232_vm2, %v18459_v0, 0.0  ;;  %v9918_v41 = vmul.f32 %v18459_v0, %v18459_v0  ;;  %v18466_v42 = vpop.f32.mrb[50].mxu0 }
 0xcaa   :  { %20019 = vst [vmem:[#allocation30_spill] sm:$0xff] %v18466_v42  ;;  %v9825_v13 = vadd.f32 %v9824_v45, %v9823_v52  ;;  %v10020_v5 = vadd.f32 %v10019_v49, %v10018_v12  ;;  %v18468_v60 = vpop.f32.mrb[51].mxu0  ;;  %v9921_v37 = vmul.f32 %v18466_v42, %v18466_v42  ;;  %v10025_v53 = vsel %vm232_vm2, %v9920_v34, 0.0 }
 0xcab   :  { %20020 = vst [vmem:[#allocation32_spill] sm:$0xff] %v18468_v60  ;;  %v10021_v26 = vsel %vm232_vm2, %v9918_v41, 0.0  ;;  %v9826_v30 = vsel %vm232_vm2, %v18468_v60, 0.0  ;;  %v9919_v18 = vmul.f32 %v18468_v60, %v18468_v60  ;;  %v9830_v6 = vsel %vm232_vm2, %v18466_v42, 0.0 }
 0xcac   :  { %v10022_v59 = vadd.f32 %v10021_v26, %v10020_v5  ;;  %v9827_v9 = vadd.f32 %v9826_v30, %v9825_v13  ;;  %v10027_v41 = vsel %vm232_vm2, %v9921_v37, 0.0 }
 0xcad   :  { %v10023_v3 = vsel %vm232_vm2, %v9919_v18, 0.0 }
 0xcae   :  { %v9829_v25 = vadd.f32 %v9828_v39, %v9827_v9  ;;  %v10024_v46 = vadd.f32 %v10023_v3, %v10022_v59 }
 0xcaf   :  { %v18485_v12 = vpop.f32.mrb[52].mxu0 }
 0xcb0   :  { %20021 = vst [vmem:[#allocation34_spill] sm:$0xff] %v18485_v12  ;;  %v10026_v52 = vadd.f32 %v10025_v53, %v10024_v46  ;;  %v18487_v49 = vpop.f32.mrb[53].mxu0  ;;  %v9831_v45 = vadd.f32 %v9830_v6, %v9829_v25  ;;  %v9924_v59 = vmul.f32 %v18485_v12, %v18485_v12  ;;  %v9836_v46 = vsel %vm232_vm2, %v18485_v12, 0.0 }
 0xcb1   :  { %20022 = vst [vmem:[#allocation35_spill] sm:$0xff] %v18487_v49  ;;  %v9832_v13 = vsel %vm232_vm2, %v18487_v49, 0.0  ;;  %v9922_v5 = vmul.f32 %v18487_v49, %v18487_v49  ;;  %v18494_v26 = vpop.f32.mrb[54].mxu0 }
 0xcb2   :  { %20023 = vst [vmem:[#allocation47_spill] sm:$0xff] %v18494_v26  ;;  %v9833_v34 = vadd.f32 %v9832_v13, %v9831_v45  ;;  %v10028_v30 = vadd.f32 %v10027_v41, %v10026_v52  ;;  %v18496_v18 = vpop.f32.mrb[55].mxu0  ;;  %v9925_v53 = vmul.f32 %v18494_v26, %v18494_v26  ;;  %v10033_v41 = vsel %vm232_vm2, %v9924_v59, 0.0 }
 0xcb3   :  { %20024 = vst [vmem:[#allocation58_spill] sm:$0xff] %v18496_v18  ;;  %v10029_v9 = vsel %vm232_vm2, %v9922_v5, 0.0  ;;  %v9834_v39 = vsel %vm232_vm2, %v18496_v18, 0.0  ;;  %v9923_v37 = vmul.f32 %v18496_v18, %v18496_v18  ;;  %v9838_v13 = vsel %vm232_vm2, %v18494_v26, 0.0 }
 0xcb4   :  { %v10030_v3 = vadd.f32 %v10029_v9, %v10028_v30  ;;  %v9835_v25 = vadd.f32 %v9834_v39, %v9833_v34  ;;  %v10035_v9 = vsel %vm232_vm2, %v9925_v53, 0.0 }
 0xcb5   :  { %v10031_v6 = vsel %vm232_vm2, %v9923_v37, 0.0 }
 0xcb6   :  { %v9837_v52 = vadd.f32 %v9836_v46, %v9835_v25  ;;  %v10032_v45 = vadd.f32 %v10031_v6, %v10030_v3 }
 0xcb7   :  { %v18513_v5 = vpop.f32.mrb[56].mxu0 }
 0xcb8   :  { %20025 = vst [vmem:[#allocation33_spill] sm:$0xff] %v18513_v5  ;;  %v10034_v18 = vadd.f32 %v10033_v41, %v10032_v45  ;;  %v18515_v30 = vpop.f32.mrb[57].mxu0  ;;  %v9839_v34 = vadd.f32 %v9838_v13, %v9837_v52  ;;  %v9928_v6 = vmul.f32 %v18513_v5, %v18513_v5 }
 0xcb9   :  { %20026 = vst [vmem:[#allocation27_spill] sm:$0xff] %v18515_v30  ;;  %v9840_v39 = vsel %vm232_vm2, %v18515_v30, 0.0  ;;  %v9926_v37 = vmul.f32 %v18515_v30, %v18515_v30  ;;  %v18522_v3 = vpop.f32.mrb[58].mxu0  ;;  %v9844_v30 = vsel %vm232_vm2, %v18513_v5, 0.0 }
 0xcba   :  { %20027 = vst [vmem:[#allocation37_spill] sm:$0xff] %v18522_v3  ;;  %v9841_v59 = vadd.f32 %v9840_v39, %v9839_v34  ;;  %v10036_v25 = vadd.f32 %v10035_v9, %v10034_v18  ;;  %v18524_v46 = vpop.f32.mrb[59].mxu0  ;;  %v9929_v18 = vmul.f32 %v18522_v3, %v18522_v3  ;;  %v9846_v26 = vsel %vm232_vm2, %v18522_v3, 0.0 }
 0xcbb   :  { %20028 = vst [vmem:[#allocation9_spill] sm:$0xff] %v18524_v46  ;;  %v10037_v45 = vsel %vm232_vm2, %v9926_v37, 0.0  ;;  %v9842_v53 = vsel %vm232_vm2, %v18524_v46, 0.0  ;;  %v9927_v52 = vmul.f32 %v18524_v46, %v18524_v46  ;;  %v10041_v37 = vsel %vm232_vm2, %v9928_v6, 0.0 }
 0xcbc   :  { %v10038_v41 = vadd.f32 %v10037_v45, %v10036_v25  ;;  %v9843_v13 = vadd.f32 %v9842_v53, %v9841_v59  ;;  %v10043_v45 = vsel %vm232_vm2, %v9929_v18, 0.0 }
 0xcbd   :  { %v10039_v34 = vsel %vm232_vm2, %v9927_v52, 0.0 }
 0xcbe   :  { %v9845_v9 = vadd.f32 %v9844_v30, %v9843_v13  ;;  %v10040_v39 = vadd.f32 %v10039_v34, %v10038_v41 }
 0xcbf   :  { %v18541_v12 = vpop.f32.mrb[60].mxu0 }
 0xcc0   :  { %20029 = vst [vmem:[#allocation36_spill] sm:$0xff] %v18541_v12  ;;  %v10042_v46 = vadd.f32 %v10041_v37, %v10040_v39  ;;  %v18543_v25 = vpop.f32.mrb[61].mxu0  ;;  %v9847_v59 = vadd.f32 %v9846_v26, %v9845_v9  ;;  %v9932_v34 = vmul.f32 %v18541_v12, %v18541_v12 }
 0xcc1   :  { %20030 = vst [vmem:[#allocation39_spill] sm:$0xff] %v18543_v25  ;;  %v9848_v53 = vsel %vm232_vm2, %v18543_v25, 0.0  ;;  %v9930_v30 = vmul.f32 %v18543_v25, %v18543_v25  ;;  %v18550_v52 = vpop.f32.mrb[62].mxu0  ;;  %v9852_v25 = vsel %vm232_vm2, %v18541_v12, 0.0 }
 0xcc2   :  { %20031 = vst [vmem:[#allocation40_spill] sm:$0xff] %v18550_v52  ;;  %v9849_v6 = vadd.f32 %v9848_v53, %v9847_v59  ;;  %v10044_v41 = vadd.f32 %v10043_v45, %v10042_v46  ;;  %v18552_v13 = vpop.f32.mrb[63].mxu0  ;;  %v9933_v46 = vmul.f32 %v18550_v52, %v18550_v52  ;;  %v9854_v3 = vsel %vm232_vm2, %v18550_v52, 0.0 }
 0xcc3   :  { %20032 = vst [vmem:[#allocation43_spill] sm:$0xff] %v18552_v13  ;;  %v10045_v39 = vsel %vm232_vm2, %v9930_v30, 0.0  ;;  %v9850_v26 = vsel %vm232_vm2, %v18552_v13, 0.0  ;;  %v9931_v18 = vmul.f32 %v18552_v13, %v18552_v13  ;;  %v10049_v30 = vsel %vm232_vm2, %v9932_v34, 0.0 }
 0xcc4   :  { %v10046_v9 = vadd.f32 %v10045_v39, %v10044_v41  ;;  %v9851_v37 = vadd.f32 %v9850_v26, %v9849_v6  ;;  %v10051_v39 = vsel %vm232_vm2, %v9933_v46, 0.0 }
 0xcc5   :  { %v10047_v59 = vsel %vm232_vm2, %v9931_v18, 0.0 }
 0xcc6   :  { %v9853_v45 = vadd.f32 %v9852_v25, %v9851_v37  ;;  %v10048_v53 = vadd.f32 %v10047_v59, %v10046_v9 }
 0xcc7   :  { %v18569_v5 = vpop.f32.mrb[64].mxu0 }
 0xcc8   :  { %20033 = vst [vmem:[#allocation44_spill] sm:$0xff] %v18569_v5  ;;  %v10050_v13 = vadd.f32 %v10049_v30, %v10048_v53  ;;  %v18571_v41 = vpop.f32.mrb[65].mxu0  ;;  %v9855_v6 = vadd.f32 %v9854_v3, %v9853_v45  ;;  %v9936_v59 = vmul.f32 %v18569_v5, %v18569_v5 }
 0xcc9   :  { %20034 = vst [vmem:[#allocation45_spill] sm:$0xff] %v18571_v41  ;;  %v9856_v26 = vsel %vm232_vm2, %v18571_v41, 0.0  ;;  %v9934_v25 = vmul.f32 %v18571_v41, %v18571_v41  ;;  %v18578_v18 = vpop.f32.mrb[66].mxu0  ;;  %v9860_v41 = vsel %vm232_vm2, %v18569_v5, 0.0 }
 0xcca   :  { %20035 = vst [vmem:[#allocation48_spill] sm:$0xff] %v18578_v18  ;;  %v9857_v34 = vadd.f32 %v9856_v26, %v9855_v6  ;;  %v10052_v9 = vadd.f32 %v10051_v39, %v10050_v13  ;;  %v18580_v37 = vpop.f32.mrb[67].mxu0  ;;  %v9937_v13 = vmul.f32 %v18578_v18, %v18578_v18  ;;  %v9862_v52 = vsel %vm232_vm2, %v18578_v18, 0.0 }
 0xccb   :  { %20036 = vst [vmem:[#allocation49_spill] sm:$0xff] %v18580_v37  ;;  %v10053_v53 = vsel %vm232_vm2, %v9934_v25, 0.0  ;;  %v9858_v3 = vsel %vm232_vm2, %v18580_v37, 0.0  ;;  %v9935_v46 = vmul.f32 %v18580_v37, %v18580_v37  ;;  %v10057_v25 = vsel %vm232_vm2, %v9936_v59, 0.0 }
 0xccc   :  { %v10054_v45 = vadd.f32 %v10053_v53, %v10052_v9  ;;  %v9859_v30 = vadd.f32 %v9858_v3, %v9857_v34  ;;  %v10059_v53 = vsel %vm232_vm2, %v9937_v13, 0.0 }
 0xccd   :  { %v10055_v6 = vsel %vm232_vm2, %v9935_v46, 0.0 }
 0xcce   :  { %v9861_v39 = vadd.f32 %v9860_v41, %v9859_v30  ;;  %v10056_v26 = vadd.f32 %v10055_v6, %v10054_v45 }
 0xccf   :  { %v18597_v12 = vpop.f32.mrb[68].mxu0 }
 0xcd0   :  { %20037 = vst [vmem:[#allocation12_spill] sm:$0xff] %v18597_v12  ;;  %v10058_v37 = vadd.f32 %v10057_v25, %v10056_v26  ;;  %v18599_v9 = vpop.f32.mrb[69].mxu0  ;;  %v9863_v34 = vadd.f32 %v9862_v52, %v9861_v39  ;;  %v9940_v6 = vmul.f32 %v18597_v12, %v18597_v12 }
 0xcd1   :  { %20038 = vst [vmem:[#allocation19_spill] sm:$0xff] %v18599_v9  ;;  %v9864_v3 = vsel %vm232_vm2, %v18599_v9, 0.0  ;;  %v9938_v41 = vmul.f32 %v18599_v9, %v18599_v9  ;;  %v18606_v46 = vpop.f32.mrb[70].mxu0  ;;  %v9868_v9 = vsel %vm232_vm2, %v18597_v12, 0.0 }
 0xcd2   :  { %20039 = vst [vmem:[#allocation18_spill] sm:$0xff] %v18606_v46  ;;  %v9865_v59 = vadd.f32 %v9864_v3, %v9863_v34  ;;  %v10060_v45 = vadd.f32 %v10059_v53, %v10058_v37  ;;  %v18608_v30 = vpop.f32.mrb[71].mxu0  ;;  %v9941_v37 = vmul.f32 %v18606_v46, %v18606_v46  ;;  %v9870_v18 = vsel %vm232_vm2, %v18606_v46, 0.0 }
 0xcd3   :  { %20040 = vst [vmem:[#allocation8_spill] sm:$0xff] %v18608_v30  ;;  %v10061_v26 = vsel %vm232_vm2, %v9938_v41, 0.0  ;;  %v9866_v52 = vsel %vm232_vm2, %v18608_v30, 0.0  ;;  %v9939_v13 = vmul.f32 %v18608_v30, %v18608_v30  ;;  %v10065_v41 = vsel %vm232_vm2, %v9940_v6, 0.0 }
 0xcd4   :  { %v10062_v39 = vadd.f32 %v10061_v26, %v10060_v45  ;;  %v9867_v25 = vadd.f32 %v9866_v52, %v9865_v59  ;;  %v10067_v45 = vsel %vm232_vm2, %v9941_v37, 0.0 }
 0xcd5   :  { %v10063_v34 = vsel %vm232_vm2, %v9939_v13, 0.0 }
 0xcd6   :  { %v9869_v53 = vadd.f32 %v9868_v9, %v9867_v25  ;;  %v10064_v3 = vadd.f32 %v10063_v34, %v10062_v39 }
 0xcd8   :  { %v9871_v5 = vadd.f32 %v9870_v18, %v9869_v53  ;;  %v10066_v49 = vadd.f32 %v10065_v41, %v10064_v3 }
 0xcda   :  { %v9872_v59 = vrot.slane %v9871_v5, 4  ;;  %v10068_v26 = vadd.f32 %v10067_v45, %v10066_v49  ;;  %v10082_v49 = vld [vmem:[%s19487_s8] sm:$0x1] }
 0xcdc   :  { %v9873_v52 = vadd.f32 %v9872_v59, %v9871_v5  ;;  %v10069_v12 = vrot.slane %v10068_v26, 4 }
 0xcde   :  { %v9874_v30 = vrot.slane %v9873_v52, 2  ;;  %v10070_v42 = vadd.f32 %v10069_v12, %v10068_v26  ;;  %v20042_v26 = vld [vmem:[#allocation26_spill] sm:$0xff] }
 0xce0   :  { %v9875_v35 = vadd.f32 %v9874_v30, %v9873_v52  ;;  %v10071_v60 = vrot.slane %v10070_v42, 2  ;;  %v20043_v52 = vld [vmem:[#allocation32_spill] sm:$0xff] }
 0xce2   :  { %v9876_v13 = vrot.slane %v9875_v35, 1  ;;  %v10072_v9 = vadd.f32 %v10071_v60, %v10070_v42  ;;  %v18632_v42 = vld [vmem:[%s19488_s9] sm:$0x1] }
 0xce3   :  { %v20041_v60 = vld [vmem:[#allocation24_spill] sm:$0xff] }
 0xce4   :  { %v9877_v39 = vadd.f32 %v9876_v13, %v9875_v35  ;;  %v10073_v25 = vrot.slane %v10072_v9, 1  ;;  %v20044_v13 = vld [vmem:[#allocation23_spill] sm:$0xff] }
 0xce6   :  { %v10074_v6 = vadd.f32 %v10073_v25, %v10072_v9  ;;  %v10075_v34 = vmul.f32 0.001953125, %v9877_v39  ;;  %v20045_v9 = vld [vmem:[#allocation30_spill] sm:$0xff]  ;;  %v20046_v39 = vld [vmem:[#allocation35_spill] sm:$0xff] }
 0xce7   :  { %v20047_v25 = vld [vmem:[#allocation58_spill] sm:$0xff] }
 0xce8   :  { %v10076_v0 = vmul.f32 0.001953125, %v10074_v6  ;;  %v10077_v46 = vmul.f32 %v10075_v34, %v10075_v34 }
 0xcea   :  { %v10078_v18 = vsub.f32 %v10076_v0, %v10077_v46  ;;  %v20061_v0 = vld [vmem:[#allocation36_spill] sm:$0xff] }
 0xcec   :  { %v10079_v53 = vmax.f32 %v10078_v18, 0.0 }
 0xcee   :  { %v10080_v3 = vadd.f32 1e-05, %v10079_v53  ;;  %v20049_v53 = vld [vmem:[#allocation47_spill] sm:$0xff] }
 0xcf0   :  { %14187 = vrsqrt.f32 %v10080_v3 }
 0xcfa   :  { %v14188_v5 = vpop.eup %14187 }
 0xcfb   :  { %v10083_v12 = vmul.f32 %v14188_v5, %v10082_v49  ;;  %v20050_v49 = vld [vmem:[#allocation27_spill] sm:$0xff] }
 0xcfd   :  { %v18634_v35 = vmul.f32 %v10083_v12, %v10075_v34  ;;  %v18637_v30 = vrot.slane %v10083_v12, %v20041_v60  ;;  %v20048_v34 = vld [vmem:[#allocation34_spill] sm:$0xff]  ;;  %v20051_v12 = vld [vmem:[#allocation9_spill] sm:$0xff] }
 0xcff   :  { %v18643_v46 = vmul.f32 %v18637_v30, %v18180_v20  ;;  %v18647_v37 = vmul.f32 %v18637_v30, %v18186_v27  ;;  %v18651_v41 = vmul.f32 %v18178_v61, %v18637_v30  ;;  %v18655_v45 = vmul.f32 %v18184_v40, %v18637_v30 }
 0xd00   :  { %v18659_v59 = vmul.f32 %v18637_v30, %v18207_v16  ;;  %v18663_v20 = vmul.f32 %v18637_v30, %v18216_v56  ;;  %v18667_v27 = vmul.f32 %v18205_v17, %v18637_v30  ;;  %v18671_v61 = vmul.f32 %v18214_v8, %v18637_v30 }
 0xd01   :  { %v18675_v40 = vmul.f32 %v18637_v30, %v18235_v28  ;;  %v18679_v16 = vmul.f32 %v18637_v30, %v18244_v21  ;;  %v18683_v56 = vmul.f32 %v18233_v47, %v18637_v30  ;;  %v18687_v17 = vmul.f32 %v18242_v55, %v18637_v30 }
 0xd02   :  { %v18691_v8 = vmul.f32 %v18637_v30, %v18263_v23  ;;  %v18695_v28 = vmul.f32 %v18637_v30, %v18272_v29  ;;  %v18699_v21 = vmul.f32 %v18261_v14, %v18637_v30  ;;  %v18703_v47 = vmul.f32 %v18270_v44, %v18637_v30 }
 0xd03   :  { %v18707_v55 = vmul.f32 %v18637_v30, %v18291_v48  ;;  %v18711_v23 = vmul.f32 %v18637_v30, %v18300_v32  ;;  %v18715_v29 = vmul.f32 %v18289_v4, %v18637_v30  ;;  %v18719_v14 = vmul.f32 %v18298_v50, %v18637_v30 }
 0xd04   :  { %v18723_v44 = vmul.f32 %v18637_v30, %v18319_v1  ;;  %v18727_v48 = vmul.f32 %v18637_v30, %v18328_v11  ;;  %v18731_v32 = vmul.f32 %v18317_v24, %v18637_v30  ;;  %v18735_v4 = vmul.f32 %v18326_v63, %v18637_v30 }
 0xd05   :  { %v18739_v50 = vmul.f32 %v18637_v30, %v18347_v38  ;;  %v18743_v1 = vmul.f32 %v18637_v30, %v18356_v10  ;;  %v18747_v11 = vmul.f32 %v18345_v19, %v18637_v30  ;;  %v18751_v24 = vmul.f32 %v18354_v43, %v18637_v30 }
 0xd06   :  { %v18755_v63 = vmul.f32 %v18637_v30, %v18375_v2  ;;  %v18759_v38 = vmul.f32 %v18637_v30, %v18384_v36  ;;  %v18763_v10 = vmul.f32 %v18373_v31, %v18637_v30  ;;  %v18767_v19 = vmul.f32 %v18382_v15, %v18637_v30 }
 0xd07   :  { %v18771_v43 = vmul.f32 %v18637_v30, %v18403_v51  ;;  %v18775_v2 = vmul.f32 %v18637_v30, %v18412_v33  ;;  %v18779_v36 = vmul.f32 %v18401_v22, %v18637_v30  ;;  %v18783_v31 = vmul.f32 %v18410_v62, %v18637_v30 }
 0xd08   :  { %v18787_v15 = vmul.f32 %v18637_v30, %v18431_v7  ;;  %v18791_v51 = vmul.f32 %v18637_v30, %v18440_v57  ;;  %v18795_v33 = vmul.f32 %v18429_v54, %v18637_v30  ;;  %v18799_v22 = vmul.f32 %v18438_v58, %v18637_v30 }
 0xd09   :  { %v18803_v62 = vmul.f32 %v18637_v30, %v20042_v26  ;;  %v18807_v7 = vmul.f32 %v18637_v30, %v20043_v52  ;;  %v18811_v57 = vmul.f32 %v20044_v13, %v18637_v30  ;;  %v18815_v54 = vmul.f32 %v20045_v9, %v18637_v30  ;;  %v20053_v52 = vld [vmem:[#allocation33_spill] sm:$0xff] }
 0xd0a   :  { %v18819_v58 = vmul.f32 %v18637_v30, %v20046_v39  ;;  %v18823_v6 = vmul.f32 %v18637_v30, %v20047_v25  ;;  %v18827_v18 = vmul.f32 %v20048_v34, %v18637_v30  ;;  %v18831_v3 = vmul.f32 %v20049_v53, %v18637_v30  ;;  %v20055_v9 = vld [vmem:[#allocation37_spill] sm:$0xff]  ;;  %v20057_v25 = vld [vmem:[#allocation39_spill] sm:$0xff] }
 0xd0b   :  { %v18835_v5 = vmul.f32 %v18637_v30, %v20050_v49  ;;  %v18839_v26 = vmul.f32 %v18637_v30, %v20051_v12  ;;  %v18843_v13 = vmul.f32 %v20053_v52, %v18637_v30  ;;  %v18847_v39 = vmul.f32 %v20055_v9, %v18637_v30  ;;  %v20059_v53 = vld [vmem:[#allocation43_spill] sm:$0xff] }
 0xd0c   :  { %v18851_v34 = vmul.f32 %v18637_v30, %v20057_v25  ;;  %v18855_v49 = vmul.f32 %v18637_v30, %v20059_v53  ;;  %v18859_v12 = vmul.f32 %v20061_v0, %v18637_v30 }
 0xd0d   :  { %20052 = vst [vmem:[#allocation5_spill] sm:$0xff] %v18839_v26  ;;  %20054 = vst [vmem:[#allocation7_spill] sm:$0xff] %v18843_v13  ;;  %v20063_v26 = vld [vmem:[#allocation40_spill] sm:$0xff]  ;;  %v20065_v13 = vld [vmem:[#allocation45_spill] sm:$0xff] }
 0xd0e   :  { %20056 = vst [vmem:[#allocation11_spill] sm:$0xff] %v18847_v39  ;;  %20058 = vst [vmem:[#allocation13_spill] sm:$0xff] %v18851_v34  ;;  %v18863_v52 = vmul.f32 %v20063_v26, %v18637_v30  ;;  %v18867_v9 = vmul.f32 %v18637_v30, %v20065_v13  ;;  %v20067_v39 = vld [vmem:[#allocation49_spill] sm:$0xff]  ;;  %v20069_v34 = vld [vmem:[#allocation44_spill] sm:$0xff] }
 0xd0f   :  { %20060 = vst [vmem:[#allocation15_spill] sm:$0xff] %v18855_v49  ;;  %20062 = vst [vmem:[#allocation17_spill] sm:$0xff] %v18859_v12  ;;  %v18871_v25 = vmul.f32 %v18637_v30, %v20067_v39  ;;  %v18875_v53 = vmul.f32 %v20069_v34, %v18637_v30  ;;  %v20070_v49 = vld [vmem:[#allocation48_spill] sm:$0xff]  ;;  %v20072_v12 = vld [vmem:[#allocation19_spill] sm:$0xff] }
 0xd10   :  { %20064 = vst [vmem:[#allocation6_spill] sm:$0xff] %v18863_v52  ;;  %20066 = vst [vmem:[#allocation16_spill] sm:$0xff] %v18867_v9  ;;  %v18879_v0 = vmul.f32 %v20070_v49, %v18637_v30  ;;  %v18883_v26 = vmul.f32 %v18637_v30, %v20072_v12  ;;  %v20073_v52 = vld [vmem:[#allocation8_spill] sm:$0xff]  ;;  %v20076_v49 = vsub.f32 %v18632_v42, %v18634_v35 }
 0xd11   :  { %20068 = vst [vmem:[#allocation25_spill] sm:$0xff] %v18871_v25  ;;  %v18887_v13 = vmul.f32 %v18637_v30, %v20073_v52  ;;  %v20074_v9 = vld [vmem:[#allocation12_spill] sm:$0xff]  ;;  %v20075_v25 = vld [vmem:[#allocation18_spill] sm:$0xff] }
 0xd12   :  { %20071 = vst [vmem:[#allocation53_spill] sm:$0xff] %v18879_v0  ;;  %v18891_v39 = vmul.f32 %v20074_v9, %v18637_v30  ;;  %v18895_v34 = vmul.f32 %v20075_v25, %v18637_v30  ;;  %v18901_v0 = vrot.slane %v20076_v49, %v20041_v60 }
 0xd14   :  { %v18905_v12 = vadd.f32 %v18901_v0, %v18643_v46  ;;  %v18909_v52 = vadd.f32 %v18901_v0, %v18647_v37  ;;  %v18913_v9 = vadd.f32 %v18901_v0, %v18651_v41  ;;  %v18917_v30 = vadd.f32 %v18901_v0, %v18655_v45 }
 0xd15   :  { %v18921_v42 = vadd.f32 %v18901_v0, %v18659_v59  ;;  %v18925_v35 = vadd.f32 %v18901_v0, %v18663_v20  ;;  %v18929_v60 = vadd.f32 %v18901_v0, %v18667_v27  ;;  %v18933_v46 = vadd.f32 %v18901_v0, %v18671_v61  ;;  %v20083_v25 = vld [vmem:[#allocation11_spill] sm:$0xff]  ;;  %v20085_v49 = vld [vmem:[#allocation13_spill] sm:$0xff] }
 0xd16   :  { %v18937_v37 = vadd.f32 %v18901_v0, %v18675_v40  ;;  %v18941_v41 = vadd.f32 %v18901_v0, %v18679_v16  ;;  %v18945_v45 = vadd.f32 %v18901_v0, %v18683_v56  ;;  %v18949_v59 = vadd.f32 %v18901_v0, %v18687_v17 }
 0xd17   :  { %v18953_v20 = vadd.f32 %v18901_v0, %v18691_v8  ;;  %v18957_v27 = vadd.f32 %v18901_v0, %v18695_v28  ;;  %v18961_v61 = vadd.f32 %v18901_v0, %v18699_v21  ;;  %v18965_v40 = vadd.f32 %v18901_v0, %v18703_v47 }
 0xd18   :  { %v18969_v16 = vadd.f32 %v18901_v0, %v18707_v55  ;;  %v18973_v56 = vadd.f32 %v18901_v0, %v18711_v23  ;;  %v18977_v17 = vadd.f32 %v18901_v0, %v18715_v29  ;;  %v18981_v8 = vadd.f32 %v18901_v0, %v18719_v14 }
 0xd19   :  { %v18985_v28 = vadd.f32 %v18901_v0, %v18723_v44  ;;  %v18989_v21 = vadd.f32 %v18901_v0, %v18727_v48  ;;  %v18993_v47 = vadd.f32 %v18901_v0, %v18731_v32  ;;  %v18997_v55 = vadd.f32 %v18901_v0, %v18735_v4 }
 0xd1a   :  { %v19001_v23 = vadd.f32 %v18901_v0, %v18739_v50  ;;  %v19005_v29 = vadd.f32 %v18901_v0, %v18743_v1  ;;  %v19009_v14 = vadd.f32 %v18901_v0, %v18747_v11  ;;  %v19013_v44 = vadd.f32 %v18901_v0, %v18751_v24 }
 0xd1b   :  { %v19017_v48 = vadd.f32 %v18901_v0, %v18755_v63  ;;  %v19021_v32 = vadd.f32 %v18901_v0, %v18759_v38  ;;  %v19025_v4 = vadd.f32 %v18901_v0, %v18763_v10  ;;  %v19029_v50 = vadd.f32 %v18901_v0, %v18767_v19 }
 0xd1c   :  { %v19033_v1 = vadd.f32 %v18901_v0, %v18771_v43  ;;  %v19037_v11 = vadd.f32 %v18901_v0, %v18775_v2  ;;  %v19041_v24 = vadd.f32 %v18901_v0, %v18779_v36  ;;  %v19045_v63 = vadd.f32 %v18901_v0, %v18783_v31 }
 0xd1d   :  { %v19049_v38 = vadd.f32 %v18901_v0, %v18787_v15  ;;  %v19053_v10 = vadd.f32 %v18901_v0, %v18791_v51  ;;  %v19057_v19 = vadd.f32 %v18901_v0, %v18795_v33  ;;  %v19061_v43 = vadd.f32 %v18901_v0, %v18799_v22 }
 0xd1e   :  { %v19065_v2 = vadd.f32 %v18901_v0, %v18803_v62  ;;  %v19069_v36 = vadd.f32 %v18901_v0, %v18807_v7  ;;  %v19073_v31 = vadd.f32 %v18901_v0, %v18811_v57  ;;  %v19077_v15 = vadd.f32 %v18901_v0, %v18815_v54  ;;  %v20079_v57 = vld [vmem:[#allocation5_spill] sm:$0xff] }
 0xd1f   :  { %v19081_v51 = vadd.f32 %v18901_v0, %v18819_v58  ;;  %v19085_v33 = vadd.f32 %v18901_v0, %v18823_v6  ;;  %v19089_v22 = vadd.f32 %v18901_v0, %v18827_v18  ;;  %v19093_v62 = vadd.f32 %v18901_v0, %v18831_v3  ;;  %v20081_v58 = vld [vmem:[#allocation7_spill] sm:$0xff] }
 0xd20   :  { %v19097_v7 = vadd.f32 %v18901_v0, %v18835_v5  ;;  %v19101_v54 = vadd.f32 %v18901_v0, %v20079_v57  ;;  %v19105_v6 = vadd.f32 %v18901_v0, %v20081_v58  ;;  %v19109_v18 = vadd.f32 %v18901_v0, %v20083_v25 }
 0xd21   :  { %20077 = vst [vmem:[#allocation22_spill] sm:$0xff] %v19093_v62  ;;  %v19113_v3 = vadd.f32 %v18901_v0, %v20085_v49  ;;  %v20086_v62 = vld [vmem:[#allocation15_spill] sm:$0xff] }
 0xd22   :  { %20078 = vst [vmem:[#allocation28_spill] sm:$0xff] %v19097_v7  ;;  %20080 = vst [vmem:[#allocation31_spill] sm:$0xff] %v19101_v54  ;;  %v19117_v5 = vadd.f32 %v18901_v0, %v20086_v62  ;;  %v20088_v7 = vld [vmem:[#allocation17_spill] sm:$0xff]  ;;  %v20089_v54 = vld [vmem:[#allocation6_spill] sm:$0xff]  ;;  %v19137_v62 = vadd.f32 %v18901_v0, %v18875_v53  ;;  %v19157_v53 = vadd.f32 %v18901_v0, %v18895_v34  ;;  %v10235_v34 = vmax.f32 %v18945_v45, 0.0 }
 0xd23   :  { %20082 = vst [vmem:[#allocation69_spill] sm:$0xff] %v19105_v6  ;;  %20084 = vst [vmem:[#allocation29_spill] sm:$0xff] %v19109_v18  ;;  %v19121_v57 = vadd.f32 %v18901_v0, %v20088_v7  ;;  %v19125_v58 = vadd.f32 %v18901_v0, %v20089_v54  ;;  %v20090_v6 = vld [vmem:[#allocation16_spill] sm:$0xff]  ;;  %v20091_v18 = vld [vmem:[#allocation25_spill] sm:$0xff]  ;;  %v19145_v54 = vadd.f32 %v18901_v0, %v18883_v26  ;;  %v10228_v26 = vmax.f32 %v18917_v30, 0.0 }
 0xd24   :  { %20087 = vst [vmem:[#allocation38_spill] sm:$0xff] %v19117_v5  ;;  %v19129_v25 = vadd.f32 %v18901_v0, %v20090_v6  ;;  %v19133_v49 = vadd.f32 %v18901_v0, %v20091_v18  ;;  %20092 = vst [vmem:[#allocation14_spill] sm:$0xff] %v19137_v62  ;;  %v20093_v5 = vld [vmem:[#allocation53_spill] sm:$0xff]  ;;  %v19149_v6 = vadd.f32 %v18901_v0, %v18887_v13  ;;  %v10225_v62 = vmax.f32 %v18905_v12, 0.0 }
 0xd25   :  { %v19141_v7 = vadd.f32 %v18901_v0, %v20093_v5  ;;  %20095 = vst [vmem:[#allocation41_spill] sm:$0xff] %v19145_v54  ;;  %v19153_v18 = vadd.f32 %v18901_v0, %v18891_v39  ;;  %v10226_v5 = vmax.f32 %v18909_v52, 0.0  ;;  %v10229_v54 = vmax.f32 %v18921_v42, 0.0  ;;  %10292 = vst.msk [vmem:[%s19489_s10 + $0x18] sm:$0xff] %vm232_vm2, %v10228_v26 }
 0xd26   :  { %20096 = vst [vmem:[#allocation42_spill] sm:$0xff] %v19149_v6  ;;  %v10230_v13 = vmax.f32 %v18925_v35, 0.0  ;;  %v10231_v6 = vmax.f32 %v18929_v60, 0.0  ;;  %v10232_v39 = vmax.f32 %v18933_v46, 0.0  ;;  %v10234_v0 = vmax.f32 %v18941_v41, 0.0  ;;  %10289 = vst.msk [vmem:[%s19489_s10] sm:$0xff] %vm232_vm2, %v10225_v62 }
 0xd27   :  { %20094 = vst [vmem:[#allocation70_spill] sm:$0xff] %v19141_v7  ;;  %20097 = vst [vmem:[#allocation46_spill] sm:$0xff] %v19153_v18  ;;  %v10227_v7 = vmax.f32 %v18913_v9, 0.0  ;;  %v10233_v18 = vmax.f32 %v18937_v37, 0.0  ;;  %v10236_v12 = vmax.f32 %v18949_v59, 0.0  ;;  %v10237_v52 = vmax.f32 %v18953_v20, 0.0 }
 0xd28   :  { %10290 = vst.msk [vmem:[%s19489_s10 + $0x8] sm:$0xff] %vm232_vm2, %v10226_v5  ;;  %v10238_v9 = vmax.f32 %v18957_v27, 0.0  ;;  %v10239_v30 = vmax.f32 %v18961_v61, 0.0  ;;  %v10240_v42 = vmax.f32 %v18965_v40, 0.0  ;;  %10293 = vst.msk [vmem:[%s19489_s10 + $0x20] sm:$0xff] %vm232_vm2, %v10229_v54  ;;  %v10241_v35 = vmax.f32 %v18969_v16, 0.0 }
 0xd29   :  { %10291 = vst.msk [vmem:[%s19489_s10 + $0x10] sm:$0xff] %vm232_vm2, %v10227_v7  ;;  %10294 = vst.msk [vmem:[%s19489_s10 + $0x28] sm:$0xff] %vm232_vm2, %v10230_v13  ;;  %v10242_v60 = vmax.f32 %v18973_v56, 0.0  ;;  %v10243_v46 = vmax.f32 %v18977_v17, 0.0  ;;  %v10244_v37 = vmax.f32 %v18981_v8, 0.0  ;;  %v10245_v41 = vmax.f32 %v18985_v28, 0.0 }
 0xd2a   :  { %10295 = vst.msk [vmem:[%s19489_s10 + $0x30] sm:$0xff] %vm232_vm2, %v10231_v6  ;;  %10296 = vst.msk [vmem:[%s19489_s10 + $0x38] sm:$0xff] %vm232_vm2, %v10232_v39  ;;  %v10246_v45 = vmax.f32 %v18989_v21, 0.0  ;;  %v10247_v59 = vmax.f32 %v18993_v47, 0.0  ;;  %v10248_v20 = vmax.f32 %v18997_v55, 0.0  ;;  %v10249_v27 = vmax.f32 %v19001_v23, 0.0 }
 0xd2b   :  { %10297 = vst.msk [vmem:[%s19489_s10 + $0x40] sm:$0xff] %vm232_vm2, %v10233_v18  ;;  %10298 = vst.msk [vmem:[%s19489_s10 + $0x48] sm:$0xff] %vm232_vm2, %v10234_v0  ;;  %v10250_v61 = vmax.f32 %v19005_v29, 0.0  ;;  %v10251_v40 = vmax.f32 %v19009_v14, 0.0  ;;  %v10252_v16 = vmax.f32 %v19013_v44, 0.0  ;;  %v10253_v56 = vmax.f32 %v19017_v48, 0.0 }
 0xd2c   :  { %10299 = vst.msk [vmem:[%s19489_s10 + $0x50] sm:$0xff] %vm232_vm2, %v10235_v34  ;;  %10300 = vst.msk [vmem:[%s19489_s10 + $0x58] sm:$0xff] %vm232_vm2, %v10236_v12  ;;  %v10254_v17 = vmax.f32 %v19021_v32, 0.0  ;;  %v10255_v8 = vmax.f32 %v19025_v4, 0.0  ;;  %v10256_v28 = vmax.f32 %v19029_v50, 0.0  ;;  %v10257_v21 = vmax.f32 %v19033_v1, 0.0 }
 0xd2d   :  { %10301 = vst.msk [vmem:[%s19489_s10 + $0x60] sm:$0xff] %vm232_vm2, %v10237_v52  ;;  %10302 = vst.msk [vmem:[%s19489_s10 + $0x68] sm:$0xff] %vm232_vm2, %v10238_v9  ;;  %v10258_v47 = vmax.f32 %v19037_v11, 0.0  ;;  %v10259_v55 = vmax.f32 %v19041_v24, 0.0  ;;  %v10260_v23 = vmax.f32 %v19045_v63, 0.0  ;;  %v10261_v29 = vmax.f32 %v19049_v38, 0.0 }
 0xd2e   :  { %10303 = vst.msk [vmem:[%s19489_s10 + $0x70] sm:$0xff] %vm232_vm2, %v10239_v30  ;;  %10304 = vst.msk [vmem:[%s19489_s10 + $0x78] sm:$0xff] %vm232_vm2, %v10240_v42  ;;  %v10262_v14 = vmax.f32 %v19053_v10, 0.0  ;;  %v10263_v44 = vmax.f32 %v19057_v19, 0.0  ;;  %v10264_v48 = vmax.f32 %v19061_v43, 0.0  ;;  %v10265_v32 = vmax.f32 %v19065_v2, 0.0 }
 0xd2f   :  { %10305 = vst.msk [vmem:[%s19489_s10 + $0x80] sm:$0xff] %vm232_vm2, %v10241_v35  ;;  %10306 = vst.msk [vmem:[%s19489_s10 + $0x88] sm:$0xff] %vm232_vm2, %v10242_v60  ;;  %v10266_v4 = vmax.f32 %v19069_v36, 0.0  ;;  %v10267_v50 = vmax.f32 %v19073_v31, 0.0  ;;  %v10268_v1 = vmax.f32 %v19077_v15, 0.0  ;;  %v10269_v11 = vmax.f32 %v19081_v51, 0.0 }
 0xd30   :  { %10307 = vst.msk [vmem:[%s19489_s10 + $0x90] sm:$0xff] %vm232_vm2, %v10243_v46  ;;  %10308 = vst.msk [vmem:[%s19489_s10 + $0x98] sm:$0xff] %vm232_vm2, %v10244_v37  ;;  %v10270_v24 = vmax.f32 %v19085_v33, 0.0  ;;  %v10271_v63 = vmax.f32 %v19089_v22, 0.0  ;;  %v20098_v38 = vld [vmem:[#allocation22_spill] sm:$0xff]  ;;  %v20099_v19 = vld [vmem:[#allocation28_spill] sm:$0xff] }
 0xd31   :  { %10309 = vst.msk [vmem:[%s19489_s10 + $0xa0] sm:$0xff] %vm232_vm2, %v10245_v41  ;;  %10310 = vst.msk [vmem:[%s19489_s10 + $0xa8] sm:$0xff] %vm232_vm2, %v10246_v45  ;;  %v10272_v10 = vmax.f32 %v20098_v38, 0.0  ;;  %v10273_v43 = vmax.f32 %v20099_v19, 0.0  ;;  %v20100_v2 = vld [vmem:[#allocation31_spill] sm:$0xff]  ;;  %v20101_v31 = vld [vmem:[#allocation69_spill] sm:$0xff] }
 0xd32   :  { %10311 = vst.msk [vmem:[%s19489_s10 + $0xb0] sm:$0xff] %vm232_vm2, %v10247_v59  ;;  %10312 = vst.msk [vmem:[%s19489_s10 + $0xb8] sm:$0xff] %vm232_vm2, %v10248_v20  ;;  %v10274_v36 = vmax.f32 %v20100_v2, 0.0  ;;  %v10275_v15 = vmax.f32 %v20101_v31, 0.0  ;;  %v20102_v51 = vld [vmem:[#allocation29_spill] sm:$0xff]  ;;  %v10277_v22 = vmax.f32 %v19113_v3, 0.0 }
 0xd33   :  { %10313 = vst.msk [vmem:[%s19489_s10 + $0xc0] sm:$0xff] %vm232_vm2, %v10249_v27  ;;  %10314 = vst.msk [vmem:[%s19489_s10 + $0xc8] sm:$0xff] %vm232_vm2, %v10250_v61  ;;  %v10276_v33 = vmax.f32 %v20102_v51, 0.0  ;;  %v20103_v62 = vld [vmem:[#allocation38_spill] sm:$0xff]  ;;  %v10279_v54 = vmax.f32 %v19121_v57, 0.0  ;;  %v10280_v6 = vmax.f32 %v19125_v58, 0.0 }
 0xd34   :  { %10315 = vst.msk [vmem:[%s19489_s10 + $0xd0] sm:$0xff] %vm232_vm2, %v10251_v40  ;;  %10316 = vst.msk [vmem:[%s19489_s10 + $0xd8] sm:$0xff] %vm232_vm2, %v10252_v16  ;;  %v10278_v7 = vmax.f32 %v20103_v62, 0.0  ;;  %v10281_v3 = vmax.f32 %v19129_v25, 0.0  ;;  %v10282_v57 = vmax.f32 %v19133_v49, 0.0  ;;  %v20104_v58 = vld [vmem:[#allocation14_spill] sm:$0xff] }
 0xd35   :  { %10317 = vst.msk [vmem:[%s19489_s10 + $0xe0] sm:$0xff] %vm232_vm2, %v10253_v56  ;;  %10318 = vst.msk [vmem:[%s19489_s10 + $0xe8] sm:$0xff] %vm232_vm2, %v10254_v17  ;;  %v10283_v18 = vmax.f32 %v20104_v58, 0.0  ;;  %v20105_v5 = vld [vmem:[#allocation70_spill] sm:$0xff]  ;;  %v20106_v25 = vld [vmem:[#allocation41_spill] sm:$0xff]  ;;  %v10288_v12 = vmax.f32 %v19157_v53, 0.0 }
 0xd36   :  { %10319 = vst.msk [vmem:[%s19489_s10 + $0xf0] sm:$0xff] %vm232_vm2, %v10255_v8  ;;  %10320 = vst.msk [vmem:[%s19489_s10 + $0xf8] sm:$0xff] %vm232_vm2, %v10256_v28  ;;  %v10284_v26 = vmax.f32 %v20105_v5, 0.0  ;;  %v10285_v49 = vmax.f32 %v20106_v25, 0.0  ;;  %v20107_v13 = vld [vmem:[#allocation42_spill] sm:$0xff] }
 0xd37   :  { %10321 = vst.msk [vmem:[%s19489_s10 + $0x100] sm:$0xff] %vm232_vm2, %v10257_v21  ;;  %10322 = vst.msk [vmem:[%s19489_s10 + $0x108] sm:$0xff] %vm232_vm2, %v10258_v47  ;;  %v10286_v39 = vmax.f32 %v20107_v13, 0.0  ;;  %v20108_v0 = vld [vmem:[#allocation46_spill] sm:$0xff] }
 0xd38   :  { %10323 = vst.msk [vmem:[%s19489_s10 + $0x110] sm:$0xff] %vm232_vm2, %v10259_v55  ;;  %10324 = vst.msk [vmem:[%s19489_s10 + $0x118] sm:$0xff] %vm232_vm2, %v10260_v23  ;;  %v10287_v34 = vmax.f32 %v20108_v0, 0.0 }
 0xd39   :  { %10325 = vst.msk [vmem:[%s19489_s10 + $0x120] sm:$0xff] %vm232_vm2, %v10261_v29  ;;  %10326 = vst.msk [vmem:[%s19489_s10 + $0x128] sm:$0xff] %vm232_vm2, %v10262_v14 }
 0xd3a   :  { %10327 = vst.msk [vmem:[%s19489_s10 + $0x130] sm:$0xff] %vm232_vm2, %v10263_v44  ;;  %10328 = vst.msk [vmem:[%s19489_s10 + $0x138] sm:$0xff] %vm232_vm2, %v10264_v48 }
 0xd3b   :  { %10329 = vst.msk [vmem:[%s19489_s10 + $0x140] sm:$0xff] %vm232_vm2, %v10265_v32  ;;  %10330 = vst.msk [vmem:[%s19489_s10 + $0x148] sm:$0xff] %vm232_vm2, %v10266_v4 }
 0xd3c   :  { %10331 = vst.msk [vmem:[%s19489_s10 + $0x150] sm:$0xff] %vm232_vm2, %v10267_v50  ;;  %10332 = vst.msk [vmem:[%s19489_s10 + $0x158] sm:$0xff] %vm232_vm2, %v10268_v1 }
 0xd3d   :  { %10333 = vst.msk [vmem:[%s19489_s10 + $0x160] sm:$0xff] %vm232_vm2, %v10269_v11  ;;  %10334 = vst.msk [vmem:[%s19489_s10 + $0x168] sm:$0xff] %vm232_vm2, %v10270_v24 }
 0xd3e   :  { %10335 = vst.msk [vmem:[%s19489_s10 + $0x170] sm:$0xff] %vm232_vm2, %v10271_v63  ;;  %10336 = vst.msk [vmem:[%s19489_s10 + $0x178] sm:$0xff] %vm232_vm2, %v10272_v10 }
 0xd3f   :  { %10337 = vst.msk [vmem:[%s19489_s10 + $0x180] sm:$0xff] %vm232_vm2, %v10273_v43  ;;  %10338 = vst.msk [vmem:[%s19489_s10 + $0x188] sm:$0xff] %vm232_vm2, %v10274_v36 }
 0xd40   :  { %10339 = vst.msk [vmem:[%s19489_s10 + $0x190] sm:$0xff] %vm232_vm2, %v10275_v15  ;;  %10340 = vst.msk [vmem:[%s19489_s10 + $0x198] sm:$0xff] %vm232_vm2, %v10276_v33 }
 0xd41   :  { %10341 = vst.msk [vmem:[%s19489_s10 + $0x1a0] sm:$0xff] %vm232_vm2, %v10277_v22  ;;  %10342 = vst.msk [vmem:[%s19489_s10 + $0x1a8] sm:$0xff] %vm232_vm2, %v10278_v7 }
 0xd42   :  { %10343 = vst.msk [vmem:[%s19489_s10 + $0x1b0] sm:$0xff] %vm232_vm2, %v10279_v54  ;;  %10344 = vst.msk [vmem:[%s19489_s10 + $0x1b8] sm:$0xff] %vm232_vm2, %v10280_v6 }
 0xd43   :  { %10345 = vst.msk [vmem:[%s19489_s10 + $0x1c0] sm:$0xff] %vm232_vm2, %v10281_v3  ;;  %10346 = vst.msk [vmem:[%s19489_s10 + $0x1c8] sm:$0xff] %vm232_vm2, %v10282_v57 }
 0xd44   :  { %10347 = vst.msk [vmem:[%s19489_s10 + $0x1d0] sm:$0xff] %vm232_vm2, %v10283_v18  ;;  %10348 = vst.msk [vmem:[%s19489_s10 + $0x1d8] sm:$0xff] %vm232_vm2, %v10284_v26 }
 0xd45   :  { %10349 = vst.msk [vmem:[%s19489_s10 + $0x1e0] sm:$0xff] %vm232_vm2, %v10285_v49  ;;  %10350 = vst.msk [vmem:[%s19489_s10 + $0x1e8] sm:$0xff] %vm232_vm2, %v10286_v39 }
 0xd46   :  { %10351 = vst.msk [vmem:[%s19489_s10 + $0x1f0] sm:$0xff] %vm232_vm2, %v10287_v34  ;;  %10352 = vst.msk [vmem:[%s19489_s10 + $0x1f8] sm:$0xff] %vm232_vm2, %v10288_v12 }

</bundles_post_ra>
